<compile_context>
chip_gen: v7x
topology: tpu7x:2x2x1
jax: 0.10.0
libtpu: 0.0.40
codegen_flags: <defaults>
</compile_context>

<pallas_src>
import functools

import jax
import jax.numpy as jnp
from jax import lax
from jax.experimental import pallas as pl
from jax.experimental.pallas import tpu as pltpu


def _round_up(x: int, m: int) -> int:
    return ((x + m - 1) // m) * m


# -----------------------------------------------------------------------------
# Kernel 1: fused conv1 -> conv2 -> conv3 (one image per grid step).
#
# conv1 patch rows arrive pre-gathered by XLA in space-to-batch row order:
#   row = ph*200 + pw*100 + h2*10 + w2   with  ho = 2*h2 + ph, wo = 2*w2 + pw.
# With that ordering, every conv2 patch read (stride-2 conv) is a CONTIGUOUS
# static row-slice of the conv1 activation, and conv3 (stride-1) reads are
# contiguous windows of the conv2 activation — no strided access needed.
# -----------------------------------------------------------------------------

def _fused_conv_kernel(p1_ref, w1_ref, b1_ref, w2_ref, b2_ref, w3_ref, b3_ref,
                       out_ref, a1_s, a2_s):
    # ---- conv1: (400, 256) @ (256, 32) + bias, ReLU -------------------------
    a1 = jnp.dot(p1_ref[0], w1_ref[...], preferred_element_type=jnp.float32)
    a1_s[...] = jnp.maximum(a1 + b1_ref[...], 0.0)        # rows in s2b order

    # ---- conv2: k=4, s=2 : 20x20x32 -> 9x9x64 --------------------------------
    w2 = w2_ref[...]
    b2 = b2_ref[...]
    for oh in range(9):
        cols = []
        for kh in range(4):
            for kw in range(4):
                pb = (kh % 2) * 2 + (kw % 2)
                start = pb * 100 + (oh + kh // 2) * 10 + (kw // 2)
                cols.append(a1_s[start:start + 9, :])      # (9, 32) f32
        prow = jnp.concatenate(cols, axis=-1).astype(jnp.bfloat16)   # (9, 512)
        r = jnp.dot(prow, w2, preferred_element_type=jnp.float32)
        a2_s[oh] = jnp.maximum(r + b2, 0.0)                # (9, 64)

    # ---- conv3: k=3, s=1 : 9x9x64 -> 7x7x64 ----------------------------------
    w3 = w3_ref[...]
    b3 = b3_ref[...]
    for oh in range(7):
        cols = []
        for kh in range(3):
            for kw in range(3):
                cols.append(a2_s[oh + kh, kw:kw + 7, :])   # (7, 64) f32
        prow = jnp.concatenate(cols, axis=-1).astype(jnp.bfloat16)   # (7, 576)
        r = jnp.dot(prow, w3, preferred_element_type=jnp.float32)
        out_ref[0, oh * 7:oh * 7 + 7, :] = (
            jnp.maximum(r + b3, 0.0).astype(out_ref.dtype))


def fused_convs(patches, w1, b1, w2, b2, w3, b3):
    """patches: (B, 400, 256) bf16 (s2b row order) -> (B, 49, 64) bf16."""
    B = patches.shape[0]
    assert patches.shape[1:] == (400, 256)
    return pl.pallas_call(
        _fused_conv_kernel,
        out_shape=jax.ShapeDtypeStruct((B, 49, 64), jnp.bfloat16),
        grid=(B,),
        in_specs=[
            pl.BlockSpec((1, 400, 256), lambda i: (i, 0, 0)),   # streamed/pipelined
            pl.BlockSpec((256, 32), lambda i: (0, 0)),          # weights resident
            pl.BlockSpec((1, 32), lambda i: (0, 0)),
            pl.BlockSpec((512, 64), lambda i: (0, 0)),
            pl.BlockSpec((1, 64), lambda i: (0, 0)),
            pl.BlockSpec((576, 64), lambda i: (0, 0)),
            pl.BlockSpec((1, 64), lambda i: (0, 0)),
        ],
        out_specs=pl.BlockSpec((1, 49, 64), lambda i: (i, 0, 0)),
        scratch_shapes=[
            pltpu.VMEM((400, 32), jnp.float32),    # conv1 activation (s2b rows)
            pltpu.VMEM((9, 9, 64), jnp.float32),   # conv2 activation
        ],
        compiler_params=pltpu.CompilerParams(
            dimension_semantics=("parallel",)),
    )(patches, w1, b1, w2, b2, w3, b3)


# -----------------------------------------------------------------------------
# Kernel 2: fused FC1(+ReLU) -> FC2 head.  Hidden (512) never touches HBM.
# Output N is padded to 128 lanes (lane-dense stores); slice happens outside.
# -----------------------------------------------------------------------------

def _fc_head_kernel(a_ref, wf1_ref, bf1_ref, wf2_ref, bf2_ref, o_ref):
    h = jnp.dot(a_ref[...], wf1_ref[...], preferred_element_type=jnp.float32)
    h = jnp.maximum(h + bf1_ref[...], 0.0)
    q = jnp.dot(h.astype(wf2_ref.dtype), wf2_ref[...],
                preferred_element_type=jnp.float32)
    o_ref[...] = (q + bf2_ref[...]).astype(o_ref.dtype)


def pallas_fc_head(a, wf1, bf1, wf2, bf2):
    """a: (B, 3136) bf16 -> (B, Npad) f32 (Npad = 128-lane-padded actions)."""
    M, K = a.shape
    K1, H = wf1.shape
    H2, Np = wf2.shape
    assert K == K1 and H == H2 and bf1.shape == (1, H) and bf2.shape == (1, Np)
    return pl.pallas_call(
        _fc_head_kernel,
        out_shape=jax.ShapeDtypeStruct((M, Np), jnp.float32),
        grid=(1,),
        in_specs=[
            pl.BlockSpec((M, K), lambda i: (0, 0)),
            pl.BlockSpec((K, H), lambda i: (0, 0)),
            pl.BlockSpec((1, H), lambda i: (0, 0)),
            pl.BlockSpec((H, Np), lambda i: (0, 0)),
            pl.BlockSpec((1, Np), lambda i: (0, 0)),
        ],
        out_specs=pl.BlockSpec((M, Np), lambda i: (0, 0)),
    )(a, wf1, bf1, wf2, bf2)


# -----------------------------------------------------------------------------
# conv1 im2col (XLA): transpose+cast fused into the patch gather; rows emitted
# in space-to-batch order so the Pallas kernel's conv2 reads are contiguous.
# -----------------------------------------------------------------------------

def _conv1_patches_s2b(x):
    """x: (B, 4, 84, 84) f32 -> (B, 400, 256) bf16, feature order (kh, kw, c)."""
    B, C, H, W = x.shape
    assert (C, H, W) == (4, 84, 84)
    xt = jnp.transpose(x, (0, 2, 3, 1)).astype(jnp.bfloat16)   # (B, 84, 84, 4)
    cols = []
    for kh in range(8):
        for kw in range(8):
            cols.append(lax.slice(
                xt,
                (0, kh, kw, 0),
                (B, kh + 4 * 19 + 1, kw + 4 * 19 + 1, 4),
                (1, 4, 4, 1)))                                  # (B, 20, 20, 4)
    p = jnp.concatenate(cols, axis=-1)                          # (B, 20, 20, 256)
    # (ho, wo) -> (h2, ph, w2, pw) -> row order (ph, pw, h2, w2)
    p = p.reshape(B, 10, 2, 10, 2, 256).transpose(0, 2, 4, 1, 3, 5)
    return p.reshape(B, 400, 256)


# -----------------------------------------------------------------------------
# Parameters (torch layout) + one-time preparation for the kernels
# -----------------------------------------------------------------------------

def init_dqn_params(key, num_actions: int):
    """Parameters in PyTorch layout (Conv2d: (C_out, C_in, kh, kw), etc.)."""
    ks = jax.random.split(key, 10)
    s = 0.05
    return {
        "w1": jax.random.normal(ks[0], (32, 4, 8, 8), jnp.float32) * s,
        "b1": jax.random.normal(ks[1], (32,), jnp.float32) * s,
        "w2": jax.random.normal(ks[2], (64, 32, 4, 4), jnp.float32) * s,
        "b2": jax.random.normal(ks[3], (64,), jnp.float32) * s,
        "w3": jax.random.normal(ks[4], (64, 64, 3, 3), jnp.float32) * s,
        "b3": jax.random.normal(ks[5], (64,), jnp.float32) * s,
        "wf1": jax.random.normal(ks[6], (64 * 7 * 7, 512), jnp.float32) * s,
        "bf1": jax.random.normal(ks[7], (512,), jnp.float32) * s,
        "wf2": jax.random.normal(ks[8], (512, num_actions), jnp.float32) * s,
        "bf2": jax.random.normal(ks[9], (num_actions,), jnp.float32) * s,
    }


def prepare_params(p):
    """One-time weight prep, hoisted out of the forward hot path."""
    def conv_w(w):
        c_out, c_in, k, _ = w.shape
        # (C_out, C_in, kh, kw) -> (kh, kw, C_in, C_out) -> (k*k*C_in, C_out)
        return jnp.transpose(w, (2, 3, 1, 0)).reshape(k * k * c_in, c_out)

    def bias(b):
        return b.astype(jnp.float32).reshape(1, -1)

    w1 = conv_w(p["w1"]) * jnp.float32(1.0 / 255.0)   # fold x/255 into conv1
    w2 = conv_w(p["w2"])
    w3 = conv_w(p["w3"])

    # wf1 row permutation: torch flattens NCHW -> index c*49 + h*7 + w;
    # our kernel's flatten order is h*(7*64) + w*64 + c.
    h_i, w_i, c_i = jnp.meshgrid(jnp.arange(7), jnp.arange(7), jnp.arange(64),
                                 indexing="ij")
    torch_rows = (c_i * 49 + h_i * 7 + w_i).reshape(-1)
    wf1 = p["wf1"][torch_rows, :]

    # Pad the action dim to 128 lanes for lane-dense output stores.
    num_actions = p["wf2"].shape[1]
    n_pad = _round_up(max(num_actions, 1), 128)
    wf2 = jnp.pad(p["wf2"], ((0, 0), (0, n_pad - num_actions)))
    bf2 = jnp.pad(p["bf2"], ((0, n_pad - num_actions),))

    bf16 = jnp.bfloat16
    return {
        "w1": w1.astype(bf16), "b1": bias(p["b1"]),
        "w2": w2.astype(bf16), "b2": bias(p["b2"]),
        "w3": w3.astype(bf16), "b3": bias(p["b3"]),
        "wf1": wf1.astype(bf16), "bf1": bias(p["bf1"]),
        "wf2": wf2.astype(bf16), "bf2": bias(bf2),
    }


# -----------------------------------------------------------------------------
# Forward pass (matches torch: net(x / 255.0))
# -----------------------------------------------------------------------------

def dqn_forward(params, x, *, num_actions):
    """x: (B, 4, 84, 84) float32 in [0, 255]. Returns (B, num_actions) f32."""
    B = x.shape[0]
    patches = _conv1_patches_s2b(x)                       # (B, 400, 256) bf16
    a3 = fused_convs(patches,
                     params["w1"], params["b1"],
                     params["w2"], params["b2"],
                     params["w3"], params["b3"])          # (B, 49, 64) bf16
    a3 = a3.reshape(B, 49 * 64)                           # free (bitcast) reshape
    q = pallas_fc_head(a3, params["wf1"], params["bf1"],
                       params["wf2"], params["bf2"])      # (B, 128) f32
    return q[:, :num_actions]


if __name__ == "__main__":
    num_actions = 4
    batch = 2

    key = jax.random.PRNGKey(0)
    k_params, k_input = jax.random.split(key)

    torch_style_params = init_dqn_params(k_params, num_actions)
    params = prepare_params(torch_style_params)   # one-time, outside hot path

    # Architecture (Linear(64*7*7, 512)) fixes the spatial size to 84x84.
    x = jax.random.uniform(
        k_input, (batch, 4, 84, 84), dtype=jnp.float32, minval=0.0, maxval=255.0
    )

    fwd = jax.jit(functools.partial(dqn_forward, num_actions=num_actions))
    q_values = fwd(params, x)
    jax.block_until_ready(q_values)

    assert q_values.shape == (batch, num_actions)
    assert q_values.dtype == jnp.float32
    print("KERNEL_OK")
</pallas_src>

<mosaic_0001>
module attributes {stable_mosaic.version = 11 : i64} {
  func.func @_fused_conv_kernel(%arg0: i32, %arg1: memref<1x400x256xbf16, #tpu.memory_space<vmem>>, %arg2: memref<256x32xbf16, #tpu.memory_space<vmem>>, %arg3: memref<1x32xf32, #tpu.memory_space<vmem>>, %arg4: memref<512x64xbf16, #tpu.memory_space<vmem>>, %arg5: memref<1x64xf32, #tpu.memory_space<vmem>>, %arg6: memref<576x64xbf16, #tpu.memory_space<vmem>>, %arg7: memref<1x64xf32, #tpu.memory_space<vmem>>, %arg8: memref<1x49x64xbf16, #tpu.memory_space<vmem>>, %arg9: memref<400x32xf32, #tpu.memory_space<vmem>>, %arg10: memref<9x9x64xf32, #tpu.memory_space<vmem>>) attributes {dimension_semantics = [#tpu.dimension_semantics<parallel>], iteration_bounds = array<i64: 2>, scalar_prefetch = 0 : i64, scratch_operands = 2 : i64, tpu.core_type = #tpu.core_type<tc>, window_params = [{transform_indices = @transform_0, window_bounds = array<i64: 1, 400, 256>}, {pipeline_mode = #tpu.pipeline_mode<synchronous>, transform_indices = @transform_1, window_bounds = array<i64: 256, 32>}, {pipeline_mode = #tpu.pipeline_mode<synchronous>, transform_indices = @transform_2, window_bounds = array<i64: 1, 32>}, {pipeline_mode = #tpu.pipeline_mode<synchronous>, transform_indices = @transform_3, window_bounds = array<i64: 512, 64>}, {pipeline_mode = #tpu.pipeline_mode<synchronous>, transform_indices = @transform_4, window_bounds = array<i64: 1, 64>}, {pipeline_mode = #tpu.pipeline_mode<synchronous>, transform_indices = @transform_5, window_bounds = array<i64: 576, 64>}, {pipeline_mode = #tpu.pipeline_mode<synchronous>, transform_indices = @transform_6, window_bounds = array<i64: 1, 64>}, {transform_indices = @transform_7, window_bounds = array<i64: 1, 49, 64>}]} {
    %c0 = arith.constant 0 : index
    %c0_0 = arith.constant 0 : index
    %c0_1 = arith.constant 0 : index
    %0 = vector.load %arg1[%c0, %c0_0, %c0_1] : memref<1x400x256xbf16, #tpu.memory_space<vmem>>, vector<1x400x256xbf16>
    %1 = vector.shape_cast %0 : vector<1x400x256xbf16> to vector<400x256xbf16>
    %c0_2 = arith.constant 0 : index
    %c0_3 = arith.constant 0 : index
    %2 = vector.load %arg2[%c0_2, %c0_3] : memref<256x32xbf16, #tpu.memory_space<vmem>>, vector<256x32xbf16>
    %cst = arith.constant dense<0.000000e+00> : vector<400x32xf32>
    %3 = tpu.matmul %1, %2, %cst {dimension_numbers = #tpu.dot_dimension_numbers<[1], [0], [0], [1], [0, 0, 1, 1], [], []>} : vector<400x256xbf16>, vector<256x32xbf16>, vector<400x32xf32> -> vector<400x32xf32>
    %c0_4 = arith.constant 0 : index
    %c0_5 = arith.constant 0 : index
    %4 = vector.load %arg3[%c0_4, %c0_5] : memref<1x32xf32, #tpu.memory_space<vmem>>, vector<1x32xf32>
    %5 = vector.broadcast %4 : vector<1x32xf32> to vector<400x32xf32>
    %6 = arith.addf %3, %5 : vector<400x32xf32>
    %cst_6 = arith.constant 0.000000e+00 : f32
    %7 = vector.broadcast %cst_6 : f32 to vector<400x32xf32>
    %8 = arith.maximumf %6, %7 : vector<400x32xf32>
    %c0_7 = arith.constant 0 : index
    %c0_8 = arith.constant 0 : index
    %9 = vector.load %arg9[%c0_7, %c0_8] : memref<400x32xf32, #tpu.memory_space<vmem>>, vector<400x32xf32>
    tpu.vector_store %arg9[%c0_7, %c0_8], %8 {strides = array<i32>} : memref<400x32xf32, #tpu.memory_space<vmem>>, vector<400x32xf32>,
    %c0_9 = arith.constant 0 : index
    %c0_10 = arith.constant 0 : index
    %10 = vector.load %arg4[%c0_9, %c0_10] : memref<512x64xbf16, #tpu.memory_space<vmem>>, vector<512x64xbf16>
    %c0_11 = arith.constant 0 : index
    %c0_12 = arith.constant 0 : index
    %11 = vector.load %arg5[%c0_11, %c0_12] : memref<1x64xf32, #tpu.memory_space<vmem>>, vector<1x64xf32>
    %c0_13 = arith.constant 0 : index
    %c0_14 = arith.constant 0 : index
    %12 = vector.load %arg9[%c0_13, %c0_14] : memref<400x32xf32, #tpu.memory_space<vmem>>, vector<9x32xf32>
    %c100 = arith.constant 100 : index
    %c0_15 = arith.constant 0 : index
    %13 = vector.load %arg9[%c100, %c0_15] : memref<400x32xf32, #tpu.memory_space<vmem>>, vector<9x32xf32>
    %c1 = arith.constant 1 : index
    %c0_16 = arith.constant 0 : index
    %14 = vector.load %arg9[%c1, %c0_16] : memref<400x32xf32, #tpu.memory_space<vmem>>, vector<9x32xf32>
    %c101 = arith.constant 101 : index
    %c0_17 = arith.constant 0 : index
    %15 = vector.load %arg9[%c101, %c0_17] : memref<400x32xf32, #tpu.memory_space<vmem>>, vector<9x32xf32>
    %c200 = arith.constant 200 : index
    %c0_18 = arith.constant 0 : index
    %16 = vector.load %arg9[%c200, %c0_18] : memref<400x32xf32, #tpu.memory_space<vmem>>, vector<9x32xf32>
    %c300 = arith.constant 300 : index
    %c0_19 = arith.constant 0 : index
    %17 = vector.load %arg9[%c300, %c0_19] : memref<400x32xf32, #tpu.memory_space<vmem>>, vector<9x32xf32>
    %c201 = arith.constant 201 : index
    %c0_20 = arith.constant 0 : index
    %18 = vector.load %arg9[%c201, %c0_20] : memref<400x32xf32, #tpu.memory_space<vmem>>, vector<9x32xf32>
    %c301 = arith.constant 301 : index
    %c0_21 = arith.constant 0 : index
    %19 = vector.load %arg9[%c301, %c0_21] : memref<400x32xf32, #tpu.memory_space<vmem>>, vector<9x32xf32>
    %c10 = arith.constant 10 : index
    %c0_22 = arith.constant 0 : index
    %20 = vector.load %arg9[%c10, %c0_22] : memref<400x32xf32, #tpu.memory_space<vmem>>, vector<9x32xf32>
    %c110 = arith.constant 110 : index
    %c0_23 = arith.constant 0 : index
    %21 = vector.load %arg9[%c110, %c0_23] : memref<400x32xf32, #tpu.memory_space<vmem>>, vector<9x32xf32>
    %c11 = arith.constant 11 : index
    %c0_24 = arith.constant 0 : index
    %22 = vector.load %arg9[%c11, %c0_24] : memref<400x32xf32, #tpu.memory_space<vmem>>, vector<9x32xf32>
    %c111 = arith.constant 111 : index
    %c0_25 = arith.constant 0 : index
    %23 = vector.load %arg9[%c111, %c0_25] : memref<400x32xf32, #tpu.memory_space<vmem>>, vector<9x32xf32>
    %c210 = arith.constant 210 : index
    %c0_26 = arith.constant 0 : index
    %24 = vector.load %arg9[%c210, %c0_26] : memref<400x32xf32, #tpu.memory_space<vmem>>, vector<9x32xf32>
    %c310 = arith.constant 310 : index
    %c0_27 = arith.constant 0 : index
    %25 = vector.load %arg9[%c310, %c0_27] : memref<400x32xf32, #tpu.memory_space<vmem>>, vector<9x32xf32>
    %c211 = arith.constant 211 : index
    %c0_28 = arith.constant 0 : index
    %26 = vector.load %arg9[%c211, %c0_28] : memref<400x32xf32, #tpu.memory_space<vmem>>, vector<9x32xf32>
    %c311 = arith.constant 311 : index
    %c0_29 = arith.constant 0 : index
    %27 = vector.load %arg9[%c311, %c0_29] : memref<400x32xf32, #tpu.memory_space<vmem>>, vector<9x32xf32>
    %28 = tpu.concatenate %12, %13, %14, %15, %16, %17, %18, %19, %20, %21, %22, %23, %24, %25, %26, %27 in 1 : vector<9x32xf32>, vector<9x32xf32>, vector<9x32xf32>, vector<9x32xf32>, vector<9x32xf32>, vector<9x32xf32>, vector<9x32xf32>, vector<9x32xf32>, vector<9x32xf32>, vector<9x32xf32>, vector<9x32xf32>, vector<9x32xf32>, vector<9x32xf32>, vector<9x32xf32>, vector<9x32xf32>, vector<9x32xf32> -> vector<9x512xf32>
    %29 = arith.truncf %28 : vector<9x512xf32> to vector<9x512xbf16>
    %cst_30 = arith.constant dense<0.000000e+00> : vector<9x64xf32>
    %30 = tpu.matmul %29, %10, %cst_30 {dimension_numbers = #tpu.dot_dimension_numbers<[1], [0], [0], [1], [0, 0, 1, 1], [], []>} : vector<9x512xbf16>, vector<512x64xbf16>, vector<9x64xf32> -> vector<9x64xf32>
    %31 = vector.broadcast %11 : vector<1x64xf32> to vector<9x64xf32>
    %32 = arith.addf %30, %31 : vector<9x64xf32>
    %cst_31 = arith.constant 0.000000e+00 : f32
    %33 = vector.broadcast %cst_31 : f32 to vector<9x64xf32>
    %34 = arith.maximumf %32, %33 : vector<9x64xf32>
    %c0_32 = arith.constant 0 : index
    %c0_33 = arith.constant 0 : index
    %c0_34 = arith.constant 0 : index
    %35 = vector.load %arg10[%c0_32, %c0_33, %c0_34] : memref<9x9x64xf32, #tpu.memory_space<vmem>>, vector<1x9x64xf32>
    %36 = vector.shape_cast %35 : vector<1x9x64xf32> to vector<9x64xf32>
    %37 = vector.shape_cast %34 : vector<9x64xf32> to vector<1x9x64xf32>
    tpu.vector_store %arg10[%c0_32, %c0_33, %c0_34], %37 {strides = array<i32>} : memref<9x9x64xf32, #tpu.memory_space<vmem>>, vector<1x9x64xf32>,
    %c10_35 = arith.constant 10 : index
    %c0_36 = arith.constant 0 : index
    %38 = vector.load %arg9[%c10_35, %c0_36] : memref<400x32xf32, #tpu.memory_space<vmem>>, vector<9x32xf32>
    %c110_37 = arith.constant 110 : index
    %c0_38 = arith.constant 0 : index
    %39 = vector.load %arg9[%c110_37, %c0_38] : memref<400x32xf32, #tpu.memory_space<vmem>>, vector<9x32xf32>
    %c11_39 = arith.constant 11 : index
    %c0_40 = arith.constant 0 : index
    %40 = vector.load %arg9[%c11_39, %c0_40] : memref<400x32xf32, #tpu.memory_space<vmem>>, vector<9x32xf32>
    %c111_41 = arith.constant 111 : index
    %c0_42 = arith.constant 0 : index
    %41 = vector.load %arg9[%c111_41, %c0_42] : memref<400x32xf32, #tpu.memory_space<vmem>>, vector<9x32xf32>
    %c210_43 = arith.constant 210 : index
    %c0_44 = arith.constant 0 : index
    %42 = vector.load %arg9[%c210_43, %c0_44] : memref<400x32xf32, #tpu.memory_space<vmem>>, vector<9x32xf32>
    %c310_45 = arith.constant 310 : index
    %c0_46 = arith.constant 0 : index
    %43 = vector.load %arg9[%c310_45, %c0_46] : memref<400x32xf32, #tpu.memory_space<vmem>>, vector<9x32xf32>
    %c211_47 = arith.constant 211 : index
    %c0_48 = arith.constant 0 : index
    %44 = vector.load %arg9[%c211_47, %c0_48] : memref<400x32xf32, #tpu.memory_space<vmem>>, vector<9x32xf32>
    %c311_49 = arith.constant 311 : index
    %c0_50 = arith.constant 0 : index
    %45 = vector.load %arg9[%c311_49, %c0_50] : memref<400x32xf32, #tpu.memory_space<vmem>>, vector<9x32xf32>
    %c20 = arith.constant 20 : index
    %c0_51 = arith.constant 0 : index
    %46 = vector.load %arg9[%c20, %c0_51] : memref<400x32xf32, #tpu.memory_space<vmem>>, vector<9x32xf32>
    %c120 = arith.constant 120 : index
    %c0_52 = arith.constant 0 : index
    %47 = vector.load %arg9[%c120, %c0_52] : memref<400x32xf32, #tpu.memory_space<vmem>>, vector<9x32xf32>
    %c21 = arith.constant 21 : index
    %c0_53 = arith.constant 0 : index
    %48 = vector.load %arg9[%c21, %c0_53] : memref<400x32xf32, #tpu.memory_space<vmem>>, vector<9x32xf32>
    %c121 = arith.constant 121 : index
    %c0_54 = arith.constant 0 : index
    %49 = vector.load %arg9[%c121, %c0_54] : memref<400x32xf32, #tpu.memory_space<vmem>>, vector<9x32xf32>
    %c220 = arith.constant 220 : index
    %c0_55 = arith.constant 0 : index
    %50 = vector.load %arg9[%c220, %c0_55] : memref<400x32xf32, #tpu.memory_space<vmem>>, vector<9x32xf32>
    %c320 = arith.constant 320 : index
    %c0_56 = arith.constant 0 : index
    %51 = vector.load %arg9[%c320, %c0_56] : memref<400x32xf32, #tpu.memory_space<vmem>>, vector<9x32xf32>
    %c221 = arith.constant 221 : index
    %c0_57 = arith.constant 0 : index
    %52 = vector.load %arg9[%c221, %c0_57] : memref<400x32xf32, #tpu.memory_space<vmem>>, vector<9x32xf32>
    %c321 = arith.constant 321 : index
    %c0_58 = arith.constant 0 : index
    %53 = vector.load %arg9[%c321, %c0_58] : memref<400x32xf32, #tpu.memory_space<vmem>>, vector<9x32xf32>
    %54 = tpu.concatenate %38, %39, %40, %41, %42, %43, %44, %45, %46, %47, %48, %49, %50, %51, %52, %53 in 1 : vector<9x32xf32>, vector<9x32xf32>, vector<9x32xf32>, vector<9x32xf32>, vector<9x32xf32>, vector<9x32xf32>, vector<9x32xf32>, vector<9x32xf32>, vector<9x32xf32>, vector<9x32xf32>, vector<9x32xf32>, vector<9x32xf32>, vector<9x32xf32>, vector<9x32xf32>, vector<9x32xf32>, vector<9x32xf32> -> vector<9x512xf32>
    %55 = arith.truncf %54 : vector<9x512xf32> to vector<9x512xbf16>
    %cst_59 = arith.constant dense<0.000000e+00> : vector<9x64xf32>
    %56 = tpu.matmul %55, %10, %cst_59 {dimension_numbers = #tpu.dot_dimension_numbers<[1], [0], [0], [1], [0, 0, 1, 1], [], []>} : vector<9x512xbf16>, vector<512x64xbf16>, vector<9x64xf32> -> vector<9x64xf32>
    %57 = vector.broadcast %11 : vector<1x64xf32> to vector<9x64xf32>
    %58 = arith.addf %56, %57 : vector<9x64xf32>
    %cst_60 = arith.constant 0.000000e+00 : f32
    %59 = vector.broadcast %cst_60 : f32 to vector<9x64xf32>
    %60 = arith.maximumf %58, %59 : vector<9x64xf32>
    %c1_61 = arith.constant 1 : index
    %c0_62 = arith.constant 0 : index
    %c0_63 = arith.constant 0 : index
    %61 = vector.load %arg10[%c1_61, %c0_62, %c0_63] : memref<9x9x64xf32, #tpu.memory_space<vmem>>, vector<1x9x64xf32>
    %62 = vector.shape_cast %61 : vector<1x9x64xf32> to vector<9x64xf32>
    %63 = vector.shape_cast %60 : vector<9x64xf32> to vector<1x9x64xf32>
    tpu.vector_store %arg10[%c1_61, %c0_62, %c0_63], %63 {strides = array<i32>} : memref<9x9x64xf32, #tpu.memory_space<vmem>>, vector<1x9x64xf32>,
    %c20_64 = arith.constant 20 : index
    %c0_65 = arith.constant 0 : index
    %64 = vector.load %arg9[%c20_64, %c0_65] : memref<400x32xf32, #tpu.memory_space<vmem>>, vector<9x32xf32>
    %c120_66 = arith.constant 120 : index
    %c0_67 = arith.constant 0 : index
    %65 = vector.load %arg9[%c120_66, %c0_67] : memref<400x32xf32, #tpu.memory_space<vmem>>, vector<9x32xf32>
    %c21_68 = arith.constant 21 : index
    %c0_69 = arith.constant 0 : index
    %66 = vector.load %arg9[%c21_68, %c0_69] : memref<400x32xf32, #tpu.memory_space<vmem>>, vector<9x32xf32>
    %c121_70 = arith.constant 121 : index
    %c0_71 = arith.constant 0 : index
    %67 = vector.load %arg9[%c121_70, %c0_71] : memref<400x32xf32, #tpu.memory_space<vmem>>, vector<9x32xf32>
    %c220_72 = arith.constant 220 : index
    %c0_73 = arith.constant 0 : index
    %68 = vector.load %arg9[%c220_72, %c0_73] : memref<400x32xf32, #tpu.memory_space<vmem>>, vector<9x32xf32>
    %c320_74 = arith.constant 320 : index
    %c0_75 = arith.constant 0 : index
    %69 = vector.load %arg9[%c320_74, %c0_75] : memref<400x32xf32, #tpu.memory_space<vmem>>, vector<9x32xf32>
    %c221_76 = arith.constant 221 : index
    %c0_77 = arith.constant 0 : index
    %70 = vector.load %arg9[%c221_76, %c0_77] : memref<400x32xf32, #tpu.memory_space<vmem>>, vector<9x32xf32>
    %c321_78 = arith.constant 321 : index
    %c0_79 = arith.constant 0 : index
    %71 = vector.load %arg9[%c321_78, %c0_79] : memref<400x32xf32, #tpu.memory_space<vmem>>, vector<9x32xf32>
    %c30 = arith.constant 30 : index
    %c0_80 = arith.constant 0 : index
    %72 = vector.load %arg9[%c30, %c0_80] : memref<400x32xf32, #tpu.memory_space<vmem>>, vector<9x32xf32>
    %c130 = arith.constant 130 : index
    %c0_81 = arith.constant 0 : index
    %73 = vector.load %arg9[%c130, %c0_81] : memref<400x32xf32, #tpu.memory_space<vmem>>, vector<9x32xf32>
    %c31 = arith.constant 31 : index
    %c0_82 = arith.constant 0 : index
    %74 = vector.load %arg9[%c31, %c0_82] : memref<400x32xf32, #tpu.memory_space<vmem>>, vector<9x32xf32>
    %c131 = arith.constant 131 : index
    %c0_83 = arith.constant 0 : index
    %75 = vector.load %arg9[%c131, %c0_83] : memref<400x32xf32, #tpu.memory_space<vmem>>, vector<9x32xf32>
    %c230 = arith.constant 230 : index
    %c0_84 = arith.constant 0 : index
    %76 = vector.load %arg9[%c230, %c0_84] : memref<400x32xf32, #tpu.memory_space<vmem>>, vector<9x32xf32>
    %c330 = arith.constant 330 : index
    %c0_85 = arith.constant 0 : index
    %77 = vector.load %arg9[%c330, %c0_85] : memref<400x32xf32, #tpu.memory_space<vmem>>, vector<9x32xf32>
    %c231 = arith.constant 231 : index
    %c0_86 = arith.constant 0 : index
    %78 = vector.load %arg9[%c231, %c0_86] : memref<400x32xf32, #tpu.memory_space<vmem>>, vector<9x32xf32>
    %c331 = arith.constant 331 : index
    %c0_87 = arith.constant 0 : index
    %79 = vector.load %arg9[%c331, %c0_87] : memref<400x32xf32, #tpu.memory_space<vmem>>, vector<9x32xf32>
    %80 = tpu.concatenate %64, %65, %66, %67, %68, %69, %70, %71, %72, %73, %74, %75, %76, %77, %78, %79 in 1 : vector<9x32xf32>, vector<9x32xf32>, vector<9x32xf32>, vector<9x32xf32>, vector<9x32xf32>, vector<9x32xf32>, vector<9x32xf32>, vector<9x32xf32>, vector<9x32xf32>, vector<9x32xf32>, vector<9x32xf32>, vector<9x32xf32>, vector<9x32xf32>, vector<9x32xf32>, vector<9x32xf32>, vector<9x32xf32> -> vector<9x512xf32>
    %81 = arith.truncf %80 : vector<9x512xf32> to vector<9x512xbf16>
    %cst_88 = arith.constant dense<0.000000e+00> : vector<9x64xf32>
    %82 = tpu.matmul %81, %10, %cst_88 {dimension_numbers = #tpu.dot_dimension_numbers<[1], [0], [0], [1], [0, 0, 1, 1], [], []>} : vector<9x512xbf16>, vector<512x64xbf16>, vector<9x64xf32> -> vector<9x64xf32>
    %83 = vector.broadcast %11 : vector<1x64xf32> to vector<9x64xf32>
    %84 = arith.addf %82, %83 : vector<9x64xf32>
    %cst_89 = arith.constant 0.000000e+00 : f32
    %85 = vector.broadcast %cst_89 : f32 to vector<9x64xf32>
    %86 = arith.maximumf %84, %85 : vector<9x64xf32>
    %c2 = arith.constant 2 : index
    %c0_90 = arith.constant 0 : index
    %c0_91 = arith.constant 0 : index
    %87 = vector.load %arg10[%c2, %c0_90, %c0_91] : memref<9x9x64xf32, #tpu.memory_space<vmem>>, vector<1x9x64xf32>
    %88 = vector.shape_cast %87 : vector<1x9x64xf32> to vector<9x64xf32>
    %89 = vector.shape_cast %86 : vector<9x64xf32> to vector<1x9x64xf32>
    tpu.vector_store %arg10[%c2, %c0_90, %c0_91], %89 {strides = array<i32>} : memref<9x9x64xf32, #tpu.memory_space<vmem>>, vector<1x9x64xf32>,
    %c30_92 = arith.constant 30 : index
    %c0_93 = arith.constant 0 : index
    %90 = vector.load %arg9[%c30_92, %c0_93] : memref<400x32xf32, #tpu.memory_space<vmem>>, vector<9x32xf32>
    %c130_94 = arith.constant 130 : index
    %c0_95 = arith.constant 0 : index
    %91 = vector.load %arg9[%c130_94, %c0_95] : memref<400x32xf32, #tpu.memory_space<vmem>>, vector<9x32xf32>
    %c31_96 = arith.constant 31 : index
    %c0_97 = arith.constant 0 : index
    %92 = vector.load %arg9[%c31_96, %c0_97] : memref<400x32xf32, #tpu.memory_space<vmem>>, vector<9x32xf32>
    %c131_98 = arith.constant 131 : index
    %c0_99 = arith.constant 0 : index
    %93 = vector.load %arg9[%c131_98, %c0_99] : memref<400x32xf32, #tpu.memory_space<vmem>>, vector<9x32xf32>
    %c230_100 = arith.constant 230 : index
    %c0_101 = arith.constant 0 : index
    %94 = vector.load %arg9[%c230_100, %c0_101] : memref<400x32xf32, #tpu.memory_space<vmem>>, vector<9x32xf32>
    %c330_102 = arith.constant 330 : index
    %c0_103 = arith.constant 0 : index
    %95 = vector.load %arg9[%c330_102, %c0_103] : memref<400x32xf32, #tpu.memory_space<vmem>>, vector<9x32xf32>
    %c231_104 = arith.constant 231 : index
    %c0_105 = arith.constant 0 : index
    %96 = vector.load %arg9[%c231_104, %c0_105] : memref<400x32xf32, #tpu.memory_space<vmem>>, vector<9x32xf32>
    %c331_106 = arith.constant 331 : index
    %c0_107 = arith.constant 0 : index
    %97 = vector.load %arg9[%c331_106, %c0_107] : memref<400x32xf32, #tpu.memory_space<vmem>>, vector<9x32xf32>
    %c40 = arith.constant 40 : index
    %c0_108 = arith.constant 0 : index
    %98 = vector.load %arg9[%c40, %c0_108] : memref<400x32xf32, #tpu.memory_space<vmem>>, vector<9x32xf32>
    %c140 = arith.constant 140 : index
    %c0_109 = arith.constant 0 : index
    %99 = vector.load %arg9[%c140, %c0_109] : memref<400x32xf32, #tpu.memory_space<vmem>>, vector<9x32xf32>
    %c41 = arith.constant 41 : index
    %c0_110 = arith.constant 0 : index
    %100 = vector.load %arg9[%c41, %c0_110] : memref<400x32xf32, #tpu.memory_space<vmem>>, vector<9x32xf32>
    %c141 = arith.constant 141 : index
    %c0_111 = arith.constant 0 : index
    %101 = vector.load %arg9[%c141, %c0_111] : memref<400x32xf32, #tpu.memory_space<vmem>>, vector<9x32xf32>
    %c240 = arith.constant 240 : index
    %c0_112 = arith.constant 0 : index
    %102 = vector.load %arg9[%c240, %c0_112] : memref<400x32xf32, #tpu.memory_space<vmem>>, vector<9x32xf32>
    %c340 = arith.constant 340 : index
    %c0_113 = arith.constant 0 : index
    %103 = vector.load %arg9[%c340, %c0_113] : memref<400x32xf32, #tpu.memory_space<vmem>>, vector<9x32xf32>
    %c241 = arith.constant 241 : index
    %c0_114 = arith.constant 0 : index
    %104 = vector.load %arg9[%c241, %c0_114] : memref<400x32xf32, #tpu.memory_space<vmem>>, vector<9x32xf32>
    %c341 = arith.constant 341 : index
    %c0_115 = arith.constant 0 : index
    %105 = vector.load %arg9[%c341, %c0_115] : memref<400x32xf32, #tpu.memory_space<vmem>>, vector<9x32xf32>
    %106 = tpu.concatenate %90, %91, %92, %93, %94, %95, %96, %97, %98, %99, %100, %101, %102, %103, %104, %105 in 1 : vector<9x32xf32>, vector<9x32xf32>, vector<9x32xf32>, vector<9x32xf32>, vector<9x32xf32>, vector<9x32xf32>, vector<9x32xf32>, vector<9x32xf32>, vector<9x32xf32>, vector<9x32xf32>, vector<9x32xf32>, vector<9x32xf32>, vector<9x32xf32>, vector<9x32xf32>, vector<9x32xf32>, vector<9x32xf32> -> vector<9x512xf32>
    %107 = arith.truncf %106 : vector<9x512xf32> to vector<9x512xbf16>
    %cst_116 = arith.constant dense<0.000000e+00> : vector<9x64xf32>
    %108 = tpu.matmul %107, %10, %cst_116 {dimension_numbers = #tpu.dot_dimension_numbers<[1], [0], [0], [1], [0, 0, 1, 1], [], []>} : vector<9x512xbf16>, vector<512x64xbf16>, vector<9x64xf32> -> vector<9x64xf32>
    %109 = vector.broadcast %11 : vector<1x64xf32> to vector<9x64xf32>
    %110 = arith.addf %108, %109 : vector<9x64xf32>
    %cst_117 = arith.constant 0.000000e+00 : f32
    %111 = vector.broadcast %cst_117 : f32 to vector<9x64xf32>
    %112 = arith.maximumf %110, %111 : vector<9x64xf32>
    %c3 = arith.constant 3 : index
    %c0_118 = arith.constant 0 : index
    %c0_119 = arith.constant 0 : index
    %113 = vector.load %arg10[%c3, %c0_118, %c0_119] : memref<9x9x64xf32, #tpu.memory_space<vmem>>, vector<1x9x64xf32>
    %114 = vector.shape_cast %113 : vector<1x9x64xf32> to vector<9x64xf32>
    %115 = vector.shape_cast %112 : vector<9x64xf32> to vector<1x9x64xf32>
    tpu.vector_store %arg10[%c3, %c0_118, %c0_119], %115 {strides = array<i32>} : memref<9x9x64xf32, #tpu.memory_space<vmem>>, vector<1x9x64xf32>,
    %c40_120 = arith.constant 40 : index
    %c0_121 = arith.constant 0 : index
    %116 = vector.load %arg9[%c40_120, %c0_121] : memref<400x32xf32, #tpu.memory_space<vmem>>, vector<9x32xf32>
    %c140_122 = arith.constant 140 : index
    %c0_123 = arith.constant 0 : index
    %117 = vector.load %arg9[%c140_122, %c0_123] : memref<400x32xf32, #tpu.memory_space<vmem>>, vector<9x32xf32>
    %c41_124 = arith.constant 41 : index
    %c0_125 = arith.constant 0 : index
    %118 = vector.load %arg9[%c41_124, %c0_125] : memref<400x32xf32, #tpu.memory_space<vmem>>, vector<9x32xf32>
    %c141_126 = arith.constant 141 : index
    %c0_127 = arith.constant 0 : index
    %119 = vector.load %arg9[%c141_126, %c0_127] : memref<400x32xf32, #tpu.memory_space<vmem>>, vector<9x32xf32>
    %c240_128 = arith.constant 240 : index
    %c0_129 = arith.constant 0 : index
    %120 = vector.load %arg9[%c240_128, %c0_129] : memref<400x32xf32, #tpu.memory_space<vmem>>, vector<9x32xf32>
    %c340_130 = arith.constant 340 : index
    %c0_131 = arith.constant 0 : index
    %121 = vector.load %arg9[%c340_130, %c0_131] : memref<400x32xf32, #tpu.memory_space<vmem>>, vector<9x32xf32>
    %c241_132 = arith.constant 241 : index
    %c0_133 = arith.constant 0 : index
    %122 = vector.load %arg9[%c241_132, %c0_133] : memref<400x32xf32, #tpu.memory_space<vmem>>, vector<9x32xf32>
    %c341_134 = arith.constant 341 : index
    %c0_135 = arith.constant 0 : index
    %123 = vector.load %arg9[%c341_134, %c0_135] : memref<400x32xf32, #tpu.memory_space<vmem>>, vector<9x32xf32>
    %c50 = arith.constant 50 : index
    %c0_136 = arith.constant 0 : index
    %124 = vector.load %arg9[%c50, %c0_136] : memref<400x32xf32, #tpu.memory_space<vmem>>, vector<9x32xf32>
    %c150 = arith.constant 150 : index
    %c0_137 = arith.constant 0 : index
    %125 = vector.load %arg9[%c150, %c0_137] : memref<400x32xf32, #tpu.memory_space<vmem>>, vector<9x32xf32>
    %c51 = arith.constant 51 : index
    %c0_138 = arith.constant 0 : index
    %126 = vector.load %arg9[%c51, %c0_138] : memref<400x32xf32, #tpu.memory_space<vmem>>, vector<9x32xf32>
    %c151 = arith.constant 151 : index
    %c0_139 = arith.constant 0 : index
    %127 = vector.load %arg9[%c151, %c0_139] : memref<400x32xf32, #tpu.memory_space<vmem>>, vector<9x32xf32>
    %c250 = arith.constant 250 : index
    %c0_140 = arith.constant 0 : index
    %128 = vector.load %arg9[%c250, %c0_140] : memref<400x32xf32, #tpu.memory_space<vmem>>, vector<9x32xf32>
    %c350 = arith.constant 350 : index
    %c0_141 = arith.constant 0 : index
    %129 = vector.load %arg9[%c350, %c0_141] : memref<400x32xf32, #tpu.memory_space<vmem>>, vector<9x32xf32>
    %c251 = arith.constant 251 : index
    %c0_142 = arith.constant 0 : index
    %130 = vector.load %arg9[%c251, %c0_142] : memref<400x32xf32, #tpu.memory_space<vmem>>, vector<9x32xf32>
    %c351 = arith.constant 351 : index
    %c0_143 = arith.constant 0 : index
    %131 = vector.load %arg9[%c351, %c0_143] : memref<400x32xf32, #tpu.memory_space<vmem>>, vector<9x32xf32>
    %132 = tpu.concatenate %116, %117, %118, %119, %120, %121, %122, %123, %124, %125, %126, %127, %128, %129, %130, %131 in 1 : vector<9x32xf32>, vector<9x32xf32>, vector<9x32xf32>, vector<9x32xf32>, vector<9x32xf32>, vector<9x32xf32>, vector<9x32xf32>, vector<9x32xf32>, vector<9x32xf32>, vector<9x32xf32>, vector<9x32xf32>, vector<9x32xf32>, vector<9x32xf32>, vector<9x32xf32>, vector<9x32xf32>, vector<9x32xf32> -> vector<9x512xf32>
    %133 = arith.truncf %132 : vector<9x512xf32> to vector<9x512xbf16>
    %cst_144 = arith.constant dense<0.000000e+00> : vector<9x64xf32>
    %134 = tpu.matmul %133, %10, %cst_144 {dimension_numbers = #tpu.dot_dimension_numbers<[1], [0], [0], [1], [0, 0, 1, 1], [], []>} : vector<9x512xbf16>, vector<512x64xbf16>, vector<9x64xf32> -> vector<9x64xf32>
    %135 = vector.broadcast %11 : vector<1x64xf32> to vector<9x64xf32>
    %136 = arith.addf %134, %135 : vector<9x64xf32>
    %cst_145 = arith.constant 0.000000e+00 : f32
    %137 = vector.broadcast %cst_145 : f32 to vector<9x64xf32>
    %138 = arith.maximumf %136, %137 : vector<9x64xf32>
    %c4 = arith.constant 4 : index
    %c0_146 = arith.constant 0 : index
    %c0_147 = arith.constant 0 : index
    %139 = vector.load %arg10[%c4, %c0_146, %c0_147] : memref<9x9x64xf32, #tpu.memory_space<vmem>>, vector<1x9x64xf32>
    %140 = vector.shape_cast %139 : vector<1x9x64xf32> to vector<9x64xf32>
    %141 = vector.shape_cast %138 : vector<9x64xf32> to vector<1x9x64xf32>
    tpu.vector_store %arg10[%c4, %c0_146, %c0_147], %141 {strides = array<i32>} : memref<9x9x64xf32, #tpu.memory_space<vmem>>, vector<1x9x64xf32>,
    %c50_148 = arith.constant 50 : index
    %c0_149 = arith.constant 0 : index
    %142 = vector.load %arg9[%c50_148, %c0_149] : memref<400x32xf32, #tpu.memory_space<vmem>>, vector<9x32xf32>
    %c150_150 = arith.constant 150 : index
    %c0_151 = arith.constant 0 : index
    %143 = vector.load %arg9[%c150_150, %c0_151] : memref<400x32xf32, #tpu.memory_space<vmem>>, vector<9x32xf32>
    %c51_152 = arith.constant 51 : index
    %c0_153 = arith.constant 0 : index
    %144 = vector.load %arg9[%c51_152, %c0_153] : memref<400x32xf32, #tpu.memory_space<vmem>>, vector<9x32xf32>
    %c151_154 = arith.constant 151 : index
    %c0_155 = arith.constant 0 : index
    %145 = vector.load %arg9[%c151_154, %c0_155] : memref<400x32xf32, #tpu.memory_space<vmem>>, vector<9x32xf32>
    %c250_156 = arith.constant 250 : index
    %c0_157 = arith.constant 0 : index
    %146 = vector.load %arg9[%c250_156, %c0_157] : memref<400x32xf32, #tpu.memory_space<vmem>>, vector<9x32xf32>
    %c350_158 = arith.constant 350 : index
    %c0_159 = arith.constant 0 : index
    %147 = vector.load %arg9[%c350_158, %c0_159] : memref<400x32xf32, #tpu.memory_space<vmem>>, vector<9x32xf32>
    %c251_160 = arith.constant 251 : index
    %c0_161 = arith.constant 0 : index
    %148 = vector.load %arg9[%c251_160, %c0_161] : memref<400x32xf32, #tpu.memory_space<vmem>>, vector<9x32xf32>
    %c351_162 = arith.constant 351 : index
    %c0_163 = arith.constant 0 : index
    %149 = vector.load %arg9[%c351_162, %c0_163] : memref<400x32xf32, #tpu.memory_space<vmem>>, vector<9x32xf32>
    %c60 = arith.constant 60 : index
    %c0_164 = arith.constant 0 : index
    %150 = vector.load %arg9[%c60, %c0_164] : memref<400x32xf32, #tpu.memory_space<vmem>>, vector<9x32xf32>
    %c160 = arith.constant 160 : index
    %c0_165 = arith.constant 0 : index
    %151 = vector.load %arg9[%c160, %c0_165] : memref<400x32xf32, #tpu.memory_space<vmem>>, vector<9x32xf32>
    %c61 = arith.constant 61 : index
    %c0_166 = arith.constant 0 : index
    %152 = vector.load %arg9[%c61, %c0_166] : memref<400x32xf32, #tpu.memory_space<vmem>>, vector<9x32xf32>
    %c161 = arith.constant 161 : index
    %c0_167 = arith.constant 0 : index
    %153 = vector.load %arg9[%c161, %c0_167] : memref<400x32xf32, #tpu.memory_space<vmem>>, vector<9x32xf32>
    %c260 = arith.constant 260 : index
    %c0_168 = arith.constant 0 : index
    %154 = vector.load %arg9[%c260, %c0_168] : memref<400x32xf32, #tpu.memory_space<vmem>>, vector<9x32xf32>
    %c360 = arith.constant 360 : index
    %c0_169 = arith.constant 0 : index
    %155 = vector.load %arg9[%c360, %c0_169] : memref<400x32xf32, #tpu.memory_space<vmem>>, vector<9x32xf32>
    %c261 = arith.constant 261 : index
    %c0_170 = arith.constant 0 : index
    %156 = vector.load %arg9[%c261, %c0_170] : memref<400x32xf32, #tpu.memory_space<vmem>>, vector<9x32xf32>
    %c361 = arith.constant 361 : index
    %c0_171 = arith.constant 0 : index
    %157 = vector.load %arg9[%c361, %c0_171] : memref<400x32xf32, #tpu.memory_space<vmem>>, vector<9x32xf32>
    %158 = tpu.concatenate %142, %143, %144, %145, %146, %147, %148, %149, %150, %151, %152, %153, %154, %155, %156, %157 in 1 : vector<9x32xf32>, vector<9x32xf32>, vector<9x32xf32>, vector<9x32xf32>, vector<9x32xf32>, vector<9x32xf32>, vector<9x32xf32>, vector<9x32xf32>, vector<9x32xf32>, vector<9x32xf32>, vector<9x32xf32>, vector<9x32xf32>, vector<9x32xf32>, vector<9x32xf32>, vector<9x32xf32>, vector<9x32xf32> -> vector<9x512xf32>
    %159 = arith.truncf %158 : vector<9x512xf32> to vector<9x512xbf16>
    %cst_172 = arith.constant dense<0.000000e+00> : vector<9x64xf32>
    %160 = tpu.matmul %159, %10, %cst_172 {dimension_numbers = #tpu.dot_dimension_numbers<[1], [0], [0], [1], [0, 0, 1, 1], [], []>} : vector<9x512xbf16>, vector<512x64xbf16>, vector<9x64xf32> -> vector<9x64xf32>
    %161 = vector.broadcast %11 : vector<1x64xf32> to vector<9x64xf32>
    %162 = arith.addf %160, %161 : vector<9x64xf32>
    %cst_173 = arith.constant 0.000000e+00 : f32
    %163 = vector.broadcast %cst_173 : f32 to vector<9x64xf32>
    %164 = arith.maximumf %162, %163 : vector<9x64xf32>
    %c5 = arith.constant 5 : index
    %c0_174 = arith.constant 0 : index
    %c0_175 = arith.constant 0 : index
    %165 = vector.load %arg10[%c5, %c0_174, %c0_175] : memref<9x9x64xf32, #tpu.memory_space<vmem>>, vector<1x9x64xf32>
    %166 = vector.shape_cast %165 : vector<1x9x64xf32> to vector<9x64xf32>
    %167 = vector.shape_cast %164 : vector<9x64xf32> to vector<1x9x64xf32>
    tpu.vector_store %arg10[%c5, %c0_174, %c0_175], %167 {strides = array<i32>} : memref<9x9x64xf32, #tpu.memory_space<vmem>>, vector<1x9x64xf32>,
    %c60_176 = arith.constant 60 : index
    %c0_177 = arith.constant 0 : index
    %168 = vector.load %arg9[%c60_176, %c0_177] : memref<400x32xf32, #tpu.memory_space<vmem>>, vector<9x32xf32>
    %c160_178 = arith.constant 160 : index
    %c0_179 = arith.constant 0 : index
    %169 = vector.load %arg9[%c160_178, %c0_179] : memref<400x32xf32, #tpu.memory_space<vmem>>, vector<9x32xf32>
    %c61_180 = arith.constant 61 : index
    %c0_181 = arith.constant 0 : index
    %170 = vector.load %arg9[%c61_180, %c0_181] : memref<400x32xf32, #tpu.memory_space<vmem>>, vector<9x32xf32>
    %c161_182 = arith.constant 161 : index
    %c0_183 = arith.constant 0 : index
    %171 = vector.load %arg9[%c161_182, %c0_183] : memref<400x32xf32, #tpu.memory_space<vmem>>, vector<9x32xf32>
    %c260_184 = arith.constant 260 : index
    %c0_185 = arith.constant 0 : index
    %172 = vector.load %arg9[%c260_184, %c0_185] : memref<400x32xf32, #tpu.memory_space<vmem>>, vector<9x32xf32>
    %c360_186 = arith.constant 360 : index
    %c0_187 = arith.constant 0 : index
    %173 = vector.load %arg9[%c360_186, %c0_187] : memref<400x32xf32, #tpu.memory_space<vmem>>, vector<9x32xf32>
    %c261_188 = arith.constant 261 : index
    %c0_189 = arith.constant 0 : index
    %174 = vector.load %arg9[%c261_188, %c0_189] : memref<400x32xf32, #tpu.memory_space<vmem>>, vector<9x32xf32>
    %c361_190 = arith.constant 361 : index
    %c0_191 = arith.constant 0 : index
    %175 = vector.load %arg9[%c361_190, %c0_191] : memref<400x32xf32, #tpu.memory_space<vmem>>, vector<9x32xf32>
    %c70 = arith.constant 70 : index
    %c0_192 = arith.constant 0 : index
    %176 = vector.load %arg9[%c70, %c0_192] : memref<400x32xf32, #tpu.memory_space<vmem>>, vector<9x32xf32>
    %c170 = arith.constant 170 : index
    %c0_193 = arith.constant 0 : index
    %177 = vector.load %arg9[%c170, %c0_193] : memref<400x32xf32, #tpu.memory_space<vmem>>, vector<9x32xf32>
    %c71 = arith.constant 71 : index
    %c0_194 = arith.constant 0 : index
    %178 = vector.load %arg9[%c71, %c0_194] : memref<400x32xf32, #tpu.memory_space<vmem>>, vector<9x32xf32>
    %c171 = arith.constant 171 : index
    %c0_195 = arith.constant 0 : index
    %179 = vector.load %arg9[%c171, %c0_195] : memref<400x32xf32, #tpu.memory_space<vmem>>, vector<9x32xf32>
    %c270 = arith.constant 270 : index
    %c0_196 = arith.constant 0 : index
    %180 = vector.load %arg9[%c270, %c0_196] : memref<400x32xf32, #tpu.memory_space<vmem>>, vector<9x32xf32>
    %c370 = arith.constant 370 : index
    %c0_197 = arith.constant 0 : index
    %181 = vector.load %arg9[%c370, %c0_197] : memref<400x32xf32, #tpu.memory_space<vmem>>, vector<9x32xf32>
    %c271 = arith.constant 271 : index
    %c0_198 = arith.constant 0 : index
    %182 = vector.load %arg9[%c271, %c0_198] : memref<400x32xf32, #tpu.memory_space<vmem>>, vector<9x32xf32>
    %c371 = arith.constant 371 : index
    %c0_199 = arith.constant 0 : index
    %183 = vector.load %arg9[%c371, %c0_199] : memref<400x32xf32, #tpu.memory_space<vmem>>, vector<9x32xf32>
    %184 = tpu.concatenate %168, %169, %170, %171, %172, %173, %174, %175, %176, %177, %178, %179, %180, %181, %182, %183 in 1 : vector<9x32xf32>, vector<9x32xf32>, vector<9x32xf32>, vector<9x32xf32>, vector<9x32xf32>, vector<9x32xf32>, vector<9x32xf32>, vector<9x32xf32>, vector<9x32xf32>, vector<9x32xf32>, vector<9x32xf32>, vector<9x32xf32>, vector<9x32xf32>, vector<9x32xf32>, vector<9x32xf32>, vector<9x32xf32> -> vector<9x512xf32>
    %185 = arith.truncf %184 : vector<9x512xf32> to vector<9x512xbf16>
    %cst_200 = arith.constant dense<0.000000e+00> : vector<9x64xf32>
    %186 = tpu.matmul %185, %10, %cst_200 {dimension_numbers = #tpu.dot_dimension_numbers<[1], [0], [0], [1], [0, 0, 1, 1], [], []>} : vector<9x512xbf16>, vector<512x64xbf16>, vector<9x64xf32> -> vector<9x64xf32>
    %187 = vector.broadcast %11 : vector<1x64xf32> to vector<9x64xf32>
    %188 = arith.addf %186, %187 : vector<9x64xf32>
    %cst_201 = arith.constant 0.000000e+00 : f32
    %189 = vector.broadcast %cst_201 : f32 to vector<9x64xf32>
    %190 = arith.maximumf %188, %189 : vector<9x64xf32>
    %c6 = arith.constant 6 : index
    %c0_202 = arith.constant 0 : index
    %c0_203 = arith.constant 0 : index
    %191 = vector.load %arg10[%c6, %c0_202, %c0_203] : memref<9x9x64xf32, #tpu.memory_space<vmem>>, vector<1x9x64xf32>
    %192 = vector.shape_cast %191 : vector<1x9x64xf32> to vector<9x64xf32>
    %193 = vector.shape_cast %190 : vector<9x64xf32> to vector<1x9x64xf32>
    tpu.vector_store %arg10[%c6, %c0_202, %c0_203], %193 {strides = array<i32>} : memref<9x9x64xf32, #tpu.memory_space<vmem>>, vector<1x9x64xf32>,
    %c70_204 = arith.constant 70 : index
    %c0_205 = arith.constant 0 : index
    %194 = vector.load %arg9[%c70_204, %c0_205] : memref<400x32xf32, #tpu.memory_space<vmem>>, vector<9x32xf32>
    %c170_206 = arith.constant 170 : index
    %c0_207 = arith.constant 0 : index
    %195 = vector.load %arg9[%c170_206, %c0_207] : memref<400x32xf32, #tpu.memory_space<vmem>>, vector<9x32xf32>
    %c71_208 = arith.constant 71 : index
    %c0_209 = arith.constant 0 : index
    %196 = vector.load %arg9[%c71_208, %c0_209] : memref<400x32xf32, #tpu.memory_space<vmem>>, vector<9x32xf32>
    %c171_210 = arith.constant 171 : index
    %c0_211 = arith.constant 0 : index
    %197 = vector.load %arg9[%c171_210, %c0_211] : memref<400x32xf32, #tpu.memory_space<vmem>>, vector<9x32xf32>
    %c270_212 = arith.constant 270 : index
    %c0_213 = arith.constant 0 : index
    %198 = vector.load %arg9[%c270_212, %c0_213] : memref<400x32xf32, #tpu.memory_space<vmem>>, vector<9x32xf32>
    %c370_214 = arith.constant 370 : index
    %c0_215 = arith.constant 0 : index
    %199 = vector.load %arg9[%c370_214, %c0_215] : memref<400x32xf32, #tpu.memory_space<vmem>>, vector<9x32xf32>
    %c271_216 = arith.constant 271 : index
    %c0_217 = arith.constant 0 : index
    %200 = vector.load %arg9[%c271_216, %c0_217] : memref<400x32xf32, #tpu.memory_space<vmem>>, vector<9x32xf32>
    %c371_218 = arith.constant 371 : index
    %c0_219 = arith.constant 0 : index
    %201 = vector.load %arg9[%c371_218, %c0_219] : memref<400x32xf32, #tpu.memory_space<vmem>>, vector<9x32xf32>
    %c80 = arith.constant 80 : index
    %c0_220 = arith.constant 0 : index
    %202 = vector.load %arg9[%c80, %c0_220] : memref<400x32xf32, #tpu.memory_space<vmem>>, vector<9x32xf32>
    %c180 = arith.constant 180 : index
    %c0_221 = arith.constant 0 : index
    %203 = vector.load %arg9[%c180, %c0_221] : memref<400x32xf32, #tpu.memory_space<vmem>>, vector<9x32xf32>
    %c81 = arith.constant 81 : index
    %c0_222 = arith.constant 0 : index
    %204 = vector.load %arg9[%c81, %c0_222] : memref<400x32xf32, #tpu.memory_space<vmem>>, vector<9x32xf32>
    %c181 = arith.constant 181 : index
    %c0_223 = arith.constant 0 : index
    %205 = vector.load %arg9[%c181, %c0_223] : memref<400x32xf32, #tpu.memory_space<vmem>>, vector<9x32xf32>
    %c280 = arith.constant 280 : index
    %c0_224 = arith.constant 0 : index
    %206 = vector.load %arg9[%c280, %c0_224] : memref<400x32xf32, #tpu.memory_space<vmem>>, vector<9x32xf32>
    %c380 = arith.constant 380 : index
    %c0_225 = arith.constant 0 : index
    %207 = vector.load %arg9[%c380, %c0_225] : memref<400x32xf32, #tpu.memory_space<vmem>>, vector<9x32xf32>
    %c281 = arith.constant 281 : index
    %c0_226 = arith.constant 0 : index
    %208 = vector.load %arg9[%c281, %c0_226] : memref<400x32xf32, #tpu.memory_space<vmem>>, vector<9x32xf32>
    %c381 = arith.constant 381 : index
    %c0_227 = arith.constant 0 : index
    %209 = vector.load %arg9[%c381, %c0_227] : memref<400x32xf32, #tpu.memory_space<vmem>>, vector<9x32xf32>
    %210 = tpu.concatenate %194, %195, %196, %197, %198, %199, %200, %201, %202, %203, %204, %205, %206, %207, %208, %209 in 1 : vector<9x32xf32>, vector<9x32xf32>, vector<9x32xf32>, vector<9x32xf32>, vector<9x32xf32>, vector<9x32xf32>, vector<9x32xf32>, vector<9x32xf32>, vector<9x32xf32>, vector<9x32xf32>, vector<9x32xf32>, vector<9x32xf32>, vector<9x32xf32>, vector<9x32xf32>, vector<9x32xf32>, vector<9x32xf32> -> vector<9x512xf32>
    %211 = arith.truncf %210 : vector<9x512xf32> to vector<9x512xbf16>
    %cst_228 = arith.constant dense<0.000000e+00> : vector<9x64xf32>
    %212 = tpu.matmul %211, %10, %cst_228 {dimension_numbers = #tpu.dot_dimension_numbers<[1], [0], [0], [1], [0, 0, 1, 1], [], []>} : vector<9x512xbf16>, vector<512x64xbf16>, vector<9x64xf32> -> vector<9x64xf32>
    %213 = vector.broadcast %11 : vector<1x64xf32> to vector<9x64xf32>
    %214 = arith.addf %212, %213 : vector<9x64xf32>
    %cst_229 = arith.constant 0.000000e+00 : f32
    %215 = vector.broadcast %cst_229 : f32 to vector<9x64xf32>
    %216 = arith.maximumf %214, %215 : vector<9x64xf32>
    %c7 = arith.constant 7 : index
    %c0_230 = arith.constant 0 : index
    %c0_231 = arith.constant 0 : index
    %217 = vector.load %arg10[%c7, %c0_230, %c0_231] : memref<9x9x64xf32, #tpu.memory_space<vmem>>, vector<1x9x64xf32>
    %218 = vector.shape_cast %217 : vector<1x9x64xf32> to vector<9x64xf32>
    %219 = vector.shape_cast %216 : vector<9x64xf32> to vector<1x9x64xf32>
    tpu.vector_store %arg10[%c7, %c0_230, %c0_231], %219 {strides = array<i32>} : memref<9x9x64xf32, #tpu.memory_space<vmem>>, vector<1x9x64xf32>,
    %c80_232 = arith.constant 80 : index
    %c0_233 = arith.constant 0 : index
    %220 = vector.load %arg9[%c80_232, %c0_233] : memref<400x32xf32, #tpu.memory_space<vmem>>, vector<9x32xf32>
    %c180_234 = arith.constant 180 : index
    %c0_235 = arith.constant 0 : index
    %221 = vector.load %arg9[%c180_234, %c0_235] : memref<400x32xf32, #tpu.memory_space<vmem>>, vector<9x32xf32>
    %c81_236 = arith.constant 81 : index
    %c0_237 = arith.constant 0 : index
    %222 = vector.load %arg9[%c81_236, %c0_237] : memref<400x32xf32, #tpu.memory_space<vmem>>, vector<9x32xf32>
    %c181_238 = arith.constant 181 : index
    %c0_239 = arith.constant 0 : index
    %223 = vector.load %arg9[%c181_238, %c0_239] : memref<400x32xf32, #tpu.memory_space<vmem>>, vector<9x32xf32>
    %c280_240 = arith.constant 280 : index
    %c0_241 = arith.constant 0 : index
    %224 = vector.load %arg9[%c280_240, %c0_241] : memref<400x32xf32, #tpu.memory_space<vmem>>, vector<9x32xf32>
    %c380_242 = arith.constant 380 : index
    %c0_243 = arith.constant 0 : index
    %225 = vector.load %arg9[%c380_242, %c0_243] : memref<400x32xf32, #tpu.memory_space<vmem>>, vector<9x32xf32>
    %c281_244 = arith.constant 281 : index
    %c0_245 = arith.constant 0 : index
    %226 = vector.load %arg9[%c281_244, %c0_245] : memref<400x32xf32, #tpu.memory_space<vmem>>, vector<9x32xf32>
    %c381_246 = arith.constant 381 : index
    %c0_247 = arith.constant 0 : index
    %227 = vector.load %arg9[%c381_246, %c0_247] : memref<400x32xf32, #tpu.memory_space<vmem>>, vector<9x32xf32>
    %c90 = arith.constant 90 : index
    %c0_248 = arith.constant 0 : index
    %228 = vector.load %arg9[%c90, %c0_248] : memref<400x32xf32, #tpu.memory_space<vmem>>, vector<9x32xf32>
    %c190 = arith.constant 190 : index
    %c0_249 = arith.constant 0 : index
    %229 = vector.load %arg9[%c190, %c0_249] : memref<400x32xf32, #tpu.memory_space<vmem>>, vector<9x32xf32>
    %c91 = arith.constant 91 : index
    %c0_250 = arith.constant 0 : index
    %230 = vector.load %arg9[%c91, %c0_250] : memref<400x32xf32, #tpu.memory_space<vmem>>, vector<9x32xf32>
    %c191 = arith.constant 191 : index
    %c0_251 = arith.constant 0 : index
    %231 = vector.load %arg9[%c191, %c0_251] : memref<400x32xf32, #tpu.memory_space<vmem>>, vector<9x32xf32>
    %c290 = arith.constant 290 : index
    %c0_252 = arith.constant 0 : index
    %232 = vector.load %arg9[%c290, %c0_252] : memref<400x32xf32, #tpu.memory_space<vmem>>, vector<9x32xf32>
    %c390 = arith.constant 390 : index
    %c0_253 = arith.constant 0 : index
    %233 = vector.load %arg9[%c390, %c0_253] : memref<400x32xf32, #tpu.memory_space<vmem>>, vector<9x32xf32>
    %c291 = arith.constant 291 : index
    %c0_254 = arith.constant 0 : index
    %234 = vector.load %arg9[%c291, %c0_254] : memref<400x32xf32, #tpu.memory_space<vmem>>, vector<9x32xf32>
    %c391 = arith.constant 391 : index
    %c0_255 = arith.constant 0 : index
    %235 = vector.load %arg9[%c391, %c0_255] : memref<400x32xf32, #tpu.memory_space<vmem>>, vector<9x32xf32>
    %236 = tpu.concatenate %220, %221, %222, %223, %224, %225, %226, %227, %228, %229, %230, %231, %232, %233, %234, %235 in 1 : vector<9x32xf32>, vector<9x32xf32>, vector<9x32xf32>, vector<9x32xf32>, vector<9x32xf32>, vector<9x32xf32>, vector<9x32xf32>, vector<9x32xf32>, vector<9x32xf32>, vector<9x32xf32>, vector<9x32xf32>, vector<9x32xf32>, vector<9x32xf32>, vector<9x32xf32>, vector<9x32xf32>, vector<9x32xf32> -> vector<9x512xf32>
    %237 = arith.truncf %236 : vector<9x512xf32> to vector<9x512xbf16>
    %cst_256 = arith.constant dense<0.000000e+00> : vector<9x64xf32>
    %238 = tpu.matmul %237, %10, %cst_256 {dimension_numbers = #tpu.dot_dimension_numbers<[1], [0], [0], [1], [0, 0, 1, 1], [], []>} : vector<9x512xbf16>, vector<512x64xbf16>, vector<9x64xf32> -> vector<9x64xf32>
    %239 = vector.broadcast %11 : vector<1x64xf32> to vector<9x64xf32>
    %240 = arith.addf %238, %239 : vector<9x64xf32>
    %cst_257 = arith.constant 0.000000e+00 : f32
    %241 = vector.broadcast %cst_257 : f32 to vector<9x64xf32>
    %242 = arith.maximumf %240, %241 : vector<9x64xf32>
    %c8 = arith.constant 8 : index
    %c0_258 = arith.constant 0 : index
    %c0_259 = arith.constant 0 : index
    %243 = vector.load %arg10[%c8, %c0_258, %c0_259] : memref<9x9x64xf32, #tpu.memory_space<vmem>>, vector<1x9x64xf32>
    %244 = vector.shape_cast %243 : vector<1x9x64xf32> to vector<9x64xf32>
    %245 = vector.shape_cast %242 : vector<9x64xf32> to vector<1x9x64xf32>
    tpu.vector_store %arg10[%c8, %c0_258, %c0_259], %245 {strides = array<i32>} : memref<9x9x64xf32, #tpu.memory_space<vmem>>, vector<1x9x64xf32>,
    %c0_260 = arith.constant 0 : index
    %c0_261 = arith.constant 0 : index
    %246 = vector.load %arg6[%c0_260, %c0_261] : memref<576x64xbf16, #tpu.memory_space<vmem>>, vector<576x64xbf16>
    %c0_262 = arith.constant 0 : index
    %c0_263 = arith.constant 0 : index
    %247 = vector.load %arg7[%c0_262, %c0_263] : memref<1x64xf32, #tpu.memory_space<vmem>>, vector<1x64xf32>
    %c0_264 = arith.constant 0 : index
    %c0_265 = arith.constant 0 : index
    %c0_266 = arith.constant 0 : index
    %248 = vector.load %arg10[%c0_264, %c0_265, %c0_266] : memref<9x9x64xf32, #tpu.memory_space<vmem>>, vector<1x7x64xf32>
    %249 = vector.shape_cast %248 : vector<1x7x64xf32> to vector<7x64xf32>
    %c0_267 = arith.constant 0 : index
    %c1_268 = arith.constant 1 : index
    %c0_269 = arith.constant 0 : index
    %250 = vector.load %arg10[%c0_267, %c1_268, %c0_269] : memref<9x9x64xf32, #tpu.memory_space<vmem>>, vector<1x7x64xf32>
    %251 = vector.shape_cast %250 : vector<1x7x64xf32> to vector<7x64xf32>
    %c0_270 = arith.constant 0 : index
    %c2_271 = arith.constant 2 : index
    %c0_272 = arith.constant 0 : index
    %252 = vector.load %arg10[%c0_270, %c2_271, %c0_272] : memref<9x9x64xf32, #tpu.memory_space<vmem>>, vector<1x7x64xf32>
    %253 = vector.shape_cast %252 : vector<1x7x64xf32> to vector<7x64xf32>
    %c1_273 = arith.constant 1 : index
    %c0_274 = arith.constant 0 : index
    %c0_275 = arith.constant 0 : index
    %254 = vector.load %arg10[%c1_273, %c0_274, %c0_275] : memref<9x9x64xf32, #tpu.memory_space<vmem>>, vector<1x7x64xf32>
    %255 = vector.shape_cast %254 : vector<1x7x64xf32> to vector<7x64xf32>
    %c1_276 = arith.constant 1 : index
    %c1_277 = arith.constant 1 : index
    %c0_278 = arith.constant 0 : index
    %256 = vector.load %arg10[%c1_276, %c1_277, %c0_278] : memref<9x9x64xf32, #tpu.memory_space<vmem>>, vector<1x7x64xf32>
    %257 = vector.shape_cast %256 : vector<1x7x64xf32> to vector<7x64xf32>
    %c1_279 = arith.constant 1 : index
    %c2_280 = arith.constant 2 : index
    %c0_281 = arith.constant 0 : index
    %258 = vector.load %arg10[%c1_279, %c2_280, %c0_281] : memref<9x9x64xf32, #tpu.memory_space<vmem>>, vector<1x7x64xf32>
    %259 = vector.shape_cast %258 : vector<1x7x64xf32> to vector<7x64xf32>
    %c2_282 = arith.constant 2 : index
    %c0_283 = arith.constant 0 : index
    %c0_284 = arith.constant 0 : index
    %260 = vector.load %arg10[%c2_282, %c0_283, %c0_284] : memref<9x9x64xf32, #tpu.memory_space<vmem>>, vector<1x7x64xf32>
    %261 = vector.shape_cast %260 : vector<1x7x64xf32> to vector<7x64xf32>
    %c2_285 = arith.constant 2 : index
    %c1_286 = arith.constant 1 : index
    %c0_287 = arith.constant 0 : index
    %262 = vector.load %arg10[%c2_285, %c1_286, %c0_287] : memref<9x9x64xf32, #tpu.memory_space<vmem>>, vector<1x7x64xf32>
    %263 = vector.shape_cast %262 : vector<1x7x64xf32> to vector<7x64xf32>
    %c2_288 = arith.constant 2 : index
    %c2_289 = arith.constant 2 : index
    %c0_290 = arith.constant 0 : index
    %264 = vector.load %arg10[%c2_288, %c2_289, %c0_290] : memref<9x9x64xf32, #tpu.memory_space<vmem>>, vector<1x7x64xf32>
    %265 = vector.shape_cast %264 : vector<1x7x64xf32> to vector<7x64xf32>
    %266 = tpu.concatenate %249, %251, %253, %255, %257, %259, %261, %263, %265 in 1 : vector<7x64xf32>, vector<7x64xf32>, vector<7x64xf32>, vector<7x64xf32>, vector<7x64xf32>, vector<7x64xf32>, vector<7x64xf32>, vector<7x64xf32>, vector<7x64xf32> -> vector<7x576xf32>
    %267 = arith.truncf %266 : vector<7x576xf32> to vector<7x576xbf16>
    %cst_291 = arith.constant dense<0.000000e+00> : vector<7x64xf32>
    %268 = tpu.matmul %267, %246, %cst_291 {dimension_numbers = #tpu.dot_dimension_numbers<[1], [0], [0], [1], [0, 0, 1, 1], [], []>} : vector<7x576xbf16>, vector<576x64xbf16>, vector<7x64xf32> -> vector<7x64xf32>
    %269 = vector.broadcast %247 : vector<1x64xf32> to vector<7x64xf32>
    %270 = arith.addf %268, %269 : vector<7x64xf32>
    %cst_292 = arith.constant 0.000000e+00 : f32
    %271 = vector.broadcast %cst_292 : f32 to vector<7x64xf32>
    %272 = arith.maximumf %270, %271 : vector<7x64xf32>
    %273 = arith.truncf %272 : vector<7x64xf32> to vector<7x64xbf16>
    %c0_293 = arith.constant 0 : index
    %c0_294 = arith.constant 0 : index
    %c0_295 = arith.constant 0 : index
    %274 = vector.load %arg8[%c0_293, %c0_294, %c0_295] : memref<1x49x64xbf16, #tpu.memory_space<vmem>>, vector<1x7x64xbf16>
    %275 = vector.shape_cast %274 : vector<1x7x64xbf16> to vector<7x64xbf16>
    %276 = vector.shape_cast %273 : vector<7x64xbf16> to vector<1x7x64xbf16>
    tpu.vector_store %arg8[%c0_293, %c0_294, %c0_295], %276 {strides = array<i32>} : memref<1x49x64xbf16, #tpu.memory_space<vmem>>, vector<1x7x64xbf16>,
    %c1_296 = arith.constant 1 : index
    %c0_297 = arith.constant 0 : index
    %c0_298 = arith.constant 0 : index
    %277 = vector.load %arg10[%c1_296, %c0_297, %c0_298] : memref<9x9x64xf32, #tpu.memory_space<vmem>>, vector<1x7x64xf32>
    %278 = vector.shape_cast %277 : vector<1x7x64xf32> to vector<7x64xf32>
    %c1_299 = arith.constant 1 : index
    %c1_300 = arith.constant 1 : index
    %c0_301 = arith.constant 0 : index
    %279 = vector.load %arg10[%c1_299, %c1_300, %c0_301] : memref<9x9x64xf32, #tpu.memory_space<vmem>>, vector<1x7x64xf32>
    %280 = vector.shape_cast %279 : vector<1x7x64xf32> to vector<7x64xf32>
    %c1_302 = arith.constant 1 : index
    %c2_303 = arith.constant 2 : index
    %c0_304 = arith.constant 0 : index
    %281 = vector.load %arg10[%c1_302, %c2_303, %c0_304] : memref<9x9x64xf32, #tpu.memory_space<vmem>>, vector<1x7x64xf32>
    %282 = vector.shape_cast %281 : vector<1x7x64xf32> to vector<7x64xf32>
    %c2_305 = arith.constant 2 : index
    %c0_306 = arith.constant 0 : index
    %c0_307 = arith.constant 0 : index
    %283 = vector.load %arg10[%c2_305, %c0_306, %c0_307] : memref<9x9x64xf32, #tpu.memory_space<vmem>>, vector<1x7x64xf32>
    %284 = vector.shape_cast %283 : vector<1x7x64xf32> to vector<7x64xf32>
    %c2_308 = arith.constant 2 : index
    %c1_309 = arith.constant 1 : index
    %c0_310 = arith.constant 0 : index
    %285 = vector.load %arg10[%c2_308, %c1_309, %c0_310] : memref<9x9x64xf32, #tpu.memory_space<vmem>>, vector<1x7x64xf32>
    %286 = vector.shape_cast %285 : vector<1x7x64xf32> to vector<7x64xf32>
    %c2_311 = arith.constant 2 : index
    %c2_312 = arith.constant 2 : index
    %c0_313 = arith.constant 0 : index
    %287 = vector.load %arg10[%c2_311, %c2_312, %c0_313] : memref<9x9x64xf32, #tpu.memory_space<vmem>>, vector<1x7x64xf32>
    %288 = vector.shape_cast %287 : vector<1x7x64xf32> to vector<7x64xf32>
    %c3_314 = arith.constant 3 : index
    %c0_315 = arith.constant 0 : index
    %c0_316 = arith.constant 0 : index
    %289 = vector.load %arg10[%c3_314, %c0_315, %c0_316] : memref<9x9x64xf32, #tpu.memory_space<vmem>>, vector<1x7x64xf32>
    %290 = vector.shape_cast %289 : vector<1x7x64xf32> to vector<7x64xf32>
    %c3_317 = arith.constant 3 : index
    %c1_318 = arith.constant 1 : index
    %c0_319 = arith.constant 0 : index
    %291 = vector.load %arg10[%c3_317, %c1_318, %c0_319] : memref<9x9x64xf32, #tpu.memory_space<vmem>>, vector<1x7x64xf32>
    %292 = vector.shape_cast %291 : vector<1x7x64xf32> to vector<7x64xf32>
    %c3_320 = arith.constant 3 : index
    %c2_321 = arith.constant 2 : index
    %c0_322 = arith.constant 0 : index
    %293 = vector.load %arg10[%c3_320, %c2_321, %c0_322] : memref<9x9x64xf32, #tpu.memory_space<vmem>>, vector<1x7x64xf32>
    %294 = vector.shape_cast %293 : vector<1x7x64xf32> to vector<7x64xf32>
    %295 = tpu.concatenate %278, %280, %282, %284, %286, %288, %290, %292, %294 in 1 : vector<7x64xf32>, vector<7x64xf32>, vector<7x64xf32>, vector<7x64xf32>, vector<7x64xf32>, vector<7x64xf32>, vector<7x64xf32>, vector<7x64xf32>, vector<7x64xf32> -> vector<7x576xf32>
    %296 = arith.truncf %295 : vector<7x576xf32> to vector<7x576xbf16>
    %cst_323 = arith.constant dense<0.000000e+00> : vector<7x64xf32>
    %297 = tpu.matmul %296, %246, %cst_323 {dimension_numbers = #tpu.dot_dimension_numbers<[1], [0], [0], [1], [0, 0, 1, 1], [], []>} : vector<7x576xbf16>, vector<576x64xbf16>, vector<7x64xf32> -> vector<7x64xf32>
    %298 = vector.broadcast %247 : vector<1x64xf32> to vector<7x64xf32>
    %299 = arith.addf %297, %298 : vector<7x64xf32>
    %cst_324 = arith.constant 0.000000e+00 : f32
    %300 = vector.broadcast %cst_324 : f32 to vector<7x64xf32>
    %301 = arith.maximumf %299, %300 : vector<7x64xf32>
    %302 = arith.truncf %301 : vector<7x64xf32> to vector<7x64xbf16>
    %c0_325 = arith.constant 0 : index
    %c7_326 = arith.constant 7 : index
    %c0_327 = arith.constant 0 : index
    %303 = vector.load %arg8[%c0_325, %c7_326, %c0_327] : memref<1x49x64xbf16, #tpu.memory_space<vmem>>, vector<1x7x64xbf16>
    %304 = vector.shape_cast %303 : vector<1x7x64xbf16> to vector<7x64xbf16>
    %305 = vector.shape_cast %302 : vector<7x64xbf16> to vector<1x7x64xbf16>
    tpu.vector_store %arg8[%c0_325, %c7_326, %c0_327], %305 {strides = array<i32>} : memref<1x49x64xbf16, #tpu.memory_space<vmem>>, vector<1x7x64xbf16>,
    %c2_328 = arith.constant 2 : index
    %c0_329 = arith.constant 0 : index
    %c0_330 = arith.constant 0 : index
    %306 = vector.load %arg10[%c2_328, %c0_329, %c0_330] : memref<9x9x64xf32, #tpu.memory_space<vmem>>, vector<1x7x64xf32>
    %307 = vector.shape_cast %306 : vector<1x7x64xf32> to vector<7x64xf32>
    %c2_331 = arith.constant 2 : index
    %c1_332 = arith.constant 1 : index
    %c0_333 = arith.constant 0 : index
    %308 = vector.load %arg10[%c2_331, %c1_332, %c0_333] : memref<9x9x64xf32, #tpu.memory_space<vmem>>, vector<1x7x64xf32>
    %309 = vector.shape_cast %308 : vector<1x7x64xf32> to vector<7x64xf32>
    %c2_334 = arith.constant 2 : index
    %c2_335 = arith.constant 2 : index
    %c0_336 = arith.constant 0 : index
    %310 = vector.load %arg10[%c2_334, %c2_335, %c0_336] : memref<9x9x64xf32, #tpu.memory_space<vmem>>, vector<1x7x64xf32>
    %311 = vector.shape_cast %310 : vector<1x7x64xf32> to vector<7x64xf32>
    %c3_337 = arith.constant 3 : index
    %c0_338 = arith.constant 0 : index
    %c0_339 = arith.constant 0 : index
    %312 = vector.load %arg10[%c3_337, %c0_338, %c0_339] : memref<9x9x64xf32, #tpu.memory_space<vmem>>, vector<1x7x64xf32>
    %313 = vector.shape_cast %312 : vector<1x7x64xf32> to vector<7x64xf32>
    %c3_340 = arith.constant 3 : index
    %c1_341 = arith.constant 1 : index
    %c0_342 = arith.constant 0 : index
    %314 = vector.load %arg10[%c3_340, %c1_341, %c0_342] : memref<9x9x64xf32, #tpu.memory_space<vmem>>, vector<1x7x64xf32>
    %315 = vector.shape_cast %314 : vector<1x7x64xf32> to vector<7x64xf32>
    %c3_343 = arith.constant 3 : index
    %c2_344 = arith.constant 2 : index
    %c0_345 = arith.constant 0 : index
    %316 = vector.load %arg10[%c3_343, %c2_344, %c0_345] : memref<9x9x64xf32, #tpu.memory_space<vmem>>, vector<1x7x64xf32>
    %317 = vector.shape_cast %316 : vector<1x7x64xf32> to vector<7x64xf32>
    %c4_346 = arith.constant 4 : index
    %c0_347 = arith.constant 0 : index
    %c0_348 = arith.constant 0 : index
    %318 = vector.load %arg10[%c4_346, %c0_347, %c0_348] : memref<9x9x64xf32, #tpu.memory_space<vmem>>, vector<1x7x64xf32>
    %319 = vector.shape_cast %318 : vector<1x7x64xf32> to vector<7x64xf32>
    %c4_349 = arith.constant 4 : index
    %c1_350 = arith.constant 1 : index
    %c0_351 = arith.constant 0 : index
    %320 = vector.load %arg10[%c4_349, %c1_350, %c0_351] : memref<9x9x64xf32, #tpu.memory_space<vmem>>, vector<1x7x64xf32>
    %321 = vector.shape_cast %320 : vector<1x7x64xf32> to vector<7x64xf32>
    %c4_352 = arith.constant 4 : index
    %c2_353 = arith.constant 2 : index
    %c0_354 = arith.constant 0 : index
    %322 = vector.load %arg10[%c4_352, %c2_353, %c0_354] : memref<9x9x64xf32, #tpu.memory_space<vmem>>, vector<1x7x64xf32>
    %323 = vector.shape_cast %322 : vector<1x7x64xf32> to vector<7x64xf32>
    %324 = tpu.concatenate %307, %309, %311, %313, %315, %317, %319, %321, %323 in 1 : vector<7x64xf32>, vector<7x64xf32>, vector<7x64xf32>, vector<7x64xf32>, vector<7x64xf32>, vector<7x64xf32>, vector<7x64xf32>, vector<7x64xf32>, vector<7x64xf32> -> vector<7x576xf32>
    %325 = arith.truncf %324 : vector<7x576xf32> to vector<7x576xbf16>
    %cst_355 = arith.constant dense<0.000000e+00> : vector<7x64xf32>
    %326 = tpu.matmul %325, %246, %cst_355 {dimension_numbers = #tpu.dot_dimension_numbers<[1], [0], [0], [1], [0, 0, 1, 1], [], []>} : vector<7x576xbf16>, vector<576x64xbf16>, vector<7x64xf32> -> vector<7x64xf32>
    %327 = vector.broadcast %247 : vector<1x64xf32> to vector<7x64xf32>
    %328 = arith.addf %326, %327 : vector<7x64xf32>
    %cst_356 = arith.constant 0.000000e+00 : f32
    %329 = vector.broadcast %cst_356 : f32 to vector<7x64xf32>
    %330 = arith.maximumf %328, %329 : vector<7x64xf32>
    %331 = arith.truncf %330 : vector<7x64xf32> to vector<7x64xbf16>
    %c0_357 = arith.constant 0 : index
    %c14 = arith.constant 14 : index
    %c0_358 = arith.constant 0 : index
    %332 = vector.load %arg8[%c0_357, %c14, %c0_358] : memref<1x49x64xbf16, #tpu.memory_space<vmem>>, vector<1x7x64xbf16>
    %333 = vector.shape_cast %332 : vector<1x7x64xbf16> to vector<7x64xbf16>
    %334 = vector.shape_cast %331 : vector<7x64xbf16> to vector<1x7x64xbf16>
    tpu.vector_store %arg8[%c0_357, %c14, %c0_358], %334 {strides = array<i32>} : memref<1x49x64xbf16, #tpu.memory_space<vmem>>, vector<1x7x64xbf16>,
    %c3_359 = arith.constant 3 : index
    %c0_360 = arith.constant 0 : index
    %c0_361 = arith.constant 0 : index
    %335 = vector.load %arg10[%c3_359, %c0_360, %c0_361] : memref<9x9x64xf32, #tpu.memory_space<vmem>>, vector<1x7x64xf32>
    %336 = vector.shape_cast %335 : vector<1x7x64xf32> to vector<7x64xf32>
    %c3_362 = arith.constant 3 : index
    %c1_363 = arith.constant 1 : index
    %c0_364 = arith.constant 0 : index
    %337 = vector.load %arg10[%c3_362, %c1_363, %c0_364] : memref<9x9x64xf32, #tpu.memory_space<vmem>>, vector<1x7x64xf32>
    %338 = vector.shape_cast %337 : vector<1x7x64xf32> to vector<7x64xf32>
    %c3_365 = arith.constant 3 : index
    %c2_366 = arith.constant 2 : index
    %c0_367 = arith.constant 0 : index
    %339 = vector.load %arg10[%c3_365, %c2_366, %c0_367] : memref<9x9x64xf32, #tpu.memory_space<vmem>>, vector<1x7x64xf32>
    %340 = vector.shape_cast %339 : vector<1x7x64xf32> to vector<7x64xf32>
    %c4_368 = arith.constant 4 : index
    %c0_369 = arith.constant 0 : index
    %c0_370 = arith.constant 0 : index
    %341 = vector.load %arg10[%c4_368, %c0_369, %c0_370] : memref<9x9x64xf32, #tpu.memory_space<vmem>>, vector<1x7x64xf32>
    %342 = vector.shape_cast %341 : vector<1x7x64xf32> to vector<7x64xf32>
    %c4_371 = arith.constant 4 : index
    %c1_372 = arith.constant 1 : index
    %c0_373 = arith.constant 0 : index
    %343 = vector.load %arg10[%c4_371, %c1_372, %c0_373] : memref<9x9x64xf32, #tpu.memory_space<vmem>>, vector<1x7x64xf32>
    %344 = vector.shape_cast %343 : vector<1x7x64xf32> to vector<7x64xf32>
    %c4_374 = arith.constant 4 : index
    %c2_375 = arith.constant 2 : index
    %c0_376 = arith.constant 0 : index
    %345 = vector.load %arg10[%c4_374, %c2_375, %c0_376] : memref<9x9x64xf32, #tpu.memory_space<vmem>>, vector<1x7x64xf32>
    %346 = vector.shape_cast %345 : vector<1x7x64xf32> to vector<7x64xf32>
    %c5_377 = arith.constant 5 : index
    %c0_378 = arith.constant 0 : index
    %c0_379 = arith.constant 0 : index
    %347 = vector.load %arg10[%c5_377, %c0_378, %c0_379] : memref<9x9x64xf32, #tpu.memory_space<vmem>>, vector<1x7x64xf32>
    %348 = vector.shape_cast %347 : vector<1x7x64xf32> to vector<7x64xf32>
    %c5_380 = arith.constant 5 : index
    %c1_381 = arith.constant 1 : index
    %c0_382 = arith.constant 0 : index
    %349 = vector.load %arg10[%c5_380, %c1_381, %c0_382] : memref<9x9x64xf32, #tpu.memory_space<vmem>>, vector<1x7x64xf32>
    %350 = vector.shape_cast %349 : vector<1x7x64xf32> to vector<7x64xf32>
    %c5_383 = arith.constant 5 : index
    %c2_384 = arith.constant 2 : index
    %c0_385 = arith.constant 0 : index
    %351 = vector.load %arg10[%c5_383, %c2_384, %c0_385] : memref<9x9x64xf32, #tpu.memory_space<vmem>>, vector<1x7x64xf32>
    %352 = vector.shape_cast %351 : vector<1x7x64xf32> to vector<7x64xf32>
    %353 = tpu.concatenate %336, %338, %340, %342, %344, %346, %348, %350, %352 in 1 : vector<7x64xf32>, vector<7x64xf32>, vector<7x64xf32>, vector<7x64xf32>, vector<7x64xf32>, vector<7x64xf32>, vector<7x64xf32>, vector<7x64xf32>, vector<7x64xf32> -> vector<7x576xf32>
    %354 = arith.truncf %353 : vector<7x576xf32> to vector<7x576xbf16>
    %cst_386 = arith.constant dense<0.000000e+00> : vector<7x64xf32>
    %355 = tpu.matmul %354, %246, %cst_386 {dimension_numbers = #tpu.dot_dimension_numbers<[1], [0], [0], [1], [0, 0, 1, 1], [], []>} : vector<7x576xbf16>, vector<576x64xbf16>, vector<7x64xf32> -> vector<7x64xf32>
    %356 = vector.broadcast %247 : vector<1x64xf32> to vector<7x64xf32>
    %357 = arith.addf %355, %356 : vector<7x64xf32>
    %cst_387 = arith.constant 0.000000e+00 : f32
    %358 = vector.broadcast %cst_387 : f32 to vector<7x64xf32>
    %359 = arith.maximumf %357, %358 : vector<7x64xf32>
    %360 = arith.truncf %359 : vector<7x64xf32> to vector<7x64xbf16>
    %c0_388 = arith.constant 0 : index
    %c21_389 = arith.constant 21 : index
    %c0_390 = arith.constant 0 : index
    %361 = vector.load %arg8[%c0_388, %c21_389, %c0_390] : memref<1x49x64xbf16, #tpu.memory_space<vmem>>, vector<1x7x64xbf16>
    %362 = vector.shape_cast %361 : vector<1x7x64xbf16> to vector<7x64xbf16>
    %363 = vector.shape_cast %360 : vector<7x64xbf16> to vector<1x7x64xbf16>
    tpu.vector_store %arg8[%c0_388, %c21_389, %c0_390], %363 {strides = array<i32>} : memref<1x49x64xbf16, #tpu.memory_space<vmem>>, vector<1x7x64xbf16>,
    %c4_391 = arith.constant 4 : index
    %c0_392 = arith.constant 0 : index
    %c0_393 = arith.constant 0 : index
    %364 = vector.load %arg10[%c4_391, %c0_392, %c0_393] : memref<9x9x64xf32, #tpu.memory_space<vmem>>, vector<1x7x64xf32>
    %365 = vector.shape_cast %364 : vector<1x7x64xf32> to vector<7x64xf32>
    %c4_394 = arith.constant 4 : index
    %c1_395 = arith.constant 1 : index
    %c0_396 = arith.constant 0 : index
    %366 = vector.load %arg10[%c4_394, %c1_395, %c0_396] : memref<9x9x64xf32, #tpu.memory_space<vmem>>, vector<1x7x64xf32>
    %367 = vector.shape_cast %366 : vector<1x7x64xf32> to vector<7x64xf32>
    %c4_397 = arith.constant 4 : index
    %c2_398 = arith.constant 2 : index
    %c0_399 = arith.constant 0 : index
    %368 = vector.load %arg10[%c4_397, %c2_398, %c0_399] : memref<9x9x64xf32, #tpu.memory_space<vmem>>, vector<1x7x64xf32>
    %369 = vector.shape_cast %368 : vector<1x7x64xf32> to vector<7x64xf32>
    %c5_400 = arith.constant 5 : index
    %c0_401 = arith.constant 0 : index
    %c0_402 = arith.constant 0 : index
    %370 = vector.load %arg10[%c5_400, %c0_401, %c0_402] : memref<9x9x64xf32, #tpu.memory_space<vmem>>, vector<1x7x64xf32>
    %371 = vector.shape_cast %370 : vector<1x7x64xf32> to vector<7x64xf32>
    %c5_403 = arith.constant 5 : index
    %c1_404 = arith.constant 1 : index
    %c0_405 = arith.constant 0 : index
    %372 = vector.load %arg10[%c5_403, %c1_404, %c0_405] : memref<9x9x64xf32, #tpu.memory_space<vmem>>, vector<1x7x64xf32>
    %373 = vector.shape_cast %372 : vector<1x7x64xf32> to vector<7x64xf32>
    %c5_406 = arith.constant 5 : index
    %c2_407 = arith.constant 2 : index
    %c0_408 = arith.constant 0 : index
    %374 = vector.load %arg10[%c5_406, %c2_407, %c0_408] : memref<9x9x64xf32, #tpu.memory_space<vmem>>, vector<1x7x64xf32>
    %375 = vector.shape_cast %374 : vector<1x7x64xf32> to vector<7x64xf32>
    %c6_409 = arith.constant 6 : index
    %c0_410 = arith.constant 0 : index
    %c0_411 = arith.constant 0 : index
    %376 = vector.load %arg10[%c6_409, %c0_410, %c0_411] : memref<9x9x64xf32, #tpu.memory_space<vmem>>, vector<1x7x64xf32>
    %377 = vector.shape_cast %376 : vector<1x7x64xf32> to vector<7x64xf32>
    %c6_412 = arith.constant 6 : index
    %c1_413 = arith.constant 1 : index
    %c0_414 = arith.constant 0 : index
    %378 = vector.load %arg10[%c6_412, %c1_413, %c0_414] : memref<9x9x64xf32, #tpu.memory_space<vmem>>, vector<1x7x64xf32>
    %379 = vector.shape_cast %378 : vector<1x7x64xf32> to vector<7x64xf32>
    %c6_415 = arith.constant 6 : index
    %c2_416 = arith.constant 2 : index
    %c0_417 = arith.constant 0 : index
    %380 = vector.load %arg10[%c6_415, %c2_416, %c0_417] : memref<9x9x64xf32, #tpu.memory_space<vmem>>, vector<1x7x64xf32>
    %381 = vector.shape_cast %380 : vector<1x7x64xf32> to vector<7x64xf32>
    %382 = tpu.concatenate %365, %367, %369, %371, %373, %375, %377, %379, %381 in 1 : vector<7x64xf32>, vector<7x64xf32>, vector<7x64xf32>, vector<7x64xf32>, vector<7x64xf32>, vector<7x64xf32>, vector<7x64xf32>, vector<7x64xf32>, vector<7x64xf32> -> vector<7x576xf32>
    %383 = arith.truncf %382 : vector<7x576xf32> to vector<7x576xbf16>
    %cst_418 = arith.constant dense<0.000000e+00> : vector<7x64xf32>
    %384 = tpu.matmul %383, %246, %cst_418 {dimension_numbers = #tpu.dot_dimension_numbers<[1], [0], [0], [1], [0, 0, 1, 1], [], []>} : vector<7x576xbf16>, vector<576x64xbf16>, vector<7x64xf32> -> vector<7x64xf32>
    %385 = vector.broadcast %247 : vector<1x64xf32> to vector<7x64xf32>
    %386 = arith.addf %384, %385 : vector<7x64xf32>
    %cst_419 = arith.constant 0.000000e+00 : f32
    %387 = vector.broadcast %cst_419 : f32 to vector<7x64xf32>
    %388 = arith.maximumf %386, %387 : vector<7x64xf32>
    %389 = arith.truncf %388 : vector<7x64xf32> to vector<7x64xbf16>
    %c0_420 = arith.constant 0 : index
    %c28 = arith.constant 28 : index
    %c0_421 = arith.constant 0 : index
    %390 = vector.load %arg8[%c0_420, %c28, %c0_421] : memref<1x49x64xbf16, #tpu.memory_space<vmem>>, vector<1x7x64xbf16>
    %391 = vector.shape_cast %390 : vector<1x7x64xbf16> to vector<7x64xbf16>
    %392 = vector.shape_cast %389 : vector<7x64xbf16> to vector<1x7x64xbf16>
    tpu.vector_store %arg8[%c0_420, %c28, %c0_421], %392 {strides = array<i32>} : memref<1x49x64xbf16, #tpu.memory_space<vmem>>, vector<1x7x64xbf16>,
    %c5_422 = arith.constant 5 : index
    %c0_423 = arith.constant 0 : index
    %c0_424 = arith.constant 0 : index
    %393 = vector.load %arg10[%c5_422, %c0_423, %c0_424] : memref<9x9x64xf32, #tpu.memory_space<vmem>>, vector<1x7x64xf32>
    %394 = vector.shape_cast %393 : vector<1x7x64xf32> to vector<7x64xf32>
    %c5_425 = arith.constant 5 : index
    %c1_426 = arith.constant 1 : index
    %c0_427 = arith.constant 0 : index
    %395 = vector.load %arg10[%c5_425, %c1_426, %c0_427] : memref<9x9x64xf32, #tpu.memory_space<vmem>>, vector<1x7x64xf32>
    %396 = vector.shape_cast %395 : vector<1x7x64xf32> to vector<7x64xf32>
    %c5_428 = arith.constant 5 : index
    %c2_429 = arith.constant 2 : index
    %c0_430 = arith.constant 0 : index
    %397 = vector.load %arg10[%c5_428, %c2_429, %c0_430] : memref<9x9x64xf32, #tpu.memory_space<vmem>>, vector<1x7x64xf32>
    %398 = vector.shape_cast %397 : vector<1x7x64xf32> to vector<7x64xf32>
    %c6_431 = arith.constant 6 : index
    %c0_432 = arith.constant 0 : index
    %c0_433 = arith.constant 0 : index
    %399 = vector.load %arg10[%c6_431, %c0_432, %c0_433] : memref<9x9x64xf32, #tpu.memory_space<vmem>>, vector<1x7x64xf32>
    %400 = vector.shape_cast %399 : vector<1x7x64xf32> to vector<7x64xf32>
    %c6_434 = arith.constant 6 : index
    %c1_435 = arith.constant 1 : index
    %c0_436 = arith.constant 0 : index
    %401 = vector.load %arg10[%c6_434, %c1_435, %c0_436] : memref<9x9x64xf32, #tpu.memory_space<vmem>>, vector<1x7x64xf32>
    %402 = vector.shape_cast %401 : vector<1x7x64xf32> to vector<7x64xf32>
    %c6_437 = arith.constant 6 : index
    %c2_438 = arith.constant 2 : index
    %c0_439 = arith.constant 0 : index
    %403 = vector.load %arg10[%c6_437, %c2_438, %c0_439] : memref<9x9x64xf32, #tpu.memory_space<vmem>>, vector<1x7x64xf32>
    %404 = vector.shape_cast %403 : vector<1x7x64xf32> to vector<7x64xf32>
    %c7_440 = arith.constant 7 : index
    %c0_441 = arith.constant 0 : index
    %c0_442 = arith.constant 0 : index
    %405 = vector.load %arg10[%c7_440, %c0_441, %c0_442] : memref<9x9x64xf32, #tpu.memory_space<vmem>>, vector<1x7x64xf32>
    %406 = vector.shape_cast %405 : vector<1x7x64xf32> to vector<7x64xf32>
    %c7_443 = arith.constant 7 : index
    %c1_444 = arith.constant 1 : index
    %c0_445 = arith.constant 0 : index
    %407 = vector.load %arg10[%c7_443, %c1_444, %c0_445] : memref<9x9x64xf32, #tpu.memory_space<vmem>>, vector<1x7x64xf32>
    %408 = vector.shape_cast %407 : vector<1x7x64xf32> to vector<7x64xf32>
    %c7_446 = arith.constant 7 : index
    %c2_447 = arith.constant 2 : index
    %c0_448 = arith.constant 0 : index
    %409 = vector.load %arg10[%c7_446, %c2_447, %c0_448] : memref<9x9x64xf32, #tpu.memory_space<vmem>>, vector<1x7x64xf32>
    %410 = vector.shape_cast %409 : vector<1x7x64xf32> to vector<7x64xf32>
    %411 = tpu.concatenate %394, %396, %398, %400, %402, %404, %406, %408, %410 in 1 : vector<7x64xf32>, vector<7x64xf32>, vector<7x64xf32>, vector<7x64xf32>, vector<7x64xf32>, vector<7x64xf32>, vector<7x64xf32>, vector<7x64xf32>, vector<7x64xf32> -> vector<7x576xf32>
    %412 = arith.truncf %411 : vector<7x576xf32> to vector<7x576xbf16>
    %cst_449 = arith.constant dense<0.000000e+00> : vector<7x64xf32>
    %413 = tpu.matmul %412, %246, %cst_449 {dimension_numbers = #tpu.dot_dimension_numbers<[1], [0], [0], [1], [0, 0, 1, 1], [], []>} : vector<7x576xbf16>, vector<576x64xbf16>, vector<7x64xf32> -> vector<7x64xf32>
    %414 = vector.broadcast %247 : vector<1x64xf32> to vector<7x64xf32>
    %415 = arith.addf %413, %414 : vector<7x64xf32>
    %cst_450 = arith.constant 0.000000e+00 : f32
    %416 = vector.broadcast %cst_450 : f32 to vector<7x64xf32>
    %417 = arith.maximumf %415, %416 : vector<7x64xf32>
    %418 = arith.truncf %417 : vector<7x64xf32> to vector<7x64xbf16>
    %c0_451 = arith.constant 0 : index
    %c35 = arith.constant 35 : index
    %c0_452 = arith.constant 0 : index
    %419 = vector.load %arg8[%c0_451, %c35, %c0_452] : memref<1x49x64xbf16, #tpu.memory_space<vmem>>, vector<1x7x64xbf16>
    %420 = vector.shape_cast %419 : vector<1x7x64xbf16> to vector<7x64xbf16>
    %421 = vector.shape_cast %418 : vector<7x64xbf16> to vector<1x7x64xbf16>
    tpu.vector_store %arg8[%c0_451, %c35, %c0_452], %421 {strides = array<i32>} : memref<1x49x64xbf16, #tpu.memory_space<vmem>>, vector<1x7x64xbf16>,
    %c6_453 = arith.constant 6 : index
    %c0_454 = arith.constant 0 : index
    %c0_455 = arith.constant 0 : index
    %422 = vector.load %arg10[%c6_453, %c0_454, %c0_455] : memref<9x9x64xf32, #tpu.memory_space<vmem>>, vector<1x7x64xf32>
    %423 = vector.shape_cast %422 : vector<1x7x64xf32> to vector<7x64xf32>
    %c6_456 = arith.constant 6 : index
    %c1_457 = arith.constant 1 : index
    %c0_458 = arith.constant 0 : index
    %424 = vector.load %arg10[%c6_456, %c1_457, %c0_458] : memref<9x9x64xf32, #tpu.memory_space<vmem>>, vector<1x7x64xf32>
    %425 = vector.shape_cast %424 : vector<1x7x64xf32> to vector<7x64xf32>
    %c6_459 = arith.constant 6 : index
    %c2_460 = arith.constant 2 : index
    %c0_461 = arith.constant 0 : index
    %426 = vector.load %arg10[%c6_459, %c2_460, %c0_461] : memref<9x9x64xf32, #tpu.memory_space<vmem>>, vector<1x7x64xf32>
    %427 = vector.shape_cast %426 : vector<1x7x64xf32> to vector<7x64xf32>
    %c7_462 = arith.constant 7 : index
    %c0_463 = arith.constant 0 : index
    %c0_464 = arith.constant 0 : index
    %428 = vector.load %arg10[%c7_462, %c0_463, %c0_464] : memref<9x9x64xf32, #tpu.memory_space<vmem>>, vector<1x7x64xf32>
    %429 = vector.shape_cast %428 : vector<1x7x64xf32> to vector<7x64xf32>
    %c7_465 = arith.constant 7 : index
    %c1_466 = arith.constant 1 : index
    %c0_467 = arith.constant 0 : index
    %430 = vector.load %arg10[%c7_465, %c1_466, %c0_467] : memref<9x9x64xf32, #tpu.memory_space<vmem>>, vector<1x7x64xf32>
    %431 = vector.shape_cast %430 : vector<1x7x64xf32> to vector<7x64xf32>
    %c7_468 = arith.constant 7 : index
    %c2_469 = arith.constant 2 : index
    %c0_470 = arith.constant 0 : index
    %432 = vector.load %arg10[%c7_468, %c2_469, %c0_470] : memref<9x9x64xf32, #tpu.memory_space<vmem>>, vector<1x7x64xf32>
    %433 = vector.shape_cast %432 : vector<1x7x64xf32> to vector<7x64xf32>
    %c8_471 = arith.constant 8 : index
    %c0_472 = arith.constant 0 : index
    %c0_473 = arith.constant 0 : index
    %434 = vector.load %arg10[%c8_471, %c0_472, %c0_473] : memref<9x9x64xf32, #tpu.memory_space<vmem>>, vector<1x7x64xf32>
    %435 = vector.shape_cast %434 : vector<1x7x64xf32> to vector<7x64xf32>
    %c8_474 = arith.constant 8 : index
    %c1_475 = arith.constant 1 : index
    %c0_476 = arith.constant 0 : index
    %436 = vector.load %arg10[%c8_474, %c1_475, %c0_476] : memref<9x9x64xf32, #tpu.memory_space<vmem>>, vector<1x7x64xf32>
    %437 = vector.shape_cast %436 : vector<1x7x64xf32> to vector<7x64xf32>
    %c8_477 = arith.constant 8 : index
    %c2_478 = arith.constant 2 : index
    %c0_479 = arith.constant 0 : index
    %438 = vector.load %arg10[%c8_477, %c2_478, %c0_479] : memref<9x9x64xf32, #tpu.memory_space<vmem>>, vector<1x7x64xf32>
    %439 = vector.shape_cast %438 : vector<1x7x64xf32> to vector<7x64xf32>
    %440 = tpu.concatenate %423, %425, %427, %429, %431, %433, %435, %437, %439 in 1 : vector<7x64xf32>, vector<7x64xf32>, vector<7x64xf32>, vector<7x64xf32>, vector<7x64xf32>, vector<7x64xf32>, vector<7x64xf32>, vector<7x64xf32>, vector<7x64xf32> -> vector<7x576xf32>
    %441 = arith.truncf %440 : vector<7x576xf32> to vector<7x576xbf16>
    %cst_480 = arith.constant dense<0.000000e+00> : vector<7x64xf32>
    %442 = tpu.matmul %441, %246, %cst_480 {dimension_numbers = #tpu.dot_dimension_numbers<[1], [0], [0], [1], [0, 0, 1, 1], [], []>} : vector<7x576xbf16>, vector<576x64xbf16>, vector<7x64xf32> -> vector<7x64xf32>
    %443 = vector.broadcast %247 : vector<1x64xf32> to vector<7x64xf32>
    %444 = arith.addf %442, %443 : vector<7x64xf32>
    %cst_481 = arith.constant 0.000000e+00 : f32
    %445 = vector.broadcast %cst_481 : f32 to vector<7x64xf32>
    %446 = arith.maximumf %444, %445 : vector<7x64xf32>
    %447 = arith.truncf %446 : vector<7x64xf32> to vector<7x64xbf16>
    %c0_482 = arith.constant 0 : index
    %c42 = arith.constant 42 : index
    %c0_483 = arith.constant 0 : index
    %448 = vector.load %arg8[%c0_482, %c42, %c0_483] : memref<1x49x64xbf16, #tpu.memory_space<vmem>>, vector<1x7x64xbf16>
    %449 = vector.shape_cast %448 : vector<1x7x64xbf16> to vector<7x64xbf16>
    %450 = vector.shape_cast %447 : vector<7x64xbf16> to vector<1x7x64xbf16>
    tpu.vector_store %arg8[%c0_482, %c42, %c0_483], %450 {strides = array<i32>} : memref<1x49x64xbf16, #tpu.memory_space<vmem>>, vector<1x7x64xbf16>,
    return
  }
  func.func @transform_0(%arg0: i32) -> (i32, i32, i32) {
    %c0_i32 = arith.constant 0 : i32
    %c0_i32_0 = arith.constant 0 : i32
    %c0_i32_1 = arith.constant 0 : i32
    return %arg0, %c0_i32, %c0_i32_0 : i32, i32, i32
  }
  func.func @transform_1(%arg0: i32) -> (i32, i32) {
    %c0_i32 = arith.constant 0 : i32
    %c0_i32_0 = arith.constant 0 : i32
    %c0_i32_1 = arith.constant 0 : i32
    return %c0_i32, %c0_i32_0 : i32, i32
  }
  func.func @transform_2(%arg0: i32) -> (i32, i32) {
    %c0_i32 = arith.constant 0 : i32
    %c0_i32_0 = arith.constant 0 : i32
    %c0_i32_1 = arith.constant 0 : i32
    return %c0_i32, %c0_i32_0 : i32, i32
  }
  func.func @transform_3(%arg0: i32) -> (i32, i32) {
    %c0_i32 = arith.constant 0 : i32
    %c0_i32_0 = arith.constant 0 : i32
    %c0_i32_1 = arith.constant 0 : i32
    return %c0_i32, %c0_i32_0 : i32, i32
  }
  func.func @transform_4(%arg0: i32) -> (i32, i32) {
    %c0_i32 = arith.constant 0 : i32
    %c0_i32_0 = arith.constant 0 : i32
    %c0_i32_1 = arith.constant 0 : i32
    return %c0_i32, %c0_i32_0 : i32, i32
  }
  func.func @transform_5(%arg0: i32) -> (i32, i32) {
    %c0_i32 = arith.constant 0 : i32
    %c0_i32_0 = arith.constant 0 : i32
    %c0_i32_1 = arith.constant 0 : i32
    return %c0_i32, %c0_i32_0 : i32, i32
  }
  func.func @transform_6(%arg0: i32) -> (i32, i32) {
    %c0_i32 = arith.constant 0 : i32
    %c0_i32_0 = arith.constant 0 : i32
    %c0_i32_1 = arith.constant 0 : i32
    return %c0_i32, %c0_i32_0 : i32, i32
  }
  func.func @transform_7(%arg0: i32) -> (i32, i32, i32) {
    %c0_i32 = arith.constant 0 : i32
    %c0_i32_0 = arith.constant 0 : i32
    %c0_i32_1 = arith.constant 0 : i32
    return %arg0, %c0_i32, %c0_i32_0 : i32, i32, i32
  }
}

module attributes {stable_mosaic.version = 11 : i64} {
  func.func @_fc_head_kernel(%arg0: i32, %arg1: memref<2x3136xbf16, #tpu.memory_space<vmem>>, %arg2: memref<3136x512xbf16, #tpu.memory_space<vmem>>, %arg3: memref<1x512xf32, #tpu.memory_space<vmem>>, %arg4: memref<512x128xbf16, #tpu.memory_space<vmem>>, %arg5: memref<1x128xf32, #tpu.memory_space<vmem>>, %arg6: memref<2x128xf32, #tpu.memory_space<vmem>>) attributes {dimension_semantics = [#tpu.dimension_semantics<arbitrary>], iteration_bounds = array<i64: 1>, scalar_prefetch = 0 : i64, scratch_operands = 0 : i64, tpu.core_type = #tpu.core_type<tc>, window_params = [{pipeline_mode = #tpu.pipeline_mode<synchronous>, transform_indices = @transform_0, window_bounds = array<i64: 2, 3136>}, {pipeline_mode = #tpu.pipeline_mode<synchronous>, transform_indices = @transform_1, window_bounds = array<i64: 3136, 512>}, {pipeline_mode = #tpu.pipeline_mode<synchronous>, transform_indices = @transform_2, window_bounds = array<i64: 1, 512>}, {pipeline_mode = #tpu.pipeline_mode<synchronous>, transform_indices = @transform_3, window_bounds = array<i64: 512, 128>}, {pipeline_mode = #tpu.pipeline_mode<synchronous>, transform_indices = @transform_4, window_bounds = array<i64: 1, 128>}, {pipeline_mode = #tpu.pipeline_mode<synchronous>, transform_indices = @transform_5, window_bounds = array<i64: 2, 128>}]} {
    %c0 = arith.constant 0 : index
    %c0_0 = arith.constant 0 : index
    %0 = vector.load %arg1[%c0, %c0_0] : memref<2x3136xbf16, #tpu.memory_space<vmem>>, vector<2x3136xbf16>
    %c0_1 = arith.constant 0 : index
    %c0_2 = arith.constant 0 : index
    %1 = vector.load %arg2[%c0_1, %c0_2] : memref<3136x512xbf16, #tpu.memory_space<vmem>>, vector<3136x512xbf16>
    %cst = arith.constant dense<0.000000e+00> : vector<2x512xf32>
    %2 = tpu.matmul %0, %1, %cst {dimension_numbers = #tpu.dot_dimension_numbers<[1], [0], [0], [1], [0, 0, 1, 1], [], []>} : vector<2x3136xbf16>, vector<3136x512xbf16>, vector<2x512xf32> -> vector<2x512xf32>
    %c0_3 = arith.constant 0 : index
    %c0_4 = arith.constant 0 : index
    %3 = vector.load %arg3[%c0_3, %c0_4] : memref<1x512xf32, #tpu.memory_space<vmem>>, vector<1x512xf32>
    %4 = vector.broadcast %3 : vector<1x512xf32> to vector<2x512xf32>
    %5 = arith.addf %2, %4 : vector<2x512xf32>
    %cst_5 = arith.constant 0.000000e+00 : f32
    %6 = vector.broadcast %cst_5 : f32 to vector<2x512xf32>
    %7 = arith.maximumf %5, %6 : vector<2x512xf32>
    %8 = arith.truncf %7 : vector<2x512xf32> to vector<2x512xbf16>
    %c0_6 = arith.constant 0 : index
    %c0_7 = arith.constant 0 : index
    %9 = vector.load %arg4[%c0_6, %c0_7] : memref<512x128xbf16, #tpu.memory_space<vmem>>, vector<512x128xbf16>
    %cst_8 = arith.constant dense<0.000000e+00> : vector<2x128xf32>
    %10 = tpu.matmul %8, %9, %cst_8 {dimension_numbers = #tpu.dot_dimension_numbers<[1], [0], [0], [1], [0, 0, 1, 1], [], []>} : vector<2x512xbf16>, vector<512x128xbf16>, vector<2x128xf32> -> vector<2x128xf32>
    %c0_9 = arith.constant 0 : index
    %c0_10 = arith.constant 0 : index
    %11 = vector.load %arg5[%c0_9, %c0_10] : memref<1x128xf32, #tpu.memory_space<vmem>>, vector<1x128xf32>
    %12 = vector.broadcast %11 : vector<1x128xf32> to vector<2x128xf32>
    %13 = arith.addf %10, %12 : vector<2x128xf32>
    %c0_11 = arith.constant 0 : index
    %c0_12 = arith.constant 0 : index
    %14 = vector.load %arg6[%c0_11, %c0_12] : memref<2x128xf32, #tpu.memory_space<vmem>>, vector<2x128xf32>
    tpu.vector_store %arg6[%c0_11, %c0_12], %13 {strides = array<i32>} : memref<2x128xf32, #tpu.memory_space<vmem>>, vector<2x128xf32>,
    return
  }
  func.func @transform_0(%arg0: i32) -> (i32, i32) {
    %c0_i32 = arith.constant 0 : i32
    %c0_i32_0 = arith.constant 0 : i32
    %c0_i32_1 = arith.constant 0 : i32
    return %c0_i32, %c0_i32_0 : i32, i32
  }
  func.func @transform_1(%arg0: i32) -> (i32, i32) {
    %c0_i32 = arith.constant 0 : i32
    %c0_i32_0 = arith.constant 0 : i32
    %c0_i32_1 = arith.constant 0 : i32
    return %c0_i32, %c0_i32_0 : i32, i32
  }
  func.func @transform_2(%arg0: i32) -> (i32, i32) {
    %c0_i32 = arith.constant 0 : i32
    %c0_i32_0 = arith.constant 0 : i32
    %c0_i32_1 = arith.constant 0 : i32
    return %c0_i32, %c0_i32_0 : i32, i32
  }
  func.func @transform_3(%arg0: i32) -> (i32, i32) {
    %c0_i32 = arith.constant 0 : i32
    %c0_i32_0 = arith.constant 0 : i32
    %c0_i32_1 = arith.constant 0 : i32
    return %c0_i32, %c0_i32_0 : i32, i32
  }
  func.func @transform_4(%arg0: i32) -> (i32, i32) {
    %c0_i32 = arith.constant 0 : i32
    %c0_i32_0 = arith.constant 0 : i32
    %c0_i32_1 = arith.constant 0 : i32
    return %c0_i32, %c0_i32_0 : i32, i32
  }
  func.func @transform_5(%arg0: i32) -> (i32, i32) {
    %c0_i32 = arith.constant 0 : i32
    %c0_i32_0 = arith.constant 0 : i32
    %c0_i32_1 = arith.constant 0 : i32
    return %c0_i32, %c0_i32_0 : i32, i32
  }
}

</mosaic_0001>

<bundles_post_ra>
// kernel: dqn_forward.2
= control target key start
LH: loop header
LB: loop body
LE: loop exit
PB: predicated region body
PF: predicated region fallthrough
CT: control target
= control target key end

     0   :  { %s6993_s24 = smov 0   ;;  %s9478_s0 = inlined_call_operand.vmem [shape: bf16[2,400,256], index: 0, kind: input, shape index: {}]   ;;  %s9479_s1 = inlined_call_operand.vmem [shape: bf16[256,32], index: 1, kind: input, shape index: {}]   ;;  %s9480_s2 = inlined_call_operand.vmem [shape: f32[1,32], index: 2, kind: input, shape index: {}]   ;;  %s9481_s3 = inlined_call_operand.vmem [shape: bf16[512,64], index: 3, kind: input, shape index: {}]   ;;  %s9482_s4 = inlined_call_operand.vmem [shape: f32[1,64], index: 4, kind: input, shape index: {}]   ;;  %s9483_s5 = inlined_call_operand.vmem [shape: bf16[576,64], index: 5, kind: input, shape index: {}]   ;;  %s9484_s6 = inlined_call_operand.vmem [shape: f32[1,64], index: 6, kind: input, shape index: {}]   ;;  %s9485_s7 = inlined_call_operand.vmem [shape: bf16[2,49,64], index: 7, kind: output, shape index: {}]  }
   0x1 LB: > { %s5080_s25 = sadd.s32 4294967295, %s6945_s24   ;;  %p5084_p0 = scmp.ge.s32.totalorder %s6945_s24, 1  ;;  %s6945_s24 = sphi %s6993_s24, %s17_s24  }
   0x2   : > { %p237_p1 = scmp.lt.s32.totalorder %s6945_s24, 3 }
   0x4   : > { %p238_p2 = pnand %p5084_p0, %p237_p1 }
   0x6   : > { %241 = sbr.rel (%p238_p2) target bundleno = 1590 (0x636), region = 48 }
   0xd   : > { %v6694_v0 = vld [vmem:[%s9479_s1] sm:$0xff]   ;;  %v6947_v1 = vmov 0   ;;  %v6695_v2 = vld [vmem:[%s9479_s1 + $0x8] sm:$0xff]   ;;  %p269_p3 = scmp.lt.s32.totalorder %s5080_s25, 1  ;;  %v6696_v3 = vld [vmem:[%s9479_s1 + $0x10] sm:$0xff]   ;;  %vm998_vm0 = vcmask 261120  }
   0xe   : > { %715 = vmatprep.subr.bf16.mxu0 %v6947_v1  ;;  %v6697_v4 = vld [vmem:[%s9479_s1 + $0x18] sm:$0xff]   ;;  %v6698_v5 = vld [vmem:[%s9479_s1 + $0x20] sm:$0xff]   ;;  %v6699_v7 = vld [vmem:[%s9479_s1 + $0x28] sm:$0xff]   ;;  %s6949_s21 = smov 32   ;;  %s6950_s22 = smov 96   ;;  %vm1244_vm1 = vcmask 523264  }
   0xf   : > { %716 = vmatpush1.bf16.msra.mxu0 %v6694_v0  ;;  %s9617_s25 = smov (!%p269_p3, %s5080_s25), 1  ;;  %v6700_v8 = vld [vmem:[%s9479_s1 + $0x30] sm:$0xff]   ;;  %v6701_v9 = vld [vmem:[%s9479_s1 + $0x38] sm:$0xff]   ;;  %v6702_v10 = vld [vmem:[%s9479_s1 + $0x40] sm:$0xff]   ;;  %vm1247_vm2 = vcmask 785408   ;;  %vm1555_vm3 = vcmask 516096  }
  0x10   : > { %717 = vmatprep.subr.bf16.mxu0 %v6947_v1  ;;  %s6068_s11 = smul.u32 400, %s9617_s25  ;;  %v6703_v11 = vld [vmem:[%s9479_s1 + $0x48] sm:$0xff]   ;;  %v6704_v12 = vld [vmem:[%s9479_s1 + $0x50] sm:$0xff]   ;;  %v6705_v13 = vld [vmem:[%s9479_s1 + $0x58] sm:$0xff]   ;;  %vm6952_vm4 = vmmov 0   ;;  %vm3955_vm5 = vcmask 519168  }
  0x11   : > { %v6706_v14 = vld [vmem:[%s9479_s1 + $0x60] sm:$0xff]   ;;  %v6707_v15 = vld [vmem:[%s9479_s1 + $0x68] sm:$0xff]   ;;  %v6708_v16 = vld [vmem:[%s9479_s1 + $0x70] sm:$0xff]   ;;  %s6069_s19 = smul.u32 28, %s9617_s25  ;;  %vm3956_vm6 = vsmask.f32 3328 }
  0x12   : > { %s7022_s16 = scalar_lea.vmem %s9478_s0, %s6068_s11  ;;  %v6709_v17 = vld [vmem:[%s9479_s1 + $0x78] sm:$0xff]   ;;  %vm3957_vm7 = vmand %vm3955_vm5, %vm3956_vm6  ;;  %vm4134_vm8 = vcmask 519171   ;;  %vm4135_vm9 = vsmask.f32 7950  ;;  %vm4140_vm11 = vcmask 518144   ;;  %vm4489_vm14 = vcmask 519170  }
  0x13   : > { %718 = vmatpush1.bf16.msra.mxu0 %v6695_v2  ;;  %v6712_v6 = vld [vmem:[%s7022_s16 + $0x4] ss:$8 sps:$4 sm:$0xff]   ;;  %v6710_v18 = vld [vmem:[%s7022_s16] ss:$8 sps:$4 sm:$0xff]   ;;  %v6713_v19 = vld [vmem:[%s7022_s16 + $0x14] ss:$8 sps:$4 sm:$0xff]   ;;  %s9346_s28 = scalar_lea.vmem %s9485_s7, %s6069_s19 }
  0x14   : > { %719 = vmatprep.subr.bf16.mxu0 %v6947_v1  ;;  %747 = vmatprep.mubr.bf16.mxu0 %v6712_v6  ;;  %v6715_v20 = vld [vmem:[%s7022_s16 + $0x10] ss:$8 sps:$4 sm:$0xff]   ;;  %v6716_v21 = vld [vmem:[%s7022_s16 + $0x24] ss:$8 sps:$4 sm:$0xff]   ;;  %v6718_v22 = vld [vmem:[%s7022_s16 + $0x20] ss:$8 sps:$4 sm:$0xff]  }
  0x15   : > { %v6719_v23 = vld [vmem:[%s7022_s16 + $0x34] ss:$8 sps:$4 sm:$0xff]   ;;  %v6721_v24 = vld [vmem:[%s7022_s16 + $0x30] ss:$8 sps:$4 sm:$0xff]   ;;  %v6722_v25 = vld [vmem:[%s7022_s16 + $0x44] ss:$8 sps:$4 sm:$0xff]  }
  0x16   : > { %v6724_v26 = vld [vmem:[%s7022_s16 + $0x40] ss:$8 sps:$4 sm:$0xff]   ;;  %v6725_v27 = vld [vmem:[%s7022_s16 + $0x54] ss:$8 sps:$4 sm:$0xff]   ;;  %v6727_v28 = vld [vmem:[%s7022_s16 + $0x50] ss:$8 sps:$4 sm:$0xff]  }
  0x17   : > { %720 = vmatpush1.bf16.msra.mxu0 %v6696_v3  ;;  %v6728_v29 = vld [vmem:[%s7022_s16 + $0x64] ss:$8 sps:$4 sm:$0xff]   ;;  %v6730_v30 = vld [vmem:[%s7022_s16 + $0x60] ss:$8 sps:$4 sm:$0xff]   ;;  %v6731_v31 = vld [vmem:[%s7022_s16 + $0x74] ss:$8 sps:$4 sm:$0xff]  }
  0x18   : > { %721 = vmatprep.subr.bf16.mxu0 %v6947_v1  ;;  %v6733_v32 = vld [vmem:[%s7022_s16 + $0x70] ss:$8 sps:$4 sm:$0xff]   ;;  %v6734_v33 = vld [vmem:[%s7022_s16 + $0x84] ss:$8 sps:$4 sm:$0xff]   ;;  %v6736_v34 = vld [vmem:[%s7022_s16 + $0x80] ss:$8 sps:$4 sm:$0xff]  }
  0x19   : > { %v6737_v35 = vld [vmem:[%s7022_s16 + $0x94] ss:$8 sps:$4 sm:$0xff]   ;;  %v6739_v36 = vld [vmem:[%s7022_s16 + $0x90] ss:$8 sps:$4 sm:$0xff]   ;;  %v6740_v37 = vld [vmem:[%s7022_s16 + $0xa4] ss:$8 sps:$4 sm:$0xff]  }
  0x1a   : > { %v6742_v38 = vld [vmem:[%s7022_s16 + $0xa0] ss:$8 sps:$4 sm:$0xff]   ;;  %v6743_v39 = vld [vmem:[%s7022_s16 + $0xb4] ss:$8 sps:$4 sm:$0xff]   ;;  %v6745_v40 = vld [vmem:[%s7022_s16 + $0xb0] ss:$8 sps:$4 sm:$0xff]  }
  0x1b   : > { %722 = vmatpush1.bf16.msra.mxu0 %v6697_v4  ;;  %v6746_v41 = vld [vmem:[%s7022_s16 + $0xc4] ss:$8 sps:$4 sm:$0xff]   ;;  %v6748_v42 = vld [vmem:[%s7022_s16 + $0xc0] ss:$8 sps:$4 sm:$0xff]   ;;  %v6749_v43 = vld [vmem:[%s7022_s16 + $0xd4] ss:$8 sps:$4 sm:$0xff]  }
  0x1c   : > { %723 = vmatprep.subr.bf16.mxu0 %v6947_v1  ;;  %v6751_v44 = vld [vmem:[%s7022_s16 + $0xd0] ss:$8 sps:$4 sm:$0xff]   ;;  %v6752_v45 = vld [vmem:[%s7022_s16 + $0xe4] ss:$8 sps:$4 sm:$0xff]   ;;  %v6754_v46 = vld [vmem:[%s7022_s16 + $0xe0] ss:$8 sps:$4 sm:$0xff]  }
  0x1d   : > { %v6755_v47 = vld [vmem:[%s7022_s16 + $0xf4] ss:$8 sps:$4 sm:$0xff]   ;;  %v6757_v48 = vld [vmem:[%s7022_s16 + $0xf0] ss:$8 sps:$4 sm:$0xff]   ;;  %v6758_v49 = vld [vmem:[%s7022_s16 + $0x104] ss:$8 sps:$4 sm:$0xff]  }
  0x1e   : > { %v6760_v50 = vld [vmem:[%s7022_s16 + $0x100] ss:$8 sps:$4 sm:$0xff]   ;;  %v6761_v51 = vld [vmem:[%s7022_s16 + $0x114] ss:$8 sps:$4 sm:$0xff]   ;;  %v6763_v52 = vld [vmem:[%s7022_s16 + $0x110] ss:$8 sps:$4 sm:$0xff]  }
  0x1f   : > { %724 = vmatpush1.bf16.msra.mxu0 %v6698_v5  ;;  %v6764_v53 = vld [vmem:[%s7022_s16 + $0x124] ss:$8 sps:$4 sm:$0xff]   ;;  %v6766_v54 = vld [vmem:[%s7022_s16 + $0x120] ss:$8 sps:$4 sm:$0xff]   ;;  %v6767_v55 = vld [vmem:[%s7022_s16 + $0x134] ss:$8 sps:$4 sm:$0xff]  }
  0x20   : > { %725 = vmatprep.subr.bf16.mxu0 %v6947_v1  ;;  %v6769_v56 = vld [vmem:[%s7022_s16 + $0x130] ss:$8 sps:$4 sm:$0xff]   ;;  %v6770_v57 = vld [vmem:[%s7022_s16 + $0x144] ss:$8 sps:$4 sm:$0xff]   ;;  %v6772_v58 = vld [vmem:[%s7022_s16 + $0x140] ss:$8 sps:$4 sm:$0xff]  }
  0x21   : > { %v6773_v59 = vld [vmem:[%s7022_s16 + $0x154] ss:$8 sps:$4 sm:$0xff]   ;;  %v6775_v60 = vld [vmem:[%s7022_s16 + $0x150] ss:$8 sps:$4 sm:$0xff]   ;;  %v6776_v61 = vld [vmem:[%s7022_s16 + $0x164] ss:$8 sps:$4 sm:$0xff]  }
  0x22   : > { %v6778_v62 = vld [vmem:[%s7022_s16 + $0x160] ss:$8 sps:$4 sm:$0xff]   ;;  %v6779_v63 = vld [vmem:[%s7022_s16 + $0x174] ss:$8 sps:$4 sm:$0xff]   ;;  %v6781_v0 = vld [vmem:[%s7022_s16 + $0x170] ss:$8 sps:$4 sm:$0xff]  }
  0x23   : > { %726 = vmatpush1.bf16.msra.mxu0 %v6699_v7  ;;  %v6784_v2 = vld [vmem:[%s7022_s16 + $0x180] ss:$8 sps:$4 sm:$0xff]   ;;  %vm4136_vm10 = vmand %vm4134_vm8, %vm4135_vm9  ;;  %vm4311_vm12 = vsmask.f32 2304  ;;  %vm4490_vm15 = vsmask.f32 7946 }
  0x24   : > { %727 = vmatprep.subr.bf16.mxu0 %v6947_v1  ;;  %v7110_v3 = vld [vmem:[%s9480_s2] ss:$0 sm:$0xff]  ;;  %vm4312_vm13 = vmand %vm4140_vm11, %vm4311_vm12  ;;  %vm4844_vm5 = vcmask 519169   ;;  %vm4845_vm6 = vsmask.f32 7942 }
  0x27   : > { %728 = vmatpush1.bf16.msra.mxu0 %v6700_v8 }
  0x28   : > { %729 = vmatprep.subr.bf16.mxu0 %v6947_v1 }
  0x2b   : > { %730 = vmatpush1.bf16.msra.mxu0 %v6701_v9 }
  0x2c   : > { %731 = vmatprep.subr.bf16.mxu0 %v6947_v1 }
  0x2f   : > { %732 = vmatpush1.bf16.msra.mxu0 %v6702_v10 }
  0x30   : > { %733 = vmatprep.subr.bf16.mxu0 %v6947_v1 }
  0x33   : > { %734 = vmatpush1.bf16.msra.mxu0 %v6703_v11 }
  0x34   : > { %735 = vmatprep.subr.bf16.mxu0 %v6947_v1 }
  0x37   : > { %736 = vmatpush1.bf16.msra.mxu0 %v6704_v12 }
  0x38   : > { %737 = vmatprep.subr.bf16.mxu0 %v6947_v1 }
  0x3b   : > { %738 = vmatpush1.bf16.msra.mxu0 %v6705_v13 }
  0x3c   : > { %739 = vmatprep.subr.bf16.mxu0 %v6947_v1 }
  0x3f   : > { %740 = vmatpush1.bf16.msra.mxu0 %v6706_v14 }
  0x40   : > { %741 = vmatprep.subr.bf16.mxu0 %v6947_v1 }
  0x43   : > { %742 = vmatpush1.bf16.msra.mxu0 %v6707_v15 }
  0x44   : > { %743 = vmatprep.subr.bf16.mxu0 %v6947_v1 }
  0x47   : > { %744 = vmatpush1.bf16.msra.mxu0 %v6708_v16 }
  0x48   : > { %745 = vmatprep.subr.bf16.mxu0 %v6947_v1  ;;  %v6782_v1 = vld [vmem:[%s7022_s16 + $0x184] ss:$8 sps:$4 sm:$0xff]   ;;  %s6948_s16 = smov 64  }
  0x4b   : > { %746 = vmatpush1.bf16.msra.mxu0 %v6709_v17 }
  0x4e   : > { %748 = vmatmul.mubr.bf16.vlgmr.msra.gmra.mrb[0].mxu0 %v6710_v18 }
  0x4f   : > { %755 = vmatprep.mubr.bf16.mxu0 %v6713_v19 }
  0x56   : > { %756 = vmatmul.mubr.bf16.gmra.mrb[4].mxu0 %v6715_v20 }
  0x57   : > { %763 = vmatprep.mubr.bf16.mxu0 %v6716_v21 }
  0x5e   : > { %764 = vmatmul.mubr.bf16.gmra.mrb[8].mxu0 %v6718_v22 }
  0x5f   : > { %771 = vmatprep.mubr.bf16.mxu0 %v6719_v23 }
  0x66   : > { %772 = vmatmul.mubr.bf16.gmra.mrb[12].mxu0 %v6721_v24 }
  0x67   : > { %779 = vmatprep.mubr.bf16.mxu0 %v6722_v25 }
  0x6e   : > { %780 = vmatmul.mubr.bf16.gmra.mrb[16].mxu0 %v6724_v26 }
  0x6f   : > { %787 = vmatprep.mubr.bf16.mxu0 %v6725_v27 }
  0x76   : > { %788 = vmatmul.mubr.bf16.gmra.mrb[20].mxu0 %v6727_v28 }
  0x77   : > { %795 = vmatprep.mubr.bf16.mxu0 %v6728_v29 }
  0x7e   : > { %796 = vmatmul.mubr.bf16.gmra.mrb[24].mxu0 %v6730_v30 }
  0x7f   : > { %803 = vmatprep.mubr.bf16.mxu0 %v6731_v31 }
  0x86   : > { %804 = vmatmul.mubr.bf16.gmra.mrb[28].mxu0 %v6733_v32 }
  0x87   : > { %811 = vmatprep.mubr.bf16.mxu0 %v6734_v33 }
  0x8e   : > { %812 = vmatmul.mubr.bf16.gmra.mrb[32].mxu0 %v6736_v34 }
  0x8f   : > { %819 = vmatprep.mubr.bf16.mxu0 %v6737_v35 }
  0x96   : > { %820 = vmatmul.mubr.bf16.gmra.mrb[36].mxu0 %v6739_v36 }
  0x97   : > { %827 = vmatprep.mubr.bf16.mxu0 %v6740_v37 }
  0x9e   : > { %828 = vmatmul.mubr.bf16.gmra.mrb[40].mxu0 %v6742_v38 }
  0x9f   : > { %835 = vmatprep.mubr.bf16.mxu0 %v6743_v39 }
  0xa6   : > { %836 = vmatmul.mubr.bf16.gmra.mrb[44].mxu0 %v6745_v40 }
  0xa7   : > { %843 = vmatprep.mubr.bf16.mxu0 %v6746_v41 }
  0xae   : > { %844 = vmatmul.mubr.bf16.gmra.mrb[48].mxu0 %v6748_v42 }
  0xaf   : > { %851 = vmatprep.mubr.bf16.mxu0 %v6749_v43 }
  0xb6   : > { %852 = vmatmul.mubr.bf16.gmra.mrb[52].mxu0 %v6751_v44 }
  0xb7   : > { %859 = vmatprep.mubr.bf16.mxu0 %v6752_v45 }
  0xbe   : > { %860 = vmatmul.mubr.bf16.gmra.mrb[56].mxu0 %v6754_v46 }
  0xbf   : > { %867 = vmatprep.mubr.bf16.mxu0 %v6755_v47 }
  0xc6   : > { %868 = vmatmul.mubr.bf16.gmra.mrb[60].mxu0 %v6757_v48 }
  0xc7   : > { %875 = vmatprep.mubr.bf16.mxu0 %v6758_v49 }
  0xce   : > { %876 = vmatmul.mubr.bf16.gmra.mrb[64].mxu0 %v6760_v50 }
  0xcf   : > { %883 = vmatprep.mubr.bf16.mxu0 %v6761_v51 }
  0xd6   : > { %884 = vmatmul.mubr.bf16.gmra.mrb[68].mxu0 %v6763_v52 }
  0xd7   : > { %891 = vmatprep.mubr.bf16.mxu0 %v6764_v53 }
  0xde   : > { %892 = vmatmul.mubr.bf16.gmra.mrb[72].mxu0 %v6766_v54 }
  0xdf   : > { %899 = vmatprep.mubr.bf16.mxu0 %v6767_v55 }
  0xe6   : > { %900 = vmatmul.mubr.bf16.gmra.mrb[76].mxu0 %v6769_v56 }
  0xe7   : > { %907 = vmatprep.mubr.bf16.mxu0 %v6770_v57 }
  0xee   : > { %908 = vmatmul.mubr.bf16.gmra.mrb[80].mxu0 %v6772_v58 }
  0xef   : > { %915 = vmatprep.mubr.bf16.mxu0 %v6773_v59 }
  0xf6   : > { %916 = vmatmul.mubr.bf16.gmra.mrb[84].mxu0 %v6775_v60 }
  0xf7   : > { %923 = vmatprep.mubr.bf16.mxu0 %v6776_v61 }
  0xfe   : > { %924 = vmatmul.mubr.bf16.gmra.mrb[88].mxu0 %v6778_v62 }
  0xff   : > { %931 = vmatprep.mubr.bf16.mxu0 %v6779_v63 }
 0x106   : > { %932 = vmatmul.mubr.bf16.gmra.mrb[92].mxu0 %v6781_v0 }
 0x107   : > { %939 = vmatprep.mubr.bf16.mxu0 %v6782_v1 }
 0x10e   : > { %940 = vmatmul.mubr.bf16.gmra.mrb[96].mxu0 %v6784_v2 }
 0x121   : > { %v749_v4 = vpop.f32.mrb[0].mxu0 }
 0x122   : > { %v750_v5 = vadd.f32 %v7110_v3, %v749_v4  ;;  %v751_v6 = vpop.f32.mrb[1].mxu0 }
 0x123   : > { %v752_v7 = vpop.f32.mrb[2].mxu0 }
 0x124   : > { %v948_v8 = vmax.f32 %v750_v5, 0.0  ;;  %v753_v9 = vadd.f32 %v7110_v3, %v752_v7  ;;  %v754_v10 = vpop.f32.mrb[3].mxu0 }
 0x126   : > { %999 = vst.msk [vmem:[#allocation2] sm:$0xff] %vm998_vm0, %v948_v8  ;;  %v949_v11 = vmax.f32 %v753_v9, 0.0 }
 0x128   : > { %1000 = vst.msk [vmem:[#allocation2 + $0x8] sm:$0xff] %vm998_vm0, %v949_v11 }
 0x129   : > { %v757_v12 = vpop.f32.mrb[4].mxu0 }
 0x12a   : > { %v758_v13 = vadd.f32 %v7110_v3, %v757_v12  ;;  %v759_v14 = vpop.f32.mrb[5].mxu0 }
 0x12b   : > { %v760_v15 = vpop.f32.mrb[6].mxu0 }
 0x12c   : > { %v950_v16 = vmax.f32 %v758_v13, 0.0  ;;  %v761_v17 = vadd.f32 %v7110_v3, %v760_v15  ;;  %v762_v18 = vpop.f32.mrb[7].mxu0 }
 0x12e   : > { %1001 = vst.msk [vmem:[#allocation2 + $0x10] sm:$0xff] %vm998_vm0, %v950_v16  ;;  %v951_v19 = vmax.f32 %v761_v17, 0.0 }
 0x12f   : > { %v1118_v20 = vld [vmem:[#allocation2 + $0x1] sm:$0xff]  ;;  %v1119_v21 = vld [vmem:[#allocation2 + $0x9] sm:$0x1] }
 0x130   : > { %1002 = vst.msk [vmem:[#allocation2 + $0x18] sm:$0xff] %vm998_vm0, %v951_v19  ;;  %v6084_v22 = vpack.i.bf16 %v1119_v21, %v1118_v20 }
 0x131   : > { %v765_v23 = vpop.f32.mrb[8].mxu0 }
 0x132   : > { %v766_v24 = vadd.f32 %v7110_v3, %v765_v23  ;;  %v767_v25 = vpop.f32.mrb[9].mxu0  ;;  %6085 = vrot.lane.b32.xlu1 %v6084_v22, %s6948_s16 }
 0x133   : > { %v768_v26 = vpop.f32.mrb[10].mxu0 }
 0x134   : > { %v952_v27 = vmax.f32 %v766_v24, 0.0  ;;  %v769_v28 = vadd.f32 %v7110_v3, %v768_v26  ;;  %v770_v29 = vpop.f32.mrb[11].mxu0 }
 0x136   : > { %1003 = vst.msk [vmem:[#allocation2 + $0x20] sm:$0xff] %vm998_vm0, %v952_v27  ;;  %v953_v30 = vmax.f32 %v769_v28, 0.0 }
 0x138   : > { %1004 = vst.msk [vmem:[#allocation2 + $0x28] sm:$0xff] %vm998_vm0, %v953_v30 }
 0x139   : > { %v773_v31 = vpop.f32.mrb[12].mxu0 }
 0x13a   : > { %v774_v32 = vadd.f32 %v7110_v3, %v773_v31  ;;  %v775_v33 = vpop.f32.mrb[13].mxu0 }
 0x13b   : > { %v776_v34 = vpop.f32.mrb[14].mxu0 }
 0x13c   : > { %v954_v35 = vmax.f32 %v774_v32, 0.0  ;;  %v777_v36 = vadd.f32 %v7110_v3, %v776_v34  ;;  %v778_v37 = vpop.f32.mrb[15].mxu0 }
 0x13e   : > { %1005 = vst.msk [vmem:[#allocation2 + $0x30] sm:$0xff] %vm998_vm0, %v954_v35  ;;  %v955_v38 = vmax.f32 %v777_v36, 0.0 }
 0x140   : > { %1006 = vst.msk [vmem:[#allocation2 + $0x38] sm:$0xff] %vm998_vm0, %v955_v38 }
 0x141   : > { %v781_v39 = vpop.f32.mrb[16].mxu0 }
 0x142   : > { %v782_v40 = vadd.f32 %v7110_v3, %v781_v39  ;;  %v783_v41 = vpop.f32.mrb[17].mxu0 }
 0x143   : > { %v784_v42 = vpop.f32.mrb[18].mxu0 }
 0x144   : > { %v956_v43 = vmax.f32 %v782_v40, 0.0  ;;  %v785_v44 = vadd.f32 %v7110_v3, %v784_v42  ;;  %v786_v45 = vpop.f32.mrb[19].mxu0 }
 0x146   : > { %1007 = vst.msk [vmem:[#allocation2 + $0x40] sm:$0xff] %vm998_vm0, %v956_v43  ;;  %v957_v46 = vmax.f32 %v785_v44, 0.0 }
 0x148   : > { %1008 = vst.msk [vmem:[#allocation2 + $0x48] sm:$0xff] %vm998_vm0, %v957_v46 }
 0x149   : > { %v789_v47 = vpop.f32.mrb[20].mxu0 }
 0x14a   : > { %v790_v48 = vadd.f32 %v7110_v3, %v789_v47  ;;  %v791_v49 = vpop.f32.mrb[21].mxu0 }
 0x14b   : > { %v792_v50 = vpop.f32.mrb[22].mxu0 }
 0x14c   : > { %v958_v51 = vmax.f32 %v790_v48, 0.0  ;;  %v793_v52 = vadd.f32 %v7110_v3, %v792_v50  ;;  %v794_v53 = vpop.f32.mrb[23].mxu0 }
 0x14e   : > { %1009 = vst.msk [vmem:[#allocation2 + $0x50] sm:$0xff] %vm998_vm0, %v958_v51  ;;  %v959_v54 = vmax.f32 %v793_v52, 0.0 }
 0x150   : > { %1010 = vst.msk [vmem:[#allocation2 + $0x58] sm:$0xff] %vm998_vm0, %v959_v54 }
 0x151   : > { %v797_v55 = vpop.f32.mrb[24].mxu0 }
 0x152   : > { %v798_v56 = vadd.f32 %v7110_v3, %v797_v55  ;;  %v799_v57 = vpop.f32.mrb[25].mxu0 }
 0x153   : > { %v800_v58 = vpop.f32.mrb[26].mxu0 }
 0x154   : > { %v960_v59 = vmax.f32 %v798_v56, 0.0  ;;  %v801_v60 = vadd.f32 %v7110_v3, %v800_v58  ;;  %v802_v61 = vpop.f32.mrb[27].mxu0 }
 0x156   : > { %1011 = vst.msk [vmem:[#allocation2 + $0x60] sm:$0xff] %vm998_vm0, %v960_v59  ;;  %v961_v62 = vmax.f32 %v801_v60, 0.0 }
 0x158   : > { %1012 = vst.msk [vmem:[#allocation2 + $0x68] sm:$0xff] %vm998_vm0, %v961_v62 }
 0x159   : > { %v805_v63 = vpop.f32.mrb[28].mxu0 }
 0x15a   : > { %v806_v0 = vadd.f32 %v7110_v3, %v805_v63  ;;  %v807_v1 = vpop.f32.mrb[29].mxu0 }
 0x15b   : > { %v808_v2 = vpop.f32.mrb[30].mxu0 }
 0x15c   : > { %v962_v4 = vmax.f32 %v806_v0, 0.0  ;;  %v809_v5 = vadd.f32 %v7110_v3, %v808_v2  ;;  %v810_v6 = vpop.f32.mrb[31].mxu0 }
 0x15e   : > { %1013 = vst.msk [vmem:[#allocation2 + $0x70] sm:$0xff] %vm998_vm0, %v962_v4  ;;  %v963_v7 = vmax.f32 %v809_v5, 0.0 }
 0x15f   : > { %v1116_v8 = vld [vmem:[#allocation2 + $0x64] sm:$0xff]  ;;  %v1117_v9 = vld [vmem:[#allocation2 + $0x6c] sm:$0x1] }
 0x160   : > { %1014 = vst.msk [vmem:[#allocation2 + $0x78] sm:$0xff] %vm998_vm0, %v963_v7  ;;  %v6089_v10 = vpack.i.bf16 %v1117_v9, %v1116_v8  ;;  %v1120_v7 = vld [vmem:[#allocation2 + $0x65] sm:$0xff]  ;;  %v1121_v8 = vld [vmem:[#allocation2 + $0x6d] sm:$0x1] }
 0x161   : > { %v813_v11 = vpop.f32.mrb[32].mxu0 }
 0x162   : > { %v814_v12 = vadd.f32 %v7110_v3, %v813_v11  ;;  %v815_v13 = vpop.f32.mrb[33].mxu0  ;;  %6090 = vrot.lane.b32.xlu0 %v6089_v10, %s6949_s21 }
 0x163   : > { %v816_v14 = vpop.f32.mrb[34].mxu0 }
 0x164   : > { %v964_v15 = vmax.f32 %v814_v12, 0.0  ;;  %v817_v16 = vadd.f32 %v7110_v3, %v816_v14  ;;  %v818_v17 = vpop.f32.mrb[35].mxu0  ;;  %v6109_v12 = vpack.i.bf16 %v1121_v8, %v1120_v7  ;;  %v7231_v7 = vld [vmem:[#allocation2 + $0x15] sm:$0xff]  ;;  %v1578_v8 = vld [vmem:[#allocation2 + $0x1d] sm:$0x1] }
 0x165   : > { %v1132_v14 = vld [vmem:[#allocation2 + $0x6e] sm:$0xff] }
 0x166   : > { %1015 = vst.msk [vmem:[#allocation2 + $0x80] sm:$0xff] %vm998_vm0, %v964_v15  ;;  %v965_v18 = vmax.f32 %v817_v16, 0.0  ;;  %v1133_v15 = vld [vmem:[#allocation2 + $0x76] sm:$0x1] }
 0x168   : > { %1016 = vst.msk [vmem:[#allocation2 + $0x88] sm:$0xff] %vm998_vm0, %v965_v18 }
 0x169   : > { %v821_v19 = vpop.f32.mrb[36].mxu0 }
 0x16a   : > { %v822_v20 = vadd.f32 %v7110_v3, %v821_v19  ;;  %v823_v21 = vpop.f32.mrb[37].mxu0 }
 0x16b   : > { %v824_v22 = vpop.f32.mrb[38].mxu0  ;;  %v1134_v21 = vld [vmem:[#allocation2 + $0xb] sm:$0xff] }
 0x16c   : > { %v966_v23 = vmax.f32 %v822_v20, 0.0  ;;  %v825_v24 = vadd.f32 %v7110_v3, %v824_v22  ;;  %v826_v25 = vpop.f32.mrb[39].mxu0  ;;  %v6114_v20 = vpack.i.bf16 %v1133_v15, %v1132_v14  ;;  %v1135_v22 = vld [vmem:[#allocation2 + $0x13] sm:$0x1] }
 0x16e   : > { %1017 = vst.msk [vmem:[#allocation2 + $0x90] sm:$0xff] %vm998_vm0, %v966_v23  ;;  %v967_v26 = vmax.f32 %v825_v24, 0.0 }
 0x170   : > { %1018 = vst.msk [vmem:[#allocation2 + $0x98] sm:$0xff] %vm998_vm0, %v967_v26  ;;  %v6124_v26 = vpack.i.bf16 %v1135_v22, %v1134_v21  ;;  %v6798_v22 = vld [vmem:[%s9481_s3 + $0x30] sm:$0xff]  }
 0x171   : > { %v829_v27 = vpop.f32.mrb[40].mxu0 }
 0x172   : > { %v830_v28 = vadd.f32 %v7110_v3, %v829_v27  ;;  %v831_v29 = vpop.f32.mrb[41].mxu0 }
 0x173   : > { %v832_v30 = vpop.f32.mrb[42].mxu0  ;;  %v1137_v29 = vld [vmem:[#allocation2 + $0x77] sm:$0x1] }
 0x174   : > { %v968_v31 = vmax.f32 %v830_v28, 0.0  ;;  %v833_v32 = vadd.f32 %v7110_v3, %v832_v30  ;;  %v834_v33 = vpop.f32.mrb[43].mxu0  ;;  %v1136_v28 = vld [vmem:[#allocation2 + $0x6f] sm:$0xff] }
 0x175   : > { %v7187_v33 = vld [vmem:[%s9481_s3 + $0x40] sm:$0xff]  }
 0x176   : > { %1019 = vst.msk [vmem:[#allocation2 + $0xa0] sm:$0xff] %vm998_vm0, %v968_v31  ;;  %v969_v34 = vmax.f32 %v833_v32, 0.0  ;;  %5245 = vmatprep.subr.bf16.mxu1 %v7187_v33  ;;  %5421 = vmatprep.subr.bf16.mxu0 %v7187_v33 }
 0x178   : > { %1020 = vst.msk [vmem:[#allocation2 + $0xa8] sm:$0xff] %vm998_vm0, %v969_v34  ;;  %v6786_v34 = vld [vmem:[%s9481_s3] sm:$0xff]  }
 0x179   : > { %v837_v35 = vpop.f32.mrb[44].mxu0  ;;  %5246 = vmatpush3.bf16.msra.mxu1 %v6786_v34  ;;  %5422 = vmatpush3.bf16.msra.mxu0 %v6786_v34 }
 0x17a   : > { %v838_v36 = vadd.f32 %v7110_v3, %v837_v35  ;;  %v839_v37 = vpop.f32.mrb[45].mxu0 }
 0x17b   : > { %v840_v38 = vpop.f32.mrb[46].mxu0  ;;  %v1560_v37 = vld [vmem:[#allocation2 + $0x76] sm:$0x1] }
 0x17c   : > { %v970_v39 = vmax.f32 %v838_v36, 0.0  ;;  %v841_v40 = vadd.f32 %v7110_v3, %v840_v38  ;;  %v842_v41 = vpop.f32.mrb[47].mxu0  ;;  %v6139_v36 = vpack.i.bf16 %v1137_v29, %v1136_v28  ;;  %v6787_v38 = vld [vmem:[%s9481_s3 + $0x48] sm:$0xff]  }
 0x17d   : > { %5247 = vmatprep.subr.bf16.mxu1 %v6787_v38  ;;  %5423 = vmatprep.subr.bf16.mxu0 %v6787_v38 }
 0x17e   : > { %1021 = vst.msk [vmem:[#allocation2 + $0xb0] sm:$0xff] %vm998_vm0, %v970_v39  ;;  %v971_v42 = vmax.f32 %v841_v40, 0.0  ;;  %v6788_v40 = vld [vmem:[%s9481_s3 + $0x8] sm:$0xff]  }
 0x17f   : > { %5248 = vmatpush3.bf16.msra.mxu1 %v6788_v40  ;;  %5424 = vmatpush3.bf16.msra.mxu0 %v6788_v40 }
 0x180   : > { %1022 = vst.msk [vmem:[#allocation2 + $0xb8] sm:$0xff] %vm998_vm0, %v971_v42 }
 0x181   : > { %v845_v43 = vpop.f32.mrb[48].mxu0 }
 0x182   : > { %v846_v44 = vadd.f32 %v7110_v3, %v845_v43  ;;  %v847_v45 = vpop.f32.mrb[49].mxu0  ;;  %v6144_v43 = vpack.i.bf16 %v1560_v37, %v1132_v14  ;;  %v6184_v14 = vpack.i.bf16 %v1578_v8, %v7231_v7 }
 0x183   : > { %v848_v46 = vpop.f32.mrb[50].mxu0  ;;  %v1562_v45 = vld [vmem:[#allocation2 + $0x13] sm:$0x1] }
 0x184   : > { %v972_v47 = vmax.f32 %v846_v44, 0.0  ;;  %v849_v48 = vadd.f32 %v7110_v3, %v848_v46  ;;  %v850_v49 = vpop.f32.mrb[51].mxu0 }
 0x185   : > { %v6789_v49 = vld [vmem:[%s9481_s3 + $0x50] sm:$0xff]  }
 0x186   : > { %1023 = vst.msk [vmem:[#allocation2 + $0xc0] sm:$0xff] %vm998_vm0, %v972_v47  ;;  %v973_v50 = vmax.f32 %v849_v48, 0.0  ;;  %5249 = vmatprep.subr.bf16.mxu1 %v6789_v49  ;;  %5425 = vmatprep.subr.bf16.mxu0 %v6789_v49 }
 0x188   : > { %1024 = vst.msk [vmem:[#allocation2 + $0xc8] sm:$0xff] %vm998_vm0, %v973_v50 }
 0x189   : > { %v853_v51 = vpop.f32.mrb[52].mxu0 }
 0x18a   : > { %v854_v52 = vadd.f32 %v7110_v3, %v853_v51  ;;  %v855_v53 = vpop.f32.mrb[53].mxu0  ;;  %v6154_v51 = vpack.i.bf16 %v1562_v45, %v1134_v21  ;;  %v6797_v21 = vld [vmem:[%s9481_s3 + $0x70] sm:$0xff]  }
 0x18b   : > { %v856_v54 = vpop.f32.mrb[54].mxu0  ;;  %v1564_v53 = vld [vmem:[#allocation2 + $0x77] sm:$0x1] }
 0x18c   : > { %v974_v55 = vmax.f32 %v854_v52, 0.0  ;;  %v857_v56 = vadd.f32 %v7110_v3, %v856_v54  ;;  %v858_v57 = vpop.f32.mrb[55].mxu0  ;;  %v6790_v52 = vld [vmem:[%s9481_s3 + $0x10] sm:$0xff]  }
 0x18d   : > { %5250 = vmatpush3.bf16.msra.mxu1 %v6790_v52  ;;  %5426 = vmatpush3.bf16.msra.mxu0 %v6790_v52 }
 0x18e   : > { %1025 = vst.msk [vmem:[#allocation2 + $0xd0] sm:$0xff] %vm998_vm0, %v974_v55  ;;  %v975_v58 = vmax.f32 %v857_v56, 0.0  ;;  %v6791_v55 = vld [vmem:[%s9481_s3 + $0x58] sm:$0xff]  }
 0x18f   : > { %v6792_v56 = vld [vmem:[%s9481_s3 + $0x18] sm:$0xff]   ;;  %5251 = vmatprep.subr.bf16.mxu1 %v6791_v55  ;;  %5427 = vmatprep.subr.bf16.mxu0 %v6791_v55 }
 0x190   : > { %1026 = vst.msk [vmem:[#allocation2 + $0xd8] sm:$0xff] %vm998_vm0, %v975_v58 }
 0x191   : > { %v861_v59 = vpop.f32.mrb[56].mxu0  ;;  %5252 = vmatpush3.bf16.msra.mxu1 %v6792_v56  ;;  %5428 = vmatpush3.bf16.msra.mxu0 %v6792_v56 }
 0x192   : > { %v862_v60 = vadd.f32 %v7110_v3, %v861_v59  ;;  %v863_v61 = vpop.f32.mrb[57].mxu0  ;;  %v6169_v59 = vpack.i.bf16 %v1564_v53, %v1136_v28 }
 0x193   : > { %v864_v62 = vpop.f32.mrb[58].mxu0  ;;  %v1576_v61 = vld [vmem:[#allocation2 + $0x80] sm:$0x1] }
 0x194   : > { %v976_v63 = vmax.f32 %v862_v60, 0.0  ;;  %v865_v0 = vadd.f32 %v7110_v3, %v864_v62  ;;  %v866_v1 = vpop.f32.mrb[59].mxu0 }
 0x195   : > { %v1126_v2 = vld [vmem:[#allocation2 + $0xc9] sm:$0xff]  ;;  %v1127_v4 = vld [vmem:[#allocation2 + $0xd1] sm:$0x1]  ;;  %v1575_v1 = vld [vmem:[#allocation2 + $0x78] sm:$0xff] }
 0x196   : > { %1027 = vst.msk [vmem:[#allocation2 + $0xe0] sm:$0xff] %vm998_vm0, %v976_v63  ;;  %v977_v5 = vmax.f32 %v865_v0, 0.0  ;;  %v6094_v6 = vpack.i.bf16 %v1127_v4, %v1126_v2  ;;  %v6793_v2 = vld [vmem:[%s9481_s3 + $0x60] sm:$0xff]  }
 0x197   : > { %v6794_v4 = vld [vmem:[%s9481_s3 + $0x20] sm:$0xff]   ;;  %5253 = vmatprep.subr.bf16.mxu1 %v6793_v2  ;;  %5429 = vmatprep.subr.bf16.mxu0 %v6793_v2  ;;  %v1142_v53 = vld [vmem:[#allocation2 + $0xd3] sm:$0xff] }
 0x198   : > { %1028 = vst.msk [vmem:[#allocation2 + $0xe8] sm:$0xff] %vm998_vm0, %v977_v5  ;;  %6095 = vrot.lane.b32.xlu1 %v6094_v6, %s6948_s16  ;;  %v6174_v6 = vpack.i.bf16 %v1576_v61, %v1575_v1  ;;  %5254 = vmatpush3.bf16.msra.mxu1 %v6794_v4  ;;  %v1820_v61 = vld [vmem:[#allocation2 + $0x1f] sm:$0xff] }
 0x199   : > { %v869_v9 = vpop.f32.mrb[60].mxu0  ;;  %5430 = vmatpush3.bf16.msra.mxu0 %v6794_v4 }
 0x19a   : > { %v870_v10 = vadd.f32 %v7110_v3, %v869_v9  ;;  %v871_v11 = vpop.f32.mrb[61].mxu0 }
 0x19b   : > { %v872_v13 = vpop.f32.mrb[62].mxu0  ;;  %v6796_v11 = vld [vmem:[%s9481_s3 + $0x28] sm:$0xff]  }
 0x19c   : > { %v978_v16 = vmax.f32 %v870_v10, 0.0  ;;  %v873_v17 = vadd.f32 %v7110_v3, %v872_v13  ;;  %v874_v18 = vpop.f32.mrb[63].mxu0  ;;  %6110 = vrot.lane.b32.xlu1 %v6109_v12, %s6950_s22  ;;  %v6795_v10 = vld [vmem:[%s9481_s3 + $0x68] sm:$0xff]  }
 0x19d   : > { %5255 = vmatprep.subr.bf16.mxu1 %v6795_v10  ;;  %5431 = vmatprep.subr.bf16.mxu0 %v6795_v10 }
 0x19e   : > { %1029 = vst.msk [vmem:[#allocation2 + $0xf0] sm:$0xff] %vm998_vm0, %v978_v16  ;;  %v979_v19 = vmax.f32 %v873_v17, 0.0  ;;  %v7243_v16 = vld [vmem:[#allocation2 + $0x79] sm:$0xff]  ;;  %v1580_v17 = vld [vmem:[#allocation2 + $0x81] sm:$0x1]  ;;  %5256 = vmatpush3.bf16.msra.mxu1 %v6796_v11  ;;  %5432 = vmatpush3.bf16.msra.mxu0 %v6796_v11 }
 0x19f   : > { %5257 = vmatprep.subr.bf16.mxu1 %v6797_v21  ;;  %5433 = vmatprep.subr.bf16.mxu0 %v6797_v21  ;;  %v1823_v11 = vld [vmem:[#allocation2 + $0x8b] sm:$0x1] }
 0x1a0   : > { %1030 = vst.msk [vmem:[#allocation2 + $0xf8] sm:$0xff] %vm998_vm0, %v979_v19  ;;  %6115 = vrot.lane.b32.xlu1 %v6114_v20, %s6949_s21 }
 0x1a1   : > { %v877_v23 = vpop.f32.mrb[64].mxu0 }
 0x1a2   : > { %v878_v24 = vadd.f32 %v7110_v3, %v877_v23  ;;  %v879_v25 = vpop.f32.mrb[65].mxu0  ;;  %5258 = vmatpush3.bf16.msra.mxu1 %v6798_v22  ;;  %5434 = vmatpush3.bf16.msra.mxu0 %v6798_v22 }
 0x1a3   : > { %v880_v27 = vpop.f32.mrb[66].mxu0  ;;  %v1803_v25 = vld [vmem:[#allocation2 + $0x80] sm:$0x1] }
 0x1a4   : > { %v980_v30 = vmax.f32 %v878_v24, 0.0  ;;  %v881_v31 = vadd.f32 %v7110_v3, %v880_v27  ;;  %v882_v32 = vpop.f32.mrb[67].mxu0  ;;  %6125 = vrot.lane.b32.xlu1 %v6124_v26, %s6948_s16  ;;  %v6199_v24 = vpack.i.bf16 %v1580_v17, %v7243_v16  ;;  %v6799_v27 = vld [vmem:[%s9481_s3 + $0x78] sm:$0xff]   ;;  %v6204_v28 = vpack.i.bf16 %v1803_v25, %v1575_v1  ;;  %v1821_v1 = vld [vmem:[#allocation2 + $0x27] sm:$0x1] }
 0x1a5   : > { %v1805_v32 = vld [vmem:[#allocation2 + $0x1d] sm:$0x1]  ;;  %5259 = vmatprep.subr.bf16.mxu1 %v6799_v27  ;;  %5435 = vmatprep.subr.bf16.mxu0 %v6799_v27  ;;  %v2048_v27 = vld [vmem:[#allocation2 + $0x27] sm:$0x1] }
 0x1a6   : > { %1031 = vst.msk [vmem:[#allocation2 + $0x100] sm:$0xff] %vm998_vm0, %v980_v30  ;;  %v981_v35 = vmax.f32 %v881_v31, 0.0  ;;  %v6800_v31 = vld [vmem:[%s9481_s3 + $0x38] sm:$0xff]  }
 0x1a7   : > { %5260 = vmatpush3.bf16.msra.mxu1 %v6800_v31  ;;  %5436 = vmatpush3.bf16.msra.mxu0 %v6800_v31 }
 0x1a8   : > { %1032 = vst.msk [vmem:[#allocation2 + $0x108] sm:$0xff] %vm998_vm0, %v981_v35  ;;  %6140 = vrot.lane.b32.xlu1 %v6139_v36, %s6950_s22  ;;  %5465 = vmatprep.subr.bf16.mxu0 %v7187_v33  ;;  %v1143_v33 = vld [vmem:[#allocation2 + $0xdb] sm:$0x1] }
 0x1a9   : > { %v885_v39 = vpop.f32.mrb[68].mxu0 }
 0x1aa   : > { %v886_v41 = vadd.f32 %v7110_v3, %v885_v39  ;;  %v887_v42 = vpop.f32.mrb[69].mxu0 }
 0x1ab   : > { %v888_v44 = vpop.f32.mrb[70].mxu0 }
 0x1ac   : > { %v982_v46 = vmax.f32 %v886_v41, 0.0  ;;  %v889_v47 = vadd.f32 %v7110_v3, %v888_v44  ;;  %v890_v48 = vpop.f32.mrb[71].mxu0  ;;  %6145 = vrot.lane.b32.xlu1 %v6144_v43, %s6949_s21  ;;  %v6214_v41 = vpack.i.bf16 %v1805_v32, %v7231_v7  ;;  %v6801_v43 = vld [vmem:[%s9481_s3 + $0xc0] sm:$0xff]  }
 0x1ad   : > { %5267 = vmatprep.subr.bf16.mxu1 %v6801_v43 }
 0x1ae   : > { %1033 = vst.msk [vmem:[#allocation2 + $0x110] sm:$0xff] %vm998_vm0, %v982_v46  ;;  %v983_v50 = vmax.f32 %v889_v47, 0.0  ;;  %v1807_v46 = vld [vmem:[#allocation2 + $0x81] sm:$0x1] }
 0x1af   : > { %v6229_v49 = vpack.i.bf16 %v1807_v46, %v7243_v16  ;;  %v2062_v46 = vld [vmem:[#allocation2 + $0x94] sm:$0x1] }
 0x1b0   : > { %1034 = vst.msk [vmem:[#allocation2 + $0x118] sm:$0xff] %vm998_vm0, %v983_v50  ;;  %6155 = vrot.lane.b32.xlu1 %v6154_v51, %s6948_s16  ;;  %v1818_v50 = vld [vmem:[#allocation2 + $0x82] sm:$0xff] }
 0x1b1   : > { %v893_v54 = vpop.f32.mrb[72].mxu0 }
 0x1b2   : > { %v894_v57 = vadd.f32 %v7110_v3, %v893_v54  ;;  %v895_v58 = vpop.f32.mrb[73].mxu0  ;;  %v1819_v54 = vld [vmem:[#allocation2 + $0x8a] sm:$0x1] }
 0x1b3   : > { %v896_v60 = vpop.f32.mrb[74].mxu0 }
 0x1b4   : > { %v984_v62 = vmax.f32 %v894_v57, 0.0  ;;  %v897_v63 = vadd.f32 %v7110_v3, %v896_v60  ;;  %v898_v0 = vpop.f32.mrb[75].mxu0  ;;  %6170 = vrot.lane.b32.xlu1 %v6169_v59, %s6950_s22  ;;  %v6119_v59 = vpack.i.bf16 %v1143_v33, %v1142_v53  ;;  %v6234_v60 = vpack.i.bf16 %v1819_v54, %v1818_v50 }
 0x1b6   : > { %1035 = vst.msk [vmem:[#allocation2 + $0x120] sm:$0xff] %vm998_vm0, %v984_v62  ;;  %v985_v5 = vmax.f32 %v897_v63, 0.0 }
 0x1b8   : > { %1036 = vst.msk [vmem:[#allocation2 + $0x128] sm:$0xff] %vm998_vm0, %v985_v5  ;;  %6175 = vrot.lane.b32.xlu1 %v6174_v6, %s6949_s21  ;;  %v6244_v5 = vpack.i.bf16 %v1821_v1, %v1820_v61  ;;  %v1822_v6 = vld [vmem:[#allocation2 + $0x83] sm:$0xff]  ;;  %v2289_v1 = vld [vmem:[#allocation2 + $0x94] sm:$0x1] }
 0x1b9   : > { %v901_v9 = vpop.f32.mrb[76].mxu0  ;;  %v6259_v17 = vpack.i.bf16 %v1823_v11, %v1822_v6  ;;  %v2305_v11 = vld [vmem:[#allocation2 + $0x9e] sm:$0x1] }
 0x1ba   : > { %v902_v12 = vadd.f32 %v7110_v3, %v901_v9  ;;  %v903_v13 = vpop.f32.mrb[77].mxu0 }
 0x1bb   : > { %v904_v15 = vpop.f32.mrb[78].mxu0 }
 0x1bc   : > { %v986_v18 = vmax.f32 %v902_v12, 0.0  ;;  %v905_v19 = vadd.f32 %v7110_v3, %v904_v15  ;;  %v906_v20 = vpop.f32.mrb[79].mxu0  ;;  %6185 = vrot.lane.b32.xlu1 %v6184_v14, %s6948_s16 }
 0x1bd   : > { %v2046_v20 = vld [vmem:[#allocation2 + $0x8a] sm:$0x1] }
 0x1be   : > { %1037 = vst.msk [vmem:[#allocation2 + $0x130] sm:$0xff] %vm998_vm0, %v986_v18  ;;  %v987_v23 = vmax.f32 %v905_v19, 0.0  ;;  %v1570_v19 = vld [vmem:[#allocation2 + $0xdb] sm:$0x1] }
 0x1bf   : > { %v6149_v22 = vpack.i.bf16 %v1570_v19, %v1142_v53 }
 0x1c0   : > { %1038 = vst.msk [vmem:[#allocation2 + $0x138] sm:$0xff] %vm998_vm0, %v987_v23  ;;  %6200 = vrot.lane.b32.xlu1 %v6199_v24, %s6950_s22  ;;  %v6264_v23 = vpack.i.bf16 %v2046_v20, %v1818_v50 }
 0x1c1   : > { %v909_v26 = vpop.f32.mrb[80].mxu0 }
 0x1c2   : > { %v910_v29 = vadd.f32 %v7110_v3, %v909_v26  ;;  %v911_v30 = vpop.f32.mrb[81].mxu0 }
 0x1c3   : > { %v912_v34 = vpop.f32.mrb[82].mxu0 }
 0x1c4   : > { %6205 = vrot.lane.b32.xlu1 %v6204_v28, %s6949_s21  ;;  %v988_v35 = vmax.f32 %v910_v29, 0.0  ;;  %v913_v36 = vadd.f32 %v7110_v3, %v912_v34  ;;  %v914_v37 = vpop.f32.mrb[83].mxu0  ;;  %v6274_v34 = vpack.i.bf16 %v2048_v27, %v1820_v61  ;;  %v2066_v61 = vld [vmem:[#allocation2 + $0x95] sm:$0x1] }
 0x1c5   : > { %v1124_v38 = vld [vmem:[#allocation2 + $0x12c] sm:$0xff]  ;;  %v1125_v39 = vld [vmem:[#allocation2 + $0x134] sm:$0x1]  ;;  %v1129_v45 = vld [vmem:[#allocation2 + $0x135] sm:$0x1] }
 0x1c6   : > { %v6099_v40 = vpack.i.bf16 %v1125_v39, %v1124_v38  ;;  %1039 = vst.msk [vmem:[#allocation2 + $0x140] sm:$0xff] %vm998_vm0, %v988_v35  ;;  %v989_v42 = vmax.f32 %v913_v36, 0.0  ;;  %v1128_v44 = vld [vmem:[#allocation2 + $0x12d] sm:$0xff]  ;;  %v2050_v37 = vld [vmem:[#allocation2 + $0x8b] sm:$0x1] }
 0x1c7   : > { %v6104_v48 = vpack.i.bf16 %v1129_v45, %v1128_v44  ;;  %v1140_v63 = vld [vmem:[#allocation2 + $0x136] sm:$0xff]  ;;  %v1141_v0 = vld [vmem:[#allocation2 + $0x13e] sm:$0x1]  ;;  %v1145_v10 = vld [vmem:[#allocation2 + $0x13f] sm:$0x1] }
 0x1c8   : > { %6100 = vrot.lane.b32.xlu0 %v6099_v40, %s6949_s21  ;;  %6215 = vrot.lane.b32.xlu1 %v6214_v41, %s6948_s16  ;;  %1040 = vst.msk [vmem:[#allocation2 + $0x148] sm:$0xff] %vm998_vm0, %v989_v42  ;;  %v6129_v4 = vpack.i.bf16 %v1141_v0, %v1140_v63  ;;  %v1144_v9 = vld [vmem:[#allocation2 + $0x137] sm:$0xff]  ;;  %v1572_v36 = vld [vmem:[#allocation2 + $0x13f] sm:$0x1]  ;;  %v6289_v40 = vpack.i.bf16 %v2050_v37, %v1822_v6  ;;  %v2061_v41 = vld [vmem:[#allocation2 + $0x8c] sm:$0xff] }
 0x1c9   : > { %v917_v47 = vpop.f32.mrb[84].mxu0  ;;  %v6134_v16 = vpack.i.bf16 %v1145_v10, %v1144_v9  ;;  %v1568_v26 = vld [vmem:[#allocation2 + $0x13e] sm:$0x1]  ;;  %v6164_v39 = vpack.i.bf16 %v1572_v36, %v1144_v9  ;;  %v1586_v45 = vld [vmem:[#allocation2 + $0xe5] sm:$0x1]  ;;  %v6294_v33 = vpack.i.bf16 %v2062_v46, %v2061_v41  ;;  %v2304_v10 = vld [vmem:[#allocation2 + $0x96] sm:$0xff] }
 0x1ca   : > { %v918_v51 = vadd.f32 %v7110_v3, %v917_v47  ;;  %v919_v52 = vpop.f32.mrb[85].mxu0  ;;  %v6159_v32 = vpack.i.bf16 %v1568_v26, %v1140_v63  ;;  %v1585_v44 = vld [vmem:[#allocation2 + $0xdd] sm:$0xff]  ;;  %v1813_v0 = vld [vmem:[#allocation2 + $0xe5] sm:$0x1]  ;;  %v2291_v6 = vld [vmem:[#allocation2 + $0x31] sm:$0x1] }
 0x1cb   : > { %v920_v55 = vpop.f32.mrb[86].mxu0  ;;  %v6179_v53 = vpack.i.bf16 %v1586_v45, %v1585_v44  ;;  %v2548_v45 = vld [vmem:[#allocation2 + $0xa8] sm:$0x1] }
 0x1cc   : > { %6105 = vrot.lane.b32.xlu0 %v6104_v48, %s6950_s22  ;;  %6230 = vrot.lane.b32.xlu1 %v6229_v49, %s6950_s22  ;;  %v990_v56 = vmax.f32 %v918_v51, 0.0  ;;  %v921_v57 = vadd.f32 %v7110_v3, %v920_v55  ;;  %v922_v58 = vpop.f32.mrb[87].mxu0  ;;  %v2063_v55 = vld [vmem:[#allocation2 + $0x29] sm:$0xff] }
 0x1cd   : > { %v1583_v51 = vld [vmem:[#allocation2 + $0x140] sm:$0xff]  ;;  %v6334_v9 = vpack.i.bf16 %v2291_v6, %v2063_v55 }
 0x1ce   : > { %1041 = vst.msk [vmem:[#allocation2 + $0x150] sm:$0xff] %vm998_vm0, %v990_v56  ;;  %v991_v62 = vmax.f32 %v921_v57, 0.0  ;;  %v2064_v56 = vld [vmem:[#allocation2 + $0x31] sm:$0x1] }
 0x1cf   : > { %v1584_v52 = vld [vmem:[#allocation2 + $0x148] sm:$0x1] }
 0x1d0   : > { %6120 = vrot.lane.b32.xlu0 %v6119_v59, %s6948_s16  ;;  %6235 = vrot.lane.b32.xlu1 %v6234_v60, %s6949_s21  ;;  %1042 = vst.msk [vmem:[#allocation2 + $0x158] sm:$0xff] %vm998_vm0, %v991_v62  ;;  %v6189_v57 = vpack.i.bf16 %v1584_v52, %v1583_v51  ;;  %v1587_v58 = vld [vmem:[#allocation2 + $0x141] sm:$0xff]  ;;  %v1588_v59 = vld [vmem:[#allocation2 + $0x149] sm:$0x1]  ;;  %v7308_v60 = vld [vmem:[#allocation2 + $0x8d] sm:$0xff] }
 0x1d1   : > { %v925_v2 = vpop.f32.mrb[88].mxu0  ;;  %v6194_v62 = vpack.i.bf16 %v1588_v59, %v1587_v58  ;;  %v6319_v63 = vpack.i.bf16 %v2066_v61, %v7308_v60  ;;  %v2072_v52 = vld [vmem:[#allocation2 + $0xf9] sm:$0x1] }
 0x1d2   : > { %v926_v7 = vadd.f32 %v7110_v3, %v925_v2  ;;  %v927_v8 = vpop.f32.mrb[89].mxu0  ;;  %v1811_v2 = vld [vmem:[#allocation2 + $0x148] sm:$0x1] }
 0x1d3   : > { %v928_v12 = vpop.f32.mrb[90].mxu0  ;;  %v1815_v8 = vld [vmem:[#allocation2 + $0x149] sm:$0x1] }
 0x1d4   : > { %6130 = vrot.lane.b32.xlu0 %v6129_v4, %s6949_s21  ;;  %6245 = vrot.lane.b32.xlu1 %v6244_v5, %s6948_s16  ;;  %v992_v13 = vmax.f32 %v926_v7, 0.0  ;;  %v929_v14 = vadd.f32 %v7110_v3, %v928_v12  ;;  %v930_v15 = vpop.f32.mrb[91].mxu0  ;;  %v6209_v4 = vpack.i.bf16 %v1813_v0, %v1585_v44  ;;  %v6324_v5 = vpack.i.bf16 %v2289_v1, %v2061_v41  ;;  %v7356_v1 = vld [vmem:[#allocation2 + $0xa1] sm:$0xff] }
 0x1d5   : > { %v6219_v7 = vpack.i.bf16 %v1811_v2, %v1583_v51  ;;  %v6224_v12 = vpack.i.bf16 %v1815_v8, %v1587_v58  ;;  %v1828_v15 = vld [vmem:[#allocation2 + $0xe7] sm:$0xff]  ;;  %v1827_v19 = vld [vmem:[#allocation2 + $0x152] sm:$0x1]  ;;  %v1831_v27 = vld [vmem:[#allocation2 + $0x153] sm:$0x1] }
 0x1d6   : > { %1043 = vst.msk [vmem:[#allocation2 + $0x160] sm:$0xff] %vm998_vm0, %v992_v13  ;;  %v993_v18 = vmax.f32 %v929_v14, 0.0  ;;  %v6344_v13 = vpack.i.bf16 %v2305_v11, %v2304_v10  ;;  %v2306_v14 = vld [vmem:[#allocation2 + $0x33] sm:$0xff]  ;;  %v1830_v26 = vld [vmem:[#allocation2 + $0x14b] sm:$0xff]  ;;  %v2552_v2 = vld [vmem:[#allocation2 + $0xa9] sm:$0x1] }
 0x1d7   : > { %v2054_v36 = vld [vmem:[#allocation2 + $0x152] sm:$0x1]  ;;  %v6439_v6 = vpack.i.bf16 %v2552_v2, %v7356_v1  ;;  %v2775_v8 = vld [vmem:[#allocation2 + $0xa8] sm:$0x1] }
 0x1d8   : > { %6135 = vrot.lane.b32.xlu0 %v6134_v16, %s6950_s22  ;;  %6260 = vrot.lane.b32.xlu1 %v6259_v17, %s6950_s22  ;;  %1044 = vst.msk [vmem:[#allocation2 + $0x168] sm:$0xff] %vm998_vm0, %v993_v18  ;;  %v1829_v16 = vld [vmem:[#allocation2 + $0xef] sm:$0x1]  ;;  %v2307_v17 = vld [vmem:[#allocation2 + $0x3b] sm:$0x1]  ;;  %v2071_v51 = vld [vmem:[#allocation2 + $0xf1] sm:$0xff] }
 0x1d9   : > { %v933_v21 = vpop.f32.mrb[92].mxu0  ;;  %v1826_v18 = vld [vmem:[#allocation2 + $0x14a] sm:$0xff]  ;;  %v6299_v58 = vpack.i.bf16 %v2072_v52, %v2071_v51 }
 0x1da   : > { %v934_v24 = vadd.f32 %v7110_v3, %v933_v21  ;;  %v935_v25 = vpop.f32.mrb[93].mxu0  ;;  %v6279_v41 = vpack.i.bf16 %v2054_v36, %v1826_v18 }
 0x1db   : > { %v936_v28 = vpop.f32.mrb[94].mxu0 }
 0x1dc   : > { %6150 = vrot.lane.b32.xlu0 %v6149_v22, %s6948_s16  ;;  %6265 = vrot.lane.b32.xlu1 %v6264_v23, %s6949_s21  ;;  %v994_v29 = vmax.f32 %v934_v24, 0.0  ;;  %v937_v30 = vadd.f32 %v7110_v3, %v936_v28  ;;  %v938_v31 = vpop.f32.mrb[95].mxu0  ;;  %v6239_v22 = vpack.i.bf16 %v1829_v16, %v1828_v15  ;;  %v6354_v23 = vpack.i.bf16 %v2307_v17, %v2306_v14  ;;  %v7326_v28 = vld [vmem:[#allocation2 + $0x97] sm:$0xff]  ;;  %v7372_v17 = vld [vmem:[#allocation2 + $0xaa] sm:$0xff] }
 0x1dd   : > { %v7321_v20 = vld [vmem:[#allocation2 + $0x15e] sm:$0xff]  ;;  %v2313_v21 = vld [vmem:[#allocation2 + $0x166] sm:$0x1]  ;;  %v6249_v24 = vpack.i.bf16 %v1827_v19, %v1826_v18  ;;  %v7330_v31 = vpop.permute.xlu1 %6085 }
 0x1de   : > { %1045 = vst.msk [vmem:[#allocation2 + $0x170] sm:$0xff] %vm998_vm0, %v994_v29  ;;  %v995_v35 = vmax.f32 %v937_v30, 0.0  ;;  %v6369_v25 = vpack.i.bf16 %v2313_v21, %v7321_v20  ;;  %v2309_v29 = vld [vmem:[#allocation2 + $0x9f] sm:$0x1]  ;;  %v6254_v30 = vpack.i.bf16 %v1831_v27, %v1830_v26  ;;  %v2315_v19 = vld [vmem:[#allocation2 + $0x103] sm:$0x1] }
 0x1df   : > { %v7374_v18 = vld [vmem:[#allocation2 + $0xfb] sm:$0xff]  ;;  %v2791_v21 = vld [vmem:[#allocation2 + $0xb2] sm:$0x1] }
 0x1e0   : > { %6160 = vrot.lane.b32.xlu0 %v6159_v32, %s6949_s21  ;;  %6275 = vrot.lane.b32.xlu1 %v6274_v34, %s6948_s16  ;;  %1046 = vst.msk [vmem:[#allocation2 + $0x178] sm:$0xff] %vm998_vm0, %v995_v35  ;;  %v6379_v32 = vpack.i.bf16 %v2309_v29, %v7326_v28  ;;  %v2056_v34 = vld [vmem:[#allocation2 + $0xef] sm:$0x1]  ;;  %v2532_v35 = vld [vmem:[#allocation2 + $0x9e] sm:$0x1] }
 0x1e1   : > { %v941_v38 = vpop.f32.mrb[96].mxu0  ;;  %v2301_v29 = vld [vmem:[#allocation2 + $0x15d] sm:$0x1] }
 0x1e2   : > { %v942_v42 = vadd.f32 %v7110_v3, %v941_v38  ;;  %v943_v43 = vpop.f32.mrb[97].mxu0  ;;  %v6269_v38 = vpack.i.bf16 %v2056_v34, %v1828_v15 }
 0x1e3   : > { %v944_v47 = vpop.f32.mrb[98].mxu0 }
 0x1e4   : > { %6165 = vrot.lane.b32.xlu0 %v6164_v39, %s6950_s22  ;;  %6290 = vrot.lane.b32.xlu1 %v6289_v40, %s6950_s22  ;;  %v996_v48 = vmax.f32 %v942_v42, 0.0  ;;  %v945_v49 = vadd.f32 %v7110_v3, %v944_v47  ;;  %v946_v50 = vpop.f32.mrb[99].mxu0  ;;  %v6304_v3 = vpack.i.bf16 %v2064_v56, %v2063_v55  ;;  %v6384_v39 = vpack.i.bf16 %v2532_v35, %v2304_v10  ;;  %v2534_v40 = vld [vmem:[#allocation2 + $0x3b] sm:$0x1]  ;;  %v2058_v42 = vld [vmem:[#allocation2 + $0x153] sm:$0x1] }
 0x1e5   : > { %v6394_v44 = vpack.i.bf16 %v2534_v40, %v2306_v14  ;;  %v6284_v46 = vpack.i.bf16 %v2058_v42, %v1830_v26  ;;  %v2547_v47 = vld [vmem:[#allocation2 + $0xa0] sm:$0xff]  ;;  %v7347_v55 = vld [vmem:[#allocation2 + $0x168] sm:$0xff]  ;;  %v2556_v56 = vld [vmem:[#allocation2 + $0x170] sm:$0x1] }
 0x1e6   : > { %1047 = vst.msk [vmem:[#allocation2 + $0x180] sm:$0xff] %vm998_vm0, %v996_v48  ;;  %v997_v54 = vmax.f32 %v945_v49, 0.0  ;;  %v6404_v49 = vpack.i.bf16 %v2548_v45, %v2547_v47  ;;  %v2549_v50 = vld [vmem:[#allocation2 + $0x3d] sm:$0xff]  ;;  %v6429_v61 = vpack.i.bf16 %v2556_v56, %v7347_v55  ;;  %v6444_v11 = vpack.i.bf16 %v2775_v8, %v2547_v47  ;;  %v7382_v26 = vld [vmem:[#allocation2 + $0x47] sm:$0xff]  ;;  %v2795_v45 = vld [vmem:[#allocation2 + $0xb3] sm:$0x1] }
 0x1e7   : > { %v2317_v40 = vld [vmem:[#allocation2 + $0x167] sm:$0x1]  ;;  %v3020_v47 = vld [vmem:[#allocation2 + $0x4f] sm:$0x1] }
 0x1e8   : > { %6180 = vrot.lane.b32.xlu0 %v6179_v53, %s6948_s16  ;;  %6295 = vrot.lane.b32.xlu1 %v6294_v33, %s6949_s21  ;;  %1048 = vst.msk [vmem:[#allocation2 + $0x188] sm:$0xff] %vm998_vm0, %v997_v54  ;;  %v2550_v53 = vld [vmem:[#allocation2 + $0x45] sm:$0x1]  ;;  %v2069_v33 = vld [vmem:[#allocation2 + $0x154] sm:$0xff]  ;;  %v2070_v54 = vld [vmem:[#allocation2 + $0x15c] sm:$0x1]  ;;  %v6514_v56 = vpack.i.bf16 %v3020_v47, %v7382_v26 }
 0x1e9   : > { %v6414_v59 = vpack.i.bf16 %v2550_v53, %v2549_v50 }
 0x1ec   : > { %6190 = vrot.lane.b32.xlu0 %v6189_v57, %s6949_s21  ;;  %6305 = vrot.lane.b32.xlu1 %v6304_v3, %s6948_s16  ;;  %v6309_v3 = vpack.i.bf16 %v2070_v54, %v2069_v33  ;;  %v2542_v54 = vld [vmem:[#allocation2 + $0x103] sm:$0x1] }
 0x1f0   : > { %6195 = vrot.lane.b32.xlu0 %v6194_v62, %s6950_s22  ;;  %6320 = vrot.lane.b32.xlu1 %v6319_v63, %s6950_s22  ;;  %v2073_v62 = vld [vmem:[#allocation2 + $0x155] sm:$0xff]  ;;  %v2074_v63 = vld [vmem:[#allocation2 + $0x15d] sm:$0x1] }
 0x1f1   : > { %v6364_v36 = vpack.i.bf16 %v2301_v29, %v2073_v62 }
 0x1f4   : > { %6210 = vrot.lane.b32.xlu0 %v6209_v4, %s6948_s16  ;;  %6325 = vrot.lane.b32.xlu1 %v6324_v5, %s6949_s21  ;;  %v6314_v4 = vpack.i.bf16 %v2074_v63, %v2073_v62  ;;  %v6088_v62 = vunpack.i.h.bf16 %v7330_v31  ;;  %v1115_v63 = vld [vmem:[#allocation2 + $0x8] sm:$0x1] }
 0x1f8   : > { %6220 = vrot.lane.b32.xlu0 %v6219_v7, %s6949_s21  ;;  %6335 = vrot.lane.b32.xlu1 %v6334_v9, %s6948_s16  ;;  %v2299_v7 = vld [vmem:[#allocation2 + $0xf9] sm:$0x1] }
 0x1f9   : > { %v6329_v10 = vpack.i.bf16 %v2299_v7, %v2071_v51 }
 0x1fc   : > { %6225 = vrot.lane.b32.xlu0 %v6224_v12, %s6950_s22  ;;  %6345 = vrot.lane.b32.xlu1 %v6344_v13, %s6949_s21  ;;  %v2293_v12 = vld [vmem:[#allocation2 + $0x95] sm:$0x1]  ;;  %v2777_v13 = vld [vmem:[#allocation2 + $0x45] sm:$0x1] }
 0x1fd   : > { %v6339_v15 = vpack.i.bf16 %v2293_v12, %v7308_v60  ;;  %v6454_v16 = vpack.i.bf16 %v2777_v13, %v2549_v50  ;;  %v2793_v60 = vld [vmem:[#allocation2 + $0x4f] sm:$0x1]  ;;  %v2536_v50 = vld [vmem:[#allocation2 + $0x9f] sm:$0x1]  ;;  %v6389_v12 = vpack.i.bf16 %v2542_v54, %v7374_v18  ;;  %v7415_v13 = vld [vmem:[#allocation2 + $0x14] sm:$0xff] }
 0x1fe   : > { %v6474_v35 = vpack.i.bf16 %v2793_v60, %v7382_v26 }
 0x200   : > { %6240 = vrot.lane.b32.xlu0 %v6239_v22, %s6948_s16  ;;  %6355 = vrot.lane.b32.xlu1 %v6354_v23, %s6948_s16  ;;  %v2297_v22 = vld [vmem:[#allocation2 + $0x15c] sm:$0x1] }
 0x201   : > { %v6359_v27 = vpack.i.bf16 %v2297_v22, %v2069_v33  ;;  %v3018_v33 = vld [vmem:[#allocation2 + $0xb2] sm:$0x1] }
 0x204   : > { %6250 = vrot.lane.b32.xlu0 %v6249_v24, %s6949_s21  ;;  %6370 = vrot.lane.b32.xlu1 %v6369_v25, %s6949_s21  ;;  %v6349_v24 = vpack.i.bf16 %v2315_v19, %v7374_v18  ;;  %v6464_v25 = vpack.i.bf16 %v2791_v21, %v7372_v17  ;;  %v1123_v18 = vld [vmem:[#allocation2 + $0xd0] sm:$0x1] }
 0x208   : > { %6255 = vrot.lane.b32.xlu0 %v6254_v30, %s6950_s22  ;;  %6380 = vrot.lane.b32.xlu1 %v6379_v32, %s6950_s22  ;;  %v7386_v30 = vld [vmem:[#allocation2 + $0x172] sm:$0xff]  ;;  %v2799_v32 = vld [vmem:[#allocation2 + $0x17a] sm:$0x1] }
 0x20a   : > { %v7335_v37 = vpop.permute.xlu1 %6095 }
 0x20b   : > { %v6098_v29 = vunpack.i.h.bf16 %v7335_v37 }
 0x20c   : > { %6270 = vrot.lane.b32.xlu0 %v6269_v38, %s6948_s16  ;;  %6385 = vrot.lane.b32.xlu1 %v6384_v39, %s6949_s21  ;;  %v6489_v38 = vpack.i.bf16 %v2799_v32, %v7386_v30  ;;  %v7394_v39 = vld [vmem:[#allocation2 + $0x15f] sm:$0xff]  ;;  %v6097_v32 = vunpack.i.l.bf16 %v7335_v37 }
 0x20e   : > { %v7339_v43 = vpop.permute.xlu1 %6110 }
 0x20f   : > { %v6112_v8 = vunpack.i.l.bf16 %v7339_v43  ;;  %v6113_v22 = vunpack.i.h.bf16 %v7339_v43 }
 0x210   : > { %6280 = vrot.lane.b32.xlu0 %v6279_v41, %s6949_s21  ;;  %6395 = vrot.lane.b32.xlu1 %v6394_v44, %s6948_s16  ;;  %v6091_v41 = vpop.permute.xlu0 %6090  ;;  %v7398_v44 = vld [vmem:[#allocation2 + $0xab] sm:$0xff] }
 0x211   : > { %v6093_v51 = vunpack.i.h.bf16 %v6091_v41  ;;  %v6499_v53 = vpack.i.bf16 %v2795_v45, %v7398_v44 }
 0x212   : > { %v7343_v48 = vpop.permute.xlu1 %6115 }
 0x213   : > { %v1243_v7 = vsel %vm998_vm0, %v1115_v63, %v6093_v51  ;;  %v2558_v51 = vld [vmem:[#allocation2 + $0x10d] sm:$0x1] }
 0x214   : > { %6285 = vrot.lane.b32.xlu0 %v6284_v46, %s6950_s22  ;;  %6405 = vrot.lane.b32.xlu1 %v6404_v49, %s6949_s21  ;;  %v6374_v46 = vpack.i.bf16 %v2317_v40, %v7394_v39  ;;  %v6092_v49 = vunpack.i.l.bf16 %v6091_v41  ;;  %v1246_v40 = vsel %vm1244_vm1, %v1243_v7, %v6088_v62  ;;  %v2540_v62 = vld [vmem:[#allocation2 + $0x166] sm:$0x1]  ;;  %v7455_v7 = vld [vmem:[#allocation2 + $0x51] sm:$0xff] }
 0x216   : > { %v7349_v57 = vpop.permute.xlu1 %6125 }
 0x218   : > { %6300 = vrot.lane.b32.xlu0 %v6299_v58, %s6948_s16  ;;  %6415 = vrot.lane.b32.xlu1 %v6414_v59, %s6948_s16  ;;  %v1114_v58 = vld [vmem:[#allocation2] sm:$0xff] }
 0x219   : > { %v1242_v2 = vsel %vm998_vm0, %v1114_v58, %v6092_v49 }
 0x21a   : > { %v7354_v0 = vpop.permute.xlu1 %6140 }
 0x21c   : > { %6310 = vrot.lane.b32.xlu0 %v6309_v3, %s6949_s21  ;;  %6430 = vrot.lane.b32.xlu1 %v6429_v61, %s6949_s21  ;;  %v6399_v61 = vpack.i.bf16 %v2536_v50, %v7326_v28  ;;  %v1801_v28 = vld [vmem:[#allocation2 + $0x1c] sm:$0x1]  ;;  %v7434_v50 = vld [vmem:[#allocation2 + $0x105] sm:$0xff] }
 0x21e   : > { %v7360_v5 = vpop.permute.xlu1 %6145 }
 0x220   : > { %6315 = vrot.lane.b32.xlu0 %v6314_v4, %s6950_s22  ;;  %6440 = vrot.lane.b32.xlu1 %v6439_v6, %s6950_s22  ;;  %v6504_v4 = vpack.i.bf16 %v3018_v33, %v7372_v17  ;;  %v6087_v6 = vunpack.i.l.bf16 %v7330_v31  ;;  %v1249_v33 = vsel %vm1247_vm2, %v1246_v40, %v6113_v22  ;;  %v3042_v22 = vld [vmem:[#allocation2 + $0x184] sm:$0x1] }
 0x222   : > { %v7365_v9 = vpop.permute.xlu1 %6155 }
 0x224   : > { %6330 = vrot.lane.b32.xlu0 %v6329_v10, %s6948_s16  ;;  %6445 = vrot.lane.b32.xlu1 %v6444_v11, %s6949_s21 }
 0x226   : > { %v7369_v14 = vpop.permute.xlu1 %6170 }
 0x228   : > { %6340 = vrot.lane.b32.xlu0 %v6339_v15, %s6950_s22  ;;  %6455 = vrot.lane.b32.xlu1 %v6454_v16, %s6948_s16 }
 0x22a   : > { %v7378_v23 = vpop.permute.xlu1 %6175 }
 0x22c   : > { %6350 = vrot.lane.b32.xlu0 %v6349_v24, %s6948_s16  ;;  %6465 = vrot.lane.b32.xlu1 %v6464_v25, %s6949_s21  ;;  %v1122_v24 = vld [vmem:[#allocation2 + $0xc8] sm:$0xff]  ;;  %v1245_v25 = vsel %vm1244_vm1, %v1242_v2, %v6087_v6  ;;  %v6409_v2 = vpack.i.bf16 %v2558_v51, %v7434_v50 }
 0x22d   : > { %v1248_v41 = vsel %vm1247_vm2, %v1245_v25, %v6112_v8  ;;  %v7460_v8 = vld [vmem:[%s9481_s3 + $0x80] sm:$0xff]   ;;  %v7501_v51 = vld [vmem:[#allocation2 + $0x169] sm:$0xff] }
 0x22e   : > { %v7388_v34 = vpop.permute.xlu1 %6185  ;;  %v7474_v25 = vld [vmem:[#allocation2 + $0x1e] sm:$0xff] }
 0x230   : > { %6360 = vrot.lane.b32.xlu0 %v6359_v27, %s6949_s21  ;;  %6475 = vrot.lane.b32.xlu1 %v6474_v35, %s6948_s16 }
 0x232   : > { %v7396_v42 = vpop.permute.xlu1 %6200 }
 0x234   : > { %6365 = vrot.lane.b32.xlu0 %v6364_v36, %s6950_s22  ;;  %6490 = vrot.lane.b32.xlu1 %v6489_v38, %s6949_s21  ;;  %v7430_v38 = vld [vmem:[#allocation2 + $0xb4] sm:$0xff] }
 0x236   : > { %v6206_v52 = vpop.permute.xlu1 %6205 }
 0x237   : > { %v6208_v59 = vunpack.i.h.bf16 %v6206_v52  ;;  %v6207_v3 = vunpack.i.l.bf16 %v6206_v52  ;;  %v3034_v52 = vld [vmem:[#allocation2 + $0xbc] sm:$0x1] }
 0x238   : > { %6375 = vrot.lane.b32.xlu0 %v6374_v46, %s6950_s22  ;;  %6500 = vrot.lane.b32.xlu1 %v6499_v53, %s6950_s22 }
 0x239   : > { %v1929_v17 = vsel %vm998_vm0, %v1801_v28, %v6208_v59  ;;  %v1928_v31 = vsel %vm998_vm0, %v7415_v13, %v6207_v3 }
 0x23a   : > { %v6101_v10 = vpop.permute.xlu0 %6100  ;;  %v6216_v11 = vpop.permute.xlu1 %6215 }
 0x23b   : > { %v6103_v15 = vunpack.i.h.bf16 %v6101_v10  ;;  %v6102_v16 = vunpack.i.l.bf16 %v6101_v10  ;;  %v6218_v19 = vunpack.i.h.bf16 %v6216_v11  ;;  %v6217_v21 = vunpack.i.l.bf16 %v6216_v11  ;;  %v3036_v10 = vld [vmem:[#allocation2 + $0x59] sm:$0x1]  ;;  %v2544_v11 = vld [vmem:[#allocation2 + $0x167] sm:$0x1] }
 0x23c   : > { %6390 = vrot.lane.b32.xlu0 %v6389_v12, %s6948_s16  ;;  %6505 = vrot.lane.b32.xlu1 %v6504_v4, %s6949_s21  ;;  %v6524_v4 = vpack.i.bf16 %v3034_v52, %v7430_v38  ;;  %v2560_v52 = vld [vmem:[#allocation2 + $0x171] sm:$0x1] }
 0x23d   : > { %v1930_v26 = vsel %vm1244_vm1, %v1928_v31, %v6217_v21  ;;  %v1931_v60 = vsel %vm1244_vm1, %v1929_v17, %v6218_v19  ;;  %v1250_v27 = vsel %vm998_vm0, %v1122_v24, %v6102_v16  ;;  %v1251_v43 = vsel %vm998_vm0, %v1123_v18, %v6103_v15  ;;  %v7468_v19 = vld [vmem:[%s9481_s3 + $0xc8] sm:$0xff]   ;;  %v7470_v21 = vld [vmem:[#allocation2 + $0x17c] sm:$0xff] }
 0x23e   : > { %v6106_v35 = vpop.permute.xlu0 %6105  ;;  %v6231_v36 = vpop.permute.xlu1 %6230  ;;  %v1252_v37 = vsel %vm1244_vm1, %v1250_v27, %v6097_v32  ;;  %v1253_v53 = vsel %vm1244_vm1, %v1251_v43, %v6098_v29  ;;  %v1268_v15 = vpack.c.bf16 %v1249_v33, %v1248_v41  ;;  %v6419_v16 = vpack.i.bf16 %v2540_v62, %v7321_v20  ;;  %v7480_v29 = vld [vmem:[%s9481_s3 + $0x88] sm:$0xff]  }
 0x23f   : > { %v6108_v45 = vunpack.i.h.bf16 %v6106_v35  ;;  %v6107_v46 = vunpack.i.l.bf16 %v6106_v35  ;;  %v6233_v47 = vunpack.i.h.bf16 %v6231_v36  ;;  %v6232_v49 = vunpack.i.l.bf16 %v6231_v36  ;;  %v1139_v36 = vld [vmem:[#allocation2 + $0xda] sm:$0x1] }
 0x240   : > { %6400 = vrot.lane.b32.xlu0 %v6399_v61, %s6950_s22  ;;  %6515 = vrot.lane.b32.xlu1 %v6514_v56, %s6948_s16  ;;  %v6534_v24 = vpack.i.bf16 %v3036_v10, %v7455_v7  ;;  %v6424_v18 = vpack.i.bf16 %v2544_v11, %v7394_v39  ;;  %v7485_v39 = vld [vmem:[#allocation2 + $0xd2] sm:$0xff]  ;;  %v6549_v40 = vpack.i.bf16 %v3042_v22, %v7470_v21  ;;  %v3038_v10 = vld [vmem:[#allocation2 + $0xbd] sm:$0x1] }
 0x241   : > { %v7442_v54 = vsel %vm1247_vm2, %v1930_v26, %v6232_v49  ;;  %v7445_v58 = vsel %vm1247_vm2, %v1931_v60, %v6233_v47  ;;  %v1254_v59 = vsel %vm1247_vm2, %v1252_v37, %v6107_v46  ;;  %v1255_v3 = vsel %vm1247_vm2, %v1253_v53, %v6108_v45  ;;  %v1817_v26 = vld [vmem:[#allocation2 + $0x26] sm:$0x1]  ;;  %v7499_v49 = vld [vmem:[%s9481_s3 + $0xd0] sm:$0xff]  }
 0x242   : > { %9533 = vst [vmem:[#allocation4_spill] sm:$0xff] %v7442_v54  ;;  %9534 = vst [vmem:[#allocation5_spill] sm:$0xff] %v7445_v58  ;;  %v7451_v61 = vpop.permute.xlu0 %6120  ;;  %v6236_v63 = vpop.permute.xlu1 %6235  ;;  %v1269_v6 = vpack.c.bf16 %v1255_v3, %v1254_v59  ;;  %v7674_v56 = vld [vmem:[#allocation2 + $0x173] sm:$0xff] }
 0x243   : > { %v6238_v12 = vunpack.i.h.bf16 %v6236_v63  ;;  %v6237_v28 = vunpack.i.l.bf16 %v6236_v63  ;;  %v6123_v37 = vunpack.i.h.bf16 %v7451_v61  ;;  %v6122_v53 = vunpack.i.l.bf16 %v7451_v61 }
 0x244   : > { %6410 = vrot.lane.b32.xlu0 %v6409_v2, %s6948_s16  ;;  %6525 = vrot.lane.b32.xlu1 %v6524_v4, %s6949_s21  ;;  %v7509_v4 = vld [vmem:[%s9481_s3 + $0x90] sm:$0xff]   ;;  %v6434_v61 = vpack.i.bf16 %v2560_v52, %v7501_v51 }
 0x245   : > { %1502 = vmatprep.mubr.bf16.mxu1 %v1269_v6  ;;  %v1941_v32 = vsel %vm998_vm0, %v1817_v26, %v6238_v12  ;;  %v1940_v35 = vsel %vm998_vm0, %v7474_v25, %v6237_v28  ;;  %v7511_v6 = vld [vmem:[#allocation2 + $0xb5] sm:$0xff] }
 0x246   : > { %1503 = vmatmul.mubr.bf16.vlgmr.msra.gmra.mrb[0].mxu1 %v1268_v15  ;;  %v6131_v17 = vpop.permute.xlu0 %6130  ;;  %v6246_v31 = vpop.permute.xlu1 %6245  ;;  %v6559_v26 = vpack.i.bf16 %v3038_v10, %v7511_v6  ;;  %v7576_v10 = vld [vmem:[%s9481_s3 + $0xe8] sm:$0xff]  }
 0x247   : > { %5268 = vmatpush3.bf16.msra.mxu1 %v7460_v8  ;;  %v6133_v20 = vunpack.i.h.bf16 %v6131_v17  ;;  %v6132_v60 = vunpack.i.l.bf16 %v6131_v17  ;;  %v6248_v27 = vunpack.i.h.bf16 %v6246_v31  ;;  %v6247_v43 = vunpack.i.l.bf16 %v6246_v31 }
 0x248   : > { %6420 = vrot.lane.b32.xlu0 %v6419_v16, %s6949_s21  ;;  %6535 = vrot.lane.b32.xlu1 %v6534_v24, %s6948_s16  ;;  %v7528_v16 = vld [vmem:[%s9481_s3 + $0xd8] sm:$0xff]  }
 0x249   : > { %v1263_v41 = vsel %vm998_vm0, %v1139_v36, %v6133_v20  ;;  %v1262_v45 = vsel %vm998_vm0, %v7485_v39, %v6132_v60  ;;  %v1942_v46 = vsel %vm1244_vm1, %v1940_v35, %v6247_v43  ;;  %v1943_v47 = vsel %vm1244_vm1, %v1941_v32, %v6248_v27  ;;  %5269 = vmatprep.subr.bf16.mxu1 %v7468_v19  ;;  %v7541_v60 = vld [vmem:[%s9481_s3 + $0x98] sm:$0xff]   ;;  %v2785_v27 = vld [vmem:[#allocation2 + $0x10d] sm:$0x1]  ;;  %v7549_v36 = vld [vmem:[%s9481_s3 + $0xe0] sm:$0xff]  }
 0x24a   : > { %v6136_v33 = vpop.permute.xlu0 %6135  ;;  %v6261_v59 = vpop.permute.xlu1 %6260  ;;  %v1264_v11 = vsel %vm1244_vm1, %v1262_v45, %v6122_v53  ;;  %v1265_v12 = vsel %vm1244_vm1, %v1263_v41, %v6123_v37  ;;  %v3261_v43 = vld [vmem:[#allocation2 + $0xbc] sm:$0x1]  ;;  %v7559_v53 = vld [vmem:[%s9481_s3 + $0xa0] sm:$0xff]  }
 0x24b   : > { %5270 = vmatpush3.bf16.msra.mxu1 %v7480_v29  ;;  %v6138_v3 = vunpack.i.h.bf16 %v6136_v33  ;;  %v6137_v62 = vunpack.i.l.bf16 %v6136_v33  ;;  %v6263_v63 = vunpack.i.h.bf16 %v6261_v59  ;;  %v6262_v2 = vunpack.i.l.bf16 %v6261_v59  ;;  %v2779_v33 = vld [vmem:[#allocation2 + $0xa9] sm:$0x1]  ;;  %v3263_v59 = vld [vmem:[#allocation2 + $0x59] sm:$0x1] }
 0x24c   : > { %6425 = vrot.lane.b32.xlu0 %v6424_v18, %s6950_s22  ;;  %6550 = vrot.lane.b32.xlu1 %v6549_v40, %s6949_s21  ;;  %v2044_v40 = vld [vmem:[#allocation2 + $0x26] sm:$0x1] }
 0x24d   : > { %v7519_v28 = vsel %vm1247_vm2, %v1942_v46, %v6262_v2  ;;  %v7522_v15 = vsel %vm1247_vm2, %v1943_v47, %v6263_v63  ;;  %5271 = vmatprep.subr.bf16.mxu1 %v7499_v49  ;;  %v1266_v22 = vsel %vm1247_vm2, %v1264_v11, %v6137_v62  ;;  %v1267_v17 = vsel %vm1247_vm2, %v1265_v12, %v6138_v3 }
 0x24e   : > { %9535 = vst [vmem:[#allocation6_spill] sm:$0xff] %v7519_v28  ;;  %9536 = vst [vmem:[#allocation7_spill] sm:$0xff] %v7522_v15  ;;  %v7534_v24 = vpop.permute.xlu0 %6150  ;;  %v6266_v18 = vpop.permute.xlu1 %6265  ;;  %v1271_v20 = vpack.c.bf16 %v1267_v17, %v1266_v22  ;;  %v6449_v46 = vpack.i.bf16 %v2785_v27, %v7434_v50  ;;  %v6564_v47 = vpack.i.bf16 %v3261_v43, %v7430_v38  ;;  %v7566_v38 = vld [vmem:[#allocation2 + $0x5b] sm:$0xff]  ;;  %v7568_v50 = vld [vmem:[#allocation2 + $0x63] sm:$0x1] }
 0x24f   : > { %5272 = vmatpush3.bf16.msra.mxu1 %v7509_v4  ;;  %v6268_v32 = vunpack.i.h.bf16 %v6266_v18  ;;  %v6267_v35 = vunpack.i.l.bf16 %v6266_v18  ;;  %v6459_v22 = vpack.i.bf16 %v2779_v33, %v7356_v1  ;;  %v6574_v17 = vpack.i.bf16 %v3263_v59, %v7455_v7  ;;  %v7587_v27 = vld [vmem:[%s9481_s3 + $0xa8] sm:$0xff]   ;;  %v2783_v7 = vld [vmem:[#allocation2 + $0x170] sm:$0x1]  ;;  %v1131_v33 = vld [vmem:[#allocation2 + $0x12] sm:$0x1] }
 0x250   : > { %6435 = vrot.lane.b32.xlu0 %v6434_v61, %s6950_s22  ;;  %6560 = vrot.lane.b32.xlu1 %v6559_v26, %s6950_s22  ;;  %v3277_v61 = vld [vmem:[#allocation2 + $0xc6] sm:$0x1]  ;;  %v6118_v18 = vunpack.i.h.bf16 %v7343_v48  ;;  %v7589_v43 = vld [vmem:[#allocation2 + $0x10f] sm:$0xff]  ;;  %v7774_v28 = vld [vmem:[#allocation2 + $0x185] sm:$0x1] }
 0x251   : > { %5273 = vmatprep.subr.bf16.mxu1 %v7528_v16  ;;  %1543 = vmatprep.mubr.bf16.mxu1 %v1271_v20  ;;  %v2172_v3 = vsel %vm998_vm0, %v2044_v40, %v6268_v32  ;;  %v2171_v62 = vsel %vm998_vm0, %v7474_v25, %v6267_v35  ;;  %v3276_v25 = vld [vmem:[#allocation2 + $0xbe] sm:$0xff]  ;;  %v2801_v32 = vld [vmem:[#allocation2 + $0x117] sm:$0x1]  ;;  %v6117_v35 = vunpack.i.l.bf16 %v7343_v48  ;;  %v6594_v40 = vpack.i.bf16 %v7568_v50, %v7566_v38 }
 0x252   : > { %v7551_v41 = vpop.permute.xlu0 %6160  ;;  %v6276_v45 = vpop.permute.xlu1 %6275  ;;  %v6584_v1 = vpack.i.bf16 %v3277_v61, %v3276_v25  ;;  %v6469_v50 = vpack.i.bf16 %v2801_v32, %v7589_v43  ;;  %v7619_v25 = vld [vmem:[#allocation2 + $0xa] sm:$0xff]  ;;  %v1257_v61 = vsel %vm998_vm0, %v1131_v33, %v6118_v18  ;;  %v6142_v18 = vunpack.i.l.bf16 %v7354_v0  ;;  %v7783_v15 = vld [vmem:[%s9481_s3 + $0x20] sm:$0xff]  }
 0x253   : > { %5274 = vmatpush3.bf16.msra.mxu1 %v7541_v60  ;;  %v6278_v52 = vunpack.i.h.bf16 %v6276_v45  ;;  %v6277_v37 = vunpack.i.l.bf16 %v6276_v45  ;;  %v7596_v45 = vld [vmem:[#allocation2 + $0x171] sm:$0x1]  ;;  %v6163_v59 = vunpack.i.h.bf16 %v7551_v41  ;;  %v7635_v32 = vld [vmem:[#allocation2 + $0x28] sm:$0xff]  ;;  %9548 = vst [vmem:[#allocation19_spill] sm:$0xff] %v7783_v15 }
 0x254   : > { %6450 = vrot.lane.b32.xlu0 %v6449_v46, %s6948_s16  ;;  %6565 = vrot.lane.b32.xlu1 %v6564_v47, %s6949_s21  ;;  %v6128_v46 = vunpack.i.h.bf16 %v7349_v57  ;;  %v6127_v47 = vunpack.i.l.bf16 %v7349_v57 }
 0x255   : > { %v2173_v63 = vsel %vm1244_vm1, %v2171_v62, %v6277_v37  ;;  %v2174_v2 = vsel %vm1244_vm1, %v2172_v3, %v6278_v52  ;;  %5275 = vmatprep.subr.bf16.mxu1 %v7549_v36  ;;  %v7610_v37 = vld [vmem:[%s9481_s3 + $0xf0] sm:$0xff]   ;;  %v6162_v3 = vunpack.i.l.bf16 %v7551_v41 }
 0x256   : > { %v7578_v11 = vpop.permute.xlu0 %6165  ;;  %v6291_v12 = vpop.permute.xlu1 %6290  ;;  %v7626_v41 = vld [vmem:[%s9481_s3 + $0xb0] sm:$0xff]  }
 0x257   : > { %5276 = vmatpush3.bf16.msra.mxu1 %v7559_v53  ;;  %v6293_v26 = vunpack.i.h.bf16 %v6291_v12  ;;  %v6292_v20 = vunpack.i.l.bf16 %v6291_v12 }
 0x258   : > { %6460 = vrot.lane.b32.xlu0 %v6459_v22, %s6950_s22  ;;  %6575 = vrot.lane.b32.xlu1 %v6574_v17, %s6948_s16  ;;  %v6479_v22 = vpack.i.bf16 %v2783_v7, %v7347_v55  ;;  %v6484_v17 = vpack.i.bf16 %v7596_v45, %v7501_v51  ;;  %v1259_v55 = vsel %vm1244_vm1, %v1257_v61, %v6128_v46  ;;  %v1566_v7 = vld [vmem:[#allocation2 + $0xda] sm:$0x1]  ;;  %v6167_v46 = vunpack.i.l.bf16 %v7578_v11 }
 0x259   : > { %v7601_v52 = vsel %vm1247_vm2, %v2173_v63, %v6292_v20  ;;  %v7604_v48 = vsel %vm1247_vm2, %v2174_v2, %v6293_v26  ;;  %5277 = vmatprep.subr.bf16.mxu1 %v7576_v10  ;;  %v3284_v63 = vld [vmem:[#allocation2 + $0x186] sm:$0xff]  ;;  %v3285_v2 = vld [vmem:[#allocation2 + $0x18e] sm:$0x1]  ;;  %v1256_v26 = vsel %vm998_vm0, %v7619_v25, %v6117_v35  ;;  %v6143_v20 = vunpack.i.h.bf16 %v7354_v0  ;;  %v7647_v0 = vld [vmem:[%s9481_s3 + $0xf8] sm:$0xff]  }
 0x25a   : > { %9537 = vst [vmem:[#allocation8_spill] sm:$0xff] %v7601_v52  ;;  %9538 = vst [vmem:[#allocation9_spill] sm:$0xff] %v7604_v48  ;;  %v7616_v62 = vpop.permute.xlu0 %6180  ;;  %v6296_v38 = vpop.permute.xlu1 %6295  ;;  %v1258_v57 = vsel %vm1244_vm1, %v1256_v26, %v6127_v47  ;;  %v6609_v35 = vpack.i.bf16 %v3285_v2, %v3284_v63  ;;  %v1692_v45 = vsel %vm998_vm0, %v1566_v7, %v6163_v59  ;;  %v6168_v47 = vunpack.i.h.bf16 %v7578_v11  ;;  %v2060_v26 = vld [vmem:[#allocation2 + $0x30] sm:$0x1]  ;;  %v3030_v52 = vld [vmem:[#allocation2 + $0x17b] sm:$0x1] }
 0x25b   : > { %5278 = vmatpush3.bf16.msra.mxu1 %v7587_v27  ;;  %v6297_v12 = vunpack.i.l.bf16 %v6296_v38  ;;  %v6298_v33 = vunpack.i.h.bf16 %v6296_v38  ;;  %v6153_v61 = vunpack.i.h.bf16 %v7534_v24  ;;  %v1260_v59 = vsel %vm1247_vm2, %v1258_v57, %v6142_v18  ;;  %v2803_v57 = vld [vmem:[#allocation2 + $0x17b] sm:$0x1]  ;;  %v7772_v48 = vld [vmem:[#allocation2 + $0x17d] sm:$0xff] }
 0x25c   : > { %6470 = vrot.lane.b32.xlu0 %v6469_v50, %s6948_s16  ;;  %6585 = vrot.lane.b32.xlu1 %v6584_v1, %s6949_s21  ;;  %v1691_v1 = vsel %vm998_vm0, %v7485_v39, %v6162_v3  ;;  %v7662_v39 = vld [vmem:[%s9481_s3 + $0xb8] sm:$0xff]   ;;  %v1261_v11 = vsel %vm1247_vm2, %v1259_v55, %v6143_v20  ;;  %v6544_v54 = vpack.i.bf16 %v3030_v52, %v7674_v56 }
 0x25d   : > { %v2183_v51 = vsel %vm998_vm0, %v7635_v32, %v6297_v12  ;;  %5279 = vmatprep.subr.bf16.mxu1 %v7610_v37  ;;  %v6152_v12 = vunpack.i.l.bf16 %v7534_v24  ;;  %v2184_v3 = vsel %vm998_vm0, %v2060_v26, %v6298_v33  ;;  %v1694_v31 = vsel %vm1244_vm1, %v1692_v45, %v6153_v61  ;;  %v3281_v26 = vld [vmem:[#allocation2 + $0xc7] sm:$0x1] }
 0x25e   : > { %v7654_v38 = vpop.permute.xlu0 %6190  ;;  %v6306_v50 = vpop.permute.xlu1 %6305  ;;  %v1270_v45 = vpack.c.bf16 %v1261_v11, %v1260_v59  ;;  %v3028_v59 = vld [vmem:[#allocation2 + $0x117] sm:$0x1]  ;;  %v7713_v11 = vld [vmem:[%s9481_s3 + $0x48] sm:$0xff]   ;;  %v6554_v58 = vpack.i.bf16 %v7774_v28, %v7772_v48  ;;  %v6147_v28 = vunpack.i.l.bf16 %v7360_v5 }
 0x25f   : > { %5280 = vmatpush3.bf16.msra.mxu1 %v7626_v41  ;;  %v6308_v63 = vunpack.i.h.bf16 %v6306_v50  ;;  %v6307_v2 = vunpack.i.l.bf16 %v6306_v50  ;;  %v1693_v50 = vsel %vm1244_vm1, %v1691_v1, %v6152_v12  ;;  %v6494_v1 = vpack.i.bf16 %v2803_v57, %v7674_v56  ;;  %v3022_v57 = vld [vmem:[#allocation2 + $0xb3] sm:$0x1] }
 0x260   : > { %6480 = vrot.lane.b32.xlu0 %v6479_v22, %s6949_s21  ;;  %6595 = vrot.lane.b32.xlu1 %v6594_v40, %s6948_s16  ;;  %v1695_v22 = vsel %vm1247_vm2, %v1693_v50, %v6167_v46  ;;  %v1696_v40 = vsel %vm1247_vm2, %v1694_v31, %v6168_v47  ;;  %v7693_v31 = vld [vmem:[%s9481_s3 + $0x40] sm:$0xff]   ;;  %v7724_v50 = vld [vmem:[%s9481_s3 + $0x8] sm:$0xff]   ;;  %v6148_v56 = vunpack.i.h.bf16 %v7360_v5 }
 0x261   : > { %v2185_v24 = vsel %vm1244_vm1, %v2183_v51, %v6307_v2  ;;  %v2186_v7 = vsel %vm1244_vm1, %v2184_v3, %v6308_v63  ;;  %5281 = vmatprep.subr.bf16.mxu1 %v7647_v0  ;;  %v3280_v51 = vld [vmem:[#allocation2 + $0xbf] sm:$0xff]  ;;  %v1710_v47 = vpack.c.bf16 %v1696_v40, %v1695_v22  ;;  %9541 = vst [vmem:[#allocation12_spill] sm:$0xff] %v7724_v50  ;;  %v7814_v5 = vld [vmem:[%s9481_s3 + $0x28] sm:$0xff]  }
 0x262   : > { %v7676_v20 = vpop.permute.xlu0 %6195  ;;  %v6321_v18 = vpop.permute.xlu1 %6320  ;;  %v6619_v63 = vpack.i.bf16 %v3281_v26, %v3280_v51  ;;  %v7705_v2 = vld [vmem:[%s9481_s3] sm:$0xff]   ;;  %v6519_v40 = vpack.i.bf16 %v3022_v57, %v7398_v44  ;;  %v7751_v44 = vld [vmem:[%s9481_s3 + $0x58] sm:$0xff]   ;;  %9550 = vst [vmem:[#allocation21_spill] sm:$0xff] %v7814_v5 }
 0x263   : > { %5282 = vmatpush3.bf16.msra.mxu1 %v7662_v39  ;;  %v6323_v33 = vunpack.i.h.bf16 %v6321_v18  ;;  %v6322_v55 = vunpack.i.l.bf16 %v6321_v18  ;;  %v7731_v18 = vld [vmem:[%s9481_s3 + $0x50] sm:$0xff]   ;;  %v7743_v51 = vld [vmem:[#allocation2 + $0x119] sm:$0xff]  ;;  %v3044_v26 = vld [vmem:[#allocation2 + $0x121] sm:$0x1]  ;;  %9545 = vst [vmem:[#allocation16_spill] sm:$0xff] %v7751_v44 }
 0x264   : > { %6485 = vrot.lane.b32.xlu0 %v6484_v17, %s6950_s22  ;;  %6610 = vrot.lane.b32.xlu1 %v6609_v35, %s6949_s21  ;;  %9542 = vst [vmem:[#allocation13_spill] sm:$0xff] %v7731_v18  ;;  %v6529_v57 = vpack.i.bf16 %v3044_v26, %v7743_v51  ;;  %v2303_v17 = vld [vmem:[#allocation2 + $0x3a] sm:$0x1] }
 0x265   : > { %v7685_v61 = vsel %vm1247_vm2, %v2185_v24, %v6322_v55  ;;  %v7688_v46 = vsel %vm1247_vm2, %v2186_v7, %v6323_v33  ;;  %5289 = vmatprep.subr.bf16.mxu1 %v7693_v31  ;;  %v6509_v7 = vpack.i.bf16 %v3028_v59, %v7589_v43  ;;  %v7740_v33 = vld [vmem:[%s9481_s3 + $0x10] sm:$0xff]  }
 0x266   : > { %9539 = vst [vmem:[#allocation10_spill] sm:$0xff] %v7685_v61  ;;  %9540 = vst [vmem:[#allocation11_spill] sm:$0xff] %v7688_v46  ;;  %1544 = vmatmul.mubr.bf16.vlgmr.msra.gmra.mrb[4].mxu1 %v1270_v45  ;;  %v7698_v35 = vpop.permute.xlu0 %6210  ;;  %v7700_v12 = vpop.permute.xlu1 %6325  ;;  %v7745_v45 = vld [vmem:[#allocation2 + $0x32] sm:$0xff] }
 0x267   : > { %5290 = vmatpush3.bf16.msra.mxu1 %v7705_v2  ;;  %1745 = vmatprep.mubr.bf16.mxu1 %v1710_v47  ;;  %9543 = vst [vmem:[#allocation14_spill] sm:$0xff] %v7740_v33  ;;  %9544 = vst [vmem:[#allocation15_spill] sm:$0xff] %v7745_v45 }
 0x268   : > { %6495 = vrot.lane.b32.xlu0 %v6494_v1, %s6950_s22  ;;  %6620 = vrot.lane.b32.xlu1 %v6619_v63, %s6950_s22  ;;  %v3026_v63 = vld [vmem:[#allocation2 + $0x17a] sm:$0x1] }
 0x269   : > { %5291 = vmatprep.subr.bf16.mxu1 %v7713_v11  ;;  %v6539_v26 = vpack.i.bf16 %v3026_v63, %v7386_v30 }
 0x26a   : > { %v7716_v3 = vpop.permute.xlu0 %6220  ;;  %v7718_v24 = vpop.permute.xlu1 %6335 }
 0x26b   : > { %5292 = vmatpush3.bf16.msra.mxu1 %v7724_v50  ;;  %v6173_v50 = vunpack.i.h.bf16 %v7369_v14 }
 0x26c   : > { %6510 = vrot.lane.b32.xlu0 %v6509_v7, %s6948_s16  ;;  %5293 = vmatprep.subr.bf16.mxu1 %v7731_v18  ;;  %v1582_v18 = vld [vmem:[#allocation2 + $0xe4] sm:$0x1] }
 0x26e   : > { %v7734_v22 = vpop.permute.xlu0 %6225  ;;  %v6346_v43 = vpop.permute.xlu1 %6345 }
 0x26f   : > { %5294 = vmatpush3.bf16.msra.mxu1 %v7740_v33  ;;  %v6347_v55 = vunpack.i.l.bf16 %v6346_v43  ;;  %v6348_v1 = vunpack.i.h.bf16 %v6346_v43  ;;  %v7760_v43 = vld [vmem:[%s9481_s3 + $0x18] sm:$0xff]  }
 0x270   : > { %6520 = vrot.lane.b32.xlu0 %v6519_v40, %s6950_s22  ;;  %5295 = vmatprep.subr.bf16.mxu1 %v7751_v44  ;;  %9546 = vst [vmem:[#allocation17_spill] sm:$0xff] %v7760_v43 }
 0x271   : > { %v2426_v47 = vsel %vm998_vm0, %v7745_v45, %v6347_v55  ;;  %v2427_v46 = vsel %vm998_vm0, %v2303_v17, %v6348_v1  ;;  %v7768_v55 = vld [vmem:[%s9481_s3 + $0x60] sm:$0xff]  }
 0x272   : > { %v6241_v59 = vpop.permute.xlu0 %6240  ;;  %v6356_v7 = vpop.permute.xlu1 %6355  ;;  %9547 = vst [vmem:[#allocation18_spill] sm:$0xff] %v7768_v55  ;;  %v7791_v45 = vld [vmem:[#allocation2 + $0xe6] sm:$0xff] }
 0x273   : > { %5296 = vmatpush3.bf16.msra.mxu1 %v7760_v43  ;;  %v6358_v40 = vunpack.i.h.bf16 %v6356_v7  ;;  %v6357_v61 = vunpack.i.l.bf16 %v6356_v7 }
 0x274   : > { %6530 = vrot.lane.b32.xlu0 %v6529_v57, %s6948_s16  ;;  %5297 = vmatprep.subr.bf16.mxu1 %v7768_v55  ;;  %v1825_v55 = vld [vmem:[#allocation2 + $0xee] sm:$0x1] }
 0x275   : > { %v2428_v7 = vsel %vm1244_vm1, %v2426_v47, %v6357_v61  ;;  %v2429_v17 = vsel %vm1244_vm1, %v2427_v46, %v6358_v40  ;;  %v6193_v61 = vunpack.i.h.bf16 %v7654_v38  ;;  %v6192_v46 = vunpack.i.l.bf16 %v7654_v38 }
 0x276   : > { %v6251_v1 = vpop.permute.xlu0 %6250  ;;  %v7778_v57 = vpop.permute.xlu1 %6370  ;;  %v6243_v47 = vunpack.i.h.bf16 %v6241_v59  ;;  %v6242_v40 = vunpack.i.l.bf16 %v6241_v59  ;;  %v6158_v59 = vunpack.i.h.bf16 %v7365_v9 }
 0x277   : > { %5298 = vmatpush3.bf16.msra.mxu1 %v7783_v15  ;;  %v6253_v30 = vunpack.i.h.bf16 %v6251_v1  ;;  %v6252_v63 = vunpack.i.l.bf16 %v6251_v1  ;;  %v7797_v1 = vld [vmem:[%s9481_s3 + $0x68] sm:$0xff]  }
 0x278   : > { %6540 = vrot.lane.b32.xlu0 %v6539_v26, %s6949_s21  ;;  %9549 = vst [vmem:[#allocation20_spill] sm:$0xff] %v7797_v1  ;;  %5299 = vmatprep.subr.bf16.mxu1 %v7797_v1  ;;  %v6157_v26 = vunpack.i.l.bf16 %v7365_v9  ;;  %v7809_v1 = vld [vmem:[#allocation2 + $0xdc] sm:$0xff] }
 0x279   : > { %v1947_v52 = vsel %vm998_vm0, %v1825_v55, %v6253_v30  ;;  %v1946_v38 = vsel %vm998_vm0, %v7791_v45, %v6252_v63 }
 0x27a   : > { %v6256_v15 = vpop.permute.xlu0 %6255  ;;  %v6381_v43 = vpop.permute.xlu1 %6380  ;;  %v1948_v44 = vsel %vm1244_vm1, %v1946_v38, %v6242_v40  ;;  %v1949_v33 = vsel %vm1244_vm1, %v1947_v52, %v6243_v47  ;;  %v6172_v40 = vunpack.i.l.bf16 %v7369_v14  ;;  %v1704_v47 = vsel %vm998_vm0, %v1582_v18, %v6193_v61  ;;  %v7826_v38 = vld [vmem:[%s9481_s3 + $0x70] sm:$0xff]  }
 0x27b   : > { %5300 = vmatpush3.bf16.msra.mxu1 %v7814_v5  ;;  %v6258_v55 = vunpack.i.h.bf16 %v6256_v15  ;;  %v6257_v30 = vunpack.i.l.bf16 %v6256_v15  ;;  %v6383_v63 = vunpack.i.h.bf16 %v6381_v43  ;;  %v6382_v9 = vunpack.i.l.bf16 %v6381_v43  ;;  %9551 = vst [vmem:[#allocation22_spill] sm:$0xff] %v7826_v38 }
 0x27c   : > { %v1703_v52 = vsel %vm998_vm0, %v7809_v1, %v6192_v46  ;;  %6545 = vrot.lane.b32.xlu0 %v6544_v54, %s6950_s22  ;;  %5301 = vmatprep.subr.bf16.mxu1 %v7826_v38  ;;  %v1558_v54 = vld [vmem:[#allocation2 + $0x12] sm:$0x1]  ;;  %v6198_v61 = vunpack.i.h.bf16 %v7676_v20  ;;  %v6197_v46 = vunpack.i.l.bf16 %v7676_v20 }
 0x27d   : > { %v7830_v15 = vsel %vm1247_vm2, %v2428_v7, %v6382_v9  ;;  %v7833_v43 = vsel %vm1247_vm2, %v2429_v17, %v6383_v63  ;;  %v7836_v14 = vsel %vm1247_vm2, %v1948_v44, %v6257_v30  ;;  %v7839_v18 = vsel %vm1247_vm2, %v1949_v33, %v6258_v55  ;;  %v7857_v20 = vld [vmem:[%s9481_s3 + $0x30] sm:$0xff]   ;;  %v3271_v63 = vld [vmem:[#allocation2 + $0x121] sm:$0x1]  ;;  %v7881_v17 = vld [vmem:[%s9481_s3 + $0x38] sm:$0xff]  }
 0x27e   : > { %9552 = vst [vmem:[#allocation23_spill] sm:$0xff] %v7830_v15  ;;  %9553 = vst [vmem:[#allocation24_spill] sm:$0xff] %v7833_v43  ;;  %v6271_v5 = vpop.permute.xlu0 %6270  ;;  %v7845_v7 = vpop.permute.xlu1 %6385  ;;  %v1686_v44 = vsel %vm998_vm0, %v1558_v54, %v6148_v56  ;;  %v1685_v33 = vsel %vm998_vm0, %v7619_v25, %v6147_v28  ;;  %v6183_v55 = vunpack.i.h.bf16 %v7616_v62  ;;  %v6182_v30 = vunpack.i.l.bf16 %v7616_v62  ;;  %v7866_v25 = vld [vmem:[%s9481_s3 + $0x78] sm:$0xff]  }
 0x27f   : > { %5302 = vmatpush3.bf16.msra.mxu1 %v7857_v20  ;;  %v1687_v9 = vsel %vm1244_vm1, %v1685_v33, %v6157_v26  ;;  %v1688_v38 = vsel %vm1244_vm1, %v1686_v44, %v6158_v59  ;;  %v7898_v15 = vld [vmem:[#allocation2 + $0x3c] sm:$0xff] }
 0x280   : > { %6555 = vrot.lane.b32.xlu0 %v6554_v58, %s6950_s22  ;;  %5303 = vmatprep.subr.bf16.mxu1 %v7866_v25  ;;  %v1689_v62 = vsel %vm1247_vm2, %v1687_v9, %v6172_v40  ;;  %v1690_v56 = vsel %vm1247_vm2, %v1688_v38, %v6173_v50  ;;  %v1705_v28 = vsel %vm1244_vm1, %v1703_v52, %v6182_v30  ;;  %v3265_v52 = vld [vmem:[#allocation2 + $0xbd] sm:$0x1]  ;;  %v6272_v38 = vunpack.i.l.bf16 %v6271_v5 }
 0x281   : > { %v1706_v54 = vsel %vm1244_vm1, %v1704_v47, %v6183_v55  ;;  %v6569_v58 = vpack.i.bf16 %v3271_v63, %v7743_v51  ;;  %v1707_v59 = vsel %vm1247_vm2, %v1705_v28, %v6197_v46  ;;  %v6273_v47 = vunpack.i.h.bf16 %v6271_v5  ;;  %v2052_v55 = vld [vmem:[#allocation2 + $0xee] sm:$0x1] }
 0x282   : > { %v6281_v26 = vpop.permute.xlu0 %6280  ;;  %v7873_v33 = vpop.permute.xlu1 %6395  ;;  %v1708_v44 = vsel %vm1247_vm2, %v1706_v54, %v6198_v61  ;;  %v1709_v51 = vpack.c.bf16 %v1690_v56, %v1689_v62  ;;  %v7888_v61 = vld [vmem:[%s9481_s3 + $0xc0] sm:$0xff]   ;;  %v6579_v28 = vpack.i.bf16 %v3265_v52, %v7511_v6 }
 0x283   : > { %5304 = vmatpush3.bf16.msra.mxu1 %v7881_v17  ;;  %v6283_v50 = vunpack.i.h.bf16 %v6281_v26  ;;  %v6282_v40 = vunpack.i.l.bf16 %v6281_v26  ;;  %v1712_v63 = vpack.c.bf16 %v1708_v44, %v1707_v59  ;;  %v3269_v59 = vld [vmem:[#allocation2 + $0x184] sm:$0x1] }
 0x284   : > { %6570 = vrot.lane.b32.xlu0 %v6569_v58, %s6948_s16  ;;  %5311 = vmatprep.subr.bf16.mxu1 %v7888_v61 }
 0x285   : > { %v2178_v46 = vsel %vm998_vm0, %v2052_v55, %v6283_v50  ;;  %v2177_v30 = vsel %vm998_vm0, %v7791_v45, %v6282_v40  ;;  %v3286_v50 = vld [vmem:[#allocation2 + $0x123] sm:$0xff]  ;;  %v3287_v55 = vld [vmem:[#allocation2 + $0x12b] sm:$0x1] }
 0x286   : > { %1746 = vmatmul.mubr.bf16.vlgmr.msra.gmra.mrb[8].mxu1 %v1709_v51  ;;  %v6286_v9 = vpop.permute.xlu0 %6285  ;;  %v6406_v5 = vpop.permute.xlu1 %6405  ;;  %v2179_v62 = vsel %vm1244_vm1, %v2177_v30, %v6272_v38  ;;  %v2180_v56 = vsel %vm1244_vm1, %v2178_v46, %v6273_v47  ;;  %v6589_v47 = vpack.i.bf16 %v3287_v55, %v3286_v50  ;;  %v2546_v51 = vld [vmem:[#allocation2 + $0x44] sm:$0x1]  ;;  %v7922_v50 = vld [vmem:[#allocation2 + $0xf0] sm:$0xff]  ;;  %v2068_v55 = vld [vmem:[#allocation2 + $0xf8] sm:$0x1] }
 0x287   : > { %5312 = vmatpush3.bf16.msra.mxu1 %v7460_v8  ;;  %1786 = vmatprep.mubr.bf16.mxu1 %v1712_v63  ;;  %v6288_v54 = vunpack.i.h.bf16 %v6286_v9  ;;  %v6287_v26 = vunpack.i.l.bf16 %v6286_v9  ;;  %v6407_v58 = vunpack.i.l.bf16 %v6406_v5  ;;  %v6408_v45 = vunpack.i.h.bf16 %v6406_v5 }
 0x288   : > { %6580 = vrot.lane.b32.xlu0 %v6579_v28, %s6950_s22  ;;  %5313 = vmatprep.subr.bf16.mxu1 %v7468_v19  ;;  %v6599_v63 = vpack.i.bf16 %v3269_v59, %v7470_v21  ;;  %v3273_v28 = vld [vmem:[#allocation2 + $0x185] sm:$0x1] }
 0x289   : > { %v2669_v6 = vsel %vm998_vm0, %v7898_v15, %v6407_v58  ;;  %v7905_v44 = vsel %vm1247_vm2, %v2179_v62, %v6287_v26  ;;  %v7908_v8 = vsel %vm1247_vm2, %v2180_v56, %v6288_v54  ;;  %v2670_v30 = vsel %vm998_vm0, %v2546_v51, %v6408_v45 }
 0x28a   : > { %v6301_v40 = vpop.permute.xlu0 %6300  ;;  %v6416_v52 = vpop.permute.xlu1 %6415  ;;  %v6604_v21 = vpack.i.bf16 %v3273_v28, %v7772_v48  ;;  %v6178_v48 = vunpack.i.h.bf16 %v7378_v23 }
 0x28b   : > { %5314 = vmatpush3.bf16.msra.mxu1 %v7480_v29  ;;  %v6418_v19 = vunpack.i.h.bf16 %v6416_v52  ;;  %v6417_v46 = vunpack.i.l.bf16 %v6416_v52  ;;  %v6303_v26 = vunpack.i.h.bf16 %v6301_v40  ;;  %v6302_v58 = vunpack.i.l.bf16 %v6301_v40 }
 0x28c   : > { %6590 = vrot.lane.b32.xlu0 %v6589_v47, %s6948_s16  ;;  %5315 = vmatprep.subr.bf16.mxu1 %v7499_v49 }
 0x28d   : > { %v2671_v9 = vsel %vm1244_vm1, %v2669_v6, %v6417_v46  ;;  %v2672_v5 = vsel %vm1244_vm1, %v2670_v30, %v6418_v19  ;;  %v3288_v6 = vld [vmem:[#allocation2 + $0x187] sm:$0xff]  ;;  %v6177_v30 = vunpack.i.l.bf16 %v7378_v23  ;;  %v6187_v23 = vunpack.i.l.bf16 %v7388_v34 }
 0x28e   : > { %v6311_v62 = vpop.permute.xlu0 %6310  ;;  %v7919_v56 = vpop.permute.xlu1 %6430 }
 0x28f   : > { %5316 = vmatpush3.bf16.msra.mxu1 %v7509_v4  ;;  %v6313_v29 = vunpack.i.h.bf16 %v6311_v62  ;;  %v6312_v54 = vunpack.i.l.bf16 %v6311_v62  ;;  %v3289_v4 = vld [vmem:[#allocation2 + $0x18f] sm:$0x1] }
 0x290   : > { %6600 = vrot.lane.b32.xlu0 %v6599_v63, %s6949_s21  ;;  %5317 = vmatprep.subr.bf16.mxu1 %v7528_v16  ;;  %v6614_v63 = vpack.i.bf16 %v3289_v4, %v3288_v6  ;;  %v1697_v6 = vsel %vm998_vm0, %v7415_v13, %v6177_v30  ;;  %v6328_v30 = vunpack.i.h.bf16 %v7700_v12 }
 0x291   : > { %v2190_v49 = vsel %vm998_vm0, %v2068_v55, %v6313_v29  ;;  %v2189_v45 = vsel %vm998_vm0, %v7922_v50, %v6312_v54  ;;  %v6188_v54 = vunpack.i.h.bf16 %v7388_v34  ;;  %v6202_v55 = vunpack.i.l.bf16 %v7396_v42 }
 0x292   : > { %v6316_v59 = vpop.permute.xlu0 %6315  ;;  %v6441_v52 = vpop.permute.xlu1 %6440  ;;  %v2191_v40 = vsel %vm1244_vm1, %v2189_v45, %v6302_v58  ;;  %v2192_v47 = vsel %vm1244_vm1, %v2190_v49, %v6303_v26  ;;  %v6203_v58 = vunpack.i.h.bf16 %v7396_v42  ;;  %v1574_v49 = vld [vmem:[#allocation2 + $0x1c] sm:$0x1]  ;;  %v6223_v34 = vunpack.i.h.bf16 %v7716_v3 }
 0x293   : > { %5318 = vmatpush3.bf16.msra.mxu1 %v7541_v60  ;;  %v6318_v51 = vunpack.i.h.bf16 %v6316_v59  ;;  %v6317_v19 = vunpack.i.l.bf16 %v6316_v59  ;;  %v6443_v16 = vunpack.i.h.bf16 %v6441_v52  ;;  %v6442_v46 = vunpack.i.l.bf16 %v6441_v52 }
 0x294   : > { %6605 = vrot.lane.b32.xlu0 %v6604_v21, %s6950_s22  ;;  %5319 = vmatprep.subr.bf16.mxu1 %v7549_v36  ;;  %v6222_v21 = vunpack.i.l.bf16 %v7716_v3  ;;  %v1698_v45 = vsel %vm998_vm0, %v1574_v49, %v6178_v48  ;;  %v1699_v4 = vsel %vm1244_vm1, %v1697_v6, %v6187_v23  ;;  %v6228_v48 = vunpack.i.h.bf16 %v7734_v22  ;;  %v8001_v49 = vld [vmem:[#allocation2 + $0x46] sm:$0xff] }
 0x295   : > { %v7938_v28 = vsel %vm1247_vm2, %v2671_v9, %v6442_v46  ;;  %v7941_v62 = vsel %vm1247_vm2, %v2672_v5, %v6443_v16  ;;  %v7944_v60 = vsel %vm1247_vm2, %v2191_v40, %v6317_v19  ;;  %v7947_v29 = vsel %vm1247_vm2, %v2192_v47, %v6318_v51  ;;  %v1809_v40 = vld [vmem:[#allocation2 + $0xe4] sm:$0x1] }
 0x296   : > { %9554 = vst [vmem:[#allocation25_spill] sm:$0xff] %v7938_v28  ;;  %9555 = vst [vmem:[#allocation26_spill] sm:$0xff] %v7941_v62  ;;  %v7953_v26 = vpop.permute.xlu0 %6330  ;;  %v7955_v9 = vpop.permute.xlu1 %6445  ;;  %v1700_v42 = vsel %vm1244_vm1, %v1698_v45, %v6188_v54  ;;  %v1934_v47 = vsel %vm998_vm0, %v7809_v1, %v6222_v21  ;;  %v1935_v13 = vsel %vm998_vm0, %v1809_v40, %v6223_v34  ;;  %v6227_v51 = vunpack.i.l.bf16 %v7734_v22  ;;  %v3040_v62 = vld [vmem:[#allocation2 + $0x120] sm:$0x1] }
 0x297   : > { %5320 = vmatpush3.bf16.msra.mxu1 %v7559_v53  ;;  %v7976_v53 = vsel %vm1247_vm2, %v1699_v4, %v6202_v55  ;;  %v1702_v3 = vsel %vm1247_vm2, %v1700_v42, %v6203_v58  ;;  %v6373_v19 = vunpack.i.h.bf16 %v7778_v57  ;;  %v6372_v16 = vunpack.i.l.bf16 %v7778_v57  ;;  %v7994_v58 = vld [vmem:[#allocation2 + $0xfa] sm:$0xff]  ;;  %v2311_v55 = vld [vmem:[#allocation2 + $0x102] sm:$0x1] }
 0x298   : > { %6615 = vrot.lane.b32.xlu0 %v6614_v63, %s6950_s22  ;;  %5321 = vmatprep.subr.bf16.mxu1 %v7576_v10  ;;  %v6212_v10 = vunpack.i.l.bf16 %v7698_v35  ;;  %v6213_v46 = vunpack.i.h.bf16 %v7698_v35  ;;  %v6327_v1 = vunpack.i.l.bf16 %v7700_v12  ;;  %v1711_v54 = vpack.c.bf16 %v1702_v3, %v7976_v53 }
 0x299   : > { %v2433_v21 = vsel %vm998_vm0, %v2311_v55, %v6373_v19  ;;  %v2432_v12 = vsel %vm998_vm0, %v7994_v58, %v6372_v16  ;;  %v6338_v53 = vunpack.i.h.bf16 %v7718_v24  ;;  %v6337_v3 = vunpack.i.l.bf16 %v7718_v24 }
 0x29a   : > { %v7971_v59 = vpop.permute.xlu0 %6340  ;;  %v7973_v52 = vpop.permute.xlu1 %6455  ;;  %v1936_v23 = vsel %vm1244_vm1, %v1934_v47, %v6212_v10  ;;  %v1937_v22 = vsel %vm1244_vm1, %v1935_v13, %v6213_v46  ;;  %v2287_v13 = vld [vmem:[#allocation2 + $0x30] sm:$0x1] }
 0x29b   : > { %5322 = vmatpush3.bf16.msra.mxu1 %v7587_v27  ;;  %v1938_v45 = vsel %vm1247_vm2, %v1936_v23, %v6227_v51  ;;  %v1939_v42 = vsel %vm1247_vm2, %v1937_v22, %v6228_v48  ;;  %v6343_v10 = vunpack.i.h.bf16 %v7971_v59  ;;  %v6342_v40 = vunpack.i.l.bf16 %v7971_v59  ;;  %v2789_v51 = vld [vmem:[#allocation2 + $0x4e] sm:$0x1]  ;;  %v2295_v23 = vld [vmem:[#allocation2 + $0xf8] sm:$0x1] }
 0x29c   : > { %5323 = vmatprep.subr.bf16.mxu1 %v7610_v37  ;;  %v2415_v48 = vsel %vm998_vm0, %v2287_v13, %v6328_v30  ;;  %v1953_v59 = vpack.c.bf16 %v1939_v42, %v1938_v45 }
 0x29e   : > { %v6351_v63 = vpop.permute.xlu0 %6350  ;;  %v6466_v27 = vpop.permute.xlu1 %6465 }
 0x29f   : > { %5324 = vmatpush3.bf16.msra.mxu1 %v7626_v41  ;;  %v6353_v37 = vunpack.i.h.bf16 %v6351_v63  ;;  %v6352_v57 = vunpack.i.l.bf16 %v6351_v63  ;;  %v6467_v35 = vunpack.i.l.bf16 %v6466_v27  ;;  %v6468_v34 = vunpack.i.h.bf16 %v6466_v27 }
 0x2a0   : > { %5325 = vmatprep.subr.bf16.mxu1 %v7647_v0  ;;  %v2414_v27 = vsel %vm998_vm0, %v7635_v32, %v6327_v1  ;;  %v6333_v32 = vunpack.i.h.bf16 %v7953_v26  ;;  %v6332_v1 = vunpack.i.l.bf16 %v7953_v26 }
 0x2a1   : > { %v2434_v6 = vsel %vm1244_vm1, %v2432_v12, %v6352_v57  ;;  %v2435_v41 = vsel %vm1244_vm1, %v2433_v21, %v6353_v37  ;;  %v2912_v4 = vsel %vm998_vm0, %v8001_v49, %v6467_v35  ;;  %v2913_v24 = vsel %vm998_vm0, %v2789_v51, %v6468_v34 }
 0x2a2   : > { %v6361_v0 = vpop.permute.xlu0 %6360  ;;  %v6476_v47 = vpop.permute.xlu1 %6475  ;;  %v2416_v30 = vsel %vm1244_vm1, %v2414_v27, %v6337_v3  ;;  %v2417_v35 = vsel %vm1244_vm1, %v2415_v48, %v6338_v53 }
 0x2a3   : > { %5326 = vmatpush3.bf16.msra.mxu1 %v7662_v39  ;;  %v6363_v19 = vunpack.i.h.bf16 %v6361_v0  ;;  %v6362_v16 = vunpack.i.l.bf16 %v6361_v0  ;;  %v6478_v46 = vunpack.i.h.bf16 %v6476_v47  ;;  %v6477_v63 = vunpack.i.l.bf16 %v6476_v47 }
 0x2a4   : > { %5333 = vmatprep.subr.bf16.mxu1 %v7693_v31  ;;  %v2418_v12 = vsel %vm1247_vm2, %v2416_v30, %v6342_v40  ;;  %v6433_v30 = vunpack.i.h.bf16 %v7919_v56 }
 0x2a5   : > { %v2421_v55 = vsel %vm998_vm0, %v2295_v23, %v6363_v19  ;;  %v2420_v39 = vsel %vm998_vm0, %v7922_v50, %v6362_v16  ;;  %v2914_v37 = vsel %vm1244_vm1, %v2912_v4, %v6477_v63  ;;  %v2915_v57 = vsel %vm1244_vm1, %v2913_v24, %v6478_v46  ;;  %v9557_v16 = vld [vmem:[#allocation13_spill] sm:$0xff] }
 0x2a6   : > { %1787 = vmatmul.mubr.bf16.vlgmr.msra.gmra.mrb[12].mxu1 %v1711_v54  ;;  %v6366_v22 = vpop.permute.xlu0 %6365  ;;  %v8029_v21 = vpop.permute.xlu1 %6490  ;;  %v2419_v50 = vsel %vm1247_vm2, %v2417_v35, %v6343_v10  ;;  %v2422_v4 = vsel %vm1244_vm1, %v2420_v39, %v6332_v1  ;;  %v2423_v42 = vsel %vm1244_vm1, %v2421_v55, %v6333_v32  ;;  %v9556_v10 = vld [vmem:[#allocation12_spill] sm:$0xff]  ;;  %v9561_v39 = vld [vmem:[#allocation14_spill] sm:$0xff]  ;;  %v6432_v35 = vunpack.i.l.bf16 %v7919_v56 }
 0x2a7   : > { %5334 = vmatpush3.bf16.msra.mxu1 %v7705_v2  ;;  %1988 = vmatprep.mubr.bf16.mxu1 %v1953_v59  ;;  %v6368_v34 = vunpack.i.h.bf16 %v6366_v22  ;;  %v6367_v45 = vunpack.i.l.bf16 %v6366_v22  ;;  %v2438_v53 = vpack.c.bf16 %v2419_v50, %v2418_v12  ;;  %v9564_v32 = vld [vmem:[#allocation18_spill] sm:$0xff]  ;;  %v8076_v12 = vld [vmem:[#allocation2 + $0x104] sm:$0xff]  ;;  %v2554_v50 = vld [vmem:[#allocation2 + $0x10c] sm:$0x1] }
 0x2a8   : > { %5335 = vmatprep.subr.bf16.mxu1 %v7713_v11  ;;  %v2675_v56 = vsel %vm998_vm0, %v8076_v12, %v6432_v35 }
 0x2a9   : > { %v2424_v26 = vsel %vm1247_vm2, %v2422_v4, %v6367_v45  ;;  %v2425_v54 = vsel %vm1247_vm2, %v2423_v42, %v6368_v34  ;;  %v9565_v34 = vld [vmem:[#allocation19_spill] sm:$0xff] }
 0x2aa   : > { %v6376_v3 = vpop.permute.xlu0 %6375  ;;  %v6501_v40 = vpop.permute.xlu1 %6500  ;;  %v2439_v0 = vpack.c.bf16 %v2425_v54, %v2424_v26  ;;  %v2676_v26 = vsel %vm998_vm0, %v2554_v50, %v6433_v30  ;;  %v8083_v54 = vld [vmem:[#allocation2 + $0x50] sm:$0xff]  ;;  %v9567_v30 = vld [vmem:[#allocation21_spill] sm:$0xff] }
 0x2ab   : > { %5336 = vmatpush3.bf16.msra.mxu1 %v9556_v10  ;;  %v6378_v47 = vunpack.i.h.bf16 %v6376_v3  ;;  %v6377_v13 = vunpack.i.l.bf16 %v6376_v3  ;;  %v6503_v51 = vunpack.i.h.bf16 %v6501_v40  ;;  %v6502_v19 = vunpack.i.l.bf16 %v6501_v40  ;;  %v9566_v3 = vld [vmem:[#allocation20_spill] sm:$0xff] }
 0x2ac   : > { %5337 = vmatprep.subr.bf16.mxu1 %v9557_v16  ;;  %2474 = vmatprep.mubr.bf16.mxu0 %v2439_v0 }
 0x2ad   : > { %v8042_v46 = vsel %vm1247_vm2, %v2914_v37, %v6502_v19  ;;  %v8045_v63 = vsel %vm1247_vm2, %v2915_v57, %v6503_v51  ;;  %2475 = vmatmul.mubr.bf16.vlgmr.msra.gmra.mrb[100].mxu0 %v2438_v53  ;;  %v8048_v48 = vsel %vm1247_vm2, %v2434_v6, %v6377_v13  ;;  %v8051_v27 = vsel %vm1247_vm2, %v2435_v41, %v6378_v47  ;;  %v9562_v6 = vld [vmem:[#allocation16_spill] sm:$0xff]  ;;  %v9563_v57 = vld [vmem:[#allocation17_spill] sm:$0xff]  ;;  %v3032_v19 = vld [vmem:[#allocation2 + $0x58] sm:$0x1] }
 0x2ae   : > { %9558 = vst [vmem:[#allocation12_spill] sm:$0xff] %v8042_v46  ;;  %9559 = vst [vmem:[#allocation13_spill] sm:$0xff] %v8045_v63  ;;  %5466 = vmatpush3.bf16.msra.mxu0 %v7705_v2  ;;  %v8056_v23 = vpop.permute.xlu0 %6390  ;;  %v8058_v59 = vpop.permute.xlu1 %6505  ;;  %v2530_v46 = vld [vmem:[#allocation2 + $0x3a] sm:$0x1] }
 0x2af   : > { %9560 = vst [vmem:[#allocation27_spill] sm:$0xff] %v8048_v48  ;;  %5338 = vmatpush3.bf16.msra.mxu1 %v9561_v39  ;;  %5467 = vmatprep.subr.bf16.mxu0 %v7713_v11  ;;  %v8309_v48 = vld [vmem:[#allocation2 + $0x118] sm:$0xff] }
 0x2b0   : > { %5339 = vmatprep.subr.bf16.mxu1 %v9562_v6 }
 0x2b2   : > { %5468 = vmatpush3.bf16.msra.mxu0 %v9556_v10  ;;  %v8066_v41 = vpop.permute.xlu0 %6400  ;;  %v8068_v37 = vpop.permute.xlu1 %6515 }
 0x2b3   : > { %5340 = vmatpush3.bf16.msra.mxu1 %v9563_v57  ;;  %5469 = vmatprep.subr.bf16.mxu0 %v9557_v16 }
 0x2b4   : > { %5341 = vmatprep.subr.bf16.mxu1 %v9564_v32 }
 0x2b6   : > { %5470 = vmatpush3.bf16.msra.mxu0 %v9561_v39  ;;  %v6411_v1 = vpop.permute.xlu0 %6410  ;;  %v6526_v22 = vpop.permute.xlu1 %6525 }
 0x2b7   : > { %5342 = vmatpush3.bf16.msra.mxu1 %v9565_v34  ;;  %v6413_v45 = vunpack.i.h.bf16 %v6411_v1  ;;  %v6412_v4 = vunpack.i.l.bf16 %v6411_v1  ;;  %v6527_v42 = vunpack.i.l.bf16 %v6526_v22  ;;  %5471 = vmatprep.subr.bf16.mxu0 %v9562_v6  ;;  %v6528_v53 = vunpack.i.h.bf16 %v6526_v22 }
 0x2b8   : > { %5343 = vmatprep.subr.bf16.mxu1 %v9566_v3 }
 0x2b9   : > { %v2677_v40 = vsel %vm1244_vm1, %v2675_v56, %v6412_v4  ;;  %v2678_v0 = vsel %vm1244_vm1, %v2676_v26, %v6413_v45  ;;  %v3155_v47 = vsel %vm998_vm0, %v8083_v54, %v6527_v42  ;;  %v3156_v4 = vsel %vm998_vm0, %v3032_v19, %v6528_v53  ;;  %v2538_v56 = vld [vmem:[#allocation2 + $0x102] sm:$0x1]  ;;  %v9568_v45 = vld [vmem:[#allocation22_spill] sm:$0xff] }
 0x2ba   : > { %5472 = vmatpush3.bf16.msra.mxu0 %v9563_v57  ;;  %v6421_v13 = vpop.permute.xlu0 %6420  ;;  %v6536_v51 = vpop.permute.xlu1 %6535 }
 0x2bb   : > { %5344 = vmatpush3.bf16.msra.mxu1 %v9567_v30  ;;  %v6423_v35 = vunpack.i.h.bf16 %v6421_v13  ;;  %v6422_v1 = vunpack.i.l.bf16 %v6421_v13  ;;  %v6538_v50 = vunpack.i.h.bf16 %v6536_v51  ;;  %v6537_v22 = vunpack.i.l.bf16 %v6536_v51  ;;  %5473 = vmatprep.subr.bf16.mxu0 %v9564_v32 }
 0x2bc   : > { %5345 = vmatprep.subr.bf16.mxu1 %v9568_v45  ;;  %v6393_v13 = vunpack.i.h.bf16 %v8056_v23  ;;  %v6392_v51 = vunpack.i.l.bf16 %v8056_v23 }
 0x2bd   : > { %v2664_v42 = vsel %vm998_vm0, %v2538_v56, %v6423_v35  ;;  %v2663_v26 = vsel %vm998_vm0, %v7994_v58, %v6422_v1  ;;  %v3157_v24 = vsel %vm1244_vm1, %v3155_v47, %v6537_v22  ;;  %v3158_v36 = vsel %vm1244_vm1, %v3156_v4, %v6538_v50 }
 0x2be   : > { %5474 = vmatpush3.bf16.msra.mxu0 %v9565_v34  ;;  %v6426_v55 = vpop.permute.xlu0 %6425  ;;  %v8103_v53 = vpop.permute.xlu1 %6550  ;;  %v6388_v58 = vunpack.i.h.bf16 %v7845_v7  ;;  %v2665_v47 = vsel %vm1244_vm1, %v2663_v26, %v6392_v51  ;;  %v2666_v1 = vsel %vm1244_vm1, %v2664_v42, %v6393_v13  ;;  %v6387_v22 = vunpack.i.l.bf16 %v7845_v7 }
 0x2bf   : > { %5346 = vmatpush3.bf16.msra.mxu1 %v7857_v20  ;;  %v6428_v19 = vunpack.i.h.bf16 %v6426_v55  ;;  %v6427_v35 = vunpack.i.l.bf16 %v6426_v55  ;;  %5475 = vmatprep.subr.bf16.mxu0 %v9566_v3  ;;  %v6398_v4 = vunpack.i.h.bf16 %v7873_v33  ;;  %v6397_v55 = vunpack.i.l.bf16 %v7873_v33 }
 0x2c0   : > { %5347 = vmatprep.subr.bf16.mxu1 %v7866_v25  ;;  %v2658_v7 = vsel %vm998_vm0, %v2530_v46, %v6388_v58  ;;  %v6402_v33 = vunpack.i.l.bf16 %v8066_v41  ;;  %v9573_v46 = vld [vmem:[#allocation15_spill] sm:$0xff] }
 0x2c1   : > { %v2667_v23 = vsel %vm1247_vm2, %v2665_v47, %v6427_v35  ;;  %v2668_v50 = vsel %vm1247_vm2, %v2666_v1, %v6428_v19  ;;  %v6403_v19 = vunpack.i.h.bf16 %v8066_v41  ;;  %v2657_v58 = vsel %vm998_vm0, %v9573_v46, %v6387_v22  ;;  %v8152_v22 = vld [vmem:[%s9481_s3 + $0x80] sm:$0xff]   ;;  %v2797_v46 = vld [vmem:[#allocation2 + $0x116] sm:$0x1] }
 0x2c2   : > { %5476 = vmatpush3.bf16.msra.mxu0 %v9567_v30  ;;  %v6436_v56 = vpop.permute.xlu0 %6435  ;;  %v6561_v5 = vpop.permute.xlu1 %6560  ;;  %v2682_v38 = vpack.c.bf16 %v2668_v50, %v2667_v23  ;;  %v9574_v23 = vld [vmem:[#allocation5_spill] sm:$0xff] }
 0x2c3   : > { %5348 = vmatpush3.bf16.msra.mxu1 %v7881_v17  ;;  %v6438_v26 = vunpack.i.h.bf16 %v6436_v56  ;;  %v6437_v42 = vunpack.i.l.bf16 %v6436_v56  ;;  %v6563_v13 = vunpack.i.h.bf16 %v6561_v5  ;;  %v6562_v51 = vunpack.i.l.bf16 %v6561_v5  ;;  %5477 = vmatprep.subr.bf16.mxu0 %v9568_v45 }
 0x2c4   : > { %5355 = vmatprep.subr.bf16.mxu1 %v7888_v61  ;;  %2717 = vmatprep.mubr.bf16.mxu0 %v2682_v38  ;;  %v9575_v38 = vld [vmem:[#allocation4_spill] sm:$0xff]  ;;  %v9577_v56 = vpack.c.bf16 %v7839_v18, %v7836_v14  ;;  %v8173_v14 = vld [vmem:[%s9481_s3 + $0x88] sm:$0xff]   ;;  %v6493_v18 = vunpack.i.h.bf16 %v8029_v21 }
 0x2c5   : > { %v8124_v35 = vsel %vm1247_vm2, %v3157_v24, %v6562_v51  ;;  %v8127_v47 = vsel %vm1247_vm2, %v3158_v36, %v6563_v13  ;;  %v8130_v1 = vsel %vm1247_vm2, %v2677_v40, %v6437_v42  ;;  %v8133_v5 = vsel %vm1247_vm2, %v2678_v0, %v6438_v26 }
 0x2c6   : > { %9569 = vst [vmem:[#allocation14_spill] sm:$0xff] %v8124_v35  ;;  %9570 = vst [vmem:[#allocation16_spill] sm:$0xff] %v8127_v47  ;;  %v9576_v50 = vpack.c.bf16 %v9574_v23, %v9575_v38  ;;  %5478 = vmatpush3.bf16.msra.mxu0 %v7857_v20  ;;  %v8143_v36 = vpop.permute.xlu0 %6450  ;;  %v2659_v40 = vsel %vm1244_vm1, %v2657_v58, %v6397_v55  ;;  %v2660_v0 = vsel %vm1244_vm1, %v2658_v7, %v6398_v4  ;;  %v8163_v55 = vld [vmem:[%s9481_s3 + $0xc8] sm:$0xff]   ;;  %v8182_v7 = vld [vmem:[%s9481_s3 + $0xd0] sm:$0xff]  }
 0x2c7   : > { %9571 = vst [vmem:[#allocation17_spill] sm:$0xff] %v8130_v1  ;;  %9572 = vst [vmem:[#allocation18_spill] sm:$0xff] %v8133_v5  ;;  %v2661_v26 = vsel %vm1247_vm2, %v2659_v40, %v6402_v33  ;;  %v2662_v42 = vsel %vm1247_vm2, %v2660_v0, %v6403_v19  ;;  %5479 = vmatprep.subr.bf16.mxu0 %v7866_v25  ;;  %v6492_v51 = vunpack.i.l.bf16 %v8029_v21  ;;  %v8186_v33 = vld [vmem:[#allocation2 + $0x10e] sm:$0xff]  ;;  %v8201_v40 = vld [vmem:[%s9481_s3 + $0xd8] sm:$0xff]  }
 0x2c8   : > { %1989 = vmatmul.mubr.bf16.vlgmr.msra.gmra.mrb[16].mxu1 %v9576_v50  ;;  %v2681_v13 = vpack.c.bf16 %v2662_v42, %v2661_v26  ;;  %v8191_v58 = vld [vmem:[%s9481_s3 + $0x90] sm:$0xff]   ;;  %v2919_v38 = vsel %vm998_vm0, %v2797_v46, %v6493_v18  ;;  %v8210_v42 = vld [vmem:[%s9481_s3 + $0x98] sm:$0xff]   ;;  %v8247_v47 = vld [vmem:[%s9481_s3 + $0xa8] sm:$0xff]  }
 0x2c9   : > { %5356 = vmatpush3.bf16.msra.mxu1 %v8152_v22  ;;  %2029 = vmatprep.mubr.bf16.mxu1 %v9577_v56  ;;  %v2918_v50 = vsel %vm998_vm0, %v8186_v33, %v6492_v51  ;;  %v2781_v51 = vld [vmem:[#allocation2 + $0x10c] sm:$0x1]  ;;  %v9580_v1 = vld [vmem:[#allocation7_spill] sm:$0xff]  ;;  %v9581_v5 = vld [vmem:[#allocation6_spill] sm:$0xff] }
 0x2ca   : > { %5357 = vmatprep.subr.bf16.mxu1 %v8163_v55  ;;  %5480 = vmatpush3.bf16.msra.mxu0 %v7881_v17  ;;  %v8168_v4 = vpop.permute.xlu0 %6460  ;;  %v9582_v43 = vpack.c.bf16 %v9580_v1, %v9581_v5 }
 0x2cb   : > { %5509 = vmatprep.subr.bf16.mxu0 %v7693_v31 }
 0x2cd   : > { %5358 = vmatpush3.bf16.msra.mxu1 %v8173_v14  ;;  %2718 = vmatmul.mubr.bf16.vlgmr.msra.gmra.mrb[104].mxu0 %v2681_v13 }
 0x2ce   : > { %5359 = vmatprep.subr.bf16.mxu1 %v8182_v7  ;;  %5510 = vmatpush3.bf16.msra.mxu0 %v7705_v2  ;;  %v6471_v19 = vpop.permute.xlu0 %6470 }
 0x2cf   : > { %v6473_v21 = vunpack.i.h.bf16 %v6471_v19  ;;  %v6472_v23 = vunpack.i.l.bf16 %v6471_v19  ;;  %5511 = vmatprep.subr.bf16.mxu0 %v7713_v11  ;;  %v8217_v19 = vld [vmem:[%s9481_s3 + $0xe0] sm:$0xff]  }
 0x2d1   : > { %5360 = vmatpush3.bf16.msra.mxu1 %v8191_v58  ;;  %v2920_v0 = vsel %vm1244_vm1, %v2918_v50, %v6472_v23  ;;  %v2921_v56 = vsel %vm1244_vm1, %v2919_v38, %v6473_v21  ;;  %v6453_v23 = vunpack.i.h.bf16 %v8143_v36  ;;  %v6452_v38 = vunpack.i.l.bf16 %v8143_v36 }
 0x2d2   : > { %5361 = vmatprep.subr.bf16.mxu1 %v8201_v40  ;;  %5512 = vmatpush3.bf16.msra.mxu0 %v9556_v10  ;;  %v6481_v26 = vpop.permute.xlu0 %6480 }
 0x2d3   : > { %v6483_v13 = vunpack.i.h.bf16 %v6481_v26  ;;  %v6482_v18 = vunpack.i.l.bf16 %v6481_v26  ;;  %5513 = vmatprep.subr.bf16.mxu0 %v9557_v16  ;;  %v8229_v26 = vld [vmem:[%s9481_s3 + $0xa0] sm:$0xff]  }
 0x2d5   : > { %5362 = vmatpush3.bf16.msra.mxu1 %v8210_v42  ;;  %v2907_v46 = vsel %vm998_vm0, %v2781_v51, %v6483_v13  ;;  %v2906_v21 = vsel %vm998_vm0, %v8076_v12, %v6482_v18  ;;  %v8236_v12 = vld [vmem:[%s9481_s3 + $0xe8] sm:$0xff]  }
 0x2d6   : > { %5363 = vmatprep.subr.bf16.mxu1 %v8217_v19  ;;  %5514 = vmatpush3.bf16.msra.mxu0 %v9561_v39  ;;  %v6486_v50 = vpop.permute.xlu0 %6485  ;;  %v2908_v36 = vsel %vm1244_vm1, %v2906_v21, %v6452_v38  ;;  %v2909_v13 = vsel %vm1244_vm1, %v2907_v46, %v6453_v23  ;;  %v8271_v38 = vld [vmem:[%s9481_s3 + $0xb0] sm:$0xff]  }
 0x2d7   : > { %v6488_v41 = vunpack.i.h.bf16 %v6486_v50  ;;  %v6487_v24 = vunpack.i.l.bf16 %v6486_v50  ;;  %5515 = vmatprep.subr.bf16.mxu0 %v9562_v6 }
 0x2d9   : > { %5364 = vmatpush3.bf16.msra.mxu1 %v8229_v26  ;;  %v2910_v18 = vsel %vm1247_vm2, %v2908_v36, %v6487_v24  ;;  %v2911_v51 = vsel %vm1247_vm2, %v2909_v13, %v6488_v41  ;;  %v8254_v24 = vld [vmem:[%s9481_s3 + $0xf0] sm:$0xff]   ;;  %v6458_v36 = vunpack.i.h.bf16 %v7973_v52  ;;  %v6553_v13 = vunpack.i.h.bf16 %v8103_v53 }
 0x2da   : > { %5365 = vmatprep.subr.bf16.mxu1 %v8236_v12  ;;  %5516 = vmatpush3.bf16.msra.mxu0 %v9563_v57  ;;  %v6496_v50 = vpop.permute.xlu0 %6495  ;;  %v2925_v35 = vpack.c.bf16 %v2911_v51, %v2910_v18  ;;  %v8292_v18 = vld [vmem:[%s9481_s3 + $0xb8] sm:$0xff]   ;;  %v6463_v51 = vunpack.i.h.bf16 %v8168_v4 }
 0x2db   : > { %v6498_v63 = vunpack.i.h.bf16 %v6496_v50  ;;  %v6497_v28 = vunpack.i.l.bf16 %v6496_v50  ;;  %5517 = vmatprep.subr.bf16.mxu0 %v9564_v32  ;;  %v6462_v50 = vunpack.i.l.bf16 %v8168_v4 }
 0x2dc   : > { %2960 = vmatprep.mubr.bf16.mxu0 %v2925_v35  ;;  %v6448_v35 = vunpack.i.h.bf16 %v7955_v9 }
 0x2dd   : > { %5366 = vmatpush3.bf16.msra.mxu1 %v8247_v47  ;;  %v8258_v41 = vsel %vm1247_vm2, %v2920_v0, %v6497_v28  ;;  %v8261_v46 = vsel %vm1247_vm2, %v2921_v56, %v6498_v63  ;;  %v8278_v28 = vld [vmem:[%s9481_s3 + $0xf8] sm:$0xff]   ;;  %v6447_v63 = vunpack.i.l.bf16 %v7955_v9  ;;  %v6457_v0 = vunpack.i.l.bf16 %v7973_v52  ;;  %v2773_v52 = vld [vmem:[#allocation2 + $0x44] sm:$0x1] }
 0x2de   : > { %5367 = vmatprep.subr.bf16.mxu1 %v8254_v24  ;;  %9578 = vst [vmem:[#allocation19_spill] sm:$0xff] %v8258_v41  ;;  %9579 = vst [vmem:[#allocation20_spill] sm:$0xff] %v8261_v46  ;;  %5518 = vmatpush3.bf16.msra.mxu0 %v9565_v34  ;;  %v8264_v21 = vpop.permute.xlu0 %6510  ;;  %v6552_v9 = vunpack.i.l.bf16 %v8103_v53  ;;  %v2901_v41 = vsel %vm998_vm0, %v2773_v52, %v6448_v35 }
 0x2df   : > { %5519 = vmatprep.subr.bf16.mxu0 %v9566_v3  ;;  %v2900_v23 = vsel %vm998_vm0, %v7898_v15, %v6447_v63  ;;  %v2903_v4 = vsel %vm1244_vm1, %v2901_v41, %v6458_v36  ;;  %v9583_v15 = vpack.c.bf16 %v7908_v8, %v7905_v44 }
 0x2e0   : > { %v2902_v46 = vsel %vm1244_vm1, %v2900_v23, %v6457_v0  ;;  %v2905_v5 = vsel %vm1247_vm2, %v2903_v4, %v6463_v51 }
 0x2e1   : > { %5368 = vmatpush3.bf16.msra.mxu1 %v8271_v38  ;;  %v2904_v1 = vsel %vm1247_vm2, %v2902_v46, %v6462_v50  ;;  %v8329_v46 = vld [vmem:[%s9481_s3 + $0x40] sm:$0xff]  }
 0x2e2   : > { %5369 = vmatprep.subr.bf16.mxu1 %v8278_v28  ;;  %5520 = vmatpush3.bf16.msra.mxu0 %v9567_v30  ;;  %v8285_v56 = vpop.permute.xlu0 %6520  ;;  %v2924_v8 = vpack.c.bf16 %v2905_v5, %v2904_v1 }
 0x2e3   : > { %5521 = vmatprep.subr.bf16.mxu0 %v9568_v45 }
 0x2e5   : > { %5370 = vmatpush3.bf16.msra.mxu1 %v8292_v18 }
 0x2e6   : > { %5377 = vmatprep.subr.bf16.mxu1 %v7693_v31  ;;  %5522 = vmatpush3.bf16.msra.mxu0 %v7857_v20  ;;  %v6531_v53 = vpop.permute.xlu0 %6530  ;;  %v3162_v31 = vsel %vm998_vm0, %v3040_v62, %v6553_v13  ;;  %v6512_v13 = vunpack.i.l.bf16 %v8264_v21 }
 0x2e7   : > { %v6533_v23 = vunpack.i.h.bf16 %v6531_v53  ;;  %v6532_v63 = vunpack.i.l.bf16 %v6531_v53  ;;  %5523 = vmatprep.subr.bf16.mxu0 %v7866_v25 }
 0x2e8   : > { %2030 = vmatmul.mubr.bf16.vlgmr.msra.gmra.mrb[20].mxu1 %v9582_v43  ;;  %v3161_v43 = vsel %vm998_vm0, %v8309_v48, %v6552_v9  ;;  %v8341_v9 = vld [vmem:[%s9481_s3] sm:$0xff]  }
 0x2e9   : > { %5378 = vmatpush3.bf16.msra.mxu1 %v7705_v2  ;;  %2231 = vmatprep.mubr.bf16.mxu1 %v9583_v15  ;;  %v3163_v62 = vsel %vm1244_vm1, %v3161_v43, %v6532_v63  ;;  %v3164_v2 = vsel %vm1244_vm1, %v3162_v31, %v6533_v23  ;;  %v8366_v63 = vld [vmem:[%s9481_s3 + $0x50] sm:$0xff]  }
 0x2ea   : > { %5379 = vmatprep.subr.bf16.mxu1 %v7713_v11  ;;  %5524 = vmatpush3.bf16.msra.mxu0 %v7881_v17  ;;  %v6541_v44 = vpop.permute.xlu0 %6540  ;;  %v3024_v11 = vld [vmem:[#allocation2 + $0x116] sm:$0x1] }
 0x2eb   : > { %v6543_v41 = vunpack.i.h.bf16 %v6541_v44  ;;  %v6542_v35 = vunpack.i.l.bf16 %v6541_v44  ;;  %5553 = vmatprep.subr.bf16.mxu0 %v8329_v46 }
 0x2ed   : > { %5380 = vmatpush3.bf16.msra.mxu1 %v9556_v10  ;;  %v3150_v0 = vsel %vm998_vm0, %v3024_v11, %v6543_v41  ;;  %v3149_v36 = vsel %vm998_vm0, %v8186_v33, %v6542_v35  ;;  %2961 = vmatmul.mubr.bf16.vlgmr.msra.gmra.mrb[108].mxu0 %v2924_v8  ;;  %v6513_v10 = vunpack.i.h.bf16 %v8264_v21  ;;  %v8348_v33 = vld [vmem:[%s9481_s3 + $0x48] sm:$0xff]   ;;  %v8404_v8 = vld [vmem:[%s9481_s3 + $0x60] sm:$0xff]   ;;  %v6507_v35 = vunpack.i.l.bf16 %v8058_v59 }
 0x2ee   : > { %5381 = vmatprep.subr.bf16.mxu1 %v9557_v16  ;;  %5554 = vmatpush3.bf16.msra.mxu0 %v8341_v9  ;;  %v6546_v51 = vpop.permute.xlu0 %6545  ;;  %v3151_v21 = vsel %vm1244_vm1, %v3149_v36, %v6512_v13  ;;  %v6508_v11 = vunpack.i.h.bf16 %v8058_v59  ;;  %v3016_v59 = vld [vmem:[#allocation2 + $0x4e] sm:$0x1] }
 0x2ef   : > { %v6548_v16 = vunpack.i.h.bf16 %v6546_v51  ;;  %v6547_v50 = vunpack.i.l.bf16 %v6546_v51  ;;  %5555 = vmatprep.subr.bf16.mxu0 %v8348_v33  ;;  %v3152_v52 = vsel %vm1244_vm1, %v3150_v0, %v6513_v10  ;;  %v6517_v0 = vunpack.i.l.bf16 %v8068_v37 }
 0x2f0   : > { %v6518_v10 = vunpack.i.h.bf16 %v8068_v37 }
 0x2f1   : > { %5382 = vmatpush3.bf16.msra.mxu1 %v9561_v39  ;;  %v3153_v53 = vsel %vm1247_vm2, %v3151_v21, %v6547_v50  ;;  %v3154_v4 = vsel %vm1247_vm2, %v3152_v52, %v6548_v16  ;;  %v8359_v39 = vld [vmem:[%s9481_s3 + $0x8] sm:$0xff]   ;;  %v3267_v16 = vld [vmem:[#allocation2 + $0x120] sm:$0x1]  ;;  %v3144_v21 = vsel %vm998_vm0, %v3016_v59, %v6508_v11 }
 0x2f2   : > { %5383 = vmatprep.subr.bf16.mxu1 %v9562_v6  ;;  %5556 = vmatpush3.bf16.msra.mxu0 %v8359_v39  ;;  %v6556_v31 = vpop.permute.xlu0 %6555  ;;  %v3168_v15 = vpack.c.bf16 %v3154_v4, %v3153_v53  ;;  %v9584_v4 = vld [vmem:[#allocation9_spill] sm:$0xff]  ;;  %v8488_v59 = vld [vmem:[%s9481_s3 + $0xc0] sm:$0xff]  }
 0x2f3   : > { %v6558_v6 = vunpack.i.h.bf16 %v6556_v31  ;;  %v6557_v23 = vunpack.i.l.bf16 %v6556_v31  ;;  %5557 = vmatprep.subr.bf16.mxu0 %v8366_v63 }
 0x2f4   : > { %3203 = vmatprep.mubr.bf16.mxu0 %v3168_v15 }
 0x2f5   : > { %5384 = vmatpush3.bf16.msra.mxu1 %v9563_v57  ;;  %v8371_v43 = vsel %vm1247_vm2, %v3163_v62, %v6557_v23  ;;  %v8374_v1 = vsel %vm1247_vm2, %v3164_v2, %v6558_v6  ;;  %v8379_v57 = vld [vmem:[%s9481_s3 + $0x10] sm:$0xff]   ;;  %v8395_v62 = vld [vmem:[%s9481_s3 + $0x18] sm:$0xff]  }
 0x2f6   : > { %5385 = vmatprep.subr.bf16.mxu1 %v9564_v32  ;;  %5558 = vmatpush3.bf16.msra.mxu0 %v8379_v57  ;;  %v6571_v5 = vpop.permute.xlu0 %6570  ;;  %v3170_v44 = vpack.c.bf16 %v8374_v1, %v8371_v43  ;;  %v8388_v32 = vld [vmem:[%s9481_s3 + $0x58] sm:$0xff]  }
 0x2f7   : > { %5559 = vmatprep.subr.bf16.mxu0 %v8388_v32  ;;  %v6573_v53 = vunpack.i.h.bf16 %v6571_v5 }
 0x2f9   : > { %5386 = vmatpush3.bf16.msra.mxu1 %v9565_v34 }
 0x2fa   : > { %5387 = vmatprep.subr.bf16.mxu1 %v9566_v3  ;;  %5560 = vmatpush3.bf16.msra.mxu0 %v8395_v62  ;;  %v8398_v2 = vpop.permute.xlu0 %6580 }
 0x2fb   : > { %5561 = vmatprep.subr.bf16.mxu0 %v8404_v8 }
 0x2fd   : > { %5388 = vmatpush3.bf16.msra.mxu1 %v9567_v30 }
 0x2fe   : > { %5389 = vmatprep.subr.bf16.mxu1 %v9568_v45  ;;  %5562 = vmatpush3.bf16.msra.mxu0 %v9565_v34  ;;  %v8409_v41 = vpop.permute.xlu0 %6590  ;;  %v6522_v34 = vunpack.i.l.bf16 %v8285_v56 }
 0x2ff   : > { %5563 = vmatprep.subr.bf16.mxu0 %v9566_v3  ;;  %v6523_v3 = vunpack.i.h.bf16 %v8285_v56  ;;  %v9585_v56 = vld [vmem:[#allocation8_spill] sm:$0xff] }
 0x300   : > { %v9586_v31 = vpack.c.bf16 %v9584_v4, %v9585_v56  ;;  %v9591_v56 = vld [vmem:[#allocation27_spill] sm:$0xff] }
 0x301   : > { %5390 = vmatpush3.bf16.msra.mxu1 %v7857_v20 }
 0x302   : > { %5391 = vmatprep.subr.bf16.mxu1 %v7866_v25  ;;  %5564 = vmatpush3.bf16.msra.mxu0 %v9567_v30  ;;  %v6601_v36 = vpop.permute.xlu0 %6600  ;;  %v3143_v30 = vsel %vm998_vm0, %v8001_v49, %v6507_v35  ;;  %v3146_v49 = vsel %vm1244_vm1, %v3144_v21, %v6518_v10  ;;  %v6896_v10 = vld [vmem:[%s9481_s3 + $0x28] sm:$0xff]   ;;  %v9588_v21 = vld [vmem:[#allocation11_spill] sm:$0xff] }
 0x303   : > { %v6603_v13 = vunpack.i.h.bf16 %v6601_v36  ;;  %v6602_v51 = vunpack.i.l.bf16 %v6601_v36  ;;  %5565 = vmatprep.subr.bf16.mxu0 %v9568_v45  ;;  %v3145_v52 = vsel %vm1244_vm1, %v3143_v30, %v6517_v0  ;;  %v6572_v45 = vunpack.i.l.bf16 %v6571_v5  ;;  %v3259_v30 = vld [vmem:[#allocation2 + $0x58] sm:$0x1] }
 0x304   : > { %v3147_v15 = vsel %vm1247_vm2, %v3145_v52, %v6522_v34  ;;  %v3148_v5 = vsel %vm1247_vm2, %v3146_v49, %v6523_v3  ;;  %v6583_v3 = vunpack.i.h.bf16 %v8398_v2  ;;  %v9589_v52 = vld [vmem:[#allocation10_spill] sm:$0xff]  ;;  %v6900_v49 = vld [vmem:[%s9481_s3 + $0x78] sm:$0xff]  }
 0x305   : > { %5392 = vmatpush3.bf16.msra.mxu1 %v7881_v17  ;;  %v3393_v50 = vsel %vm998_vm0, %v3267_v16, %v6603_v13  ;;  %v3392_v37 = vsel %vm998_vm0, %v8309_v48, %v6602_v51  ;;  %v9587_v48 = vpack.c.bf16 %v7947_v29, %v7944_v60  ;;  %v3167_v29 = vpack.c.bf16 %v3148_v5, %v3147_v15  ;;  %v6897_v51 = vld [vmem:[%s9481_s3 + $0x70] sm:$0xff]   ;;  %v6901_v15 = vld [vmem:[%s9481_s3 + $0x38] sm:$0xff]  }
 0x306   : > { %5399 = vmatprep.subr.bf16.mxu1 %v7888_v61  ;;  %5566 = vmatpush3.bf16.msra.mxu0 %v7857_v20  ;;  %v6606_v61 = vpop.permute.xlu0 %6605  ;;  %v3394_v20 = vsel %vm1244_vm1, %v3392_v37, %v6572_v45  ;;  %v3395_v35 = vsel %vm1244_vm1, %v3393_v50, %v6573_v53  ;;  %v6582_v16 = vunpack.i.l.bf16 %v8398_v2  ;;  %v9590_v53 = vpack.c.bf16 %v9588_v21, %v9589_v52  ;;  %v6899_v2 = vld [vmem:[%s9481_s3 + $0x30] sm:$0xff]   ;;  %v8583_v21 = vld [vmem:[%s9483_s5 + $0x8] sm:$0xff]   ;;  %v9602_v52 = vld [vmem:[#allocation20_spill] sm:$0xff] }
 0x307   : > { %v6608_v6 = vunpack.i.h.bf16 %v6606_v61  ;;  %v6607_v23 = vunpack.i.l.bf16 %v6606_v61  ;;  %5567 = vmatprep.subr.bf16.mxu0 %v7866_v25  ;;  %v6566_v25 = vpop.permute.xlu1 %6565 }
 0x308   : > { %2232 = vmatmul.mubr.bf16.vlgmr.msra.gmra.mrb[24].mxu1 %v9586_v31  ;;  %v6567_v36 = vunpack.i.l.bf16 %v6566_v25  ;;  %v9592_v31 = vpack.c.bf16 %v8051_v27, %v9591_v56  ;;  %v8525_v27 = vld [vmem:[%s9482_s4] ss:$0 sm:$0xff]  ;;  %v8607_v56 = vld [vmem:[%s9483_s5 + $0x58] sm:$0xff]  }
 0x309   : > { %5400 = vmatpush3.bf16.msra.mxu1 %v8152_v22  ;;  %2272 = vmatprep.mubr.bf16.mxu1 %v9587_v48  ;;  %v3396_v11 = vsel %vm1247_vm2, %v3394_v20, %v6607_v23  ;;  %v3397_v0 = vsel %vm1247_vm2, %v3395_v35, %v6608_v6 }
 0x30a   : > { %5401 = vmatprep.subr.bf16.mxu1 %v8163_v55  ;;  %5568 = vmatpush3.bf16.msra.mxu0 %v7881_v17  ;;  %v3411_v60 = vpack.c.bf16 %v3397_v0, %v3396_v11  ;;  %v3386_v37 = vsel %vm998_vm0, %v8083_v54, %v6567_v36 }
 0x30b   : > { %5597 = vmatprep.subr.bf16.mxu0 %v8329_v46 }
 0x30d   : > { %5402 = vmatpush3.bf16.msra.mxu1 %v8173_v14  ;;  %3204 = vmatmul.mubr.bf16.vlgmr.msra.gmra.mrb[112].mxu0 %v3167_v29 }
 0x30e   : > { %5403 = vmatprep.subr.bf16.mxu1 %v8182_v7  ;;  %5598 = vmatpush3.bf16.msra.mxu0 %v8341_v9 }
 0x30f   : > { %3446 = vmatprep.mubr.bf16.mxu0 %v3411_v60  ;;  %5599 = vmatprep.subr.bf16.mxu0 %v8348_v33 }
 0x311   : > { %5404 = vmatpush3.bf16.msra.mxu1 %v8191_v58 }
 0x312   : > { %5405 = vmatprep.subr.bf16.mxu1 %v8201_v40  ;;  %5600 = vmatpush3.bf16.msra.mxu0 %v8359_v39 }
 0x313   : > { %5601 = vmatprep.subr.bf16.mxu0 %v8366_v63 }
 0x315   : > { %5406 = vmatpush3.bf16.msra.mxu1 %v8210_v42 }
 0x316   : > { %5407 = vmatprep.subr.bf16.mxu1 %v8217_v19  ;;  %5602 = vmatpush3.bf16.msra.mxu0 %v8379_v57  ;;  %v6894_v57 = vld [vmem:[%s9481_s3 + $0x20] sm:$0xff]  }
 0x317   : > { %5603 = vmatprep.subr.bf16.mxu0 %v8388_v32  ;;  %v6895_v32 = vld [vmem:[%s9481_s3 + $0x68] sm:$0xff]  }
 0x319   : > { %5408 = vmatpush3.bf16.msra.mxu1 %v8229_v26  ;;  %v5261_v17 = vpop.f32.mrb[0].mxu1 }
 0x31a   : > { %5409 = vmatprep.subr.bf16.mxu1 %v8236_v12  ;;  %v5262_v46 = vpop.f32.mrb[1].mxu1  ;;  %5604 = vmatpush3.bf16.msra.mxu0 %v8395_v62  ;;  %v6576_v62 = vpop.permute.xlu1 %6575 }
 0x31b   : > { %v5263_v9 = vadd.f32 %v5262_v46, %v5261_v17  ;;  %v5264_v33 = vpop.f32.mrb[2].mxu1  ;;  %5605 = vmatprep.subr.bf16.mxu0 %v8404_v8  ;;  %v6568_v8 = vunpack.i.h.bf16 %v6566_v25  ;;  %v6578_v34 = vunpack.i.h.bf16 %v6576_v62  ;;  %v6577_v13 = vunpack.i.l.bf16 %v6576_v62 }
 0x31c   : > { %v5265_v39 = vpop.f32.mrb[3].mxu1 }
 0x31d   : > { %5410 = vmatpush3.bf16.msra.mxu1 %v8247_v47  ;;  %v5266_v63 = vadd.f32 %v5265_v39, %v5264_v33  ;;  %v3387_v50 = vsel %vm998_vm0, %v3259_v30, %v6568_v8  ;;  %v3388_v45 = vsel %vm1244_vm1, %v3386_v37, %v6577_v13  ;;  %v1505_v5 = vadd.f32 %v5263_v9, %v8525_v27  ;;  %v9593_v9 = vld [vmem:[#allocation24_spill] sm:$0xff]  ;;  %v9594_v33 = vld [vmem:[#allocation23_spill] sm:$0xff]  ;;  %v9600_v30 = vld [vmem:[#allocation25_spill] sm:$0xff] }
 0x31e   : > { %5411 = vmatprep.subr.bf16.mxu1 %v8254_v24  ;;  %5606 = vmatpush3.bf16.msra.mxu0 %v6894_v57  ;;  %v3389_v4 = vsel %vm1244_vm1, %v3387_v50, %v6578_v34  ;;  %v3390_v54 = vsel %vm1247_vm2, %v3388_v45, %v6582_v16  ;;  %v9595_v39 = vpack.c.bf16 %v9593_v9, %v9594_v33  ;;  %v9597_v57 = vld [vmem:[#allocation17_spill] sm:$0xff]  ;;  %v9599_v16 = vld [vmem:[#allocation26_spill] sm:$0xff]  ;;  %v8668_v9 = vld [vmem:[%s9483_s5 + $0x78] sm:$0xff]  }
 0x31f   : > { %5607 = vmatprep.subr.bf16.mxu0 %v6895_v32  ;;  %v3391_v61 = vsel %vm1247_vm2, %v3389_v4, %v6583_v3  ;;  %v1508_v0 = vadd.f32 %v5266_v63, %v8525_v27  ;;  %v9596_v63 = vld [vmem:[#allocation18_spill] sm:$0xff]  ;;  %v8568_v3 = vld [vmem:[%s9483_s5] sm:$0xff]   ;;  %v9601_v50 = vpack.c.bf16 %v9599_v16, %v9600_v30  ;;  %v8578_v37 = vld [vmem:[%s9483_s5 + $0x48] sm:$0xff]   ;;  %9605 = vst [vmem:[#allocation21_spill] sm:$0xff] %v8668_v9 }
 0x320   : > { %v3410_v48 = vpack.c.bf16 %v3391_v61, %v3390_v54  ;;  %v9598_v32 = vpack.c.bf16 %v9596_v63, %v9597_v57  ;;  %v8592_v45 = vld [vmem:[%s9483_s5 + $0x50] sm:$0xff]   ;;  %v8621_v54 = vld [vmem:[%s9483_s5 + $0x60] sm:$0xff]  }
 0x321   : > { %5412 = vmatpush3.bf16.msra.mxu1 %v8271_v38  ;;  %v8600_v4 = vld [vmem:[%s9483_s5 + $0x10] sm:$0xff]   ;;  %v8628_v61 = vld [vmem:[%s9483_s5 + $0x20] sm:$0xff]  }
 0x322   : > { %5413 = vmatprep.subr.bf16.mxu1 %v8278_v28  ;;  %5608 = vmatpush3.bf16.msra.mxu0 %v6896_v10 }
 0x323   : > { %5609 = vmatprep.subr.bf16.mxu0 %v6897_v51  ;;  %v8562_v51 = vld [vmem:[%s9483_s5 + $0x40] sm:$0xff]  }
 0x325   : > { %5414 = vmatpush3.bf16.msra.mxu1 %v8292_v18 }
 0x326   : > { %5443 = vmatprep.subr.bf16.mxu1 %v8488_v59  ;;  %5610 = vmatpush3.bf16.msra.mxu0 %v6899_v2 }
 0x327   : > { %5611 = vmatprep.subr.bf16.mxu0 %v6900_v49  ;;  %v8635_v49 = vld [vmem:[%s9483_s5 + $0x68] sm:$0xff]  }
 0x328   : > { %2273 = vmatmul.mubr.bf16.vlgmr.msra.gmra.mrb[28].mxu1 %v9590_v53  ;;  %v9603_v53 = vld [vmem:[#allocation19_spill] sm:$0xff] }
 0x329   : > { %5444 = vmatpush3.bf16.msra.mxu1 %v8152_v22  ;;  %2515 = vmatprep.mubr.bf16.mxu1 %v9592_v31  ;;  %v9604_v2 = vpack.c.bf16 %v9602_v52, %v9603_v53  ;;  %v8614_v31 = vld [vmem:[%s9483_s5 + $0x18] sm:$0xff]   ;;  %v8698_v53 = vpop.permute.xlu1 %6585 }
 0x32a   : > { %5445 = vmatprep.subr.bf16.mxu1 %v8163_v55  ;;  %5612 = vmatpush3.bf16.msra.mxu0 %v6901_v15  ;;  %v8642_v15 = vld [vmem:[%s9483_s5 + $0x28] sm:$0xff]  }
 0x32b   : > { %5641 = vmatprep.subr.bf16.mxu0 %v8562_v51 }
 0x32d   : > { %5446 = vmatpush3.bf16.msra.mxu1 %v8173_v14  ;;  %3447 = vmatmul.mubr.bf16.vlgmr.msra.gmra.mrb[116].mxu0 %v3410_v48 }
 0x32e   : > { %5447 = vmatprep.subr.bf16.mxu1 %v8182_v7  ;;  %5642 = vmatpush3.bf16.msra.mxu0 %v8568_v3 }
 0x32f   : > { %5643 = vmatprep.subr.bf16.mxu0 %v8578_v37 }
 0x331   : > { %5448 = vmatpush3.bf16.msra.mxu1 %v8191_v58 }
 0x332   : > { %5449 = vmatprep.subr.bf16.mxu1 %v8201_v40  ;;  %5644 = vmatpush3.bf16.msra.mxu0 %v8583_v21 }
 0x333   : > { %5645 = vmatprep.subr.bf16.mxu0 %v8592_v45 }
 0x335   : > { %5450 = vmatpush3.bf16.msra.mxu1 %v8210_v42 }
 0x336   : > { %5451 = vmatprep.subr.bf16.mxu1 %v8217_v19  ;;  %5646 = vmatpush3.bf16.msra.mxu0 %v8600_v4 }
 0x337   : > { %5647 = vmatprep.subr.bf16.mxu0 %v8607_v56 }
 0x339   : > { %5452 = vmatpush3.bf16.msra.mxu1 %v8229_v26  ;;  %v5283_v6 = vpop.f32.mrb[4].mxu1 }
 0x33a   : > { %5453 = vmatprep.subr.bf16.mxu1 %v8236_v12  ;;  %v5284_v23 = vpop.f32.mrb[5].mxu1  ;;  %5648 = vmatpush3.bf16.msra.mxu0 %v8614_v31 }
 0x33b   : > { %v5285_v20 = vadd.f32 %v5284_v23, %v5283_v6  ;;  %v5286_v35 = vpop.f32.mrb[6].mxu1  ;;  %5649 = vmatprep.subr.bf16.mxu0 %v8621_v54 }
 0x33c   : > { %v5287_v11 = vpop.f32.mrb[7].mxu1 }
 0x33d   : > { %5454 = vmatpush3.bf16.msra.mxu1 %v8247_v47  ;;  %v1546_v60 = vadd.f32 %v5285_v20, %v1505_v5  ;;  %v5288_v29 = vadd.f32 %v5287_v11, %v5286_v35  ;;  %v8653_v35 = vld [vmem:[%s9483_s5 + $0x70] sm:$0xff]  }
 0x33e   : > { %5455 = vmatprep.subr.bf16.mxu1 %v8254_v24  ;;  %5650 = vmatpush3.bf16.msra.mxu0 %v8628_v61 }
 0x33f   : > { %v1552_v17 = vmax.f32 %v1546_v60, 0.0  ;;  %v1549_v25 = vadd.f32 %v5288_v29, %v1508_v0  ;;  %5651 = vmatprep.subr.bf16.mxu0 %v8635_v49  ;;  %v8659_v0 = vld [vmem:[%s9483_s5 + $0x30] sm:$0xff]  }
 0x341   : > { %5456 = vmatpush3.bf16.msra.mxu1 %v8271_v38  ;;  %1554 = vst.msk [vmem:[#allocation3] sm:$0xff] %vm1244_vm1, %v1552_v17  ;;  %v1553_v46 = vmax.f32 %v1549_v25, 0.0 }
 0x342   : > { %5457 = vmatprep.subr.bf16.mxu1 %v8278_v28  ;;  %5652 = vmatpush3.bf16.msra.mxu0 %v8642_v15 }
 0x343   : > { %1556 = vst.msk [vmem:[#allocation3 + $0x8] sm:$0x1] %vm1555_vm3, %v1553_v46  ;;  %5653 = vmatprep.subr.bf16.mxu0 %v8653_v35 }
 0x345   : > { %5458 = vmatpush3.bf16.msra.mxu1 %v8292_v18 }
 0x346   : > { %5487 = vmatprep.subr.bf16.mxu1 %v8488_v59  ;;  %5654 = vmatpush3.bf16.msra.mxu0 %v8659_v0 }
 0x347   : > { %5655 = vmatprep.subr.bf16.mxu0 %v8668_v9 }
 0x348   : > { %2516 = vmatmul.mubr.bf16.vlgmr.msra.gmra.mrb[32].mxu1 %v9595_v39  ;;  %v8674_v39 = vld [vmem:[%s9483_s5 + $0x38] sm:$0xff]   ;;  %v3575_v30 = vld [vmem:[#allocation3 + $0x1] sm:$0x7f] }
 0x349   : > { %5488 = vmatpush3.bf16.msra.mxu1 %v8152_v22  ;;  %2758 = vmatprep.mubr.bf16.mxu1 %v9598_v32  ;;  %9606 = vst [vmem:[#allocation22_spill] sm:$0xff] %v8674_v39 }
 0x34a   : > { %5489 = vmatprep.subr.bf16.mxu1 %v8163_v55  ;;  %5656 = vmatpush3.bf16.msra.mxu0 %v8674_v39 }
 0x34d   : > { %5490 = vmatpush3.bf16.msra.mxu1 %v8173_v14 }
 0x34e   : > { %5491 = vmatprep.subr.bf16.mxu1 %v8182_v7 }
 0x351   : > { %5492 = vmatpush3.bf16.msra.mxu1 %v8191_v58 }
 0x352   : > { %5493 = vmatprep.subr.bf16.mxu1 %v8201_v40 }
 0x355   : > { %5494 = vmatpush3.bf16.msra.mxu1 %v8210_v42 }
 0x356   : > { %5495 = vmatprep.subr.bf16.mxu1 %v8217_v19 }
 0x359   : > { %5496 = vmatpush3.bf16.msra.mxu1 %v8229_v26  ;;  %v5305_v62 = vpop.f32.mrb[8].mxu1 }
 0x35a   : > { %5497 = vmatprep.subr.bf16.mxu1 %v8236_v12  ;;  %v5306_v8 = vpop.f32.mrb[9].mxu1 }
 0x35b   : > { %v5307_v36 = vadd.f32 %v5306_v8, %v5305_v62  ;;  %v5308_v10 = vpop.f32.mrb[10].mxu1 }
 0x35c   : > { %v5309_v34 = vpop.f32.mrb[11].mxu1 }
 0x35d   : > { %5498 = vmatpush3.bf16.msra.mxu1 %v8247_v47  ;;  %v5310_v13 = vadd.f32 %v5309_v34, %v5308_v10  ;;  %v1748_v23 = vadd.f32 %v5307_v36, %v8525_v27  ;;  %v9528_v10 = vmov 0.0   ;;  %v9607_v34 = vld [vmem:[#allocation13_spill] sm:$0xff] }
 0x35e   : > { %5499 = vmatprep.subr.bf16.mxu1 %v8254_v24  ;;  %5984 = vmatprep.subr.bf16.mxu0 %v9528_v10 }
 0x35f   : > { %v1751_v60 = vadd.f32 %v5310_v13, %v8525_v27  ;;  %v9608_v13 = vld [vmem:[#allocation12_spill] sm:$0xff] }
 0x360   : > { %v9609_v16 = vpack.c.bf16 %v9607_v34, %v9608_v13 }
 0x361   : > { %5500 = vmatpush3.bf16.msra.mxu1 %v8271_v38 }
 0x362   : > { %5501 = vmatprep.subr.bf16.mxu1 %v8278_v28 }
 0x365   : > { %5502 = vmatpush3.bf16.msra.mxu1 %v8292_v18 }
 0x366   : > { %5531 = vmatprep.subr.bf16.mxu1 %v8488_v59 }
 0x368   : > { %2759 = vmatmul.mubr.bf16.vlgmr.msra.gmra.mrb[36].mxu1 %v9601_v50 }
 0x369   : > { %5532 = vmatpush3.bf16.msra.mxu1 %v8152_v22  ;;  %3001 = vmatprep.mubr.bf16.mxu1 %v9604_v2  ;;  %v8702_v2 = vpop.permute.xlu1 %6595 }
 0x36a   : > { %5533 = vmatprep.subr.bf16.mxu1 %v8163_v55 }
 0x36d   : > { %5534 = vmatpush3.bf16.msra.mxu1 %v8173_v14  ;;  %v6611_v43 = vpop.permute.xlu1 %6610 }
 0x36e   : > { %5535 = vmatprep.subr.bf16.mxu1 %v8182_v7 }
 0x371   : > { %5536 = vmatpush3.bf16.msra.mxu1 %v8191_v58 }
 0x372   : > { %5537 = vmatprep.subr.bf16.mxu1 %v8201_v40 }
 0x375   : > { %5538 = vmatpush3.bf16.msra.mxu1 %v8210_v42 }
 0x376   : > { %5539 = vmatprep.subr.bf16.mxu1 %v8217_v19 }
 0x379   : > { %5540 = vmatpush3.bf16.msra.mxu1 %v8229_v26  ;;  %v5327_v48 = vpop.f32.mrb[12].mxu1 }
 0x37a   : > { %5541 = vmatprep.subr.bf16.mxu1 %v8236_v12  ;;  %v5328_v6 = vpop.f32.mrb[13].mxu1 }
 0x37b   : > { %v5329_v5 = vadd.f32 %v5328_v6, %v5327_v48  ;;  %v5330_v20 = vpop.f32.mrb[14].mxu1  ;;  %v6616_v48 = vpop.permute.xlu0 %6615 }
 0x37c   : > { %v5331_v11 = vpop.f32.mrb[15].mxu1 }
 0x37d   : > { %5542 = vmatpush3.bf16.msra.mxu1 %v8247_v47  ;;  %v1789_v29 = vadd.f32 %v5329_v5, %v1748_v23  ;;  %v5332_v17 = vadd.f32 %v5331_v11, %v5330_v20  ;;  %v6613_v5 = vunpack.i.h.bf16 %v6611_v43  ;;  %v6612_v20 = vunpack.i.l.bf16 %v6611_v43 }
 0x37e   : > { %5543 = vmatprep.subr.bf16.mxu1 %v8254_v24 }
 0x37f   : > { %v1795_v25 = vmax.f32 %v1789_v29, 0.0  ;;  %v1792_v46 = vadd.f32 %v5332_v17, %v1751_v60  ;;  %v6593_v60 = vunpack.i.h.bf16 %v8409_v41  ;;  %v6592_v29 = vunpack.i.l.bf16 %v8409_v41 }
 0x380   : > { %v5437_v33 = vpop.f32.mrb[100].mxu0 }
 0x381   : > { %5544 = vmatpush3.bf16.msra.mxu1 %v8271_v38  ;;  %1798 = vst.msk [vmem:[#allocation3 + $0x10] sm:$0xff] %vm1244_vm1, %v1795_v25  ;;  %v1796_v63 = vmax.f32 %v1792_v46, 0.0  ;;  %v5438_v57 = vpop.f32.mrb[101].mxu0  ;;  %v6618_v25 = vunpack.i.h.bf16 %v6616_v48  ;;  %v6617_v46 = vunpack.i.l.bf16 %v6616_v48  ;;  %v9610_v48 = vld [vmem:[#allocation16_spill] sm:$0xff] }
 0x382   : > { %5545 = vmatprep.subr.bf16.mxu1 %v8278_v28  ;;  %v8678_v32 = vadd.f32 %v5438_v57, %v5437_v33  ;;  %v5440_v62 = vpop.f32.mrb[102].mxu0  ;;  %v3282_v33 = vld [vmem:[#allocation2 + $0x122] sm:$0xff] }
 0x383   : > { %1799 = vst.msk [vmem:[#allocation3 + $0x18] sm:$0x1] %vm1555_vm3, %v1796_v63  ;;  %v5441_v8 = vpop.f32.mrb[103].mxu0  ;;  %v3283_v63 = vld [vmem:[#allocation2 + $0x12a] sm:$0x1] }
 0x384   : > { %v8683_v36 = vadd.f32 %v5441_v8, %v5440_v62  ;;  %v3405_v57 = vsel %vm998_vm0, %v3283_v63, %v6613_v5  ;;  %v3404_v62 = vsel %vm998_vm0, %v3282_v33, %v6612_v20 }
 0x385   : > { %5546 = vmatpush3.bf16.msra.mxu1 %v8292_v18  ;;  %v3406_v34 = vsel %vm1244_vm1, %v3404_v62, %v6592_v29  ;;  %v3407_v13 = vsel %vm1244_vm1, %v3405_v57, %v6593_v60 }
 0x386   : > { %5575 = vmatprep.subr.bf16.mxu1 %v8488_v59 }
 0x388   : > { %3002 = vmatmul.mubr.bf16.vlgmr.msra.gmra.mrb[40].mxu1 %v9609_v16  ;;  %v3577_v50 = vld [vmem:[#allocation3 + $0x10] sm:$0x7f] }
 0x389   : > { %5576 = vmatpush3.bf16.msra.mxu1 %v8152_v22  ;;  %3244 = vmatprep.mubr.bf16.mxu1 %v3170_v44  ;;  %v6624_v52 = vpack.i.bf16 %v3575_v30, %v3577_v50  ;;  %v3408_v50 = vsel %vm1247_vm2, %v3406_v34, %v6617_v46  ;;  %v3275_v46 = vld [vmem:[#allocation2 + $0x62] sm:$0x1] }
 0x38a   : > { %5577 = vmatprep.subr.bf16.mxu1 %v8163_v55 }
 0x38b   : > { %6625 = vrot.lane.b32.xlu0 %v6624_v52, %s6948_s16  ;;  %v3409_v52 = vsel %vm1247_vm2, %v3407_v13, %v6618_v25 }
 0x38d   : > { %5578 = vmatpush3.bf16.msra.mxu1 %v8173_v14 }
 0x38e   : > { %5579 = vmatprep.subr.bf16.mxu1 %v8182_v7 }
 0x391   : > { %5580 = vmatpush3.bf16.msra.mxu1 %v8191_v58 }
 0x392   : > { %5581 = vmatprep.subr.bf16.mxu1 %v8201_v40 }
 0x395   : > { %5582 = vmatpush3.bf16.msra.mxu1 %v8210_v42 }
 0x396   : > { %5583 = vmatprep.subr.bf16.mxu1 %v8217_v19 }
 0x399   : > { %5584 = vmatpush3.bf16.msra.mxu1 %v8229_v26 }
 0x39a   : > { %5585 = vmatprep.subr.bf16.mxu1 %v8236_v12 }
 0x39b   : > { %v5349_v1 = vpop.f32.mrb[16].mxu1 }
 0x39c   : > { %v5350_v44 = vpop.f32.mrb[17].mxu1 }
 0x39d   : > { %v5351_v6 = vadd.f32 %v5350_v44, %v5349_v1  ;;  %v5352_v23 = vpop.f32.mrb[18].mxu1  ;;  %5586 = vmatpush3.bf16.msra.mxu1 %v8247_v47  ;;  %v3413_v44 = vpack.c.bf16 %v3409_v52, %v3408_v50 }
 0x39e   : > { %v5353_v11 = vpop.f32.mrb[19].mxu1  ;;  %5587 = vmatprep.subr.bf16.mxu1 %v8254_v24 }
 0x39f   : > { %v5354_v17 = vadd.f32 %v5353_v11, %v5352_v23  ;;  %v9611_v23 = vld [vmem:[#allocation14_spill] sm:$0xff] }
 0x3a0   : > { %v5481_v8 = vpop.f32.mrb[104].mxu0  ;;  %v9612_v5 = vpack.c.bf16 %v9610_v48, %v9611_v23  ;;  %v3962_v48 = vld [vmem:[#allocation3 + $0x11] sm:$0x7f] }
 0x3a1   : > { %5588 = vmatpush3.bf16.msra.mxu1 %v8271_v38  ;;  %v5482_v16 = vpop.f32.mrb[105].mxu0  ;;  %v1994_v60 = vadd.f32 %v5354_v17, %v8525_v27  ;;  %v8756_v17 = vld [vmem:[%s9483_s5 + $0xc0] sm:$0xff]  }
 0x3a2   : > { %5589 = vmatprep.subr.bf16.mxu1 %v8278_v28  ;;  %v8718_v41 = vadd.f32 %v5482_v16, %v5481_v8  ;;  %v5484_v30 = vpop.f32.mrb[106].mxu0 }
 0x3a3   : > { %v5485_v43 = vpop.f32.mrb[107].mxu0 }
 0x3a4   : > { %v8723_v1 = vadd.f32 %v5485_v43, %v5484_v30  ;;  %v8768_v30 = vld [vmem:[%s9483_s5 + $0x80] sm:$0xff]   ;;  %v8776_v43 = vld [vmem:[%s9483_s5 + $0xc8] sm:$0xff]  }
 0x3a5   : > { %5590 = vmatpush3.bf16.msra.mxu1 %v8292_v18 }
 0x3a6   : > { %5619 = vmatprep.subr.bf16.mxu1 %v8488_v59 }
 0x3a8   : > { %3245 = vmatmul.mubr.bf16.vlgmr.msra.gmra.mrb[44].mxu1 %v9612_v5  ;;  %v8783_v5 = vld [vmem:[%s9483_s5 + $0x88] sm:$0xff]  }
 0x3a9   : > { %5620 = vmatpush3.bf16.msra.mxu1 %v8152_v22  ;;  %3487 = vmatprep.mubr.bf16.mxu1 %v3413_v44  ;;  %v6621_v22 = vpop.permute.xlu1 %6620  ;;  %v3579_v44 = vld [vmem:[#allocation3 + $0x12] sm:$0x7f] }
 0x3aa   : > { %5621 = vmatprep.subr.bf16.mxu1 %v8163_v55  ;;  %v6588_v55 = vunpack.i.h.bf16 %v8698_v53 }
 0x3ad   : > { %5622 = vmatpush3.bf16.msra.mxu1 %v8173_v14  ;;  %v6587_v14 = vunpack.i.l.bf16 %v8698_v53  ;;  %v3274_v53 = vld [vmem:[#allocation2 + $0x5a] sm:$0xff] }
 0x3ae   : > { %5623 = vmatprep.subr.bf16.mxu1 %v8182_v7  ;;  %v1991_v7 = vadd.f32 %v5351_v6, %v8525_v27  ;;  %v3399_v6 = vsel %vm998_vm0, %v3275_v46, %v6588_v55  ;;  %v8796_v55 = vld [vmem:[%s9483_s5 + $0x90] sm:$0xff]  }
 0x3af   : > { %v3398_v33 = vsel %vm998_vm0, %v3274_v53, %v6587_v14  ;;  %v8802_v14 = vld [vmem:[%s9483_s5 + $0xd8] sm:$0xff]   ;;  %v8844_v53 = vld [vmem:[%s9483_s5 + $0xb0] sm:$0xff]   ;;  %vm4491_vm0 = vmand %vm4489_vm14, %vm4490_vm15 }
 0x3b1   : > { %5624 = vmatpush3.bf16.msra.mxu1 %v8191_v58 }
 0x3b2   : > { %5625 = vmatprep.subr.bf16.mxu1 %v8201_v40  ;;  %v6598_v40 = vunpack.i.h.bf16 %v8702_v2 }
 0x3b4   : > { %v3401_v57 = vsel %vm1244_vm1, %v3399_v6, %v6598_v40  ;;  %v8826_v40 = vld [vmem:[%s9483_s5 + $0xe8] sm:$0xff]   ;;  %v8850_v6 = vld [vmem:[%s9483_s5 + $0xf8] sm:$0xff]  }
 0x3b5   : > { %5626 = vmatpush3.bf16.msra.mxu1 %v8210_v42  ;;  %v6597_v42 = vunpack.i.l.bf16 %v8702_v2 }
 0x3b6   : > { %5627 = vmatprep.subr.bf16.mxu1 %v8217_v19  ;;  %v6623_v19 = vunpack.i.h.bf16 %v6621_v22 }
 0x3b7   : > { %v3400_v2 = vsel %vm1244_vm1, %v3398_v33, %v6597_v42  ;;  %v8832_v42 = vld [vmem:[%s9483_s5 + $0xa8] sm:$0xff]  }
 0x3b8   : > { %v3403_v8 = vsel %vm1247_vm2, %v3401_v57, %v6623_v19 }
 0x3b9   : > { %5628 = vmatpush3.bf16.msra.mxu1 %v8229_v26 }
 0x3ba   : > { %5629 = vmatprep.subr.bf16.mxu1 %v8236_v12  ;;  %v6622_v12 = vunpack.i.l.bf16 %v6621_v22 }
 0x3bb   : > { %v5371_v59 = vpop.f32.mrb[20].mxu1 }
 0x3bc   : > { %v5372_v20 = vpop.f32.mrb[21].mxu1  ;;  %v3402_v62 = vsel %vm1247_vm2, %v3400_v2, %v6622_v12  ;;  %vm4666_vm2 = vsmask.f32 1280 }
 0x3bd   : > { %v5373_v58 = vadd.f32 %v5372_v20, %v5371_v59  ;;  %v5374_v11 = vpop.f32.mrb[22].mxu1  ;;  %5630 = vmatpush3.bf16.msra.mxu1 %v8247_v47  ;;  %v3412_v50 = vpack.c.bf16 %v3403_v8, %v3402_v62  ;;  %v8788_v20 = vld [vmem:[%s9483_s5 + $0xd0] sm:$0xff]  }
 0x3be   : > { %v5375_v26 = vpop.f32.mrb[23].mxu1  ;;  %5631 = vmatprep.subr.bf16.mxu1 %v8254_v24 }
 0x3bf   : > { %v2032_v29 = vadd.f32 %v5373_v58, %v1991_v7  ;;  %v5376_v25 = vadd.f32 %v5375_v26, %v5374_v11  ;;  %v8808_v7 = vld [vmem:[%s9483_s5 + $0x98] sm:$0xff]   ;;  %v8814_v58 = vld [vmem:[%s9483_s5 + $0xe0] sm:$0xff]   ;;  %v8838_v26 = vld [vmem:[%s9483_s5 + $0xf0] sm:$0xff]  }
 0x3c0   : > { %v5525_v24 = vpop.f32.mrb[108].mxu0  ;;  %v8820_v11 = vld [vmem:[%s9483_s5 + $0xa0] sm:$0xff]  }
 0x3c1   : > { %v2038_v47 = vmax.f32 %v2032_v29, 0.0  ;;  %v2035_v63 = vadd.f32 %v5376_v25, %v1994_v60  ;;  %5632 = vmatpush3.bf16.msra.mxu1 %v8271_v38  ;;  %v5526_v38 = vpop.f32.mrb[109].mxu0 }
 0x3c2   : > { %5633 = vmatprep.subr.bf16.mxu1 %v8278_v28  ;;  %v8761_v13 = vadd.f32 %v5526_v38, %v5525_v24  ;;  %v5528_v16 = vpop.f32.mrb[110].mxu0 }
 0x3c3   : > { %2041 = vst.msk [vmem:[#allocation3 + $0x20] sm:$0xff] %vm1244_vm1, %v2038_v47  ;;  %v2039_v34 = vmax.f32 %v2035_v63, 0.0  ;;  %v5529_v28 = vpop.f32.mrb[111].mxu0  ;;  %v8856_v47 = vld [vmem:[%s9483_s5 + $0xb8] sm:$0xff]  }
 0x3c4   : > { %v8770_v52 = vadd.f32 %v5529_v28, %v5528_v16 }
 0x3c5   : > { %2042 = vst.msk [vmem:[#allocation3 + $0x28] sm:$0x1] %vm1555_vm3, %v2039_v34  ;;  %5634 = vmatpush3.bf16.msra.mxu1 %v8292_v18 }
 0x3c6   : > { %5663 = vmatprep.subr.bf16.mxu1 %v8756_v17 }
 0x3c8   : > { %3488 = vmatmul.mubr.bf16.vlgmr.msra.gmra.mrb[48].mxu1 %v3412_v50 }
 0x3c9   : > { %5664 = vmatpush3.bf16.msra.mxu1 %v8768_v30 }
 0x3ca   : > { %v3581_v18 = vld [vmem:[#allocation3 + $0x21] sm:$0x7f]  ;;  %5665 = vmatprep.subr.bf16.mxu1 %v8776_v43 }
 0x3cb   : > { %v3964_v23 = vld [vmem:[#allocation3 + $0x20] sm:$0x7f]  ;;  %v6629_v22 = vpack.i.bf16 %v3579_v44, %v3581_v18 }
 0x3cc   : > { %v6634_v59 = vpack.i.bf16 %v3962_v48, %v3964_v23 }
 0x3cd   : > { %6630 = vrot.lane.b32.xlu1 %v6629_v22, %s6948_s16  ;;  %5666 = vmatpush3.bf16.msra.mxu1 %v8783_v5 }
 0x3ce   : > { %6635 = vrot.lane.b32.xlu0 %v6634_v59, %s6948_s16  ;;  %5667 = vmatprep.subr.bf16.mxu1 %v8788_v20 }
 0x3d1   : > { %5668 = vmatpush3.bf16.msra.mxu1 %v8796_v55 }
 0x3d2   : > { %5669 = vmatprep.subr.bf16.mxu1 %v8802_v14 }
 0x3d5   : > { %5670 = vmatpush3.bf16.msra.mxu1 %v8808_v7 }
 0x3d6   : > { %5671 = vmatprep.subr.bf16.mxu1 %v8814_v58 }
 0x3d9   : > { %5672 = vmatpush3.bf16.msra.mxu1 %v8820_v11 }
 0x3da   : > { %5673 = vmatprep.subr.bf16.mxu1 %v8826_v40 }
 0x3db   : > { %v5393_v19 = vpop.f32.mrb[24].mxu1 }
 0x3dc   : > { %v5394_v12 = vpop.f32.mrb[25].mxu1 }
 0x3dd   : > { %v5395_v60 = vadd.f32 %v5394_v12, %v5393_v19  ;;  %v5396_v29 = vpop.f32.mrb[26].mxu1  ;;  %5674 = vmatpush3.bf16.msra.mxu1 %v8832_v42 }
 0x3de   : > { %v5397_v25 = vpop.f32.mrb[27].mxu1  ;;  %5675 = vmatprep.subr.bf16.mxu1 %v8838_v26 }
 0x3df   : > { %v5398_v46 = vadd.f32 %v5397_v25, %v5396_v29  ;;  %v2234_v38 = vadd.f32 %v5395_v60, %v8525_v27  ;;  %v3574_v29 = vld [vmem:[#allocation3] sm:$0x7f] }
 0x3e0   : > { %v5569_v33 = vpop.f32.mrb[112].mxu0  ;;  %v3576_v25 = vld [vmem:[#allocation3 + $0x2] sm:$0x7f] }
 0x3e1   : > { %5676 = vmatpush3.bf16.msra.mxu1 %v8844_v53  ;;  %v5570_v63 = vpop.f32.mrb[113].mxu0  ;;  %v2237_v44 = vadd.f32 %v5398_v46, %v8525_v27 }
 0x3e2   : > { %5677 = vmatprep.subr.bf16.mxu1 %v8850_v6  ;;  %v8859_v2 = vadd.f32 %v5570_v63, %v5569_v33  ;;  %v5572_v57 = vpop.f32.mrb[114].mxu0 }
 0x3e3   : > { %v5573_v24 = vpop.f32.mrb[115].mxu0 }
 0x3e4   : > { %v8861_v62 = vadd.f32 %v5573_v24, %v5572_v57 }
 0x3e5   : > { %5678 = vmatpush3.bf16.msra.mxu1 %v8856_v47 }
 0x3e6   : > { %5712 = vmatprep.subr.bf16.mxu1 %v8756_v17 }
 0x3fb   : > { %v5415_v8 = vpop.f32.mrb[28].mxu1 }
 0x3fc   : > { %v5416_v34 = vpop.f32.mrb[29].mxu1 }
 0x3fd   : > { %v5417_v16 = vadd.f32 %v5416_v34, %v5415_v8  ;;  %v5418_v28 = vpop.f32.mrb[30].mxu1  ;;  %v6626_v23 = vpop.permute.xlu0 %6625  ;;  %v8873_v34 = vld [vmem:[%s9483_s5 + $0x100] sm:$0xff]  }
 0x3fe   : > { %v5419_v50 = vpop.f32.mrb[31].mxu1  ;;  %v6628_v22 = vunpack.i.h.bf16 %v6626_v23  ;;  %v6627_v59 = vunpack.i.l.bf16 %v6626_v23 }
 0x3ff   : > { %v2275_v48 = vadd.f32 %v5417_v16, %v2234_v38  ;;  %v5420_v18 = vadd.f32 %v5419_v50, %v5418_v28 }
 0x400   : > { %v3599_v33 = vsel %vm1244_vm1, %v3574_v29, %v6628_v22  ;;  %v5613_v63 = vpop.f32.mrb[116].mxu0  ;;  %v3600_v57 = vsel %vm1244_vm1, %v3576_v25, %v6627_v59  ;;  %v8902_v29 = vld [vmem:[%s9483_s5 + $0x118] sm:$0xff]  }
 0x401   : > { %v2281_v19 = vmax.f32 %v2275_v48, 0.0  ;;  %v2278_v12 = vadd.f32 %v5420_v18, %v2237_v44  ;;  %v3603_v24 = vpack.c.bf16 %v3599_v33, %v3599_v33  ;;  %v5614_v8 = vpop.f32.mrb[117].mxu0  ;;  %v3604_v46 = vpack.c.bf16 %v3600_v57, %v3600_v57  ;;  %v8884_v44 = vld [vmem:[%s9483_s5 + $0x108] sm:$0xff]   ;;  %v4143_v48 = vld [vmem:[#allocation3 + $0x21] sm:$0x7f] }
 0x402   : > { %v8875_v38 = vadd.f32 %v5614_v8, %v5613_v63  ;;  %v5616_v16 = vpop.f32.mrb[118].mxu0  ;;  %v3966_v18 = vld [vmem:[#allocation3 + $0x22] sm:$0x7f] }
 0x403   : > { %2284 = vst.msk [vmem:[#allocation3 + $0x30] sm:$0xff] %vm1244_vm1, %v2281_v19  ;;  %v2282_v60 = vmax.f32 %v2278_v12, 0.0  ;;  %3865 = vmatprep.mubr.bf16.mxu0 %v3604_v46  ;;  %v5617_v28 = vpop.f32.mrb[119].mxu0  ;;  %v8893_v12 = vld [vmem:[%s9483_s5 + $0x110] sm:$0xff]  }
 0x404   : > { %v8878_v50 = vadd.f32 %v5617_v28, %v5616_v16  ;;  %3866 = vmatmul.mubr.bf16.vlgmr.msra.gmra.mrb[120].mxu0 %v3603_v24  ;;  %v3582_v25 = vld [vmem:[#allocation3 + $0x22] sm:$0x7f]  ;;  %v2480_v16 = vadd.f32 %v8683_v36, %v8525_v27 }
 0x405   : > { %2285 = vst.msk [vmem:[#allocation3 + $0x38] sm:$0x1] %vm1555_vm3, %v2282_v60  ;;  %5985 = vmatpush3.bf16.msra.mxu0 %v8873_v34  ;;  %5992 = vmatprep.mubr.msk.bf16.mxu0 %vm6952_vm4, %v9528_v10  ;;  %v3607_v33 = vpack.c.bf16 %v3582_v25, %v3582_v25  ;;  %v2477_v60 = vadd.f32 %v8678_v32, %v8525_v27 }
 0x406   : > { %5986 = vmatprep.subr.bf16.mxu0 %v9528_v10 }
 0x409   : > { %5987 = vmatpush3.bf16.msra.mxu0 %v8884_v44 }
 0x40a   : > { %v3968_v23 = vld [vmem:[#allocation3 + $0x31] sm:$0x7f]  ;;  %5988 = vmatprep.subr.bf16.mxu0 %v9528_v10 }
 0x40b   : > { %v4145_v22 = vld [vmem:[#allocation3 + $0x30] sm:$0x7f]  ;;  %v6639_v59 = vpack.i.bf16 %v3966_v18, %v3968_v23 }
 0x40c   : > { %v6644_v19 = vpack.i.bf16 %v4143_v48, %v4145_v22  ;;  %v4317_v32 = vld [vmem:[#allocation3 + $0x31] sm:$0x7f] }
 0x40d   : > { %6640 = vrot.lane.b32.xlu1 %v6639_v59, %s6948_s16  ;;  %5989 = vmatpush3.bf16.msra.mxu0 %v8893_v12  ;;  %v4147_v36 = vld [vmem:[#allocation3 + $0x32] sm:$0x7f] }
 0x40e   : > { %6645 = vrot.lane.b32.xlu0 %v6644_v19, %s6948_s16  ;;  %5990 = vmatprep.subr.bf16.mxu0 %v9528_v10 }
 0x411   : > { %5991 = vmatpush3.bf16.msra.mxu0 %v8902_v29 }
 0x412   : > { %5690 = vmatprep.subr.bf16.mxu0 %v8562_v51 }
 0x414   : > { %5993 = vmatmul.mubr.msk.bf16.vlgmr.msra.gmra.mrb[124].mxu0 %vm1244_vm1, %v3607_v33 }
 0x415   : > { %5691 = vmatpush3.bf16.msra.mxu0 %v8568_v3 }
 0x416   : > { %5692 = vmatprep.subr.bf16.mxu0 %v8578_v37 }
 0x419   : > { %5693 = vmatpush3.bf16.msra.mxu0 %v8583_v21 }
 0x41a   : > { %5694 = vmatprep.subr.bf16.mxu0 %v8592_v45 }
 0x41b   : > { %v5459_v63 = vpop.f32.mrb[32].mxu1 }
 0x41c   : > { %v5460_v57 = vpop.f32.mrb[33].mxu1 }
 0x41d   : > { %v5461_v24 = vadd.f32 %v5460_v57, %v5459_v63  ;;  %v5462_v8 = vpop.f32.mrb[34].mxu1  ;;  %5695 = vmatpush3.bf16.msra.mxu0 %v8600_v4 }
 0x41e   : > { %v5463_v46 = vpop.f32.mrb[35].mxu1  ;;  %5696 = vmatprep.subr.bf16.mxu0 %v8607_v56 }
 0x41f   : > { %v2518_v28 = vadd.f32 %v5461_v24, %v2477_v60  ;;  %v5464_v48 = vadd.f32 %v5463_v46, %v5462_v8  ;;  %v2720_v60 = vadd.f32 %v8718_v41, %v8525_v27  ;;  %v3963_v41 = vld [vmem:[#allocation3 + $0x12] sm:$0x7f] }
 0x421   : > { %v2524_v18 = vmax.f32 %v2518_v28, 0.0  ;;  %v2521_v23 = vadd.f32 %v5464_v48, %v2480_v16  ;;  %5697 = vmatpush3.bf16.msra.mxu0 %v8614_v31  ;;  %v2723_v16 = vadd.f32 %v8723_v1, %v8525_v27 }
 0x422   : > { %5698 = vmatprep.subr.bf16.mxu0 %v8621_v54 }
 0x423   : > { %2527 = vst.msk [vmem:[#allocation3 + $0x40] sm:$0xff] %vm1244_vm1, %v2524_v18  ;;  %v2525_v22 = vmax.f32 %v2521_v23, 0.0 }
 0x425   : > { %2528 = vst.msk [vmem:[#allocation3 + $0x48] sm:$0x1] %vm1555_vm3, %v2525_v22  ;;  %5699 = vmatpush3.bf16.msra.mxu0 %v8628_v61 }
 0x426   : > { %5700 = vmatprep.subr.bf16.mxu0 %v8635_v49 }
 0x429   : > { %5701 = vmatpush3.bf16.msra.mxu0 %v8642_v15 }
 0x42a   : > { %v4149_v59 = vld [vmem:[#allocation3 + $0x41] sm:$0x7f]  ;;  %5702 = vmatprep.subr.bf16.mxu0 %v8653_v35 }
 0x42b   : > { %v4319_v19 = vld [vmem:[#allocation3 + $0x40] sm:$0x7f]  ;;  %v6649_v25 = vpack.i.bf16 %v4147_v36, %v4149_v59  ;;  %v3578_v36 = vld [vmem:[#allocation3 + $0x11] sm:$0x7f] }
 0x42c   : > { %v6654_v33 = vpack.i.bf16 %v4317_v32, %v4319_v19  ;;  %v3961_v59 = vld [vmem:[#allocation3 + $0x10] sm:$0x7f] }
 0x42d   : > { %6650 = vrot.lane.b32.xlu1 %v6649_v25, %s6948_s16  ;;  %5703 = vmatpush3.bf16.msra.mxu0 %v8659_v0 }
 0x42e   : > { %6655 = vrot.lane.b32.xlu0 %v6654_v33, %s6948_s16  ;;  %5704 = vmatprep.subr.bf16.mxu0 %v8668_v9 }
 0x431   : > { %5705 = vmatpush3.bf16.msra.mxu0 %v8674_v39  ;;  %v3580_v39 = vld [vmem:[#allocation3 + $0x20] sm:$0x7f] }
 0x432   : > { %5996 = vmatprep.subr.bf16.mxu0 %v9528_v10 }
 0x43b   : > { %v5503_v63 = vpop.f32.mrb[36].mxu1 }
 0x43c   : > { %v5504_v57 = vpop.f32.mrb[37].mxu1 }
 0x43d   : > { %v5505_v24 = vadd.f32 %v5504_v57, %v5503_v63  ;;  %v5506_v8 = vpop.f32.mrb[38].mxu1 }
 0x43e   : > { %v5507_v46 = vpop.f32.mrb[39].mxu1 }
 0x43f   : > { %v2761_v28 = vadd.f32 %v5505_v24, %v2720_v60  ;;  %v5508_v48 = vadd.f32 %v5507_v46, %v5506_v8  ;;  %v6631_v18 = vpop.permute.xlu1 %6630 }
 0x440   : > { %v6636_v23 = vpop.permute.xlu0 %6635  ;;  %v6633_v22 = vunpack.i.h.bf16 %v6631_v18  ;;  %v6632_v32 = vunpack.i.l.bf16 %v6631_v18 }
 0x441   : > { %v6638_v19 = vunpack.i.h.bf16 %v6636_v23  ;;  %v6637_v25 = vunpack.i.l.bf16 %v6636_v23  ;;  %v2767_v33 = vmax.f32 %v2761_v28, 0.0  ;;  %v2764_v10 = vadd.f32 %v5508_v48, %v2723_v16  ;;  %v4321_v16 = vld [vmem:[#allocation3 + $0x42] sm:$0x7f] }
 0x442   : > { %v3601_v63 = vsel %vm1244_vm1, %v3578_v36, %v6633_v22  ;;  %v3602_v1 = vsel %vm1244_vm1, %v3580_v39, %v6632_v32  ;;  %v9613_v39 = vmov 0.0  }
 0x443   : > { %v3986_v57 = vsel %vm1244_vm1, %v3961_v59, %v6638_v19  ;;  %v3987_v60 = vsel %vm1244_vm1, %v3963_v41, %v6637_v25  ;;  %2770 = vst.msk [vmem:[#allocation3 + $0x50] sm:$0xff] %vm1244_vm1, %v2767_v33  ;;  %v2768_v24 = vmax.f32 %v2764_v10, 0.0  ;;  %v3605_v8 = vpack.c.bf16 %v3601_v63, %v3601_v63  ;;  %v4498_v10 = vld [vmem:[#allocation3 + $0x41] sm:$0x7f] }
 0x444   : > { %v3990_v46 = vpack.c.bf16 %v3986_v57, %v3986_v57  ;;  %v3606_v18 = vpack.c.bf16 %v3602_v1, %v3602_v1  ;;  %v3991_v9 = vpack.c.bf16 %v3987_v60, %v3987_v60  ;;  %v2963_v19 = vadd.f32 %v8761_v13, %v8525_v27 }
 0x445   : > { %2771 = vst.msk [vmem:[#allocation3 + $0x58] sm:$0x1] %vm1555_vm3, %v2768_v24  ;;  %v2966_v63 = vadd.f32 %v8770_v52, %v8525_v27 }
 0x446   : > { %3905 = vmatprep.mubr.bf16.mxu1 %v3606_v18  ;;  %4030 = vmatprep.mubr.bf16.mxu0 %v3991_v9  ;;  %v3969_v9 = vld [vmem:[#allocation3 + $0x32] sm:$0x7f] }
 0x447   : > { %3906 = vmatmul.mubr.bf16.vlgmr.msra.gmra.mrb[52].mxu1 %v3605_v8  ;;  %4031 = vmatmul.mubr.bf16.vlgmr.msra.gmra.mrb[128].mxu0 %v3990_v46  ;;  %v3994_v32 = vpack.c.bf16 %v3969_v9, %v3969_v9 }
 0x448   : > { %5713 = vmatpush3.bf16.msra.mxu1 %v8768_v30  ;;  %5997 = vmatpush3.bf16.msra.mxu0 %v8873_v34 }
 0x449   : > { %6004 = vmatprep.mubr.msk.bf16.mxu0 %vm6952_vm4, %v9613_v39  ;;  %5998 = vmatprep.subr.bf16.mxu0 %v9613_v39 }
 0x44a   : > { %5714 = vmatprep.subr.bf16.mxu1 %v8776_v43  ;;  %v4323_v28 = vld [vmem:[#allocation3 + $0x51] sm:$0x7f] }
 0x44b   : > { %v4500_v48 = vld [vmem:[#allocation3 + $0x50] sm:$0x7f]  ;;  %v6659_v23 = vpack.i.bf16 %v4321_v16, %v4323_v28 }
 0x44c   : > { %v6664_v22 = vpack.i.bf16 %v4498_v10, %v4500_v48  ;;  %5715 = vmatpush3.bf16.msra.mxu1 %v8783_v5  ;;  %5999 = vmatpush3.bf16.msra.mxu0 %v8884_v44  ;;  %v4672_v52 = vld [vmem:[#allocation3 + $0x51] sm:$0x7f] }
 0x44d   : > { %5716 = vmatprep.subr.bf16.mxu1 %v8788_v20  ;;  %6660 = vrot.lane.b32.xlu1 %v6659_v23, %s6948_s16  ;;  %v4502_v8 = vld [vmem:[#allocation3 + $0x52] sm:$0x7f]  ;;  %v3206_v23 = vadd.f32 %v8859_v2, %v8525_v27 }
 0x44e   : > { %6665 = vrot.lane.b32.xlu0 %v6664_v22, %s6948_s16  ;;  %6000 = vmatprep.subr.bf16.mxu0 %v9613_v39 }
 0x450   : > { %5717 = vmatpush3.bf16.msra.mxu1 %v8796_v55  ;;  %6001 = vmatpush3.bf16.msra.mxu0 %v8893_v12 }
 0x451   : > { %5718 = vmatprep.subr.bf16.mxu1 %v8802_v14  ;;  %6002 = vmatprep.subr.bf16.mxu0 %v9613_v39 }
 0x454   : > { %5719 = vmatpush3.bf16.msra.mxu1 %v8808_v7  ;;  %6003 = vmatpush3.bf16.msra.mxu0 %v8902_v29 }
 0x455   : > { %5720 = vmatprep.subr.bf16.mxu1 %v8814_v58  ;;  %5761 = vmatprep.subr.bf16.mxu0 %v8756_v17 }
 0x457   : > { %6005 = vmatmul.mubr.msk.bf16.vlgmr.msra.gmra.mrb[132].mxu0 %vm1244_vm1, %v3994_v32 }
 0x458   : > { %5721 = vmatpush3.bf16.msra.mxu1 %v8820_v11  ;;  %5762 = vmatpush3.bf16.msra.mxu0 %v8768_v30 }
 0x459   : > { %5722 = vmatprep.subr.bf16.mxu1 %v8826_v40  ;;  %5763 = vmatprep.subr.bf16.mxu0 %v8776_v43 }
 0x45b   : > { %v5547_v36 = vpop.f32.mrb[40].mxu1 }
 0x45c   : > { %5723 = vmatpush3.bf16.msra.mxu1 %v8832_v42  ;;  %v5548_v59 = vpop.f32.mrb[41].mxu1  ;;  %5764 = vmatpush3.bf16.msra.mxu0 %v8783_v5 }
 0x45d   : > { %5724 = vmatprep.subr.bf16.mxu1 %v8838_v26  ;;  %v5549_v25 = vadd.f32 %v5548_v59, %v5547_v36  ;;  %v5550_v33 = vpop.f32.mrb[42].mxu1  ;;  %5765 = vmatprep.subr.bf16.mxu0 %v8788_v20  ;;  %v3209_v36 = vadd.f32 %v8861_v62, %v8525_v27 }
 0x45e   : > { %v5551_v41 = vpop.f32.mrb[43].mxu1 }
 0x45f   : > { %v3004_v57 = vadd.f32 %v5549_v25, %v2963_v19  ;;  %v5552_v1 = vadd.f32 %v5551_v41, %v5550_v33  ;;  %v3965_v41 = vld [vmem:[#allocation3 + $0x21] sm:$0x7f] }
 0x460   : > { %5725 = vmatpush3.bf16.msra.mxu1 %v8844_v53  ;;  %5766 = vmatpush3.bf16.msra.mxu0 %v8796_v55 }
 0x461   : > { %5726 = vmatprep.subr.bf16.mxu1 %v8850_v6  ;;  %v3010_v60 = vmax.f32 %v3004_v57, 0.0  ;;  %v3007_v24 = vadd.f32 %v5552_v1, %v2966_v63  ;;  %5767 = vmatprep.subr.bf16.mxu0 %v8802_v14 }
 0x463   : > { %3013 = vst.msk [vmem:[#allocation3 + $0x60] sm:$0xff] %vm1244_vm1, %v3010_v60  ;;  %v3011_v13 = vmax.f32 %v3007_v24, 0.0  ;;  %v3967_v24 = vld [vmem:[#allocation3 + $0x30] sm:$0x7f] }
 0x464   : > { %5727 = vmatpush3.bf16.msra.mxu1 %v8856_v47  ;;  %5768 = vmatpush3.bf16.msra.mxu0 %v8808_v7 }
 0x465   : > { %5739 = vmatprep.subr.bf16.mxu1 %v8562_v51  ;;  %3014 = vst.msk [vmem:[#allocation3 + $0x68] sm:$0x1] %vm1555_vm3, %v3011_v13  ;;  %5769 = vmatprep.subr.bf16.mxu0 %v8814_v58  ;;  %v4144_v13 = vld [vmem:[#allocation3 + $0x22] sm:$0x7f] }
 0x468   : > { %5770 = vmatpush3.bf16.msra.mxu0 %v8820_v11 }
 0x469   : > { %5771 = vmatprep.subr.bf16.mxu0 %v8826_v40 }
 0x46a   : > { %v4504_v46 = vld [vmem:[#allocation3 + $0x61] sm:$0x7f] }
 0x46b   : > { %v4674_v18 = vld [vmem:[#allocation3 + $0x60] sm:$0x7f]  ;;  %v6669_v10 = vpack.i.bf16 %v4502_v8, %v4504_v46 }
 0x46c   : > { %v6674_v16 = vpack.i.bf16 %v4672_v52, %v4674_v18  ;;  %5772 = vmatpush3.bf16.msra.mxu0 %v8832_v42 }
 0x46d   : > { %6670 = vrot.lane.b32.xlu1 %v6669_v10, %s6948_s16  ;;  %5773 = vmatprep.subr.bf16.mxu0 %v8838_v26  ;;  %v4852_v10 = vld [vmem:[#allocation3 + $0x61] sm:$0x7f] }
 0x46e   : > { %6675 = vrot.lane.b32.xlu0 %v6674_v16, %s6948_s16  ;;  %v4676_v16 = vld [vmem:[#allocation3 + $0x62] sm:$0x7f] }
 0x470   : > { %5774 = vmatpush3.bf16.msra.mxu0 %v8844_v53 }
 0x471   : > { %5775 = vmatprep.subr.bf16.mxu0 %v8850_v6 }
 0x474   : > { %5776 = vmatpush3.bf16.msra.mxu0 %v8856_v47 }
 0x475   : > { %5788 = vmatprep.subr.bf16.mxu0 %v8562_v51 }
 0x47b   : > { %v5591_v28 = vpop.f32.mrb[44].mxu1 }
 0x47c   : > { %v5592_v48 = vpop.f32.mrb[45].mxu1 }
 0x47d   : > { %v5593_v22 = vadd.f32 %v5592_v48, %v5591_v28  ;;  %v5594_v9 = vpop.f32.mrb[46].mxu1 }
 0x47e   : > { %v5595_v32 = vpop.f32.mrb[47].mxu1 }
 0x47f   : > { %v3247_v59 = vadd.f32 %v5593_v22, %v3206_v23  ;;  %v5596_v19 = vadd.f32 %v5595_v32, %v5594_v9  ;;  %v6641_v25 = vpop.permute.xlu1 %6640 }
 0x480   : > { %v6646_v33 = vpop.permute.xlu0 %6645  ;;  %v6643_v63 = vunpack.i.h.bf16 %v6641_v25  ;;  %v6642_v57 = vunpack.i.l.bf16 %v6641_v25  ;;  %v9614_v25 = vld [vmem:[#allocation21_spill] sm:$0xff] }
 0x481   : > { %v6647_v1 = vunpack.i.l.bf16 %v6646_v33  ;;  %v3253_v51 = vmax.f32 %v3247_v59, 0.0  ;;  %v3250_v60 = vadd.f32 %v5596_v19, %v3209_v36 }
 0x482   : > { %v3988_v2 = vsel %vm1244_vm1, %v3965_v41, %v6643_v63  ;;  %v3989_v52 = vsel %vm1244_vm1, %v3967_v24, %v6642_v57  ;;  %v4146_v63 = vld [vmem:[#allocation3 + $0x31] sm:$0x7f]  ;;  %v9615_v24 = vld [vmem:[#allocation22_spill] sm:$0xff] }
 0x483   : > { %v4168_v8 = vsel %vm1244_vm1, %v4144_v13, %v6647_v1  ;;  %3256 = vst.msk [vmem:[#allocation3 + $0x70] sm:$0xff] %vm1244_vm1, %v3253_v51  ;;  %v3254_v27 = vmax.f32 %v3250_v60, 0.0  ;;  %v3992_v62 = vpack.c.bf16 %v3988_v2, %v3988_v2  ;;  %v3993_v46 = vpack.c.bf16 %v3989_v52, %v3989_v52  ;;  %v4318_v1 = vld [vmem:[#allocation3 + $0x32] sm:$0x7f] }
 0x484   : > { %v4172_v18 = vpack.c.bf16 %v4168_v8, %v4168_v8 }
 0x485   : > { %3257 = vst.msk [vmem:[#allocation3 + $0x78] sm:$0x1] %vm1555_vm3, %v3254_v27  ;;  %4070 = vmatprep.mubr.bf16.mxu1 %v3993_v46  ;;  %v9040_v27 = vld [vmem:[%s9483_s5] sm:$0xff]  }
 0x486   : > { %4071 = vmatmul.mubr.bf16.vlgmr.msra.gmra.mrb[56].mxu1 %v3992_v62  ;;  %v9047_v62 = vld [vmem:[%s9483_s5 + $0x48] sm:$0xff]  }
 0x487   : > { %5740 = vmatpush3.bf16.msra.mxu1 %v8568_v3  ;;  %4211 = vmatprep.mubr.bf16.mxu1 %v4172_v18 }
 0x488   : > { %5741 = vmatprep.subr.bf16.mxu1 %v8578_v37 }
 0x48a   : > { %v4678_v28 = vld [vmem:[#allocation3 + $0x71] sm:$0x7f] }
 0x48b   : > { %v4854_v48 = vld [vmem:[#allocation3 + $0x70] sm:$0x7f]  ;;  %5742 = vmatpush3.bf16.msra.mxu1 %v8583_v21  ;;  %v6679_v23 = vpack.i.bf16 %v4676_v16, %v4678_v28  ;;  %v9063_v28 = vld [vmem:[%s9483_s5 + $0x50] sm:$0xff]  }
 0x48c   : > { %v6684_v22 = vpack.i.bf16 %v4852_v10, %v4854_v48  ;;  %5743 = vmatprep.subr.bf16.mxu1 %v8592_v45  ;;  %v6902_v21 = vld [vmem:[%s9482_s4] ss:$0 sm:$0xff]  ;;  %v4856_v46 = vld [vmem:[#allocation3 + $0x72] sm:$0x7f]  ;;  %v9071_v48 = vld [vmem:[%s9483_s5 + $0x10] sm:$0xff]  }
 0x48d   : > { %6680 = vrot.lane.b32.xlu1 %v6679_v23, %s6948_s16  ;;  %v3449_v45 = vadd.f32 %v6902_v21, %v8875_v38  ;;  %v9056_v10 = vld [vmem:[%s9483_s5 + $0x8] sm:$0xff]   ;;  %v9078_v23 = vld [vmem:[%s9483_s5 + $0x58] sm:$0xff]  }
 0x48e   : > { %6685 = vrot.lane.b32.xlu0 %v6684_v22, %s6948_s16  ;;  %v4150_v22 = vld [vmem:[#allocation3 + $0x42] sm:$0x7f] }
 0x48f   : > { %5744 = vmatpush3.bf16.msra.mxu1 %v8600_v4  ;;  %v6648_v4 = vunpack.i.h.bf16 %v6646_v33 }
 0x490   : > { %5745 = vmatprep.subr.bf16.mxu1 %v8607_v56 }
 0x493   : > { %5746 = vmatpush3.bf16.msra.mxu1 %v8614_v31 }
 0x494   : > { %5747 = vmatprep.subr.bf16.mxu1 %v8621_v54 }
 0x497   : > { %5748 = vmatpush3.bf16.msra.mxu1 %v8628_v61  ;;  %v3452_v61 = vadd.f32 %v6902_v21, %v8878_v50  ;;  %v4148_v50 = vld [vmem:[#allocation3 + $0x40] sm:$0x7f]  ;;  %v9091_v21 = vld [vmem:[%s9483_s5 + $0x60] sm:$0xff]  }
 0x498   : > { %5749 = vmatprep.subr.bf16.mxu1 %v8635_v49 }
 0x49b   : > { %5750 = vmatpush3.bf16.msra.mxu1 %v8642_v15  ;;  %v5635_v3 = vpop.f32.mrb[48].mxu1 }
 0x49c   : > { %v5636_v37 = vpop.f32.mrb[49].mxu1  ;;  %5751 = vmatprep.subr.bf16.mxu1 %v8653_v35  ;;  %v4142_v35 = vld [vmem:[#allocation3 + $0x20] sm:$0x7f] }
 0x49d   : > { %v5637_v56 = vadd.f32 %v5636_v37, %v5635_v3  ;;  %v5638_v31 = vpop.f32.mrb[50].mxu1  ;;  %v4167_v38 = vsel %vm1244_vm1, %v4142_v35, %v6648_v4  ;;  %v9085_v3 = vld [vmem:[%s9483_s5 + $0x18] sm:$0xff]   ;;  %v4175_v37 = vpack.c.bf16 %v4150_v22, %v4150_v22  ;;  %v9106_v4 = vld [vmem:[%s9483_s5 + $0x68] sm:$0xff]  }
 0x49e   : > { %v5639_v54 = vpop.f32.mrb[51].mxu1  ;;  %v4171_v52 = vpack.c.bf16 %v4167_v38, %v4167_v38 }
 0x49f   : > { %v3490_v9 = vadd.f32 %v5637_v56, %v3449_v45  ;;  %v5640_v49 = vadd.f32 %v5639_v54, %v5638_v31  ;;  %5752 = vmatpush3.bf16.msra.mxu1 %v8659_v0  ;;  %v6651_v15 = vpop.permute.xlu1 %6650  ;;  %v9099_v45 = vld [vmem:[%s9483_s5 + $0x20] sm:$0xff]   ;;  %v9113_v56 = vld [vmem:[%s9483_s5 + $0x28] sm:$0xff]   ;;  %v9120_v31 = vld [vmem:[%s9483_s5 + $0x70] sm:$0xff]  }
 0x4a0   : > { %v9024_v32 = vpop.permute.xlu0 %6655  ;;  %v6653_v36 = vunpack.i.h.bf16 %v6651_v15  ;;  %v6652_v59 = vunpack.i.l.bf16 %v6651_v15  ;;  %5753 = vmatprep.subr.bf16.mxu1 %v9614_v25 }
 0x4a1   : > { %v6657_v19 = vunpack.i.l.bf16 %v9024_v32  ;;  %v3496_v33 = vmax.f32 %v3490_v9, 0.0  ;;  %v3493_v41 = vadd.f32 %v5640_v49, %v3452_v61  ;;  %v6658_v54 = vunpack.i.h.bf16 %v9024_v32  ;;  %v9128_v61 = vld [vmem:[%s9483_s5 + $0x30] sm:$0xff]   ;;  %v4316_v49 = vld [vmem:[#allocation3 + $0x30] sm:$0x7f] }
 0x4a2   : > { %v4169_v57 = vsel %vm1244_vm1, %v4146_v63, %v6653_v36  ;;  %v4170_v0 = vsel %vm1244_vm1, %v4148_v50, %v6652_v59  ;;  %v4322_v36 = vld [vmem:[#allocation3 + $0x50] sm:$0x7f]  ;;  %v9139_v59 = vld [vmem:[%s9483_s5 + $0x38] sm:$0xff]   ;;  %v4320_v63 = vld [vmem:[#allocation3 + $0x41] sm:$0x7f] }
 0x4a3   : > { %3499 = vst.msk [vmem:[#allocation3 + $0x80] sm:$0xff] %vm1244_vm1, %v3496_v33  ;;  %v3497_v51 = vmax.f32 %v3493_v41, 0.0  ;;  %v4173_v60 = vpack.c.bf16 %v4169_v57, %v4169_v57  ;;  %5754 = vmatpush3.bf16.msra.mxu1 %v9615_v24  ;;  %v4174_v13 = vpack.c.bf16 %v4170_v0, %v4170_v0  ;;  %v4342_v2 = vsel %vm1244_vm1, %v4318_v1, %v6657_v19  ;;  %v4324_v57 = vld [vmem:[#allocation3 + $0x52] sm:$0x7f]  ;;  %v4499_v0 = vld [vmem:[#allocation3 + $0x42] sm:$0x7f] }
 0x4a4   : > { %6008 = vmatprep.subr.bf16.mxu1 %v9613_v39  ;;  %v4346_v8 = vpack.c.bf16 %v4342_v2, %v4342_v2  ;;  %v4341_v35 = vsel %vm1244_vm1, %v4316_v49, %v6658_v54  ;;  %v9169_v24 = vld [vmem:[%s9483_s5 + $0x40] sm:$0xff]   ;;  %v9212_v49 = vld [vmem:[%s9483_s5 + $0x78] sm:$0xff]  }
 0x4a5   : > { %3500 = vst.msk [vmem:[#allocation3 + $0x88] sm:$0x1] %vm1555_vm3, %v3497_v51  ;;  %4251 = vmatprep.mubr.bf16.mxu0 %v4174_v13  ;;  %v4345_v38 = vpack.c.bf16 %v4341_v35, %v4341_v35  ;;  %v4673_v35 = vld [vmem:[#allocation3 + $0x52] sm:$0x7f] }
 0x4a6   : > { %4212 = vmatmul.mubr.bf16.vlgmr.msra.gmra.mrb[60].mxu1 %v4171_v52  ;;  %4252 = vmatmul.mubr.bf16.vlgmr.msra.gmra.mrb[136].mxu0 %v4173_v60  ;;  %v4349_v60 = vpack.c.bf16 %v4324_v57, %v4324_v57  ;;  %v9254_v57 = vld [vmem:[%s9483_s5 + $0x80] sm:$0xff]  }
 0x4a7   : > { %6009 = vmatpush3.bf16.msra.mxu1 %v8873_v34  ;;  %5789 = vmatpush3.bf16.msra.mxu0 %v9040_v27 }
 0x4a8   : > { %4385 = vmatprep.mubr.bf16.mxu0 %v4346_v8  ;;  %6010 = vmatprep.subr.bf16.mxu1 %v9613_v39 }
 0x4a9   : > { %5790 = vmatprep.subr.bf16.mxu0 %v9047_v62  ;;  %6016 = vmatprep.mubr.msk.bf16.mxu1 %vm6952_vm4, %v9613_v39 }
 0x4aa   : > { %v4858_v18 = vld [vmem:[#allocation3 + $0x81] sm:$0x7f] }
 0x4ab   : > { %6011 = vmatpush3.bf16.msra.mxu1 %v8884_v44  ;;  %5791 = vmatpush3.bf16.msra.mxu0 %v9056_v10  ;;  %v6689_v16 = vpack.i.bf16 %v4856_v46, %v4858_v18 }
 0x4ac   : > { %6012 = vmatprep.subr.bf16.mxu1 %v9613_v39  ;;  %5792 = vmatprep.subr.bf16.mxu0 %v9063_v28 }
 0x4ad   : > { %6690 = vrot.lane.b32.xlu1 %v6689_v16, %s6948_s16 }
 0x4af   : > { %6013 = vmatpush3.bf16.msra.mxu1 %v8893_v12  ;;  %5793 = vmatpush3.bf16.msra.mxu0 %v9071_v48 }
 0x4b0   : > { %6014 = vmatprep.subr.bf16.mxu1 %v9613_v39  ;;  %5794 = vmatprep.subr.bf16.mxu0 %v9078_v23 }
 0x4b3   : > { %6015 = vmatpush3.bf16.msra.mxu1 %v8902_v29  ;;  %5795 = vmatpush3.bf16.msra.mxu0 %v9085_v3 }
 0x4b4   : > { %5796 = vmatprep.subr.bf16.mxu0 %v9091_v21  ;;  %5810 = vmatprep.subr.bf16.mxu1 %v8756_v17 }
 0x4b6   : > { %6017 = vmatmul.mubr.msk.bf16.vlgmr.msra.gmra.mrb[64].mxu1 %vm1244_vm1, %v4175_v37 }
 0x4b7   : > { %5797 = vmatpush3.bf16.msra.mxu0 %v9099_v45  ;;  %5811 = vmatpush3.bf16.msra.mxu1 %v8768_v30 }
 0x4b8   : > { %5798 = vmatprep.subr.bf16.mxu0 %v9106_v4  ;;  %5812 = vmatprep.subr.bf16.mxu1 %v8776_v43 }
 0x4bb   : > { %5799 = vmatpush3.bf16.msra.mxu0 %v9113_v56  ;;  %5813 = vmatpush3.bf16.msra.mxu1 %v8783_v5 }
 0x4bc   : > { %5800 = vmatprep.subr.bf16.mxu0 %v9120_v31  ;;  %5814 = vmatprep.subr.bf16.mxu1 %v8788_v20 }
 0x4bf   : > { %5801 = vmatpush3.bf16.msra.mxu0 %v9128_v61  ;;  %5815 = vmatpush3.bf16.msra.mxu1 %v8796_v55  ;;  %v6661_v9 = vpop.permute.xlu1 %6660 }
 0x4c0   : > { %v6662_v15 = vunpack.i.l.bf16 %v6661_v9  ;;  %5802 = vmatprep.subr.bf16.mxu0 %v9614_v25  ;;  %5816 = vmatprep.subr.bf16.mxu1 %v8802_v14  ;;  %v9151_v25 = vpop.permute.xlu0 %6665  ;;  %v6663_v33 = vunpack.i.h.bf16 %v6661_v9 }
 0x4c1   : > { %v6667_v41 = vunpack.i.l.bf16 %v9151_v25  ;;  %v6668_v54 = vunpack.i.h.bf16 %v9151_v25  ;;  %v4677_v25 = vld [vmem:[#allocation3 + $0x70] sm:$0x7f] }
 0x4c2   : > { %v4344_v32 = vsel %vm1244_vm1, %v4322_v36, %v6662_v15  ;;  %v4343_v50 = vsel %vm1244_vm1, %v4320_v63, %v6663_v33  ;;  %v4501_v15 = vld [vmem:[#allocation3 + $0x51] sm:$0x7f] }
 0x4c3   : > { %5803 = vmatpush3.bf16.msra.mxu0 %v9139_v59  ;;  %5817 = vmatpush3.bf16.msra.mxu1 %v8808_v7  ;;  %v4348_v19 = vpack.c.bf16 %v4344_v32, %v4344_v32  ;;  %v4523_v1 = vsel %vm1244_vm1, %v4499_v0, %v6667_v41  ;;  %v4347_v51 = vpack.c.bf16 %v4343_v50, %v4343_v50  ;;  %v9246_v50 = vld [vmem:[%s9483_s5 + $0xc0] sm:$0xff]   ;;  %v9261_v0 = vld [vmem:[%s9483_s5 + $0xc8] sm:$0xff]  }
 0x4c4   : > { %5818 = vmatprep.subr.bf16.mxu1 %v8814_v58  ;;  %6020 = vmatprep.subr.bf16.mxu0 %v9613_v39  ;;  %v4527_v13 = vpack.c.bf16 %v4523_v1, %v4523_v1  ;;  %v9268_v1 = vld [vmem:[%s9483_s5 + $0x88] sm:$0xff]  }
 0x4c5   : > { %4425 = vmatprep.mubr.bf16.mxu1 %v4348_v19 }
 0x4c6   : > { %4386 = vmatmul.mubr.bf16.vlgmr.msra.gmra.mrb[140].mxu0 %v4345_v38  ;;  %v4505_v38 = vld [vmem:[#allocation3 + $0x62] sm:$0x7f] }
 0x4c7   : > { %5819 = vmatpush3.bf16.msra.mxu1 %v8820_v11  ;;  %6021 = vmatpush3.bf16.msra.mxu0 %v8873_v34  ;;  %v4530_v63 = vpack.c.bf16 %v4505_v38, %v4505_v38  ;;  %v4857_v38 = vld [vmem:[#allocation3 + $0x80] sm:$0x7f] }
 0x4c8   : > { %5820 = vmatprep.subr.bf16.mxu1 %v8826_v40  ;;  %6022 = vmatprep.subr.bf16.mxu0 %v9613_v39 }
 0x4c9   : > { %6028 = vmatprep.mubr.msk.bf16.mxu0 %vm6952_vm4, %v9613_v39 }
 0x4cb   : > { %5821 = vmatpush3.bf16.msra.mxu1 %v8832_v42  ;;  %6023 = vmatpush3.bf16.msra.mxu0 %v8884_v44 }
 0x4cc   : > { %5822 = vmatprep.subr.bf16.mxu1 %v8838_v26  ;;  %6024 = vmatprep.subr.bf16.mxu0 %v9613_v39 }
 0x4cf   : > { %5823 = vmatpush3.bf16.msra.mxu1 %v8844_v53  ;;  %6025 = vmatpush3.bf16.msra.mxu0 %v8893_v12 }
 0x4d0   : > { %5824 = vmatprep.subr.bf16.mxu1 %v8850_v6  ;;  %6026 = vmatprep.subr.bf16.mxu0 %v9613_v39 }
 0x4d3   : > { %5825 = vmatpush3.bf16.msra.mxu1 %v8856_v47  ;;  %6027 = vmatpush3.bf16.msra.mxu0 %v8902_v29 }
 0x4d4   : > { %5837 = vmatprep.subr.bf16.mxu1 %v9169_v24  ;;  %5859 = vmatprep.subr.bf16.mxu0 %v8756_v17 }
 0x4d6   : > { %4426 = vmatmul.mubr.bf16.vlgmr.msra.gmra.mrb[68].mxu1 %v4347_v51  ;;  %6029 = vmatmul.mubr.msk.bf16.vlgmr.msra.gmra.mrb[144].mxu0 %vm1244_vm1, %v4349_v60  ;;  %v9275_v51 = vld [vmem:[%s9483_s5 + $0xd0] sm:$0xff]  }
 0x4d7   : > { %5838 = vmatpush3.bf16.msra.mxu1 %v9040_v27  ;;  %4566 = vmatprep.mubr.bf16.mxu1 %v4527_v13  ;;  %v5657_v2 = vpop.f32.mrb[120].mxu0  ;;  %v4671_v13 = vld [vmem:[#allocation3 + $0x50] sm:$0x7f] }
 0x4d8   : > { %5860 = vmatpush3.bf16.msra.mxu0 %v8768_v30  ;;  %5839 = vmatprep.subr.bf16.mxu1 %v9047_v62  ;;  %v5658_v52 = vpop.f32.mrb[121].mxu0 }
 0x4d9   : > { %5861 = vmatprep.subr.bf16.mxu0 %v8776_v43  ;;  %v9178_v8 = vadd.f32 %v5658_v52, %v5657_v2  ;;  %v5660_v17 = vpop.f32.mrb[122].mxu0  ;;  %v4503_v43 = vld [vmem:[#allocation3 + $0x60] sm:$0x7f]  ;;  %v9288_v52 = vld [vmem:[%s9483_s5 + $0x98] sm:$0xff]  }
 0x4da   : > { %v5661_v46 = vpop.f32.mrb[123].mxu0  ;;  %v9302_v17 = vld [vmem:[%s9483_s5 + $0xa0] sm:$0xff]  }
 0x4db   : > { %5840 = vmatpush3.bf16.msra.mxu1 %v9056_v10  ;;  %v9308_v46 = vld [vmem:[%s9484_s6] ss:$0 sm:$0xff] }
 0x4dc   : > { %5862 = vmatpush3.bf16.msra.mxu0 %v8783_v5  ;;  %5841 = vmatprep.subr.bf16.mxu1 %v9063_v28 }
 0x4dd   : > { %5863 = vmatprep.subr.bf16.mxu0 %v8788_v20 }
 0x4df   : > { %5842 = vmatpush3.bf16.msra.mxu1 %v9071_v48  ;;  %v6671_v30 = vpop.permute.xlu1 %6670 }
 0x4e0   : > { %5864 = vmatpush3.bf16.msra.mxu0 %v8796_v55  ;;  %v6672_v18 = vunpack.i.l.bf16 %v6671_v30  ;;  %5843 = vmatprep.subr.bf16.mxu1 %v9078_v23 }
 0x4e1   : > { %5865 = vmatprep.subr.bf16.mxu0 %v8802_v14 }
 0x4e2   : > { %v4525_v16 = vsel %vm1244_vm1, %v4503_v43, %v6672_v18 }
 0x4e3   : > { %5844 = vmatpush3.bf16.msra.mxu1 %v9085_v3  ;;  %v4529_v5 = vpack.c.bf16 %v4525_v16, %v4525_v16 }
 0x4e4   : > { %5866 = vmatpush3.bf16.msra.mxu0 %v8808_v7  ;;  %5845 = vmatprep.subr.bf16.mxu1 %v9091_v21  ;;  %v9200_v7 = vpop.permute.xlu0 %6675 }
 0x4e5   : > { %5867 = vmatprep.subr.bf16.mxu0 %v8814_v58  ;;  %4606 = vmatprep.mubr.bf16.mxu0 %v4529_v5  ;;  %v6677_v9 = vunpack.i.l.bf16 %v9200_v7  ;;  %v6678_v60 = vunpack.i.h.bf16 %v9200_v7  ;;  %v9328_v7 = vld [vmem:[%s9483_s5 + $0xa8] sm:$0xff]  }
 0x4e7   : > { %5846 = vmatpush3.bf16.msra.mxu1 %v9099_v45  ;;  %v9196_v20 = vpop.f32.mrb[124].mxu0  ;;  %v4697_v36 = vsel %vm1244_vm1, %v4673_v35, %v6677_v9  ;;  %v4696_v2 = vsel %vm1244_vm1, %v4671_v13, %v6678_v60  ;;  %v9352_v35 = vld [vmem:[%s9483_s5 + $0xb0] sm:$0xff]  }
 0x4e8   : > { %5868 = vmatpush3.bf16.msra.mxu0 %v8820_v11  ;;  %5847 = vmatprep.subr.bf16.mxu1 %v9106_v4  ;;  %v5994_v22 = vpop.f32.mrb[125].mxu0  ;;  %v6673_v11 = vunpack.i.h.bf16 %v6671_v30  ;;  %v4701_v19 = vpack.c.bf16 %v4697_v36, %v4697_v36  ;;  %v9314_v30 = vld [vmem:[%s9483_s5 + $0xe8] sm:$0xff]  }
 0x4e9   : > { %5869 = vmatprep.subr.bf16.mxu0 %v8826_v40  ;;  %v3950_v37 = vpop.f32.mrb[126].mxu0  ;;  %v4497_v40 = vld [vmem:[#allocation3 + $0x40] sm:$0x7f] }
 0x4ea   : > { %v5995_v58 = vpop.f32.mrb[127].mxu0 }
 0x4eb   : > { %5848 = vmatpush3.bf16.msra.mxu1 %v9113_v56 }
 0x4ec   : > { %5870 = vmatpush3.bf16.msra.mxu0 %v8832_v42  ;;  %5849 = vmatprep.subr.bf16.mxu1 %v9120_v31  ;;  %v4522_v42 = vsel %vm1244_vm1, %v4497_v40, %v6668_v54 }
 0x4ed   : > { %5871 = vmatprep.subr.bf16.mxu0 %v8838_v26  ;;  %v4524_v26 = vsel %vm1244_vm1, %v4501_v15, %v6673_v11 }
 0x4ee   : > { %v4528_v32 = vpack.c.bf16 %v4524_v26, %v4524_v26 }
 0x4ef   : > { %5850 = vmatpush3.bf16.msra.mxu1 %v9128_v61 }
 0x4f0   : > { %5872 = vmatpush3.bf16.msra.mxu0 %v8844_v53  ;;  %5851 = vmatprep.subr.bf16.mxu1 %v9212_v49  ;;  %v4526_v53 = vpack.c.bf16 %v4522_v42, %v4522_v42 }
 0x4f1   : > { %5873 = vmatprep.subr.bf16.mxu0 %v8850_v6 }
 0x4f3   : > { %5852 = vmatpush3.bf16.msra.mxu1 %v9139_v59 }
 0x4f4   : > { %5874 = vmatpush3.bf16.msra.mxu0 %v8856_v47  ;;  %6032 = vmatprep.subr.bf16.mxu1 %v9613_v39 }
 0x4f5   : > { %5886 = vmatprep.subr.bf16.mxu0 %v9169_v24 }
 0x4f6   : > { %4567 = vmatmul.mubr.bf16.vlgmr.msra.gmra.mrb[72].mxu1 %v4526_v53  ;;  %v4675_v53 = vld [vmem:[#allocation3 + $0x61] sm:$0x7f] }
 0x4f7   : > { %4607 = vmatmul.mubr.bf16.vlgmr.msra.gmra.mrb[148].mxu0 %v4528_v32  ;;  %6033 = vmatpush3.bf16.msra.mxu1 %v8873_v34 }
 0x4f8   : > { %5887 = vmatpush3.bf16.msra.mxu0 %v9040_v27  ;;  %4740 = vmatprep.mubr.bf16.mxu0 %v4701_v19 }
 0x4f9   : > { %6034 = vmatprep.subr.bf16.mxu1 %v9613_v39  ;;  %5888 = vmatprep.subr.bf16.mxu0 %v9047_v62 }
 0x4fa   : > { %6040 = vmatprep.mubr.msk.bf16.mxu1 %vm6952_vm4, %v9613_v39 }
 0x4fb   : > { %6035 = vmatpush3.bf16.msra.mxu1 %v8884_v44 }
 0x4fc   : > { %5889 = vmatpush3.bf16.msra.mxu0 %v9056_v10  ;;  %6036 = vmatprep.subr.bf16.mxu1 %v9613_v39 }
 0x4fd   : > { %5890 = vmatprep.subr.bf16.mxu0 %v9063_v28 }
 0x4ff   : > { %6037 = vmatpush3.bf16.msra.mxu1 %v8893_v12  ;;  %v9234_v6 = vpop.permute.xlu1 %6680 }
 0x500   : > { %5891 = vmatpush3.bf16.msra.mxu0 %v9071_v48  ;;  %v6682_v47 = vunpack.i.l.bf16 %v9234_v6  ;;  %6038 = vmatprep.subr.bf16.mxu1 %v9613_v39  ;;  %v9317_v18 = vpop.permute.xlu0 %6685  ;;  %v6683_v40 = vunpack.i.h.bf16 %v9234_v6 }
 0x501   : > { %5892 = vmatprep.subr.bf16.mxu0 %v9078_v23  ;;  %v6687_v26 = vunpack.i.l.bf16 %v9317_v18 }
 0x502   : > { %v4699_v33 = vsel %vm1244_vm1, %v4677_v25, %v6682_v47  ;;  %v4698_v19 = vsel %vm1244_vm1, %v4675_v53, %v6683_v40  ;;  %v4853_v47 = vld [vmem:[#allocation3 + $0x62] sm:$0x7f]  ;;  %v4679_v25 = vld [vmem:[#allocation3 + $0x72] sm:$0x7f] }
 0x503   : > { %6039 = vmatpush3.bf16.msra.mxu1 %v8902_v29  ;;  %v4703_v41 = vpack.c.bf16 %v4699_v33, %v4699_v33  ;;  %v4877_v60 = vsel %vm1244_vm1, %v4853_v47, %v6687_v26  ;;  %v4702_v13 = vpack.c.bf16 %v4698_v19, %v4698_v19 }
 0x504   : > { %5893 = vmatpush3.bf16.msra.mxu0 %v9085_v3  ;;  %5908 = vmatprep.subr.bf16.mxu1 %v9246_v50 }
 0x505   : > { %5894 = vmatprep.subr.bf16.mxu0 %v9091_v21 }
 0x506   : > { %6041 = vmatmul.mubr.msk.bf16.vlgmr.msra.gmra.mrb[76].mxu1 %vm1244_vm1, %v4530_v63  ;;  %v6932_v63 = vld [vmem:[%s9483_s5 + $0xb8] sm:$0xff]  }
 0x507   : > { %5909 = vmatpush3.bf16.msra.mxu1 %v9254_v57  ;;  %4780 = vmatprep.mubr.bf16.mxu1 %v4703_v41 }
 0x508   : > { %5895 = vmatpush3.bf16.msra.mxu0 %v9099_v45  ;;  %5910 = vmatprep.subr.bf16.mxu1 %v9261_v0 }
 0x509   : > { %5896 = vmatprep.subr.bf16.mxu0 %v9106_v4 }
 0x50b   : > { %5911 = vmatpush3.bf16.msra.mxu1 %v9268_v1 }
 0x50c   : > { %5897 = vmatpush3.bf16.msra.mxu0 %v9113_v56  ;;  %5912 = vmatprep.subr.bf16.mxu1 %v9275_v51 }
 0x50d   : > { %5898 = vmatprep.subr.bf16.mxu0 %v9120_v31 }
 0x50f   : > { %5913 = vmatpush3.bf16.msra.mxu1 %v8796_v55  ;;  %v9295_v55 = vld [vmem:[%s9483_s5 + $0xe0] sm:$0xff]  }
 0x510   : > { %5899 = vmatpush3.bf16.msra.mxu0 %v9128_v61  ;;  %5914 = vmatprep.subr.bf16.mxu1 %v8802_v14  ;;  %v4700_v14 = vpack.c.bf16 %v4696_v2, %v4696_v2 }
 0x511   : > { %5900 = vmatprep.subr.bf16.mxu0 %v9212_v49 }
 0x513   : > { %5915 = vmatpush3.bf16.msra.mxu1 %v9288_v52 }
 0x514   : > { %5901 = vmatpush3.bf16.msra.mxu0 %v9139_v59  ;;  %5916 = vmatprep.subr.bf16.mxu1 %v9295_v55 }
 0x515   : > { %6044 = vmatprep.subr.bf16.mxu0 %v9613_v39 }
 0x517   : > { %4741 = vmatmul.mubr.bf16.vlgmr.msra.gmra.mrb[152].mxu0 %v4700_v14  ;;  %5917 = vmatpush3.bf16.msra.mxu1 %v9302_v17  ;;  %v4704_v14 = vpack.c.bf16 %v4679_v25, %v4679_v25 }
 0x518   : > { %6045 = vmatpush3.bf16.msra.mxu0 %v8873_v34  ;;  %5918 = vmatprep.subr.bf16.mxu1 %v9314_v30  ;;  %v3868_v34 = vadd.f32 %v9178_v8, %v9308_v46  ;;  %v9337_v8 = vld [vmem:[%s9483_s5 + $0xf0] sm:$0xff]  }
 0x519   : > { %6046 = vmatprep.subr.bf16.mxu0 %v9613_v39  ;;  %6052 = vmatprep.mubr.msk.bf16.mxu0 %vm6952_vm4, %v9613_v39 }
 0x51a   : > { %v5679_v43 = vpop.f32.mrb[52].mxu1  ;;  %v5706_v16 = vpop.f32.mrb[128].mxu0 }
 0x51b   : > { %v5680_v5 = vpop.f32.mrb[53].mxu1  ;;  %v5707_v37 = vpop.f32.mrb[129].mxu0  ;;  %5919 = vmatpush3.bf16.msra.mxu1 %v9328_v7 }
 0x51c   : > { %v5681_v22 = vadd.f32 %v5680_v5, %v5679_v43  ;;  %v5682_v58 = vpop.f32.mrb[54].mxu1  ;;  %v9331_v54 = vadd.f32 %v5707_v37, %v5706_v16  ;;  %6047 = vmatpush3.bf16.msra.mxu0 %v8884_v44  ;;  %v5709_v11 = vpop.f32.mrb[130].mxu0  ;;  %5920 = vmatprep.subr.bf16.mxu1 %v9337_v8  ;;  %v4881_v16 = vpack.c.bf16 %v4877_v60, %v4877_v60 }
 0x51d   : > { %v5683_v9 = vpop.f32.mrb[55].mxu1  ;;  %v5710_v15 = vpop.f32.mrb[131].mxu0  ;;  %6048 = vmatprep.subr.bf16.mxu0 %v9613_v39 }
 0x51e   : > { %v3908_v42 = vadd.f32 %v5681_v22, %v3868_v34 }
 0x51f   : > { %5921 = vmatpush3.bf16.msra.mxu1 %v9352_v35  ;;  %v9355_v36 = vpop.permute.xlu1 %6690 }
 0x520   : > { %v3948_v44 = vadd.f32 %v9196_v20, %v3908_v42  ;;  %6049 = vmatpush3.bf16.msra.mxu0 %v8893_v12  ;;  %v6692_v32 = vunpack.i.l.bf16 %v9355_v36  ;;  %v9362_v20 = vld [vmem:[%s9483_s5 + $0xf8] sm:$0xff]   ;;  %v3958_v12 = vld [vmem:[%s9346_s28] sm:$0xf] }
 0x521   : > { %5922 = vmatprep.subr.bf16.mxu1 %v9362_v20  ;;  %6050 = vmatprep.subr.bf16.mxu0 %v9613_v39 }
 0x522   : > { %v3953_v6 = vmax.f32 %v3948_v44, 0.0  ;;  %v4879_v33 = vsel %vm1244_vm1, %v4857_v38, %v6692_v32 }
 0x523   : > { %5923 = vmatpush3.bf16.msra.mxu1 %v6932_v63  ;;  %v4883_v43 = vpack.c.bf16 %v4879_v33, %v4879_v33 }
 0x524   : > { %v3954_v41 = vpack.c.bf16 %v3953_v6, %v3953_v6  ;;  %6051 = vmatpush3.bf16.msra.mxu0 %v8902_v29  ;;  %5935 = vmatprep.subr.bf16.mxu1 %v9169_v24 }
 0x525   : > { %5957 = vmatprep.subr.bf16.mxu0 %v9246_v50 }
 0x526   : > { %v3959_v2 = vsel %vm3957_vm7, %v3954_v41, %v3958_v12  ;;  %4781 = vmatmul.mubr.bf16.vlgmr.msra.gmra.mrb[80].mxu1 %v4702_v13  ;;  %v4313_v13 = vld [vmem:[%s9346_s28 + $0x8] sm:$0x7]  ;;  %vm4846_vm7 = vmand %vm4844_vm5, %vm4845_vm6 }
 0x527   : > { %3960 = vst [vmem:[%s9346_s28] sm:$0xf] %v3959_v2  ;;  %6053 = vmatmul.mubr.msk.bf16.vlgmr.msra.gmra.mrb[156].mxu0 %vm1244_vm1, %v4704_v14  ;;  %5936 = vmatpush3.bf16.msra.mxu1 %v9040_v27  ;;  %v6933_v27 = vld [vmem:[%s9483_s5 + $0x90] sm:$0xff]  }
 0x528   : > { %4920 = vmatprep.mubr.bf16.mxu1 %v4881_v16  ;;  %5958 = vmatpush3.bf16.msra.mxu0 %v9254_v57 }
 0x529   : > { %4960 = vmatprep.mubr.bf16.mxu0 %v4883_v43  ;;  %5937 = vmatprep.subr.bf16.mxu1 %v9047_v62  ;;  %v6934_v62 = vld [vmem:[%s9483_s5 + $0xd8] sm:$0xff]  }
 0x52a   : > { %v9382_v29 = vpop.f32.mrb[132].mxu0  ;;  %5959 = vmatprep.subr.bf16.mxu0 %v9261_v0 }
 0x52b   : > { %v6006_v24 = vpop.f32.mrb[133].mxu0  ;;  %5938 = vmatpush3.bf16.msra.mxu1 %v9056_v10  ;;  %v6688_v10 = vunpack.i.h.bf16 %v9317_v18 }
 0x52c   : > { %v4115_v50 = vpop.f32.mrb[134].mxu0  ;;  %5960 = vmatpush3.bf16.msra.mxu0 %v9268_v1  ;;  %5939 = vmatprep.subr.bf16.mxu1 %v9063_v28  ;;  %v6693_v28 = vunpack.i.h.bf16 %v9355_v36 }
 0x52d   : > { %v6007_v5 = vpop.f32.mrb[135].mxu0  ;;  %5961 = vmatprep.subr.bf16.mxu0 %v9275_v51  ;;  %v4033_v51 = vadd.f32 %v9331_v54, %v9308_v46 }
 0x52e   : > { %v4137_v11 = vld [vmem:[%s9346_s28] sm:$0x8] }
 0x52f   : > { %5940 = vmatpush3.bf16.msra.mxu1 %v9071_v48  ;;  %v4851_v48 = vld [vmem:[#allocation3 + $0x60] sm:$0x7f] }
 0x530   : > { %5962 = vmatpush3.bf16.msra.mxu0 %v6933_v27  ;;  %5941 = vmatprep.subr.bf16.mxu1 %v9078_v23  ;;  %v4876_v23 = vsel %vm1244_vm1, %v4851_v48, %v6688_v10 }
 0x531   : > { %5963 = vmatprep.subr.bf16.mxu0 %v6934_v62 }
 0x533   : > { %5942 = vmatpush3.bf16.msra.mxu1 %v9085_v3  ;;  %v4855_v3 = vld [vmem:[#allocation3 + $0x71] sm:$0x7f] }
 0x534   : > { %5964 = vmatpush3.bf16.msra.mxu0 %v9288_v52  ;;  %5943 = vmatprep.subr.bf16.mxu1 %v9091_v21  ;;  %v4878_v21 = vsel %vm1244_vm1, %v4855_v3, %v6693_v28 }
 0x535   : > { %5965 = vmatprep.subr.bf16.mxu0 %v9295_v55 }
 0x537   : > { %5944 = vmatpush3.bf16.msra.mxu1 %v9099_v45  ;;  %v4880_v45 = vpack.c.bf16 %v4876_v23, %v4876_v23 }
 0x538   : > { %5966 = vmatpush3.bf16.msra.mxu0 %v9302_v17  ;;  %5945 = vmatprep.subr.bf16.mxu1 %v9106_v4  ;;  %v4882_v4 = vpack.c.bf16 %v4878_v21, %v4878_v21 }
 0x539   : > { %5967 = vmatprep.subr.bf16.mxu0 %v9314_v30 }
 0x53b   : > { %5946 = vmatpush3.bf16.msra.mxu1 %v9113_v56  ;;  %v6935_v56 = vld [vmem:[%s9483_s5 + $0x100] sm:$0xff]  }
 0x53c   : > { %5968 = vmatpush3.bf16.msra.mxu0 %v9328_v7  ;;  %5947 = vmatprep.subr.bf16.mxu1 %v9120_v31  ;;  %v6936_v31 = vld [vmem:[%s9483_s5 + $0x108] sm:$0xff]  }
 0x53d   : > { %5969 = vmatprep.subr.bf16.mxu0 %v9337_v8 }
 0x53f   : > { %5948 = vmatpush3.bf16.msra.mxu1 %v9128_v61  ;;  %v6937_v61 = vld [vmem:[%s9483_s5 + $0x110] sm:$0xff]  }
 0x540   : > { %5970 = vmatpush3.bf16.msra.mxu0 %v9352_v35  ;;  %5949 = vmatprep.subr.bf16.mxu1 %v9212_v49  ;;  %v6938_v49 = vld [vmem:[%s9483_s5 + $0x118] sm:$0xff]  }
 0x541   : > { %5971 = vmatprep.subr.bf16.mxu0 %v9362_v20 }
 0x543   : > { %5950 = vmatpush3.bf16.msra.mxu1 %v9139_v59  ;;  %v4859_v59 = vld [vmem:[#allocation3 + $0x82] sm:$0x7f] }
 0x544   : > { %5972 = vmatpush3.bf16.msra.mxu0 %v6932_v63  ;;  %6056 = vmatprep.subr.bf16.mxu1 %v9613_v39  ;;  %v4884_v57 = vpack.c.bf16 %v4859_v59, %v4859_v59 }
 0x546   : > { %4921 = vmatmul.mubr.bf16.vlgmr.msra.gmra.mrb[84].mxu1 %v4880_v45 }
 0x547   : > { %4961 = vmatmul.mubr.bf16.vlgmr.msra.gmra.mrb[160].mxu0 %v4882_v4  ;;  %6057 = vmatpush3.bf16.msra.mxu1 %v6935_v56 }
 0x548   : > { %6058 = vmatprep.subr.bf16.mxu1 %v9613_v39  ;;  %6064 = vmatprep.mubr.msk.bf16.mxu1 %vm6952_vm4, %v9613_v39 }
 0x54b   : > { %6059 = vmatpush3.bf16.msra.mxu1 %v6936_v31 }
 0x54c   : > { %6060 = vmatprep.subr.bf16.mxu1 %v9613_v39 }
 0x54f   : > { %6061 = vmatpush3.bf16.msra.mxu1 %v6937_v61 }
 0x550   : > { %6062 = vmatprep.subr.bf16.mxu1 %v9613_v39 }
 0x553   : > { %6063 = vmatpush3.bf16.msra.mxu1 %v6938_v49 }
 0x556   : > { %6065 = vmatmul.mubr.msk.bf16.vlgmr.msra.gmra.mrb[88].mxu1 %vm1244_vm1, %v4884_v57  ;;  %vm4495_vm1 = vcmask 517120  }
 0x557   : > { %vm4667_vm4 = vmand %vm4495_vm1, %vm4666_vm2 }
 0x559   : > { %v5728_v0 = vpop.f32.mrb[56].mxu1 }
 0x55a   : > { %v5729_v1 = vpop.f32.mrb[57].mxu1 }
 0x55b   : > { %v5730_v52 = vadd.f32 %v5729_v1, %v5728_v0  ;;  %v5731_v55 = vpop.f32.mrb[58].mxu1 }
 0x55c   : > { %v5732_v17 = vpop.f32.mrb[59].mxu1 }
 0x55d   : > { %v4073_v39 = vadd.f32 %v5730_v52, %v4033_v51 }
 0x55f   : > { %v4113_v30 = vadd.f32 %v9382_v29, %v4073_v39 }
 0x561   : > { %v4118_v18 = vmax.f32 %v4113_v30, 0.0 }
 0x563   : > { %v5239_v34 = vpack.c.bf16 %v4118_v18, %v4118_v18 }
 0x565   : > { %v4124_v22 = vshll.u32 %v5239_v34, 16  ;;  %v4127_v37 = vshrl.u32 %v5239_v34, 16 }
 0x567   : > { %v4126_v7 = vrot.slane %v4124_v22, 5  ;;  %v4129_v58 = vrot.slane %v4127_v37, 4 }
 0x569   : > { %v4130_v54 = vor.u32 %v4129_v58, %v4126_v7  ;;  %v4138_v9 = vsel %vm4136_vm10, %v4126_v7, %v4137_v11 }
 0x56a   : > { %4139 = vst [vmem:[%s9346_s28] sm:$0x8] %v4138_v9 }
 0x56b   : > { %v4131_v8 = vrot.slane %v4130_v54, 4 }
 0x56d   : > { %4141 = vst.msk [vmem:[%s9346_s28 + $0x4] sm:$0x7] %vm4140_vm11, %v4131_v8 }
 0x579   : > { %v5755_v40 = vpop.f32.mrb[60].mxu1  ;;  %v5777_v42 = vpop.f32.mrb[136].mxu0 }
 0x57a   : > { %v5756_v15 = vpop.f32.mrb[61].mxu1  ;;  %v5778_v26 = vpop.f32.mrb[137].mxu0 }
 0x57b   : > { %v5757_v44 = vadd.f32 %v5756_v15, %v5755_v40  ;;  %v5758_v35 = vpop.f32.mrb[62].mxu1  ;;  %v5779_v36 = vadd.f32 %v5778_v26, %v5777_v42  ;;  %v5780_v53 = vpop.f32.mrb[138].mxu0 }
 0x57c   : > { %v5759_v32 = vpop.f32.mrb[63].mxu1  ;;  %v5781_v20 = vpop.f32.mrb[139].mxu0  ;;  %v4668_v53 = vld [vmem:[%s9346_s28 + $0x10] sm:$0x3] }
 0x57d   : > { %v4214_v19 = vadd.f32 %v5757_v44, %v9308_v46 }
 0x57f   : > { %v4254_v6 = vadd.f32 %v5779_v36, %v4214_v19 }
 0x589   : > { %v4293_v47 = vpop.f32.mrb[64].mxu1 }
 0x58a   : > { %v4294_v38 = vadd.f32 %v4293_v47, %v4254_v6  ;;  %v6018_v12 = vpop.f32.mrb[65].mxu1 }
 0x58b   : > { %v4296_v25 = vpop.f32.mrb[66].mxu1 }
 0x58c   : > { %v4299_v33 = vmax.f32 %v4294_v38, 0.0  ;;  %v6019_v41 = vpop.f32.mrb[67].mxu1 }
 0x58e   : > { %v5240_v63 = vpack.c.bf16 %v4299_v33, %v4299_v33 }
 0x590   : > { %v4304_v60 = vrot.slane %v5240_v63, 5 }
 0x592   : > { %v4305_v2 = vrot.slane %v4304_v60, 4  ;;  %4309 = vst.msk [vmem:[%s9346_s28 + $0x4] sm:$0x8] %vm4134_vm8, %v4304_v60  ;;  %vm5020_vm8 = vsmask.f32 256 }
 0x593   : > { %vm5021_vm9 = vmand %vm1555_vm3, %vm5020_vm8 }
 0x594   : > { %v4314_v14 = vsel %vm4312_vm13, %v4305_v2, %v4313_v13 }
 0x595   : > { %4315 = vst [vmem:[%s9346_s28 + $0x8] sm:$0x7] %v4314_v14 }
 0x599   : > { %v5804_v43 = vpop.f32.mrb[140].mxu0 }
 0x59a   : > { %v5805_v16 = vpop.f32.mrb[141].mxu0 }
 0x59b   : > { %v5806_v29 = vadd.f32 %v5805_v16, %v5804_v43  ;;  %v5807_v24 = vpop.f32.mrb[142].mxu0 }
 0x59c   : > { %v5808_v50 = vpop.f32.mrb[143].mxu0  ;;  %v4492_v51 = vld [vmem:[%s9346_s28 + $0x8] sm:$0xc] }
 0x59d   : > { %v4388_v28 = vadd.f32 %v5806_v29, %v9308_v46 }
 0x5a9   : > { %v5826_v5 = vpop.f32.mrb[68].mxu1  ;;  %v4467_v27 = vpop.f32.mrb[144].mxu0 }
 0x5aa   : > { %v5827_v62 = vpop.f32.mrb[69].mxu1  ;;  %v6030_v10 = vpop.f32.mrb[145].mxu0 }
 0x5ab   : > { %v5828_v48 = vadd.f32 %v5827_v62, %v5826_v5  ;;  %v5829_v23 = vpop.f32.mrb[70].mxu1  ;;  %v4470_v3 = vpop.f32.mrb[146].mxu0 }
 0x5ac   : > { %v5830_v21 = vpop.f32.mrb[71].mxu1  ;;  %v6031_v45 = vpop.f32.mrb[147].mxu0 }
 0x5ad   : > { %v4428_v4 = vadd.f32 %v5828_v48, %v4388_v28 }
 0x5af   : > { %v4468_v56 = vadd.f32 %v4467_v27, %v4428_v4 }
 0x5b1   : > { %v4473_v31 = vmax.f32 %v4468_v56, 0.0 }
 0x5b3   : > { %v5241_v61 = vpack.c.bf16 %v4473_v31, %v4473_v31 }
 0x5b5   : > { %v4479_v59 = vshrl.u32 %v5241_v61, 16  ;;  %v4482_v49 = vshll.u32 %v5241_v61, 16 }
 0x5b7   : > { %v4481_v57 = vrot.slane %v4479_v59, 5  ;;  %v4484_v0 = vrot.slane %v4482_v49, 6 }
 0x5b9   : > { %v4485_v1 = vor.u32 %v4484_v0, %v4481_v57 }
 0x5bb   : > { %v4486_v52 = vrot.slane %v4485_v1, 4  ;;  %v4493_v55 = vsel %vm4491_vm0, %v4485_v1, %v4492_v51 }
 0x5bc   : > { %4494 = vst [vmem:[%s9346_s28 + $0x8] sm:$0xc] %v4493_v55 }
 0x5bd   : > { %4496 = vst.msk [vmem:[%s9346_s28 + $0xc] sm:$0x3] %vm4495_vm1, %v4486_v52 }
 0x5c9   : > { %v5853_v17 = vpop.f32.mrb[72].mxu1 }
 0x5ca   : > { %v5875_v39 = vpop.f32.mrb[148].mxu0  ;;  %v5854_v30 = vpop.f32.mrb[73].mxu1 }
 0x5cb   : > { %v5855_v18 = vadd.f32 %v5854_v30, %v5853_v17  ;;  %v5876_v34 = vpop.f32.mrb[149].mxu0  ;;  %v5856_v22 = vpop.f32.mrb[74].mxu1 }
 0x5cc   : > { %v5877_v37 = vadd.f32 %v5876_v34, %v5875_v39  ;;  %v5878_v7 = vpop.f32.mrb[150].mxu0  ;;  %v5857_v58 = vpop.f32.mrb[75].mxu1 }
 0x5cd   : > { %v4569_v11 = vadd.f32 %v5855_v18, %v9308_v46  ;;  %v5879_v54 = vpop.f32.mrb[151].mxu0  ;;  %v5022_v7 = vld [vmem:[%s9346_s28 + $0x18] sm:$0x1] }
 0x5cf   : > { %v4609_v9 = vadd.f32 %v5877_v37, %v4569_v11 }
 0x5d9   : > { %v4648_v8 = vpop.f32.mrb[76].mxu1 }
 0x5da   : > { %v4649_v40 = vadd.f32 %v4648_v8, %v4609_v9  ;;  %v6042_v42 = vpop.f32.mrb[77].mxu1 }
 0x5db   : > { %v4651_v15 = vpop.f32.mrb[78].mxu1 }
 0x5dc   : > { %v4654_v26 = vmax.f32 %v4649_v40, 0.0  ;;  %v6043_v44 = vpop.f32.mrb[79].mxu1 }
 0x5de   : > { %v5242_v35 = vpack.c.bf16 %v4654_v26, %v4654_v26 }
 0x5e0   : > { %v4659_v36 = vrot.slane %v5242_v35, 6 }
 0x5e2   : > { %v4660_v32 = vrot.slane %v4659_v36, 4  ;;  %4664 = vst.msk [vmem:[%s9346_s28 + $0xc] sm:$0xc] %vm4489_vm14, %v4659_v36 }
 0x5e4   : > { %v4669_v20 = vsel %vm4667_vm4, %v4660_v32, %v4668_v53 }
 0x5e5   : > { %4670 = vst [vmem:[%s9346_s28 + $0x10] sm:$0x3] %v4669_v20 }
 0x5ea   : > { %v5902_v19 = vpop.f32.mrb[152].mxu0 }
 0x5eb   : > { %v5903_v6 = vpop.f32.mrb[153].mxu0 }
 0x5ec   : > { %v5904_v47 = vadd.f32 %v5903_v6, %v5902_v19  ;;  %v5905_v38 = vpop.f32.mrb[154].mxu0  ;;  %v4847_v23 = vld [vmem:[%s9346_s28 + $0x10] sm:$0xe] }
 0x5ed   : > { %v5906_v12 = vpop.f32.mrb[155].mxu0 }
 0x5ee   : > { %v4743_v63 = vadd.f32 %v5904_v47, %v9308_v46 }
 0x5f9   : > { %v5924_v25 = vpop.f32.mrb[80].mxu1 }
 0x5fa   : > { %v4822_v33 = vpop.f32.mrb[156].mxu0  ;;  %v5925_v41 = vpop.f32.mrb[81].mxu1 }
 0x5fb   : > { %v5926_v60 = vadd.f32 %v5925_v41, %v5924_v25  ;;  %v6054_v13 = vpop.f32.mrb[157].mxu0  ;;  %v5927_v2 = vpop.f32.mrb[82].mxu1 }
 0x5fc   : > { %v4825_v14 = vpop.f32.mrb[158].mxu0  ;;  %v5928_v43 = vpop.f32.mrb[83].mxu1 }
 0x5fd   : > { %v4783_v16 = vadd.f32 %v5926_v60, %v4743_v63  ;;  %v6055_v29 = vpop.f32.mrb[159].mxu0 }
 0x5ff   : > { %v4823_v24 = vadd.f32 %v4822_v33, %v4783_v16 }
 0x601   : > { %v4828_v50 = vmax.f32 %v4823_v24, 0.0 }
 0x603   : > { %v5243_v5 = vpack.c.bf16 %v4828_v50, %v4828_v50 }
 0x605   : > { %v4834_v27 = vshrl.u32 %v5243_v5, 16  ;;  %v4837_v62 = vshll.u32 %v5243_v5, 16 }
 0x607   : > { %v4836_v10 = vrot.slane %v4834_v27, 6  ;;  %v4839_v28 = vrot.slane %v4837_v62, 7 }
 0x609   : > { %v4840_v48 = vor.u32 %v4839_v28, %v4836_v10 }
 0x60b   : > { %v4841_v3 = vrot.slane %v4840_v48, 4  ;;  %v4848_v21 = vsel %vm4846_vm7, %v4840_v48, %v4847_v23 }
 0x60c   : > { %4849 = vst [vmem:[%s9346_s28 + $0x10] sm:$0xe] %v4848_v21 }
 0x60d   : > { %4850 = vst.msk [vmem:[%s9346_s28 + $0x14] sm:$0x1] %vm1555_vm3, %v4841_v3 }
 0x619   : > { %v5951_v45 = vpop.f32.mrb[84].mxu1 }
 0x61a   : > { %v5973_v4 = vpop.f32.mrb[160].mxu0  ;;  %v5952_v56 = vpop.f32.mrb[85].mxu1 }
 0x61b   : > { %v5953_v31 = vadd.f32 %v5952_v56, %v5951_v45  ;;  %v5974_v61 = vpop.f32.mrb[161].mxu0  ;;  %v5954_v59 = vpop.f32.mrb[86].mxu1 }
 0x61c   : > { %v5975_v49 = vadd.f32 %v5974_v61, %v5973_v4  ;;  %v5976_v57 = vpop.f32.mrb[162].mxu0  ;;  %v5955_v0 = vpop.f32.mrb[87].mxu1 }
 0x61d   : > { %v4923_v1 = vadd.f32 %v5953_v31, %v9308_v46  ;;  %v5977_v51 = vpop.f32.mrb[163].mxu0 }
 0x61f   : > { %v4963_v52 = vadd.f32 %v5975_v49, %v4923_v1 }
 0x629   : > { %v5002_v55 = vpop.f32.mrb[88].mxu1 }
 0x62a   : > { %v5003_v17 = vadd.f32 %v5002_v55, %v4963_v52  ;;  %v6066_v39 = vpop.f32.mrb[89].mxu1 }
 0x62b   : > { %v5005_v30 = vpop.f32.mrb[90].mxu1 }
 0x62c   : > { %v5008_v18 = vmax.f32 %v5003_v17, 0.0  ;;  %v6067_v34 = vpop.f32.mrb[91].mxu1 }
 0x62e   : > { %v5244_v22 = vpack.c.bf16 %v5008_v18, %v5008_v18 }
 0x630   : > { %v5013_v37 = vrot.slane %v5244_v22, 7 }
 0x632   : > { %v5014_v58 = vrot.slane %v5013_v37, 4  ;;  %5018 = vst.msk [vmem:[%s9346_s28 + $0x14] sm:$0xe] %vm4844_vm5, %v5013_v37 }
 0x634   : > { %v5023_v11 = vsel %vm5021_vm9, %v5014_v58, %v5022_v7 }
 0x635   : > { %5024 = vst [vmem:[%s9346_s28 + $0x18] sm:$0x1] %v5023_v11 }
 0x636 PF: > { %s17_s24 = sadd.s32 1, %s6945_s24  }
 0x637   : > { %p14_p4 = scmp.ge.s32.totalorder %s17_s24, 4  }
 0x639   :  { %16 = sbr.rel (!%p14_p4) target bundleno = 1 (0x1), region = 86 }

// kernel: dqn_forward.3
= control target key start
LH: loop header
LB: loop body
LE: loop exit
PB: predicated region body
PF: predicated region fallthrough
CT: control target
= control target key end

     0   :  { %v812_v36 = vlaneseq  ;;  %v8581_v37 = vmov 1966171168   ;;  %s11223_s0 = inlined_call_operand.vmem [shape: bf16[2,3136], index: 0, kind: input, shape index: {}]   ;;  %s11224_s1 = inlined_call_operand.vmem [shape: bf16[3136,512], index: 1, kind: input, shape index: {}]   ;;  %s11225_s2 = inlined_call_operand.vmem [shape: f32[1,512], index: 2, kind: input, shape index: {}]   ;;  %s11226_s3 = inlined_call_operand.vmem [shape: bf16[512,128], index: 3, kind: input, shape index: {}]   ;;  %s11227_s4 = inlined_call_operand.vmem [shape: f32[1,128], index: 4, kind: input, shape index: {}]   ;;  %s11228_s5 = inlined_call_operand.hbm [shape: f32[2,128], index: 5, kind: output, shape index: {}]  }
   0x1   :  { %v7344_v0 = vld [vmem:[%s11224_s1 + $0x4] ss:$16 sps:$4 sm:$0xff]   ;;  %v7346_v1 = vld [vmem:[%s11224_s1 + $0xc] ss:$16 sps:$4 sm:$0xff]   ;;  %v7348_v2 = vld [vmem:[%s11224_s1] ss:$16 sps:$4 sm:$0xff]   ;;  %v838_v38 = vunpack.c.l.s4 %v8581_v37 }
   0x2   :  { %4945 = vmatprep.subr.bf16.mxu0 %v7344_v0  ;;  %v7349_v3 = vld [vmem:[%s11224_s1 + $0x8] ss:$16 sps:$4 sm:$0xff]   ;;  %5478 = vmatprep.subr.bf16.mxu1 %v7346_v1  ;;  %v7350_v4 = vld [vmem:[%s11224_s1 + $0x24] ss:$16 sps:$4 sm:$0xff]   ;;  %v7352_v5 = vld [vmem:[%s11224_s1 + $0x2c] ss:$16 sps:$4 sm:$0xff]  }
   0x3   :  { %4946 = vmatpush1.bf16.msra.mxu0 %v7348_v2  ;;  %5479 = vmatpush1.bf16.msra.mxu1 %v7349_v3  ;;  %v7354_v6 = vld [vmem:[%s11224_s1 + $0x20] ss:$16 sps:$4 sm:$0xff]   ;;  %v7355_v7 = vld [vmem:[%s11224_s1 + $0x28] ss:$16 sps:$4 sm:$0xff]   ;;  %v7356_v8 = vld [vmem:[%s11224_s1 + $0x44] ss:$16 sps:$4 sm:$0xff]   ;;  %v839_v43 = vunpack.c.0.s8 %v838_v38 }
   0x4   :  { %4947 = vmatprep.subr.bf16.mxu0 %v7350_v4  ;;  %5480 = vmatprep.subr.bf16.mxu1 %v7352_v5  ;;  %v7358_v9 = vld [vmem:[%s11224_s1 + $0x4c] ss:$16 sps:$4 sm:$0xff]   ;;  %v7360_v10 = vld [vmem:[%s11224_s1 + $0x40] ss:$16 sps:$4 sm:$0xff]   ;;  %v7361_v11 = vld [vmem:[%s11224_s1 + $0x48] ss:$16 sps:$4 sm:$0xff]  }
   0x5   :  { %v7362_v12 = vld [vmem:[%s11224_s1 + $0x64] ss:$16 sps:$4 sm:$0xff]   ;;  %v7364_v13 = vld [vmem:[%s11224_s1 + $0x6c] ss:$16 sps:$4 sm:$0xff]   ;;  %v7366_v14 = vld [vmem:[%s11224_s1 + $0x60] ss:$16 sps:$4 sm:$0xff]  }
   0x6   :  { %v7367_v15 = vld [vmem:[%s11224_s1 + $0x68] ss:$16 sps:$4 sm:$0xff]   ;;  %v7368_v16 = vld [vmem:[%s11224_s1 + $0x84] ss:$16 sps:$4 sm:$0xff]   ;;  %v7370_v17 = vld [vmem:[%s11224_s1 + $0x8c] ss:$16 sps:$4 sm:$0xff]  }
   0x7   :  { %4948 = vmatpush1.bf16.msra.mxu0 %v7354_v6  ;;  %5481 = vmatpush1.bf16.msra.mxu1 %v7355_v7  ;;  %v7372_v18 = vld [vmem:[%s11224_s1 + $0x80] ss:$16 sps:$4 sm:$0xff]   ;;  %v7373_v19 = vld [vmem:[%s11224_s1 + $0x88] ss:$16 sps:$4 sm:$0xff]   ;;  %v7374_v20 = vld [vmem:[%s11224_s1 + $0xa4] ss:$16 sps:$4 sm:$0xff]  }
   0x8   :  { %4949 = vmatprep.subr.bf16.mxu0 %v7356_v8  ;;  %5482 = vmatprep.subr.bf16.mxu1 %v7358_v9  ;;  %v7376_v21 = vld [vmem:[%s11224_s1 + $0xac] ss:$16 sps:$4 sm:$0xff]   ;;  %v7378_v22 = vld [vmem:[%s11224_s1 + $0xa0] ss:$16 sps:$4 sm:$0xff]   ;;  %v7379_v23 = vld [vmem:[%s11224_s1 + $0xa8] ss:$16 sps:$4 sm:$0xff]  }
   0x9   :  { %v7380_v24 = vld [vmem:[%s11224_s1 + $0xc4] ss:$16 sps:$4 sm:$0xff]   ;;  %v7382_v25 = vld [vmem:[%s11224_s1 + $0xcc] ss:$16 sps:$4 sm:$0xff]   ;;  %v7384_v26 = vld [vmem:[%s11224_s1 + $0xc0] ss:$16 sps:$4 sm:$0xff]  }
   0xa   :  { %v7385_v27 = vld [vmem:[%s11224_s1 + $0xc8] ss:$16 sps:$4 sm:$0xff]   ;;  %v7386_v28 = vld [vmem:[%s11224_s1 + $0xe4] ss:$16 sps:$4 sm:$0xff]   ;;  %v7388_v29 = vld [vmem:[%s11224_s1 + $0xec] ss:$16 sps:$4 sm:$0xff]  }
   0xb   :  { %4950 = vmatpush1.bf16.msra.mxu0 %v7360_v10  ;;  %5483 = vmatpush1.bf16.msra.mxu1 %v7361_v11  ;;  %v7390_v30 = vld [vmem:[%s11224_s1 + $0xe0] ss:$16 sps:$4 sm:$0xff]   ;;  %v7391_v31 = vld [vmem:[%s11224_s1 + $0xe8] ss:$16 sps:$4 sm:$0xff]   ;;  %v7392_v32 = vld [vmem:[%s11224_s1 + $0x104] ss:$16 sps:$4 sm:$0xff]  }
   0xc   :  { %4951 = vmatprep.subr.bf16.mxu0 %v7362_v12  ;;  %5484 = vmatprep.subr.bf16.mxu1 %v7364_v13  ;;  %v7394_v33 = vld [vmem:[%s11224_s1 + $0x10c] ss:$16 sps:$4 sm:$0xff]   ;;  %v7396_v34 = vld [vmem:[%s11224_s1 + $0x100] ss:$16 sps:$4 sm:$0xff]   ;;  %v7397_v35 = vld [vmem:[%s11224_s1 + $0x108] ss:$16 sps:$4 sm:$0xff]  }
   0xd   :  { %v7398_v39 = vld [vmem:[%s11224_s1 + $0x124] ss:$16 sps:$4 sm:$0xff]   ;;  %v7400_v40 = vld [vmem:[%s11224_s1 + $0x12c] ss:$16 sps:$4 sm:$0xff]   ;;  %v7402_v41 = vld [vmem:[%s11224_s1 + $0x120] ss:$16 sps:$4 sm:$0xff]  }
   0xe   :  { %v8731_v42 = vshrl.u32 %v812_v36, 7  ;;  %v7403_v44 = vld [vmem:[%s11224_s1 + $0x128] ss:$16 sps:$4 sm:$0xff]   ;;  %v7404_v45 = vld [vmem:[%s11224_s1 + $0x144] ss:$16 sps:$4 sm:$0xff]  }
   0xf   :  { %4952 = vmatpush1.bf16.msra.mxu0 %v7366_v14  ;;  %5485 = vmatpush1.bf16.msra.mxu1 %v7367_v15  ;;  %v7406_v46 = vld [vmem:[%s11224_s1 + $0x14c] ss:$16 sps:$4 sm:$0xff]   ;;  %v7408_v47 = vld [vmem:[%s11224_s1 + $0x140] ss:$16 sps:$4 sm:$0xff]   ;;  %v7409_v48 = vld [vmem:[%s11224_s1 + $0x148] ss:$16 sps:$4 sm:$0xff]  }
  0x10   :  { %4953 = vmatprep.subr.bf16.mxu0 %v7368_v16  ;;  %5486 = vmatprep.subr.bf16.mxu1 %v7370_v17  ;;  %v8749_v49 = vsub.s32 %v839_v43, %v8731_v42  ;;  %v7410_v50 = vld [vmem:[%s11224_s1 + $0x164] ss:$16 sps:$4 sm:$0xff]   ;;  %v7412_v51 = vld [vmem:[%s11224_s1 + $0x16c] ss:$16 sps:$4 sm:$0xff]   ;;  %v7414_v53 = vld [vmem:[%s11224_s1 + $0x160] ss:$16 sps:$4 sm:$0xff]  }
  0x11   :  { %v8760_v52 = vld [vmem:[%s11223_s0] sm:$0xff]  ;;  %v7415_v55 = vld [vmem:[%s11224_s1 + $0x168] ss:$16 sps:$4 sm:$0xff]   ;;  %v7418_v57 = vld [vmem:[%s11224_s1 + $0x18c] ss:$16 sps:$4 sm:$0xff]  }
  0x12   :  { %v843_v54 = vrot.slane %v8760_v52, %v8749_v49  ;;  %v7416_v56 = vld [vmem:[%s11224_s1 + $0x184] ss:$16 sps:$4 sm:$0xff]   ;;  %v7420_v59 = vld [vmem:[%s11224_s1 + $0x180] ss:$16 sps:$4 sm:$0xff]   ;;  %v7421_v61 = vld [vmem:[%s11224_s1 + $0x188] ss:$16 sps:$4 sm:$0xff]  }
  0x13   :  { %4954 = vmatpush1.bf16.msra.mxu0 %v7372_v18  ;;  %5487 = vmatpush1.bf16.msra.mxu1 %v7373_v19  ;;  %v7422_v62 = vld [vmem:[%s11224_s1 + $0x1a4] ss:$16 sps:$4 sm:$0xff]   ;;  %v7424_v63 = vld [vmem:[%s11224_s1 + $0x1ac] ss:$16 sps:$4 sm:$0xff]   ;;  %v7426_v0 = vld [vmem:[%s11224_s1 + $0x1a0] ss:$16 sps:$4 sm:$0xff]  }
  0x14   :  { %4955 = vmatprep.subr.bf16.mxu0 %v7374_v20  ;;  %5488 = vmatprep.subr.bf16.mxu1 %v7376_v21  ;;  %v851_v58 = vcombine.high %v843_v54, %v843_v54  ;;  %v7427_v1 = vld [vmem:[%s11224_s1 + $0x1a8] ss:$16 sps:$4 sm:$0xff]   ;;  %v7428_v2 = vld [vmem:[%s11224_s1 + $0x1c4] ss:$16 sps:$4 sm:$0xff]   ;;  %v7430_v3 = vld [vmem:[%s11224_s1 + $0x1cc] ss:$16 sps:$4 sm:$0xff]   ;;  %v8829_v13 = vrot.slane %v843_v54, %v8749_v49 }
  0x15   :  { %v7432_v4 = vld [vmem:[%s11224_s1 + $0x1c0] ss:$16 sps:$4 sm:$0xff]   ;;  %v7433_v5 = vld [vmem:[%s11224_s1 + $0x1c8] ss:$16 sps:$4 sm:$0xff]   ;;  %v7434_v6 = vld [vmem:[%s11224_s1 + $0x1e4] ss:$16 sps:$4 sm:$0xff]  }
  0x16   :  { %v873_v60 = vrot.slane %v851_v58, %v8749_v49  ;;  %v7436_v7 = vld [vmem:[%s11224_s1 + $0x1ec] ss:$16 sps:$4 sm:$0xff]   ;;  %v7438_v8 = vld [vmem:[%s11224_s1 + $0x1e0] ss:$16 sps:$4 sm:$0xff]   ;;  %v7439_v9 = vld [vmem:[%s11224_s1 + $0x1e8] ss:$16 sps:$4 sm:$0xff]  }
  0x17   :  { %4956 = vmatpush1.bf16.msra.mxu0 %v7378_v22  ;;  %5489 = vmatpush1.bf16.msra.mxu1 %v7379_v23  ;;  %v7442_v10 = vld [vmem:[%s11224_s1 + $0x204] ss:$16 sps:$4 sm:$0xff]   ;;  %v7445_v11 = vld [vmem:[%s11224_s1 + $0x20c] ss:$16 sps:$4 sm:$0xff]   ;;  %v7440_v12 = vld [vmem:[%s11224_s1 + $0x200] ss:$16 sps:$4 sm:$0xff]  }
  0x18   :  { %4957 = vmatprep.subr.bf16.mxu0 %v7380_v24  ;;  %5490 = vmatprep.subr.bf16.mxu1 %v7382_v25  ;;  %v7443_v14 = vld [vmem:[%s11224_s1 + $0x208] ss:$16 sps:$4 sm:$0xff]   ;;  %v7448_v15 = vld [vmem:[%s11224_s1 + $0x224] ss:$16 sps:$4 sm:$0xff]   ;;  %v7451_v16 = vld [vmem:[%s11224_s1 + $0x22c] ss:$16 sps:$4 sm:$0xff]   ;;  %v883_v17 = vcombine.high %v873_v60, %v873_v60 }
  0x19   :  { %4977 = vmatprep.mubr.bf16.mxu0 %v873_v60  ;;  %5510 = vmatprep.mubr.bf16.mxu1 %v873_v60  ;;  %v7446_v18 = vld [vmem:[%s11224_s1 + $0x220] ss:$16 sps:$4 sm:$0xff]   ;;  %v7449_v19 = vld [vmem:[%s11224_s1 + $0x228] ss:$16 sps:$4 sm:$0xff]   ;;  %v7454_v20 = vld [vmem:[%s11224_s1 + $0x244] ss:$16 sps:$4 sm:$0xff]  }
  0x1a   :  { %v7457_v21 = vld [vmem:[%s11224_s1 + $0x24c] ss:$16 sps:$4 sm:$0xff]   ;;  %v7452_v22 = vld [vmem:[%s11224_s1 + $0x240] ss:$16 sps:$4 sm:$0xff]   ;;  %v7455_v23 = vld [vmem:[%s11224_s1 + $0x248] ss:$16 sps:$4 sm:$0xff]  }
  0x1b   :  { %4958 = vmatpush1.bf16.msra.mxu0 %v7384_v26  ;;  %5491 = vmatpush1.bf16.msra.mxu1 %v7385_v27  ;;  %v7460_v24 = vld [vmem:[%s11224_s1 + $0x264] ss:$16 sps:$4 sm:$0xff]   ;;  %v7463_v25 = vld [vmem:[%s11224_s1 + $0x26c] ss:$16 sps:$4 sm:$0xff]   ;;  %v7458_v26 = vld [vmem:[%s11224_s1 + $0x260] ss:$16 sps:$4 sm:$0xff]  }
  0x1c   :  { %4959 = vmatprep.subr.bf16.mxu0 %v7386_v28  ;;  %5492 = vmatprep.subr.bf16.mxu1 %v7388_v29  ;;  %v7461_v27 = vld [vmem:[%s11224_s1 + $0x268] ss:$16 sps:$4 sm:$0xff]   ;;  %v7466_v28 = vld [vmem:[%s11224_s1 + $0x284] ss:$16 sps:$4 sm:$0xff]   ;;  %v7469_v29 = vld [vmem:[%s11224_s1 + $0x28c] ss:$16 sps:$4 sm:$0xff]  }
  0x1d   :  { %v7478_v36 = vld [vmem:[%s11224_s1 + $0x2c4] ss:$16 sps:$4 sm:$0xff]   ;;  %v7481_v37 = vld [vmem:[%s11224_s1 + $0x2cc] ss:$16 sps:$4 sm:$0xff]   ;;  %v7476_v38 = vld [vmem:[%s11224_s1 + $0x2c0] ss:$16 sps:$4 sm:$0xff]  }
  0x1e   :  { %v7482_v43 = vld [vmem:[%s11224_s1 + $0x2e0] ss:$16 sps:$4 sm:$0xff]   ;;  %v7497_v54 = vld [vmem:[%s11224_s1 + $0x328] ss:$16 sps:$4 sm:$0xff]   ;;  %v7511_v60 = vld [vmem:[%s11224_s1 + $0x36c] ss:$16 sps:$4 sm:$0xff]  }
  0x1f   :  { %4960 = vmatpush1.bf16.msra.mxu0 %v7390_v30  ;;  %5493 = vmatpush1.bf16.msra.mxu1 %v7391_v31  ;;  %v7464_v30 = vld [vmem:[%s11224_s1 + $0x280] ss:$16 sps:$4 sm:$0xff]   ;;  %v7467_v31 = vld [vmem:[%s11224_s1 + $0x288] ss:$16 sps:$4 sm:$0xff]  }
  0x20   :  { %4961 = vmatprep.subr.bf16.mxu0 %v7392_v32  ;;  %5494 = vmatprep.subr.bf16.mxu1 %v7394_v33  ;;  %v7472_v32 = vld [vmem:[%s11224_s1 + $0x2a4] ss:$16 sps:$4 sm:$0xff]   ;;  %v7475_v33 = vld [vmem:[%s11224_s1 + $0x2ac] ss:$16 sps:$4 sm:$0xff]   ;;  %v7503_v58 = vld [vmem:[%s11224_s1 + $0x348] ss:$16 sps:$4 sm:$0xff]  }
  0x23   :  { %4962 = vmatpush1.bf16.msra.mxu0 %v7396_v34  ;;  %5495 = vmatpush1.bf16.msra.mxu1 %v7397_v35  ;;  %v7470_v34 = vld [vmem:[%s11224_s1 + $0x2a0] ss:$16 sps:$4 sm:$0xff]   ;;  %v7473_v35 = vld [vmem:[%s11224_s1 + $0x2a8] ss:$16 sps:$4 sm:$0xff]  }
  0x24   :  { %4963 = vmatprep.subr.bf16.mxu0 %v7398_v39  ;;  %5496 = vmatprep.subr.bf16.mxu1 %v7400_v40  ;;  %v7479_v39 = vld [vmem:[%s11224_s1 + $0x2c8] ss:$16 sps:$4 sm:$0xff]   ;;  %v7484_v40 = vld [vmem:[%s11224_s1 + $0x2e4] ss:$16 sps:$4 sm:$0xff]  }
  0x27   :  { %4964 = vmatpush1.bf16.msra.mxu0 %v7402_v41  ;;  %5497 = vmatpush1.bf16.msra.mxu1 %v7403_v44  ;;  %v7487_v41 = vld [vmem:[%s11224_s1 + $0x2ec] ss:$16 sps:$4 sm:$0xff]   ;;  %v7485_v44 = vld [vmem:[%s11224_s1 + $0x2e8] ss:$16 sps:$4 sm:$0xff]  }
  0x28   :  { %4965 = vmatprep.subr.bf16.mxu0 %v7404_v45  ;;  %5498 = vmatprep.subr.bf16.mxu1 %v7406_v46  ;;  %v7490_v45 = vld [vmem:[%s11224_s1 + $0x304] ss:$16 sps:$4 sm:$0xff]   ;;  %v7493_v46 = vld [vmem:[%s11224_s1 + $0x30c] ss:$16 sps:$4 sm:$0xff]  }
  0x2b   :  { %4966 = vmatpush1.bf16.msra.mxu0 %v7408_v47  ;;  %5499 = vmatpush1.bf16.msra.mxu1 %v7409_v48  ;;  %v7488_v47 = vld [vmem:[%s11224_s1 + $0x300] ss:$16 sps:$4 sm:$0xff]   ;;  %v7491_v48 = vld [vmem:[%s11224_s1 + $0x308] ss:$16 sps:$4 sm:$0xff]  }
  0x2c   :  { %4967 = vmatprep.subr.bf16.mxu0 %v7410_v50  ;;  %5500 = vmatprep.subr.bf16.mxu1 %v7412_v51  ;;  %v7496_v50 = vld [vmem:[%s11224_s1 + $0x324] ss:$16 sps:$4 sm:$0xff]   ;;  %v7499_v51 = vld [vmem:[%s11224_s1 + $0x32c] ss:$16 sps:$4 sm:$0xff]  }
  0x2f   :  { %4968 = vmatpush1.bf16.msra.mxu0 %v7414_v53  ;;  %5501 = vmatpush1.bf16.msra.mxu1 %v7415_v55  ;;  %v7494_v53 = vld [vmem:[%s11224_s1 + $0x320] ss:$16 sps:$4 sm:$0xff]   ;;  %v7502_v55 = vld [vmem:[%s11224_s1 + $0x344] ss:$16 sps:$4 sm:$0xff]  }
  0x30   :  { %4969 = vmatprep.subr.bf16.mxu0 %v7416_v56  ;;  %5502 = vmatprep.subr.bf16.mxu1 %v7418_v57  ;;  %v7505_v56 = vld [vmem:[%s11224_s1 + $0x34c] ss:$16 sps:$4 sm:$0xff]   ;;  %v7500_v57 = vld [vmem:[%s11224_s1 + $0x340] ss:$16 sps:$4 sm:$0xff]  }
  0x33   :  { %4970 = vmatpush1.bf16.msra.mxu0 %v7420_v59  ;;  %5503 = vmatpush1.bf16.msra.mxu1 %v7421_v61  ;;  %v7508_v59 = vld [vmem:[%s11224_s1 + $0x364] ss:$16 sps:$4 sm:$0xff]   ;;  %v7506_v61 = vld [vmem:[%s11224_s1 + $0x360] ss:$16 sps:$4 sm:$0xff]  }
  0x34   :  { %4971 = vmatprep.subr.bf16.mxu0 %v7422_v62  ;;  %5504 = vmatprep.subr.bf16.mxu1 %v7424_v63  ;;  %v7509_v62 = vld [vmem:[%s11224_s1 + $0x368] ss:$16 sps:$4 sm:$0xff]   ;;  %v7514_v63 = vld [vmem:[%s11224_s1 + $0x384] ss:$16 sps:$4 sm:$0xff]  }
  0x37   :  { %4972 = vmatpush1.bf16.msra.mxu0 %v7426_v0  ;;  %5505 = vmatpush1.bf16.msra.mxu1 %v7427_v1  ;;  %v7517_v0 = vld [vmem:[%s11224_s1 + $0x38c] ss:$16 sps:$4 sm:$0xff]   ;;  %v7512_v1 = vld [vmem:[%s11224_s1 + $0x380] ss:$16 sps:$4 sm:$0xff]  }
  0x38   :  { %4973 = vmatprep.subr.bf16.mxu0 %v7428_v2  ;;  %5506 = vmatprep.subr.bf16.mxu1 %v7430_v3  ;;  %v7515_v2 = vld [vmem:[%s11224_s1 + $0x388] ss:$16 sps:$4 sm:$0xff]   ;;  %v7520_v3 = vld [vmem:[%s11224_s1 + $0x3a4] ss:$16 sps:$4 sm:$0xff]  }
  0x3b   :  { %4974 = vmatpush1.bf16.msra.mxu0 %v7432_v4  ;;  %5507 = vmatpush1.bf16.msra.mxu1 %v7433_v5  ;;  %v7523_v4 = vld [vmem:[%s11224_s1 + $0x3ac] ss:$16 sps:$4 sm:$0xff]   ;;  %v7518_v5 = vld [vmem:[%s11224_s1 + $0x3a0] ss:$16 sps:$4 sm:$0xff]  }
  0x3c   :  { %4975 = vmatprep.subr.bf16.mxu0 %v7434_v6  ;;  %5508 = vmatprep.subr.bf16.mxu1 %v7436_v7  ;;  %v7521_v6 = vld [vmem:[%s11224_s1 + $0x3a8] ss:$16 sps:$4 sm:$0xff]   ;;  %v7526_v7 = vld [vmem:[%s11224_s1 + $0x3c4] ss:$16 sps:$4 sm:$0xff]  }
  0x3f   :  { %4976 = vmatpush1.bf16.msra.mxu0 %v7438_v8  ;;  %5509 = vmatpush1.bf16.msra.mxu1 %v7439_v9  ;;  %v7529_v8 = vld [vmem:[%s11224_s1 + $0x3cc] ss:$16 sps:$4 sm:$0xff]   ;;  %v836_v9 = vcombine.high %v8760_v52, %v8760_v52 }
  0x40   :  { %4986 = vmatprep.subr.bf16.mxu0 %v7442_v10  ;;  %5519 = vmatprep.subr.bf16.mxu1 %v7445_v11  ;;  %v7524_v10 = vld [vmem:[%s11224_s1 + $0x3c0] ss:$16 sps:$4 sm:$0xff]   ;;  %v7527_v11 = vld [vmem:[%s11224_s1 + $0x3c8] ss:$16 sps:$4 sm:$0xff]   ;;  %v7535_v52 = vld [vmem:[%s11224_s1 + $0x3ec] ss:$16 sps:$4 sm:$0xff]  }
  0x42   :  { %4978 = vmatmul.mubr.bf16.vlgmr.msra.gmra.mrb[0].mxu0 %v8829_v13  ;;  %5511 = vmatmul.mubr.bf16.vlgmr.msra.gmra.mrb[0].mxu1 %v8829_v13 }
  0x43   :  { %4987 = vmatpush1.bf16.msra.mxu0 %v7440_v12  ;;  %5520 = vmatpush1.bf16.msra.mxu1 %v7443_v14  ;;  %v7532_v12 = vld [vmem:[%s11224_s1 + $0x3e4] ss:$16 sps:$4 sm:$0xff]   ;;  %v9013_v14 = vrot.slane %v836_v9, %v8749_v49  ;;  %v7611_v9 = vld [vmem:[%s11224_s1 + $0x588] ss:$16 sps:$4 sm:$0xff]  }
  0x44   :  { %4988 = vmatprep.subr.bf16.mxu0 %v7448_v15  ;;  %5521 = vmatprep.subr.bf16.mxu1 %v7451_v16  ;;  %v7530_v15 = vld [vmem:[%s11224_s1 + $0x3e0] ss:$16 sps:$4 sm:$0xff]   ;;  %v7533_v16 = vld [vmem:[%s11224_s1 + $0x3e8] ss:$16 sps:$4 sm:$0xff]  }
  0x45   :  { %5018 = vmatprep.mubr.bf16.mxu0 %v883_v17  ;;  %5551 = vmatprep.mubr.bf16.mxu1 %v883_v17  ;;  %v7538_v17 = vld [vmem:[%s11224_s1 + $0x404] ss:$16 sps:$4 sm:$0xff]  }
  0x47   :  { %4989 = vmatpush1.bf16.msra.mxu0 %v7446_v18  ;;  %5522 = vmatpush1.bf16.msra.mxu1 %v7449_v19  ;;  %v7541_v18 = vld [vmem:[%s11224_s1 + $0x40c] ss:$16 sps:$4 sm:$0xff]   ;;  %v852_v19 = vcombine.high %v9013_v14, %v9013_v14 }
  0x48   :  { %4990 = vmatprep.subr.bf16.mxu0 %v7454_v20  ;;  %5523 = vmatprep.subr.bf16.mxu1 %v7457_v21  ;;  %v7536_v20 = vld [vmem:[%s11224_s1 + $0x400] ss:$16 sps:$4 sm:$0xff]   ;;  %v881_v21 = vcombine.high %v8829_v13, %v8829_v13 }
  0x49   :  { %v7542_v13 = vld [vmem:[%s11224_s1 + $0x420] ss:$16 sps:$4 sm:$0xff]  }
  0x4b   :  { %4991 = vmatpush1.bf16.msra.mxu0 %v7452_v22  ;;  %5524 = vmatpush1.bf16.msra.mxu1 %v7455_v23  ;;  %v7539_v22 = vld [vmem:[%s11224_s1 + $0x408] ss:$16 sps:$4 sm:$0xff]   ;;  %v7544_v23 = vld [vmem:[%s11224_s1 + $0x424] ss:$16 sps:$4 sm:$0xff]  }
  0x4c   :  { %4992 = vmatprep.subr.bf16.mxu0 %v7460_v24  ;;  %5525 = vmatprep.subr.bf16.mxu1 %v7463_v25  ;;  %v7547_v24 = vld [vmem:[%s11224_s1 + $0x42c] ss:$16 sps:$4 sm:$0xff]   ;;  %v9044_v25 = vrot.slane %v852_v19, %v8749_v49  ;;  %v7628_v19 = vld [vmem:[%s11224_s1 + $0x5e4] ss:$16 sps:$4 sm:$0xff]  }
  0x4f   :  { %4993 = vmatpush1.bf16.msra.mxu0 %v7458_v26  ;;  %5526 = vmatpush1.bf16.msra.mxu1 %v7461_v27  ;;  %v7545_v26 = vld [vmem:[%s11224_s1 + $0x428] ss:$16 sps:$4 sm:$0xff]   ;;  %v7550_v27 = vld [vmem:[%s11224_s1 + $0x444] ss:$16 sps:$4 sm:$0xff]  }
  0x50   :  { %4994 = vmatprep.subr.bf16.mxu0 %v7466_v28  ;;  %5527 = vmatprep.subr.bf16.mxu1 %v7469_v29  ;;  %v7553_v28 = vld [vmem:[%s11224_s1 + $0x44c] ss:$16 sps:$4 sm:$0xff]   ;;  %v7548_v29 = vld [vmem:[%s11224_s1 + $0x440] ss:$16 sps:$4 sm:$0xff]  }
  0x53   :  { %4995 = vmatpush1.bf16.msra.mxu0 %v7464_v30  ;;  %5528 = vmatpush1.bf16.msra.mxu1 %v7467_v31  ;;  %v7551_v30 = vld [vmem:[%s11224_s1 + $0x448] ss:$16 sps:$4 sm:$0xff]   ;;  %v7556_v31 = vld [vmem:[%s11224_s1 + $0x464] ss:$16 sps:$4 sm:$0xff]  }
  0x54   :  { %4996 = vmatprep.subr.bf16.mxu0 %v7472_v32  ;;  %5529 = vmatprep.subr.bf16.mxu1 %v7475_v33  ;;  %v7559_v32 = vld [vmem:[%s11224_s1 + $0x46c] ss:$16 sps:$4 sm:$0xff]   ;;  %v7554_v33 = vld [vmem:[%s11224_s1 + $0x460] ss:$16 sps:$4 sm:$0xff]  }
  0x57   :  { %4997 = vmatpush1.bf16.msra.mxu0 %v7470_v34  ;;  %5530 = vmatpush1.bf16.msra.mxu1 %v7473_v35  ;;  %v7557_v34 = vld [vmem:[%s11224_s1 + $0x468] ss:$16 sps:$4 sm:$0xff]   ;;  %v7562_v35 = vld [vmem:[%s11224_s1 + $0x484] ss:$16 sps:$4 sm:$0xff]  }
  0x58   :  { %4998 = vmatprep.subr.bf16.mxu0 %v7478_v36  ;;  %5531 = vmatprep.subr.bf16.mxu1 %v7481_v37  ;;  %v7565_v36 = vld [vmem:[%s11224_s1 + $0x48c] ss:$16 sps:$4 sm:$0xff]   ;;  %v7560_v37 = vld [vmem:[%s11224_s1 + $0x480] ss:$16 sps:$4 sm:$0xff]  }
  0x5b   :  { %4999 = vmatpush1.bf16.msra.mxu0 %v7476_v38  ;;  %5532 = vmatpush1.bf16.msra.mxu1 %v7479_v39  ;;  %v7563_v38 = vld [vmem:[%s11224_s1 + $0x488] ss:$16 sps:$4 sm:$0xff]   ;;  %v7568_v39 = vld [vmem:[%s11224_s1 + $0x4a4] ss:$16 sps:$4 sm:$0xff]  }
  0x5c   :  { %5000 = vmatprep.subr.bf16.mxu0 %v7484_v40  ;;  %5533 = vmatprep.subr.bf16.mxu1 %v7487_v41  ;;  %v7571_v40 = vld [vmem:[%s11224_s1 + $0x4ac] ss:$16 sps:$4 sm:$0xff]   ;;  %v7566_v41 = vld [vmem:[%s11224_s1 + $0x4a0] ss:$16 sps:$4 sm:$0xff]  }
  0x5f   :  { %5001 = vmatpush1.bf16.msra.mxu0 %v7482_v43  ;;  %5534 = vmatpush1.bf16.msra.mxu1 %v7485_v44  ;;  %v7569_v43 = vld [vmem:[%s11224_s1 + $0x4a8] ss:$16 sps:$4 sm:$0xff]   ;;  %v7574_v44 = vld [vmem:[%s11224_s1 + $0x4c4] ss:$16 sps:$4 sm:$0xff]  }
  0x60   :  { %5002 = vmatprep.subr.bf16.mxu0 %v7490_v45  ;;  %5535 = vmatprep.subr.bf16.mxu1 %v7493_v46  ;;  %v7577_v45 = vld [vmem:[%s11224_s1 + $0x4cc] ss:$16 sps:$4 sm:$0xff]   ;;  %v7572_v46 = vld [vmem:[%s11224_s1 + $0x4c0] ss:$16 sps:$4 sm:$0xff]  }
  0x63   :  { %5003 = vmatpush1.bf16.msra.mxu0 %v7488_v47  ;;  %5536 = vmatpush1.bf16.msra.mxu1 %v7491_v48  ;;  %v7575_v47 = vld [vmem:[%s11224_s1 + $0x4c8] ss:$16 sps:$4 sm:$0xff]   ;;  %v7580_v48 = vld [vmem:[%s11224_s1 + $0x4e4] ss:$16 sps:$4 sm:$0xff]  }
  0x64   :  { %5004 = vmatprep.subr.bf16.mxu0 %v7496_v50  ;;  %5537 = vmatprep.subr.bf16.mxu1 %v7499_v51  ;;  %v7583_v50 = vld [vmem:[%s11224_s1 + $0x4ec] ss:$16 sps:$4 sm:$0xff]   ;;  %v7578_v51 = vld [vmem:[%s11224_s1 + $0x4e0] ss:$16 sps:$4 sm:$0xff]  }
  0x67   :  { %5005 = vmatpush1.bf16.msra.mxu0 %v7494_v53  ;;  %5538 = vmatpush1.bf16.msra.mxu1 %v7497_v54  ;;  %v7581_v53 = vld [vmem:[%s11224_s1 + $0x4e8] ss:$16 sps:$4 sm:$0xff]   ;;  %v7586_v54 = vld [vmem:[%s11224_s1 + $0x504] ss:$16 sps:$4 sm:$0xff]  }
  0x68   :  { %5006 = vmatprep.subr.bf16.mxu0 %v7502_v55  ;;  %5539 = vmatprep.subr.bf16.mxu1 %v7505_v56  ;;  %v7589_v55 = vld [vmem:[%s11224_s1 + $0x50c] ss:$16 sps:$4 sm:$0xff]   ;;  %v7584_v56 = vld [vmem:[%s11224_s1 + $0x500] ss:$16 sps:$4 sm:$0xff]  }
  0x6b   :  { %5007 = vmatpush1.bf16.msra.mxu0 %v7500_v57  ;;  %5540 = vmatpush1.bf16.msra.mxu1 %v7503_v58  ;;  %v7587_v57 = vld [vmem:[%s11224_s1 + $0x508] ss:$16 sps:$4 sm:$0xff]   ;;  %v7592_v58 = vld [vmem:[%s11224_s1 + $0x524] ss:$16 sps:$4 sm:$0xff]  }
  0x6c   :  { %5008 = vmatprep.subr.bf16.mxu0 %v7508_v59  ;;  %5541 = vmatprep.subr.bf16.mxu1 %v7511_v60  ;;  %v7595_v59 = vld [vmem:[%s11224_s1 + $0x52c] ss:$16 sps:$4 sm:$0xff]   ;;  %v7590_v60 = vld [vmem:[%s11224_s1 + $0x520] ss:$16 sps:$4 sm:$0xff]  }
  0x6f   :  { %5009 = vmatpush1.bf16.msra.mxu0 %v7506_v61  ;;  %5542 = vmatpush1.bf16.msra.mxu1 %v7509_v62  ;;  %v7593_v61 = vld [vmem:[%s11224_s1 + $0x528] ss:$16 sps:$4 sm:$0xff]   ;;  %v7598_v62 = vld [vmem:[%s11224_s1 + $0x544] ss:$16 sps:$4 sm:$0xff]  }
  0x70   :  { %5010 = vmatprep.subr.bf16.mxu0 %v7514_v63  ;;  %5543 = vmatprep.subr.bf16.mxu1 %v7517_v0  ;;  %v7601_v63 = vld [vmem:[%s11224_s1 + $0x54c] ss:$16 sps:$4 sm:$0xff]   ;;  %v7596_v0 = vld [vmem:[%s11224_s1 + $0x540] ss:$16 sps:$4 sm:$0xff]  }
  0x73   :  { %5011 = vmatpush1.bf16.msra.mxu0 %v7512_v1  ;;  %5544 = vmatpush1.bf16.msra.mxu1 %v7515_v2  ;;  %v7599_v1 = vld [vmem:[%s11224_s1 + $0x548] ss:$16 sps:$4 sm:$0xff]   ;;  %v7604_v2 = vld [vmem:[%s11224_s1 + $0x564] ss:$16 sps:$4 sm:$0xff]  }
  0x74   :  { %5012 = vmatprep.subr.bf16.mxu0 %v7520_v3  ;;  %5545 = vmatprep.subr.bf16.mxu1 %v7523_v4  ;;  %v7607_v3 = vld [vmem:[%s11224_s1 + $0x56c] ss:$16 sps:$4 sm:$0xff]   ;;  %v7602_v4 = vld [vmem:[%s11224_s1 + $0x560] ss:$16 sps:$4 sm:$0xff]  }
  0x77   :  { %5013 = vmatpush1.bf16.msra.mxu0 %v7518_v5  ;;  %5546 = vmatpush1.bf16.msra.mxu1 %v7521_v6  ;;  %v7605_v5 = vld [vmem:[%s11224_s1 + $0x568] ss:$16 sps:$4 sm:$0xff]   ;;  %v7610_v6 = vld [vmem:[%s11224_s1 + $0x584] ss:$16 sps:$4 sm:$0xff]  }
  0x78   :  { %5014 = vmatprep.subr.bf16.mxu0 %v7526_v7  ;;  %5547 = vmatprep.subr.bf16.mxu1 %v7529_v8  ;;  %v7613_v7 = vld [vmem:[%s11224_s1 + $0x58c] ss:$16 sps:$4 sm:$0xff]   ;;  %v7608_v8 = vld [vmem:[%s11224_s1 + $0x580] ss:$16 sps:$4 sm:$0xff]  }
  0x7b   :  { %5015 = vmatpush1.bf16.msra.mxu0 %v7524_v10  ;;  %5548 = vmatpush1.bf16.msra.mxu1 %v7527_v11  ;;  %v7616_v10 = vld [vmem:[%s11224_s1 + $0x5a4] ss:$16 sps:$4 sm:$0xff]   ;;  %v7619_v11 = vld [vmem:[%s11224_s1 + $0x5ac] ss:$16 sps:$4 sm:$0xff]  }
  0x7c   :  { %5016 = vmatprep.subr.bf16.mxu0 %v7532_v12  ;;  %5549 = vmatprep.subr.bf16.mxu1 %v7535_v52  ;;  %v7614_v12 = vld [vmem:[%s11224_s1 + $0x5a0] ss:$16 sps:$4 sm:$0xff]   ;;  %v7617_v52 = vld [vmem:[%s11224_s1 + $0x5a8] ss:$16 sps:$4 sm:$0xff]  }
  0x7f   :  { %5017 = vmatpush1.bf16.msra.mxu0 %v7530_v15  ;;  %5550 = vmatpush1.bf16.msra.mxu1 %v7533_v16  ;;  %v7622_v15 = vld [vmem:[%s11224_s1 + $0x5c4] ss:$16 sps:$4 sm:$0xff]   ;;  %v7625_v16 = vld [vmem:[%s11224_s1 + $0x5cc] ss:$16 sps:$4 sm:$0xff]  }
  0x80   :  { %5027 = vmatprep.subr.bf16.mxu0 %v7538_v17  ;;  %5560 = vmatprep.subr.bf16.mxu1 %v7541_v18  ;;  %v7620_v17 = vld [vmem:[%s11224_s1 + $0x5c0] ss:$16 sps:$4 sm:$0xff]   ;;  %v7623_v18 = vld [vmem:[%s11224_s1 + $0x5c8] ss:$16 sps:$4 sm:$0xff]  }
  0x82   :  { %5019 = vmatmul.mubr.bf16.vlgmr.msra.gmra.mrb[0].mxu0 %v881_v21  ;;  %5552 = vmatmul.mubr.bf16.vlgmr.msra.gmra.mrb[0].mxu1 %v881_v21  ;;  %v7626_v21 = vld [vmem:[%s11224_s1 + $0x5e0] ss:$16 sps:$4 sm:$0xff]  }
  0x83   :  { %5028 = vmatpush1.bf16.msra.mxu0 %v7536_v20  ;;  %5561 = vmatpush1.bf16.msra.mxu1 %v7539_v22  ;;  %v7631_v20 = vld [vmem:[%s11224_s1 + $0x5ec] ss:$16 sps:$4 sm:$0xff]   ;;  %v7629_v22 = vld [vmem:[%s11224_s1 + $0x5e8] ss:$16 sps:$4 sm:$0xff]  }
  0x84   :  { %5029 = vmatprep.subr.bf16.mxu0 %v7544_v23  ;;  %5562 = vmatprep.subr.bf16.mxu1 %v7547_v24  ;;  %v7635_v23 = vld [vmem:[%s11224_s1 + $0x604] ss:$16 sps:$4 sm:$0xff]   ;;  %v7638_v24 = vld [vmem:[%s11224_s1 + $0x60c] ss:$16 sps:$4 sm:$0xff]  }
  0x85   :  { %5059 = vmatprep.mubr.bf16.mxu0 %v9044_v25  ;;  %5592 = vmatprep.mubr.bf16.mxu1 %v9044_v25 }
  0x87   :  { %5030 = vmatpush1.bf16.msra.mxu0 %v7542_v13  ;;  %5563 = vmatpush1.bf16.msra.mxu1 %v7545_v26  ;;  %v7633_v13 = vld [vmem:[%s11224_s1 + $0x600] ss:$16 sps:$4 sm:$0xff]   ;;  %v9233_v26 = vrot.slane %v9013_v14, %v8749_v49  ;;  %v884_v14 = vcombine.high %v9044_v25, %v9044_v25  ;;  %v7647_v25 = vld [vmem:[%s11224_s1 + $0x644] ss:$16 sps:$4 sm:$0xff]  }
  0x88   :  { %5031 = vmatprep.subr.bf16.mxu0 %v7550_v27  ;;  %5564 = vmatprep.subr.bf16.mxu1 %v7553_v28  ;;  %v7636_v27 = vld [vmem:[%s11224_s1 + $0x608] ss:$16 sps:$4 sm:$0xff]   ;;  %v7641_v28 = vld [vmem:[%s11224_s1 + $0x624] ss:$16 sps:$4 sm:$0xff]  }
  0x8b   :  { %5032 = vmatpush1.bf16.msra.mxu0 %v7548_v29  ;;  %5565 = vmatpush1.bf16.msra.mxu1 %v7551_v30  ;;  %v7644_v29 = vld [vmem:[%s11224_s1 + $0x62c] ss:$16 sps:$4 sm:$0xff]   ;;  %v7639_v30 = vld [vmem:[%s11224_s1 + $0x620] ss:$16 sps:$4 sm:$0xff]  }
  0x8c   :  { %5033 = vmatprep.subr.bf16.mxu0 %v7556_v31  ;;  %5566 = vmatprep.subr.bf16.mxu1 %v7559_v32  ;;  %v7642_v31 = vld [vmem:[%s11224_s1 + $0x628] ss:$16 sps:$4 sm:$0xff]   ;;  %v7650_v32 = vld [vmem:[%s11224_s1 + $0x64c] ss:$16 sps:$4 sm:$0xff]  }
  0x8f   :  { %5034 = vmatpush1.bf16.msra.mxu0 %v7554_v33  ;;  %5567 = vmatpush1.bf16.msra.mxu1 %v7557_v34  ;;  %v7645_v33 = vld [vmem:[%s11224_s1 + $0x640] ss:$16 sps:$4 sm:$0xff]   ;;  %v7648_v34 = vld [vmem:[%s11224_s1 + $0x648] ss:$16 sps:$4 sm:$0xff]  }
  0x90   :  { %5035 = vmatprep.subr.bf16.mxu0 %v7562_v35  ;;  %5568 = vmatprep.subr.bf16.mxu1 %v7565_v36  ;;  %v7653_v35 = vld [vmem:[%s11224_s1 + $0x664] ss:$16 sps:$4 sm:$0xff]   ;;  %v7656_v36 = vld [vmem:[%s11224_s1 + $0x66c] ss:$16 sps:$4 sm:$0xff]  }
  0x93   :  { %5036 = vmatpush1.bf16.msra.mxu0 %v7560_v37  ;;  %5569 = vmatpush1.bf16.msra.mxu1 %v7563_v38  ;;  %v7651_v37 = vld [vmem:[%s11224_s1 + $0x660] ss:$16 sps:$4 sm:$0xff]   ;;  %v7654_v38 = vld [vmem:[%s11224_s1 + $0x668] ss:$16 sps:$4 sm:$0xff]  }
  0x94   :  { %5037 = vmatprep.subr.bf16.mxu0 %v7568_v39  ;;  %5570 = vmatprep.subr.bf16.mxu1 %v7571_v40  ;;  %v7659_v39 = vld [vmem:[%s11224_s1 + $0x684] ss:$16 sps:$4 sm:$0xff]   ;;  %v7662_v40 = vld [vmem:[%s11224_s1 + $0x68c] ss:$16 sps:$4 sm:$0xff]  }
  0x97   :  { %5038 = vmatpush1.bf16.msra.mxu0 %v7566_v41  ;;  %5571 = vmatpush1.bf16.msra.mxu1 %v7569_v43  ;;  %v7657_v41 = vld [vmem:[%s11224_s1 + $0x680] ss:$16 sps:$4 sm:$0xff]   ;;  %v7660_v43 = vld [vmem:[%s11224_s1 + $0x688] ss:$16 sps:$4 sm:$0xff]  }
  0x98   :  { %5039 = vmatprep.subr.bf16.mxu0 %v7574_v44  ;;  %5572 = vmatprep.subr.bf16.mxu1 %v7577_v45  ;;  %v7665_v44 = vld [vmem:[%s11224_s1 + $0x6a4] ss:$16 sps:$4 sm:$0xff]   ;;  %v7668_v45 = vld [vmem:[%s11224_s1 + $0x6ac] ss:$16 sps:$4 sm:$0xff]  }
  0x9b   :  { %5040 = vmatpush1.bf16.msra.mxu0 %v7572_v46  ;;  %5573 = vmatpush1.bf16.msra.mxu1 %v7575_v47  ;;  %v7663_v46 = vld [vmem:[%s11224_s1 + $0x6a0] ss:$16 sps:$4 sm:$0xff]   ;;  %v7666_v47 = vld [vmem:[%s11224_s1 + $0x6a8] ss:$16 sps:$4 sm:$0xff]  }
  0x9c   :  { %5041 = vmatprep.subr.bf16.mxu0 %v7580_v48  ;;  %5574 = vmatprep.subr.bf16.mxu1 %v7583_v50  ;;  %v7671_v48 = vld [vmem:[%s11224_s1 + $0x6c4] ss:$16 sps:$4 sm:$0xff]   ;;  %v7674_v50 = vld [vmem:[%s11224_s1 + $0x6cc] ss:$16 sps:$4 sm:$0xff]  }
  0x9f   :  { %5042 = vmatpush1.bf16.msra.mxu0 %v7578_v51  ;;  %5575 = vmatpush1.bf16.msra.mxu1 %v7581_v53  ;;  %v7669_v51 = vld [vmem:[%s11224_s1 + $0x6c0] ss:$16 sps:$4 sm:$0xff]   ;;  %v7672_v53 = vld [vmem:[%s11224_s1 + $0x6c8] ss:$16 sps:$4 sm:$0xff]  }
  0xa0   :  { %5043 = vmatprep.subr.bf16.mxu0 %v7586_v54  ;;  %5576 = vmatprep.subr.bf16.mxu1 %v7589_v55  ;;  %v7677_v54 = vld [vmem:[%s11224_s1 + $0x6e4] ss:$16 sps:$4 sm:$0xff]   ;;  %v7680_v55 = vld [vmem:[%s11224_s1 + $0x6ec] ss:$16 sps:$4 sm:$0xff]  }
  0xa3   :  { %5044 = vmatpush1.bf16.msra.mxu0 %v7584_v56  ;;  %5577 = vmatpush1.bf16.msra.mxu1 %v7587_v57  ;;  %v7675_v56 = vld [vmem:[%s11224_s1 + $0x6e0] ss:$16 sps:$4 sm:$0xff]   ;;  %v7678_v57 = vld [vmem:[%s11224_s1 + $0x6e8] ss:$16 sps:$4 sm:$0xff]  }
  0xa4   :  { %5045 = vmatprep.subr.bf16.mxu0 %v7592_v58  ;;  %5578 = vmatprep.subr.bf16.mxu1 %v7595_v59  ;;  %v7683_v58 = vld [vmem:[%s11224_s1 + $0x704] ss:$16 sps:$4 sm:$0xff]   ;;  %v7686_v59 = vld [vmem:[%s11224_s1 + $0x70c] ss:$16 sps:$4 sm:$0xff]  }
  0xa7   :  { %5046 = vmatpush1.bf16.msra.mxu0 %v7590_v60  ;;  %5579 = vmatpush1.bf16.msra.mxu1 %v7593_v61  ;;  %v7681_v60 = vld [vmem:[%s11224_s1 + $0x700] ss:$16 sps:$4 sm:$0xff]   ;;  %v7684_v61 = vld [vmem:[%s11224_s1 + $0x708] ss:$16 sps:$4 sm:$0xff]  }
  0xa8   :  { %5047 = vmatprep.subr.bf16.mxu0 %v7598_v62  ;;  %5580 = vmatprep.subr.bf16.mxu1 %v7601_v63  ;;  %v7689_v62 = vld [vmem:[%s11224_s1 + $0x724] ss:$16 sps:$4 sm:$0xff]   ;;  %v7692_v63 = vld [vmem:[%s11224_s1 + $0x72c] ss:$16 sps:$4 sm:$0xff]  }
  0xab   :  { %5048 = vmatpush1.bf16.msra.mxu0 %v7596_v0  ;;  %5581 = vmatpush1.bf16.msra.mxu1 %v7599_v1  ;;  %v7687_v0 = vld [vmem:[%s11224_s1 + $0x720] ss:$16 sps:$4 sm:$0xff]   ;;  %v7690_v1 = vld [vmem:[%s11224_s1 + $0x728] ss:$16 sps:$4 sm:$0xff]  }
  0xac   :  { %5049 = vmatprep.subr.bf16.mxu0 %v7604_v2  ;;  %5582 = vmatprep.subr.bf16.mxu1 %v7607_v3  ;;  %v7695_v2 = vld [vmem:[%s11224_s1 + $0x744] ss:$16 sps:$4 sm:$0xff]   ;;  %v7698_v3 = vld [vmem:[%s11224_s1 + $0x74c] ss:$16 sps:$4 sm:$0xff]  }
  0xaf   :  { %5050 = vmatpush1.bf16.msra.mxu0 %v7602_v4  ;;  %5583 = vmatpush1.bf16.msra.mxu1 %v7605_v5  ;;  %v7693_v4 = vld [vmem:[%s11224_s1 + $0x740] ss:$16 sps:$4 sm:$0xff]   ;;  %v7696_v5 = vld [vmem:[%s11224_s1 + $0x748] ss:$16 sps:$4 sm:$0xff]  }
  0xb0   :  { %5051 = vmatprep.subr.bf16.mxu0 %v7610_v6  ;;  %5584 = vmatprep.subr.bf16.mxu1 %v7613_v7  ;;  %v7701_v6 = vld [vmem:[%s11224_s1 + $0x764] ss:$16 sps:$4 sm:$0xff]   ;;  %v7704_v7 = vld [vmem:[%s11224_s1 + $0x76c] ss:$16 sps:$4 sm:$0xff]  }
  0xb3   :  { %5052 = vmatpush1.bf16.msra.mxu0 %v7608_v8  ;;  %5585 = vmatpush1.bf16.msra.mxu1 %v7611_v9  ;;  %v7699_v8 = vld [vmem:[%s11224_s1 + $0x760] ss:$16 sps:$4 sm:$0xff]   ;;  %v7702_v9 = vld [vmem:[%s11224_s1 + $0x768] ss:$16 sps:$4 sm:$0xff]  }
  0xb4   :  { %5053 = vmatprep.subr.bf16.mxu0 %v7616_v10  ;;  %5586 = vmatprep.subr.bf16.mxu1 %v7619_v11  ;;  %v7707_v10 = vld [vmem:[%s11224_s1 + $0x784] ss:$16 sps:$4 sm:$0xff]   ;;  %v7710_v11 = vld [vmem:[%s11224_s1 + $0x78c] ss:$16 sps:$4 sm:$0xff]  }
  0xb7   :  { %5054 = vmatpush1.bf16.msra.mxu0 %v7614_v12  ;;  %5587 = vmatpush1.bf16.msra.mxu1 %v7617_v52  ;;  %v7705_v12 = vld [vmem:[%s11224_s1 + $0x780] ss:$16 sps:$4 sm:$0xff]   ;;  %v7708_v52 = vld [vmem:[%s11224_s1 + $0x788] ss:$16 sps:$4 sm:$0xff]  }
  0xb8   :  { %5055 = vmatprep.subr.bf16.mxu0 %v7622_v15  ;;  %5588 = vmatprep.subr.bf16.mxu1 %v7625_v16  ;;  %v7713_v15 = vld [vmem:[%s11224_s1 + $0x7a4] ss:$16 sps:$4 sm:$0xff]   ;;  %v7716_v16 = vld [vmem:[%s11224_s1 + $0x7ac] ss:$16 sps:$4 sm:$0xff]  }
  0xbb   :  { %5056 = vmatpush1.bf16.msra.mxu0 %v7620_v17  ;;  %5589 = vmatpush1.bf16.msra.mxu1 %v7623_v18  ;;  %v7711_v17 = vld [vmem:[%s11224_s1 + $0x7a0] ss:$16 sps:$4 sm:$0xff]   ;;  %v7714_v18 = vld [vmem:[%s11224_s1 + $0x7a8] ss:$16 sps:$4 sm:$0xff]  }
  0xbc   :  { %5057 = vmatprep.subr.bf16.mxu0 %v7628_v19  ;;  %5590 = vmatprep.subr.bf16.mxu1 %v7631_v20  ;;  %v7719_v19 = vld [vmem:[%s11224_s1 + $0x7c4] ss:$16 sps:$4 sm:$0xff]   ;;  %v7722_v20 = vld [vmem:[%s11224_s1 + $0x7cc] ss:$16 sps:$4 sm:$0xff]  }
  0xbf   :  { %5058 = vmatpush1.bf16.msra.mxu0 %v7626_v21  ;;  %5591 = vmatpush1.bf16.msra.mxu1 %v7629_v22  ;;  %v9407_v21 = vld.sshfl [vmem:[%s11223_s0 + $0x8] sm:$0xff pattern:$0x75316420]  ;;  %v7717_v22 = vld [vmem:[%s11224_s1 + $0x7c0] ss:$16 sps:$4 sm:$0xff]  }
  0xc0   :  { %5068 = vmatprep.subr.bf16.mxu0 %v7635_v23  ;;  %5601 = vmatprep.subr.bf16.mxu1 %v7638_v24  ;;  %v7720_v23 = vld [vmem:[%s11224_s1 + $0x7c8] ss:$16 sps:$4 sm:$0xff]   ;;  %v7725_v24 = vld [vmem:[%s11224_s1 + $0x7e4] ss:$16 sps:$4 sm:$0xff]  }
  0xc2   :  { %5060 = vmatmul.mubr.bf16.vlgmr.msra.gmra.mrb[0].mxu0 %v9233_v26  ;;  %5593 = vmatmul.mubr.bf16.vlgmr.msra.gmra.mrb[0].mxu1 %v9233_v26 }
  0xc3   :  { %5069 = vmatpush1.bf16.msra.mxu0 %v7633_v13  ;;  %5602 = vmatpush1.bf16.msra.mxu1 %v7636_v27  ;;  %v7728_v13 = vld [vmem:[%s11224_s1 + $0x7ec] ss:$16 sps:$4 sm:$0xff]   ;;  %v7723_v27 = vld [vmem:[%s11224_s1 + $0x7e0] ss:$16 sps:$4 sm:$0xff]  }
  0xc4   :  { %5070 = vmatprep.subr.bf16.mxu0 %v7641_v28  ;;  %5603 = vmatprep.subr.bf16.mxu1 %v7644_v29  ;;  %v7726_v28 = vld [vmem:[%s11224_s1 + $0x7e8] ss:$16 sps:$4 sm:$0xff]   ;;  %v7731_v29 = vld [vmem:[%s11224_s1 + $0x804] ss:$16 sps:$4 sm:$0xff]  }
  0xc5   :  { %5100 = vmatprep.mubr.bf16.mxu0 %v884_v14  ;;  %5633 = vmatprep.mubr.bf16.mxu1 %v884_v14  ;;  %v7734_v14 = vld [vmem:[%s11224_s1 + $0x80c] ss:$16 sps:$4 sm:$0xff]  }
  0xc7   :  { %5071 = vmatpush1.bf16.msra.mxu0 %v7639_v30  ;;  %5604 = vmatpush1.bf16.msra.mxu1 %v7642_v31  ;;  %v900_v30 = vcombine.high %v9407_v21, %v9407_v21  ;;  %v882_v31 = vcombine.high %v9233_v26, %v9233_v26  ;;  %v7740_v26 = vld [vmem:[%s11224_s1 + $0x82c] ss:$16 sps:$4 sm:$0xff]  }
  0xc8   :  { %5072 = vmatprep.subr.bf16.mxu0 %v7647_v25  ;;  %5605 = vmatprep.subr.bf16.mxu1 %v7650_v32  ;;  %v7729_v25 = vld [vmem:[%s11224_s1 + $0x800] ss:$16 sps:$4 sm:$0xff]   ;;  %v7732_v32 = vld [vmem:[%s11224_s1 + $0x808] ss:$16 sps:$4 sm:$0xff]  }
  0xcb   :  { %5073 = vmatpush1.bf16.msra.mxu0 %v7645_v33  ;;  %5606 = vmatpush1.bf16.msra.mxu1 %v7648_v34  ;;  %v7737_v33 = vld [vmem:[%s11224_s1 + $0x824] ss:$16 sps:$4 sm:$0xff]   ;;  %v9450_v34 = vrot.slane %v900_v30, %v8749_v49 }
  0xcc   :  { %5074 = vmatprep.subr.bf16.mxu0 %v7653_v35  ;;  %5607 = vmatprep.subr.bf16.mxu1 %v7656_v36  ;;  %v7735_v35 = vld [vmem:[%s11224_s1 + $0x820] ss:$16 sps:$4 sm:$0xff]   ;;  %v7738_v36 = vld [vmem:[%s11224_s1 + $0x828] ss:$16 sps:$4 sm:$0xff]   ;;  %v7821_v30 = vld [vmem:[%s11224_s1 + $0x9e4] ss:$16 sps:$4 sm:$0xff]  }
  0xcf   :  { %5075 = vmatpush1.bf16.msra.mxu0 %v7651_v37  ;;  %5608 = vmatpush1.bf16.msra.mxu1 %v7654_v38  ;;  %v7743_v37 = vld [vmem:[%s11224_s1 + $0x844] ss:$16 sps:$4 sm:$0xff]   ;;  %v7746_v38 = vld [vmem:[%s11224_s1 + $0x84c] ss:$16 sps:$4 sm:$0xff]  }
  0xd0   :  { %5076 = vmatprep.subr.bf16.mxu0 %v7659_v39  ;;  %5609 = vmatprep.subr.bf16.mxu1 %v7662_v40  ;;  %v7741_v39 = vld [vmem:[%s11224_s1 + $0x840] ss:$16 sps:$4 sm:$0xff]   ;;  %v7744_v40 = vld [vmem:[%s11224_s1 + $0x848] ss:$16 sps:$4 sm:$0xff]  }
  0xd3   :  { %5077 = vmatpush1.bf16.msra.mxu0 %v7657_v41  ;;  %5610 = vmatpush1.bf16.msra.mxu1 %v7660_v43  ;;  %v7749_v41 = vld [vmem:[%s11224_s1 + $0x864] ss:$16 sps:$4 sm:$0xff]   ;;  %v7752_v43 = vld [vmem:[%s11224_s1 + $0x86c] ss:$16 sps:$4 sm:$0xff]  }
  0xd4   :  { %5078 = vmatprep.subr.bf16.mxu0 %v7665_v44  ;;  %5611 = vmatprep.subr.bf16.mxu1 %v7668_v45  ;;  %v7747_v44 = vld [vmem:[%s11224_s1 + $0x860] ss:$16 sps:$4 sm:$0xff]   ;;  %v7750_v45 = vld [vmem:[%s11224_s1 + $0x868] ss:$16 sps:$4 sm:$0xff]  }
  0xd7   :  { %5079 = vmatpush1.bf16.msra.mxu0 %v7663_v46  ;;  %5612 = vmatpush1.bf16.msra.mxu1 %v7666_v47  ;;  %v7755_v46 = vld [vmem:[%s11224_s1 + $0x884] ss:$16 sps:$4 sm:$0xff]   ;;  %v7758_v47 = vld [vmem:[%s11224_s1 + $0x88c] ss:$16 sps:$4 sm:$0xff]  }
  0xd8   :  { %5080 = vmatprep.subr.bf16.mxu0 %v7671_v48  ;;  %5613 = vmatprep.subr.bf16.mxu1 %v7674_v50  ;;  %v7753_v48 = vld [vmem:[%s11224_s1 + $0x880] ss:$16 sps:$4 sm:$0xff]   ;;  %v7756_v50 = vld [vmem:[%s11224_s1 + $0x888] ss:$16 sps:$4 sm:$0xff]  }
  0xdb   :  { %5081 = vmatpush1.bf16.msra.mxu0 %v7669_v51  ;;  %5614 = vmatpush1.bf16.msra.mxu1 %v7672_v53  ;;  %v7761_v51 = vld [vmem:[%s11224_s1 + $0x8a4] ss:$16 sps:$4 sm:$0xff]   ;;  %v7764_v53 = vld [vmem:[%s11224_s1 + $0x8ac] ss:$16 sps:$4 sm:$0xff]  }
  0xdc   :  { %5082 = vmatprep.subr.bf16.mxu0 %v7677_v54  ;;  %5615 = vmatprep.subr.bf16.mxu1 %v7680_v55  ;;  %v7759_v54 = vld [vmem:[%s11224_s1 + $0x8a0] ss:$16 sps:$4 sm:$0xff]   ;;  %v7762_v55 = vld [vmem:[%s11224_s1 + $0x8a8] ss:$16 sps:$4 sm:$0xff]  }
  0xdf   :  { %5083 = vmatpush1.bf16.msra.mxu0 %v7675_v56  ;;  %5616 = vmatpush1.bf16.msra.mxu1 %v7678_v57  ;;  %v7767_v56 = vld [vmem:[%s11224_s1 + $0x8c4] ss:$16 sps:$4 sm:$0xff]   ;;  %v7770_v57 = vld [vmem:[%s11224_s1 + $0x8cc] ss:$16 sps:$4 sm:$0xff]  }
  0xe0   :  { %5084 = vmatprep.subr.bf16.mxu0 %v7683_v58  ;;  %5617 = vmatprep.subr.bf16.mxu1 %v7686_v59  ;;  %v7765_v58 = vld [vmem:[%s11224_s1 + $0x8c0] ss:$16 sps:$4 sm:$0xff]   ;;  %v7768_v59 = vld [vmem:[%s11224_s1 + $0x8c8] ss:$16 sps:$4 sm:$0xff]  }
  0xe3   :  { %5085 = vmatpush1.bf16.msra.mxu0 %v7681_v60  ;;  %5618 = vmatpush1.bf16.msra.mxu1 %v7684_v61  ;;  %v7773_v60 = vld [vmem:[%s11224_s1 + $0x8e4] ss:$16 sps:$4 sm:$0xff]   ;;  %v7776_v61 = vld [vmem:[%s11224_s1 + $0x8ec] ss:$16 sps:$4 sm:$0xff]  }
  0xe4   :  { %5086 = vmatprep.subr.bf16.mxu0 %v7689_v62  ;;  %5619 = vmatprep.subr.bf16.mxu1 %v7692_v63  ;;  %v7771_v62 = vld [vmem:[%s11224_s1 + $0x8e0] ss:$16 sps:$4 sm:$0xff]   ;;  %v7774_v63 = vld [vmem:[%s11224_s1 + $0x8e8] ss:$16 sps:$4 sm:$0xff]  }
  0xe7   :  { %5087 = vmatpush1.bf16.msra.mxu0 %v7687_v0  ;;  %5620 = vmatpush1.bf16.msra.mxu1 %v7690_v1  ;;  %v7779_v0 = vld [vmem:[%s11224_s1 + $0x904] ss:$16 sps:$4 sm:$0xff]   ;;  %v7782_v1 = vld [vmem:[%s11224_s1 + $0x90c] ss:$16 sps:$4 sm:$0xff]  }
  0xe8   :  { %5088 = vmatprep.subr.bf16.mxu0 %v7695_v2  ;;  %5621 = vmatprep.subr.bf16.mxu1 %v7698_v3  ;;  %v7777_v2 = vld [vmem:[%s11224_s1 + $0x900] ss:$16 sps:$4 sm:$0xff]   ;;  %v7780_v3 = vld [vmem:[%s11224_s1 + $0x908] ss:$16 sps:$4 sm:$0xff]  }
  0xeb   :  { %5089 = vmatpush1.bf16.msra.mxu0 %v7693_v4  ;;  %5622 = vmatpush1.bf16.msra.mxu1 %v7696_v5  ;;  %v7785_v4 = vld [vmem:[%s11224_s1 + $0x924] ss:$16 sps:$4 sm:$0xff]   ;;  %v7788_v5 = vld [vmem:[%s11224_s1 + $0x92c] ss:$16 sps:$4 sm:$0xff]  }
  0xec   :  { %5090 = vmatprep.subr.bf16.mxu0 %v7701_v6  ;;  %5623 = vmatprep.subr.bf16.mxu1 %v7704_v7  ;;  %v7783_v6 = vld [vmem:[%s11224_s1 + $0x920] ss:$16 sps:$4 sm:$0xff]   ;;  %v7786_v7 = vld [vmem:[%s11224_s1 + $0x928] ss:$16 sps:$4 sm:$0xff]  }
  0xef   :  { %5091 = vmatpush1.bf16.msra.mxu0 %v7699_v8  ;;  %5624 = vmatpush1.bf16.msra.mxu1 %v7702_v9  ;;  %v7791_v8 = vld [vmem:[%s11224_s1 + $0x944] ss:$16 sps:$4 sm:$0xff]   ;;  %v7794_v9 = vld [vmem:[%s11224_s1 + $0x94c] ss:$16 sps:$4 sm:$0xff]  }
  0xf0   :  { %5092 = vmatprep.subr.bf16.mxu0 %v7707_v10  ;;  %5625 = vmatprep.subr.bf16.mxu1 %v7710_v11  ;;  %v7789_v10 = vld [vmem:[%s11224_s1 + $0x940] ss:$16 sps:$4 sm:$0xff]   ;;  %v7792_v11 = vld [vmem:[%s11224_s1 + $0x948] ss:$16 sps:$4 sm:$0xff]  }
  0xf3   :  { %5093 = vmatpush1.bf16.msra.mxu0 %v7705_v12  ;;  %5626 = vmatpush1.bf16.msra.mxu1 %v7708_v52  ;;  %v7797_v12 = vld [vmem:[%s11224_s1 + $0x964] ss:$16 sps:$4 sm:$0xff]   ;;  %v7800_v52 = vld [vmem:[%s11224_s1 + $0x96c] ss:$16 sps:$4 sm:$0xff]  }
  0xf4   :  { %5094 = vmatprep.subr.bf16.mxu0 %v7713_v15  ;;  %5627 = vmatprep.subr.bf16.mxu1 %v7716_v16  ;;  %v7795_v15 = vld [vmem:[%s11224_s1 + $0x960] ss:$16 sps:$4 sm:$0xff]   ;;  %v7798_v16 = vld [vmem:[%s11224_s1 + $0x968] ss:$16 sps:$4 sm:$0xff]  }
  0xf7   :  { %5095 = vmatpush1.bf16.msra.mxu0 %v7711_v17  ;;  %5628 = vmatpush1.bf16.msra.mxu1 %v7714_v18  ;;  %v7803_v17 = vld [vmem:[%s11224_s1 + $0x984] ss:$16 sps:$4 sm:$0xff]   ;;  %v7806_v18 = vld [vmem:[%s11224_s1 + $0x98c] ss:$16 sps:$4 sm:$0xff]  }
  0xf8   :  { %5096 = vmatprep.subr.bf16.mxu0 %v7719_v19  ;;  %5629 = vmatprep.subr.bf16.mxu1 %v7722_v20  ;;  %v7801_v19 = vld [vmem:[%s11224_s1 + $0x980] ss:$16 sps:$4 sm:$0xff]   ;;  %v7804_v20 = vld [vmem:[%s11224_s1 + $0x988] ss:$16 sps:$4 sm:$0xff]  }
  0xfb   :  { %5097 = vmatpush1.bf16.msra.mxu0 %v7717_v22  ;;  %5630 = vmatpush1.bf16.msra.mxu1 %v7720_v23  ;;  %v7809_v22 = vld [vmem:[%s11224_s1 + $0x9a4] ss:$16 sps:$4 sm:$0xff]   ;;  %v7812_v23 = vld [vmem:[%s11224_s1 + $0x9ac] ss:$16 sps:$4 sm:$0xff]  }
  0xfc   :  { %5098 = vmatprep.subr.bf16.mxu0 %v7725_v24  ;;  %5631 = vmatprep.subr.bf16.mxu1 %v7728_v13  ;;  %v7807_v24 = vld [vmem:[%s11224_s1 + $0x9a0] ss:$16 sps:$4 sm:$0xff]   ;;  %v7810_v13 = vld [vmem:[%s11224_s1 + $0x9a8] ss:$16 sps:$4 sm:$0xff]  }
  0xff   :  { %5099 = vmatpush1.bf16.msra.mxu0 %v7723_v27  ;;  %5632 = vmatpush1.bf16.msra.mxu1 %v7726_v28  ;;  %v7815_v27 = vld [vmem:[%s11224_s1 + $0x9c4] ss:$16 sps:$4 sm:$0xff]   ;;  %v7818_v28 = vld [vmem:[%s11224_s1 + $0x9cc] ss:$16 sps:$4 sm:$0xff]  }
 0x100   :  { %5109 = vmatprep.subr.bf16.mxu0 %v7731_v29  ;;  %5642 = vmatprep.subr.bf16.mxu1 %v7734_v14  ;;  %v7813_v29 = vld [vmem:[%s11224_s1 + $0x9c0] ss:$16 sps:$4 sm:$0xff]   ;;  %v7816_v14 = vld [vmem:[%s11224_s1 + $0x9c8] ss:$16 sps:$4 sm:$0xff]  }
 0x102   :  { %5101 = vmatmul.mubr.bf16.vlgmr.msra.gmra.mrb[0].mxu0 %v882_v31  ;;  %5634 = vmatmul.mubr.bf16.vlgmr.msra.gmra.mrb[0].mxu1 %v882_v31  ;;  %v7824_v31 = vld [vmem:[%s11224_s1 + $0x9ec] ss:$16 sps:$4 sm:$0xff]  }
 0x103   :  { %5110 = vmatpush1.bf16.msra.mxu0 %v7729_v25  ;;  %5643 = vmatpush1.bf16.msra.mxu1 %v7732_v32  ;;  %v7819_v25 = vld [vmem:[%s11224_s1 + $0x9e0] ss:$16 sps:$4 sm:$0xff]   ;;  %v7822_v32 = vld [vmem:[%s11224_s1 + $0x9e8] ss:$16 sps:$4 sm:$0xff]  }
 0x104   :  { %5111 = vmatprep.subr.bf16.mxu0 %v7737_v33  ;;  %5644 = vmatprep.subr.bf16.mxu1 %v7740_v26  ;;  %v7827_v33 = vld [vmem:[%s11224_s1 + $0xa04] ss:$16 sps:$4 sm:$0xff]   ;;  %v7830_v26 = vld [vmem:[%s11224_s1 + $0xa0c] ss:$16 sps:$4 sm:$0xff]  }
 0x105   :  { %5141 = vmatprep.mubr.bf16.mxu0 %v9450_v34  ;;  %5674 = vmatprep.mubr.bf16.mxu1 %v9450_v34 }
 0x107   :  { %5112 = vmatpush1.bf16.msra.mxu0 %v7735_v35  ;;  %5645 = vmatpush1.bf16.msra.mxu1 %v7738_v36  ;;  %v9636_v35 = vrot.slane %v9407_v21, %v8749_v49  ;;  %v7825_v36 = vld [vmem:[%s11224_s1 + $0xa00] ss:$16 sps:$4 sm:$0xff]   ;;  %v7836_v21 = vld [vmem:[%s11224_s1 + $0xa2c] ss:$16 sps:$4 sm:$0xff]  }
 0x108   :  { %5113 = vmatprep.subr.bf16.mxu0 %v7743_v37  ;;  %5646 = vmatprep.subr.bf16.mxu1 %v7746_v38  ;;  %v7828_v37 = vld [vmem:[%s11224_s1 + $0xa08] ss:$16 sps:$4 sm:$0xff]   ;;  %v7833_v38 = vld [vmem:[%s11224_s1 + $0xa24] ss:$16 sps:$4 sm:$0xff]  }
 0x10b   :  { %5114 = vmatpush1.bf16.msra.mxu0 %v7741_v39  ;;  %5647 = vmatpush1.bf16.msra.mxu1 %v7744_v40  ;;  %v932_v39 = vcombine.high %v9450_v34, %v9450_v34  ;;  %v7831_v40 = vld [vmem:[%s11224_s1 + $0xa20] ss:$16 sps:$4 sm:$0xff]   ;;  %v7839_v34 = vld [vmem:[%s11224_s1 + $0xa44] ss:$16 sps:$4 sm:$0xff]  }
 0x10c   :  { %5115 = vmatprep.subr.bf16.mxu0 %v7749_v41  ;;  %5648 = vmatprep.subr.bf16.mxu1 %v7752_v43  ;;  %v7834_v41 = vld [vmem:[%s11224_s1 + $0xa28] ss:$16 sps:$4 sm:$0xff]   ;;  %v7842_v43 = vld [vmem:[%s11224_s1 + $0xa4c] ss:$16 sps:$4 sm:$0xff]  }
 0x10f   :  { %5116 = vmatpush1.bf16.msra.mxu0 %v7747_v44  ;;  %5649 = vmatpush1.bf16.msra.mxu1 %v7750_v45  ;;  %v7837_v44 = vld [vmem:[%s11224_s1 + $0xa40] ss:$16 sps:$4 sm:$0xff]   ;;  %v7840_v45 = vld [vmem:[%s11224_s1 + $0xa48] ss:$16 sps:$4 sm:$0xff]  }
 0x110   :  { %5117 = vmatprep.subr.bf16.mxu0 %v7755_v46  ;;  %5650 = vmatprep.subr.bf16.mxu1 %v7758_v47  ;;  %v7845_v46 = vld [vmem:[%s11224_s1 + $0xa64] ss:$16 sps:$4 sm:$0xff]   ;;  %v7848_v47 = vld [vmem:[%s11224_s1 + $0xa6c] ss:$16 sps:$4 sm:$0xff]  }
 0x113   :  { %5118 = vmatpush1.bf16.msra.mxu0 %v7753_v48  ;;  %5651 = vmatpush1.bf16.msra.mxu1 %v7756_v50  ;;  %v7843_v48 = vld [vmem:[%s11224_s1 + $0xa60] ss:$16 sps:$4 sm:$0xff]   ;;  %v7846_v50 = vld [vmem:[%s11224_s1 + $0xa68] ss:$16 sps:$4 sm:$0xff]  }
 0x114   :  { %5119 = vmatprep.subr.bf16.mxu0 %v7761_v51  ;;  %5652 = vmatprep.subr.bf16.mxu1 %v7764_v53  ;;  %v7851_v51 = vld [vmem:[%s11224_s1 + $0xa84] ss:$16 sps:$4 sm:$0xff]   ;;  %v7854_v53 = vld [vmem:[%s11224_s1 + $0xa8c] ss:$16 sps:$4 sm:$0xff]  }
 0x117   :  { %5120 = vmatpush1.bf16.msra.mxu0 %v7759_v54  ;;  %5653 = vmatpush1.bf16.msra.mxu1 %v7762_v55  ;;  %v7849_v54 = vld [vmem:[%s11224_s1 + $0xa80] ss:$16 sps:$4 sm:$0xff]   ;;  %v7852_v55 = vld [vmem:[%s11224_s1 + $0xa88] ss:$16 sps:$4 sm:$0xff]  }
 0x118   :  { %5121 = vmatprep.subr.bf16.mxu0 %v7767_v56  ;;  %5654 = vmatprep.subr.bf16.mxu1 %v7770_v57  ;;  %v7857_v56 = vld [vmem:[%s11224_s1 + $0xaa4] ss:$16 sps:$4 sm:$0xff]   ;;  %v7860_v57 = vld [vmem:[%s11224_s1 + $0xaac] ss:$16 sps:$4 sm:$0xff]  }
 0x11b   :  { %5122 = vmatpush1.bf16.msra.mxu0 %v7765_v58  ;;  %5655 = vmatpush1.bf16.msra.mxu1 %v7768_v59  ;;  %v7855_v58 = vld [vmem:[%s11224_s1 + $0xaa0] ss:$16 sps:$4 sm:$0xff]   ;;  %v7858_v59 = vld [vmem:[%s11224_s1 + $0xaa8] ss:$16 sps:$4 sm:$0xff]  }
 0x11c   :  { %5123 = vmatprep.subr.bf16.mxu0 %v7773_v60  ;;  %5656 = vmatprep.subr.bf16.mxu1 %v7776_v61  ;;  %v7863_v60 = vld [vmem:[%s11224_s1 + $0xac4] ss:$16 sps:$4 sm:$0xff]   ;;  %v7866_v61 = vld [vmem:[%s11224_s1 + $0xacc] ss:$16 sps:$4 sm:$0xff]  }
 0x11f   :  { %5124 = vmatpush1.bf16.msra.mxu0 %v7771_v62  ;;  %5657 = vmatpush1.bf16.msra.mxu1 %v7774_v63  ;;  %v7861_v62 = vld [vmem:[%s11224_s1 + $0xac0] ss:$16 sps:$4 sm:$0xff]   ;;  %v7864_v63 = vld [vmem:[%s11224_s1 + $0xac8] ss:$16 sps:$4 sm:$0xff]  }
 0x120   :  { %5125 = vmatprep.subr.bf16.mxu0 %v7779_v0  ;;  %5658 = vmatprep.subr.bf16.mxu1 %v7782_v1  ;;  %v7869_v0 = vld [vmem:[%s11224_s1 + $0xae4] ss:$16 sps:$4 sm:$0xff]   ;;  %v7872_v1 = vld [vmem:[%s11224_s1 + $0xaec] ss:$16 sps:$4 sm:$0xff]  }
 0x123   :  { %5126 = vmatpush1.bf16.msra.mxu0 %v7777_v2  ;;  %5659 = vmatpush1.bf16.msra.mxu1 %v7780_v3  ;;  %v7867_v2 = vld [vmem:[%s11224_s1 + $0xae0] ss:$16 sps:$4 sm:$0xff]   ;;  %v7870_v3 = vld [vmem:[%s11224_s1 + $0xae8] ss:$16 sps:$4 sm:$0xff]  }
 0x124   :  { %5127 = vmatprep.subr.bf16.mxu0 %v7785_v4  ;;  %5660 = vmatprep.subr.bf16.mxu1 %v7788_v5  ;;  %v7875_v4 = vld [vmem:[%s11224_s1 + $0xb04] ss:$16 sps:$4 sm:$0xff]   ;;  %v7878_v5 = vld [vmem:[%s11224_s1 + $0xb0c] ss:$16 sps:$4 sm:$0xff]  }
 0x127   :  { %5128 = vmatpush1.bf16.msra.mxu0 %v7783_v6  ;;  %5661 = vmatpush1.bf16.msra.mxu1 %v7786_v7  ;;  %v7873_v6 = vld [vmem:[%s11224_s1 + $0xb00] ss:$16 sps:$4 sm:$0xff]   ;;  %v7876_v7 = vld [vmem:[%s11224_s1 + $0xb08] ss:$16 sps:$4 sm:$0xff]  }
 0x128   :  { %5129 = vmatprep.subr.bf16.mxu0 %v7791_v8  ;;  %5662 = vmatprep.subr.bf16.mxu1 %v7794_v9  ;;  %v7881_v8 = vld [vmem:[%s11224_s1 + $0xb24] ss:$16 sps:$4 sm:$0xff]   ;;  %v7884_v9 = vld [vmem:[%s11224_s1 + $0xb2c] ss:$16 sps:$4 sm:$0xff]  }
 0x12b   :  { %5130 = vmatpush1.bf16.msra.mxu0 %v7789_v10  ;;  %5663 = vmatpush1.bf16.msra.mxu1 %v7792_v11  ;;  %v7879_v10 = vld [vmem:[%s11224_s1 + $0xb20] ss:$16 sps:$4 sm:$0xff]   ;;  %v7882_v11 = vld [vmem:[%s11224_s1 + $0xb28] ss:$16 sps:$4 sm:$0xff]  }
 0x12c   :  { %5131 = vmatprep.subr.bf16.mxu0 %v7797_v12  ;;  %5664 = vmatprep.subr.bf16.mxu1 %v7800_v52  ;;  %v7887_v12 = vld [vmem:[%s11224_s1 + $0xb44] ss:$16 sps:$4 sm:$0xff]   ;;  %v7890_v52 = vld [vmem:[%s11224_s1 + $0xb4c] ss:$16 sps:$4 sm:$0xff]  }
 0x12f   :  { %5132 = vmatpush1.bf16.msra.mxu0 %v7795_v15  ;;  %5665 = vmatpush1.bf16.msra.mxu1 %v7798_v16  ;;  %v7885_v15 = vld [vmem:[%s11224_s1 + $0xb40] ss:$16 sps:$4 sm:$0xff]   ;;  %v7888_v16 = vld [vmem:[%s11224_s1 + $0xb48] ss:$16 sps:$4 sm:$0xff]  }
 0x130   :  { %5133 = vmatprep.subr.bf16.mxu0 %v7803_v17  ;;  %5666 = vmatprep.subr.bf16.mxu1 %v7806_v18  ;;  %v7893_v17 = vld [vmem:[%s11224_s1 + $0xb64] ss:$16 sps:$4 sm:$0xff]   ;;  %v7896_v18 = vld [vmem:[%s11224_s1 + $0xb6c] ss:$16 sps:$4 sm:$0xff]  }
 0x133   :  { %5134 = vmatpush1.bf16.msra.mxu0 %v7801_v19  ;;  %5667 = vmatpush1.bf16.msra.mxu1 %v7804_v20  ;;  %v7891_v19 = vld [vmem:[%s11224_s1 + $0xb60] ss:$16 sps:$4 sm:$0xff]   ;;  %v7894_v20 = vld [vmem:[%s11224_s1 + $0xb68] ss:$16 sps:$4 sm:$0xff]  }
 0x134   :  { %5135 = vmatprep.subr.bf16.mxu0 %v7809_v22  ;;  %5668 = vmatprep.subr.bf16.mxu1 %v7812_v23  ;;  %v7899_v22 = vld [vmem:[%s11224_s1 + $0xb84] ss:$16 sps:$4 sm:$0xff]   ;;  %v7902_v23 = vld [vmem:[%s11224_s1 + $0xb8c] ss:$16 sps:$4 sm:$0xff]  }
 0x137   :  { %5136 = vmatpush1.bf16.msra.mxu0 %v7807_v24  ;;  %5669 = vmatpush1.bf16.msra.mxu1 %v7810_v13  ;;  %v7897_v24 = vld [vmem:[%s11224_s1 + $0xb80] ss:$16 sps:$4 sm:$0xff]   ;;  %v7900_v13 = vld [vmem:[%s11224_s1 + $0xb88] ss:$16 sps:$4 sm:$0xff]  }
 0x138   :  { %5137 = vmatprep.subr.bf16.mxu0 %v7815_v27  ;;  %5670 = vmatprep.subr.bf16.mxu1 %v7818_v28  ;;  %v7905_v27 = vld [vmem:[%s11224_s1 + $0xba4] ss:$16 sps:$4 sm:$0xff]   ;;  %v7908_v28 = vld [vmem:[%s11224_s1 + $0xbac] ss:$16 sps:$4 sm:$0xff]  }
 0x13b   :  { %5138 = vmatpush1.bf16.msra.mxu0 %v7813_v29  ;;  %5671 = vmatpush1.bf16.msra.mxu1 %v7816_v14  ;;  %v7903_v29 = vld [vmem:[%s11224_s1 + $0xba0] ss:$16 sps:$4 sm:$0xff]   ;;  %v7906_v14 = vld [vmem:[%s11224_s1 + $0xba8] ss:$16 sps:$4 sm:$0xff]  }
 0x13c   :  { %5139 = vmatprep.subr.bf16.mxu0 %v7821_v30  ;;  %5672 = vmatprep.subr.bf16.mxu1 %v7824_v31  ;;  %v7911_v30 = vld [vmem:[%s11224_s1 + $0xbc4] ss:$16 sps:$4 sm:$0xff]   ;;  %v7914_v31 = vld [vmem:[%s11224_s1 + $0xbcc] ss:$16 sps:$4 sm:$0xff]  }
 0x13f   :  { %5140 = vmatpush1.bf16.msra.mxu0 %v7819_v25  ;;  %5673 = vmatpush1.bf16.msra.mxu1 %v7822_v32  ;;  %v8555_v25 = vld [vmem:[%s11223_s0 + $0x8] sm:$0xff] }
 0x140   :  { %5150 = vmatprep.subr.bf16.mxu0 %v7827_v33  ;;  %5683 = vmatprep.subr.bf16.mxu1 %v7830_v26  ;;  %v885_v32 = vcombine.high %v8555_v25, %v8555_v25  ;;  %v7909_v33 = vld [vmem:[%s11224_s1 + $0xbc0] ss:$16 sps:$4 sm:$0xff]   ;;  %v7912_v26 = vld [vmem:[%s11224_s1 + $0xbc8] ss:$16 sps:$4 sm:$0xff]  }
 0x141   :  { %v7993_v25 = vld [vmem:[%s11224_s1 + $0xd80] ss:$16 sps:$4 sm:$0xff]  }
 0x142   :  { %5142 = vmatmul.mubr.bf16.vlgmr.msra.gmra.mrb[0].mxu0 %v9636_v35  ;;  %5675 = vmatmul.mubr.bf16.vlgmr.msra.gmra.mrb[0].mxu1 %v9636_v35 }
 0x143   :  { %5151 = vmatpush1.bf16.msra.mxu0 %v7825_v36  ;;  %5684 = vmatpush1.bf16.msra.mxu1 %v7828_v37  ;;  %v7917_v36 = vld [vmem:[%s11224_s1 + $0xbe4] ss:$16 sps:$4 sm:$0xff]   ;;  %v7920_v37 = vld [vmem:[%s11224_s1 + $0xbec] ss:$16 sps:$4 sm:$0xff]  }
 0x144   :  { %5152 = vmatprep.subr.bf16.mxu0 %v7833_v38  ;;  %5685 = vmatprep.subr.bf16.mxu1 %v7836_v21  ;;  %v9826_v38 = vrot.slane %v885_v32, %v8749_v49  ;;  %v7915_v21 = vld [vmem:[%s11224_s1 + $0xbe0] ss:$16 sps:$4 sm:$0xff]   ;;  %v7996_v32 = vld [vmem:[%s11224_s1 + $0xd88] ss:$16 sps:$4 sm:$0xff]  }
 0x145   :  { %5182 = vmatprep.mubr.bf16.mxu0 %v932_v39  ;;  %5715 = vmatprep.mubr.bf16.mxu1 %v932_v39  ;;  %v7918_v39 = vld [vmem:[%s11224_s1 + $0xbe8] ss:$16 sps:$4 sm:$0xff]  }
 0x147   :  { %5153 = vmatpush1.bf16.msra.mxu0 %v7831_v40  ;;  %5686 = vmatpush1.bf16.msra.mxu1 %v7834_v41  ;;  %v7923_v40 = vld [vmem:[%s11224_s1 + $0xc04] ss:$16 sps:$4 sm:$0xff]   ;;  %v7926_v41 = vld [vmem:[%s11224_s1 + $0xc0c] ss:$16 sps:$4 sm:$0xff]  }
 0x148   :  { %5154 = vmatprep.subr.bf16.mxu0 %v7839_v34  ;;  %5687 = vmatprep.subr.bf16.mxu1 %v7842_v43  ;;  %v901_v34 = vcombine.high %v9826_v38, %v9826_v38  ;;  %v930_v43 = vcombine.high %v9636_v35, %v9636_v35  ;;  %v7932_v35 = vld [vmem:[%s11224_s1 + $0xc2c] ss:$16 sps:$4 sm:$0xff]  }
 0x14b   :  { %5155 = vmatpush1.bf16.msra.mxu0 %v7837_v44  ;;  %5688 = vmatpush1.bf16.msra.mxu1 %v7840_v45  ;;  %v7921_v44 = vld [vmem:[%s11224_s1 + $0xc00] ss:$16 sps:$4 sm:$0xff]   ;;  %v7924_v45 = vld [vmem:[%s11224_s1 + $0xc08] ss:$16 sps:$4 sm:$0xff]  }
 0x14c   :  { %5156 = vmatprep.subr.bf16.mxu0 %v7845_v46  ;;  %5689 = vmatprep.subr.bf16.mxu1 %v7848_v47  ;;  %v7929_v46 = vld [vmem:[%s11224_s1 + $0xc24] ss:$16 sps:$4 sm:$0xff]   ;;  %v9857_v47 = vrot.slane %v901_v34, %v8749_v49 }
 0x14d   :  { %v8013_v34 = vld [vmem:[%s11224_s1 + $0xde4] ss:$16 sps:$4 sm:$0xff]  }
 0x14f   :  { %5157 = vmatpush1.bf16.msra.mxu0 %v7843_v48  ;;  %5690 = vmatpush1.bf16.msra.mxu1 %v7846_v50  ;;  %v7927_v48 = vld [vmem:[%s11224_s1 + $0xc20] ss:$16 sps:$4 sm:$0xff]   ;;  %v7930_v50 = vld [vmem:[%s11224_s1 + $0xc28] ss:$16 sps:$4 sm:$0xff]  }
 0x150   :  { %5158 = vmatprep.subr.bf16.mxu0 %v7851_v51  ;;  %5691 = vmatprep.subr.bf16.mxu1 %v7854_v53  ;;  %v7935_v51 = vld [vmem:[%s11224_s1 + $0xc44] ss:$16 sps:$4 sm:$0xff]   ;;  %v7938_v53 = vld [vmem:[%s11224_s1 + $0xc4c] ss:$16 sps:$4 sm:$0xff]  }
 0x153   :  { %5159 = vmatpush1.bf16.msra.mxu0 %v7849_v54  ;;  %5692 = vmatpush1.bf16.msra.mxu1 %v7852_v55  ;;  %v7933_v54 = vld [vmem:[%s11224_s1 + $0xc40] ss:$16 sps:$4 sm:$0xff]   ;;  %v7936_v55 = vld [vmem:[%s11224_s1 + $0xc48] ss:$16 sps:$4 sm:$0xff]  }
 0x154   :  { %5160 = vmatprep.subr.bf16.mxu0 %v7857_v56  ;;  %5693 = vmatprep.subr.bf16.mxu1 %v7860_v57  ;;  %v7941_v56 = vld [vmem:[%s11224_s1 + $0xc64] ss:$16 sps:$4 sm:$0xff]   ;;  %v7944_v57 = vld [vmem:[%s11224_s1 + $0xc6c] ss:$16 sps:$4 sm:$0xff]  }
 0x157   :  { %5161 = vmatpush1.bf16.msra.mxu0 %v7855_v58  ;;  %5694 = vmatpush1.bf16.msra.mxu1 %v7858_v59  ;;  %v7939_v58 = vld [vmem:[%s11224_s1 + $0xc60] ss:$16 sps:$4 sm:$0xff]   ;;  %v7942_v59 = vld [vmem:[%s11224_s1 + $0xc68] ss:$16 sps:$4 sm:$0xff]  }
 0x158   :  { %5162 = vmatprep.subr.bf16.mxu0 %v7863_v60  ;;  %5695 = vmatprep.subr.bf16.mxu1 %v7866_v61  ;;  %v7947_v60 = vld [vmem:[%s11224_s1 + $0xc84] ss:$16 sps:$4 sm:$0xff]   ;;  %v7950_v61 = vld [vmem:[%s11224_s1 + $0xc8c] ss:$16 sps:$4 sm:$0xff]  }
 0x15b   :  { %5163 = vmatpush1.bf16.msra.mxu0 %v7861_v62  ;;  %5696 = vmatpush1.bf16.msra.mxu1 %v7864_v63  ;;  %v7945_v62 = vld [vmem:[%s11224_s1 + $0xc80] ss:$16 sps:$4 sm:$0xff]   ;;  %v7948_v63 = vld [vmem:[%s11224_s1 + $0xc88] ss:$16 sps:$4 sm:$0xff]  }
 0x15c   :  { %5164 = vmatprep.subr.bf16.mxu0 %v7869_v0  ;;  %5697 = vmatprep.subr.bf16.mxu1 %v7872_v1  ;;  %v7953_v0 = vld [vmem:[%s11224_s1 + $0xca4] ss:$16 sps:$4 sm:$0xff]   ;;  %v7956_v1 = vld [vmem:[%s11224_s1 + $0xcac] ss:$16 sps:$4 sm:$0xff]  }
 0x15f   :  { %5165 = vmatpush1.bf16.msra.mxu0 %v7867_v2  ;;  %5698 = vmatpush1.bf16.msra.mxu1 %v7870_v3  ;;  %v7951_v2 = vld [vmem:[%s11224_s1 + $0xca0] ss:$16 sps:$4 sm:$0xff]   ;;  %v7954_v3 = vld [vmem:[%s11224_s1 + $0xca8] ss:$16 sps:$4 sm:$0xff]  }
 0x160   :  { %5166 = vmatprep.subr.bf16.mxu0 %v7875_v4  ;;  %5699 = vmatprep.subr.bf16.mxu1 %v7878_v5  ;;  %v7959_v4 = vld [vmem:[%s11224_s1 + $0xcc4] ss:$16 sps:$4 sm:$0xff]   ;;  %v7962_v5 = vld [vmem:[%s11224_s1 + $0xccc] ss:$16 sps:$4 sm:$0xff]  }
 0x163   :  { %5167 = vmatpush1.bf16.msra.mxu0 %v7873_v6  ;;  %5700 = vmatpush1.bf16.msra.mxu1 %v7876_v7  ;;  %v7957_v6 = vld [vmem:[%s11224_s1 + $0xcc0] ss:$16 sps:$4 sm:$0xff]   ;;  %v7960_v7 = vld [vmem:[%s11224_s1 + $0xcc8] ss:$16 sps:$4 sm:$0xff]  }
 0x164   :  { %5168 = vmatprep.subr.bf16.mxu0 %v7881_v8  ;;  %5701 = vmatprep.subr.bf16.mxu1 %v7884_v9  ;;  %v7965_v8 = vld [vmem:[%s11224_s1 + $0xce4] ss:$16 sps:$4 sm:$0xff]   ;;  %v7968_v9 = vld [vmem:[%s11224_s1 + $0xcec] ss:$16 sps:$4 sm:$0xff]  }
 0x167   :  { %5169 = vmatpush1.bf16.msra.mxu0 %v7879_v10  ;;  %5702 = vmatpush1.bf16.msra.mxu1 %v7882_v11  ;;  %v7963_v10 = vld [vmem:[%s11224_s1 + $0xce0] ss:$16 sps:$4 sm:$0xff]   ;;  %v7966_v11 = vld [vmem:[%s11224_s1 + $0xce8] ss:$16 sps:$4 sm:$0xff]  }
 0x168   :  { %5170 = vmatprep.subr.bf16.mxu0 %v7887_v12  ;;  %5703 = vmatprep.subr.bf16.mxu1 %v7890_v52  ;;  %v7971_v12 = vld [vmem:[%s11224_s1 + $0xd04] ss:$16 sps:$4 sm:$0xff]   ;;  %v7974_v52 = vld [vmem:[%s11224_s1 + $0xd0c] ss:$16 sps:$4 sm:$0xff]  }
 0x16b   :  { %5171 = vmatpush1.bf16.msra.mxu0 %v7885_v15  ;;  %5704 = vmatpush1.bf16.msra.mxu1 %v7888_v16  ;;  %v7969_v15 = vld [vmem:[%s11224_s1 + $0xd00] ss:$16 sps:$4 sm:$0xff]   ;;  %v7972_v16 = vld [vmem:[%s11224_s1 + $0xd08] ss:$16 sps:$4 sm:$0xff]  }
 0x16c   :  { %5172 = vmatprep.subr.bf16.mxu0 %v7893_v17  ;;  %5705 = vmatprep.subr.bf16.mxu1 %v7896_v18  ;;  %v7977_v17 = vld [vmem:[%s11224_s1 + $0xd24] ss:$16 sps:$4 sm:$0xff]   ;;  %v7980_v18 = vld [vmem:[%s11224_s1 + $0xd2c] ss:$16 sps:$4 sm:$0xff]  }
 0x16f   :  { %5173 = vmatpush1.bf16.msra.mxu0 %v7891_v19  ;;  %5706 = vmatpush1.bf16.msra.mxu1 %v7894_v20  ;;  %v7975_v19 = vld [vmem:[%s11224_s1 + $0xd20] ss:$16 sps:$4 sm:$0xff]   ;;  %v7978_v20 = vld [vmem:[%s11224_s1 + $0xd28] ss:$16 sps:$4 sm:$0xff]  }
 0x170   :  { %5174 = vmatprep.subr.bf16.mxu0 %v7899_v22  ;;  %5707 = vmatprep.subr.bf16.mxu1 %v7902_v23  ;;  %v7983_v22 = vld [vmem:[%s11224_s1 + $0xd44] ss:$16 sps:$4 sm:$0xff]   ;;  %v7986_v23 = vld [vmem:[%s11224_s1 + $0xd4c] ss:$16 sps:$4 sm:$0xff]  }
 0x173   :  { %5175 = vmatpush1.bf16.msra.mxu0 %v7897_v24  ;;  %5708 = vmatpush1.bf16.msra.mxu1 %v7900_v13  ;;  %v7981_v24 = vld [vmem:[%s11224_s1 + $0xd40] ss:$16 sps:$4 sm:$0xff]   ;;  %v7984_v13 = vld [vmem:[%s11224_s1 + $0xd48] ss:$16 sps:$4 sm:$0xff]  }
 0x174   :  { %5176 = vmatprep.subr.bf16.mxu0 %v7905_v27  ;;  %5709 = vmatprep.subr.bf16.mxu1 %v7908_v28  ;;  %v7989_v27 = vld [vmem:[%s11224_s1 + $0xd64] ss:$16 sps:$4 sm:$0xff]   ;;  %v7992_v28 = vld [vmem:[%s11224_s1 + $0xd6c] ss:$16 sps:$4 sm:$0xff]  }
 0x177   :  { %5177 = vmatpush1.bf16.msra.mxu0 %v7903_v29  ;;  %5710 = vmatpush1.bf16.msra.mxu1 %v7906_v14  ;;  %v7987_v29 = vld [vmem:[%s11224_s1 + $0xd60] ss:$16 sps:$4 sm:$0xff]   ;;  %v7990_v14 = vld [vmem:[%s11224_s1 + $0xd68] ss:$16 sps:$4 sm:$0xff]  }
 0x178   :  { %5178 = vmatprep.subr.bf16.mxu0 %v7911_v30  ;;  %5711 = vmatprep.subr.bf16.mxu1 %v7914_v31  ;;  %v7995_v30 = vld [vmem:[%s11224_s1 + $0xd84] ss:$16 sps:$4 sm:$0xff]   ;;  %v7998_v31 = vld [vmem:[%s11224_s1 + $0xd8c] ss:$16 sps:$4 sm:$0xff]  }
 0x17b   :  { %5179 = vmatpush1.bf16.msra.mxu0 %v7909_v33  ;;  %5712 = vmatpush1.bf16.msra.mxu1 %v7912_v26  ;;  %v8001_v33 = vld [vmem:[%s11224_s1 + $0xda4] ss:$16 sps:$4 sm:$0xff]   ;;  %v8004_v26 = vld [vmem:[%s11224_s1 + $0xdac] ss:$16 sps:$4 sm:$0xff]  }
 0x17c   :  { %5180 = vmatprep.subr.bf16.mxu0 %v7917_v36  ;;  %5713 = vmatprep.subr.bf16.mxu1 %v7920_v37  ;;  %v7999_v36 = vld [vmem:[%s11224_s1 + $0xda0] ss:$16 sps:$4 sm:$0xff]   ;;  %v8002_v37 = vld [vmem:[%s11224_s1 + $0xda8] ss:$16 sps:$4 sm:$0xff]  }
 0x17f   :  { %5181 = vmatpush1.bf16.msra.mxu0 %v7915_v21  ;;  %5714 = vmatpush1.bf16.msra.mxu1 %v7918_v39  ;;  %v8007_v21 = vld [vmem:[%s11224_s1 + $0xdc4] ss:$16 sps:$4 sm:$0xff]   ;;  %v8010_v39 = vld [vmem:[%s11224_s1 + $0xdcc] ss:$16 sps:$4 sm:$0xff]  }
 0x180   :  { %5191 = vmatprep.subr.bf16.mxu0 %v7923_v40  ;;  %5724 = vmatprep.subr.bf16.mxu1 %v7926_v41  ;;  %v8005_v40 = vld [vmem:[%s11224_s1 + $0xdc0] ss:$16 sps:$4 sm:$0xff]   ;;  %v8008_v41 = vld [vmem:[%s11224_s1 + $0xdc8] ss:$16 sps:$4 sm:$0xff]  }
 0x182   :  { %5183 = vmatmul.mubr.bf16.vlgmr.msra.gmra.mrb[0].mxu0 %v930_v43  ;;  %5716 = vmatmul.mubr.bf16.vlgmr.msra.gmra.mrb[0].mxu1 %v930_v43  ;;  %v8016_v43 = vld [vmem:[%s11224_s1 + $0xdec] ss:$16 sps:$4 sm:$0xff]  }
 0x183   :  { %5192 = vmatpush1.bf16.msra.mxu0 %v7921_v44  ;;  %5725 = vmatpush1.bf16.msra.mxu1 %v7924_v45  ;;  %v8011_v44 = vld [vmem:[%s11224_s1 + $0xde0] ss:$16 sps:$4 sm:$0xff]   ;;  %v8014_v45 = vld [vmem:[%s11224_s1 + $0xde8] ss:$16 sps:$4 sm:$0xff]  }
 0x184   :  { %5193 = vmatprep.subr.bf16.mxu0 %v7929_v46  ;;  %5726 = vmatprep.subr.bf16.mxu1 %v7932_v35  ;;  %v8020_v46 = vld [vmem:[%s11224_s1 + $0xe04] ss:$16 sps:$4 sm:$0xff]   ;;  %v8023_v35 = vld [vmem:[%s11224_s1 + $0xe0c] ss:$16 sps:$4 sm:$0xff]  }
 0x185   :  { %5223 = vmatprep.mubr.bf16.mxu0 %v9857_v47  ;;  %5756 = vmatprep.mubr.bf16.mxu1 %v9857_v47 }
 0x187   :  { %5194 = vmatpush1.bf16.msra.mxu0 %v7927_v48  ;;  %5727 = vmatpush1.bf16.msra.mxu1 %v7930_v50  ;;  %v10043_v48 = vrot.slane %v9826_v38, %v8749_v49  ;;  %v8018_v50 = vld [vmem:[%s11224_s1 + $0xe00] ss:$16 sps:$4 sm:$0xff]   ;;  %v8029_v38 = vld [vmem:[%s11224_s1 + $0xe2c] ss:$16 sps:$4 sm:$0xff]  }
 0x188   :  { %5195 = vmatprep.subr.bf16.mxu0 %v7935_v51  ;;  %5728 = vmatprep.subr.bf16.mxu1 %v7938_v53  ;;  %v8021_v51 = vld [vmem:[%s11224_s1 + $0xe08] ss:$16 sps:$4 sm:$0xff]   ;;  %v8026_v53 = vld [vmem:[%s11224_s1 + $0xe24] ss:$16 sps:$4 sm:$0xff]  }
 0x18b   :  { %5196 = vmatpush1.bf16.msra.mxu0 %v7933_v54  ;;  %5729 = vmatpush1.bf16.msra.mxu1 %v7936_v55  ;;  %v933_v54 = vcombine.high %v9857_v47, %v9857_v47  ;;  %v8024_v55 = vld [vmem:[%s11224_s1 + $0xe20] ss:$16 sps:$4 sm:$0xff]   ;;  %v8032_v47 = vld [vmem:[%s11224_s1 + $0xe44] ss:$16 sps:$4 sm:$0xff]  }
 0x18c   :  { %5197 = vmatprep.subr.bf16.mxu0 %v7941_v56  ;;  %5730 = vmatprep.subr.bf16.mxu1 %v7944_v57  ;;  %v8027_v56 = vld [vmem:[%s11224_s1 + $0xe28] ss:$16 sps:$4 sm:$0xff]   ;;  %v8035_v57 = vld [vmem:[%s11224_s1 + $0xe4c] ss:$16 sps:$4 sm:$0xff]  }
 0x18f   :  { %5198 = vmatpush1.bf16.msra.mxu0 %v7939_v58  ;;  %5731 = vmatpush1.bf16.msra.mxu1 %v7942_v59  ;;  %v8030_v58 = vld [vmem:[%s11224_s1 + $0xe40] ss:$16 sps:$4 sm:$0xff]   ;;  %v8033_v59 = vld [vmem:[%s11224_s1 + $0xe48] ss:$16 sps:$4 sm:$0xff]  }
 0x190   :  { %5199 = vmatprep.subr.bf16.mxu0 %v7947_v60  ;;  %5732 = vmatprep.subr.bf16.mxu1 %v7950_v61  ;;  %v8038_v60 = vld [vmem:[%s11224_s1 + $0xe64] ss:$16 sps:$4 sm:$0xff]   ;;  %v8041_v61 = vld [vmem:[%s11224_s1 + $0xe6c] ss:$16 sps:$4 sm:$0xff]  }
 0x193   :  { %5200 = vmatpush1.bf16.msra.mxu0 %v7945_v62  ;;  %5733 = vmatpush1.bf16.msra.mxu1 %v7948_v63  ;;  %v8036_v62 = vld [vmem:[%s11224_s1 + $0xe60] ss:$16 sps:$4 sm:$0xff]   ;;  %v8039_v63 = vld [vmem:[%s11224_s1 + $0xe68] ss:$16 sps:$4 sm:$0xff]  }
 0x194   :  { %5201 = vmatprep.subr.bf16.mxu0 %v7953_v0  ;;  %5734 = vmatprep.subr.bf16.mxu1 %v7956_v1  ;;  %v8044_v0 = vld [vmem:[%s11224_s1 + $0xe84] ss:$16 sps:$4 sm:$0xff]   ;;  %v8047_v1 = vld [vmem:[%s11224_s1 + $0xe8c] ss:$16 sps:$4 sm:$0xff]  }
 0x197   :  { %5202 = vmatpush1.bf16.msra.mxu0 %v7951_v2  ;;  %5735 = vmatpush1.bf16.msra.mxu1 %v7954_v3  ;;  %v8042_v2 = vld [vmem:[%s11224_s1 + $0xe80] ss:$16 sps:$4 sm:$0xff]   ;;  %v8045_v3 = vld [vmem:[%s11224_s1 + $0xe88] ss:$16 sps:$4 sm:$0xff]  }
 0x198   :  { %5203 = vmatprep.subr.bf16.mxu0 %v7959_v4  ;;  %5736 = vmatprep.subr.bf16.mxu1 %v7962_v5  ;;  %v8050_v4 = vld [vmem:[%s11224_s1 + $0xea4] ss:$16 sps:$4 sm:$0xff]   ;;  %v8053_v5 = vld [vmem:[%s11224_s1 + $0xeac] ss:$16 sps:$4 sm:$0xff]  }
 0x19b   :  { %5204 = vmatpush1.bf16.msra.mxu0 %v7957_v6  ;;  %5737 = vmatpush1.bf16.msra.mxu1 %v7960_v7  ;;  %v8048_v6 = vld [vmem:[%s11224_s1 + $0xea0] ss:$16 sps:$4 sm:$0xff]   ;;  %v8051_v7 = vld [vmem:[%s11224_s1 + $0xea8] ss:$16 sps:$4 sm:$0xff]  }
 0x19c   :  { %5205 = vmatprep.subr.bf16.mxu0 %v7965_v8  ;;  %5738 = vmatprep.subr.bf16.mxu1 %v7968_v9  ;;  %v8056_v8 = vld [vmem:[%s11224_s1 + $0xec4] ss:$16 sps:$4 sm:$0xff]   ;;  %v8059_v9 = vld [vmem:[%s11224_s1 + $0xecc] ss:$16 sps:$4 sm:$0xff]  }
 0x19f   :  { %5206 = vmatpush1.bf16.msra.mxu0 %v7963_v10  ;;  %5739 = vmatpush1.bf16.msra.mxu1 %v7966_v11  ;;  %v8054_v10 = vld [vmem:[%s11224_s1 + $0xec0] ss:$16 sps:$4 sm:$0xff]   ;;  %v8057_v11 = vld [vmem:[%s11224_s1 + $0xec8] ss:$16 sps:$4 sm:$0xff]  }
 0x1a0   :  { %5207 = vmatprep.subr.bf16.mxu0 %v7971_v12  ;;  %5740 = vmatprep.subr.bf16.mxu1 %v7974_v52  ;;  %v8062_v12 = vld [vmem:[%s11224_s1 + $0xee4] ss:$16 sps:$4 sm:$0xff]   ;;  %v8065_v52 = vld [vmem:[%s11224_s1 + $0xeec] ss:$16 sps:$4 sm:$0xff]  }
 0x1a3   :  { %5208 = vmatpush1.bf16.msra.mxu0 %v7969_v15  ;;  %5741 = vmatpush1.bf16.msra.mxu1 %v7972_v16  ;;  %v8060_v15 = vld [vmem:[%s11224_s1 + $0xee0] ss:$16 sps:$4 sm:$0xff]   ;;  %v8063_v16 = vld [vmem:[%s11224_s1 + $0xee8] ss:$16 sps:$4 sm:$0xff]  }
 0x1a4   :  { %5209 = vmatprep.subr.bf16.mxu0 %v7977_v17  ;;  %5742 = vmatprep.subr.bf16.mxu1 %v7980_v18  ;;  %v8068_v17 = vld [vmem:[%s11224_s1 + $0xf04] ss:$16 sps:$4 sm:$0xff]   ;;  %v8071_v18 = vld [vmem:[%s11224_s1 + $0xf0c] ss:$16 sps:$4 sm:$0xff]  }
 0x1a7   :  { %5210 = vmatpush1.bf16.msra.mxu0 %v7975_v19  ;;  %5743 = vmatpush1.bf16.msra.mxu1 %v7978_v20  ;;  %v8066_v19 = vld [vmem:[%s11224_s1 + $0xf00] ss:$16 sps:$4 sm:$0xff]   ;;  %v8069_v20 = vld [vmem:[%s11224_s1 + $0xf08] ss:$16 sps:$4 sm:$0xff]  }
 0x1a8   :  { %5211 = vmatprep.subr.bf16.mxu0 %v7983_v22  ;;  %5744 = vmatprep.subr.bf16.mxu1 %v7986_v23  ;;  %v8074_v22 = vld [vmem:[%s11224_s1 + $0xf24] ss:$16 sps:$4 sm:$0xff]   ;;  %v8077_v23 = vld [vmem:[%s11224_s1 + $0xf2c] ss:$16 sps:$4 sm:$0xff]  }
 0x1ab   :  { %5212 = vmatpush1.bf16.msra.mxu0 %v7981_v24  ;;  %5745 = vmatpush1.bf16.msra.mxu1 %v7984_v13  ;;  %v8072_v24 = vld [vmem:[%s11224_s1 + $0xf20] ss:$16 sps:$4 sm:$0xff]   ;;  %v8075_v13 = vld [vmem:[%s11224_s1 + $0xf28] ss:$16 sps:$4 sm:$0xff]  }
 0x1ac   :  { %5213 = vmatprep.subr.bf16.mxu0 %v7989_v27  ;;  %5746 = vmatprep.subr.bf16.mxu1 %v7992_v28  ;;  %v8080_v27 = vld [vmem:[%s11224_s1 + $0xf44] ss:$16 sps:$4 sm:$0xff]   ;;  %v8083_v28 = vld [vmem:[%s11224_s1 + $0xf4c] ss:$16 sps:$4 sm:$0xff]  }
 0x1af   :  { %5214 = vmatpush1.bf16.msra.mxu0 %v7987_v29  ;;  %5747 = vmatpush1.bf16.msra.mxu1 %v7990_v14  ;;  %v8078_v29 = vld [vmem:[%s11224_s1 + $0xf40] ss:$16 sps:$4 sm:$0xff]   ;;  %v8081_v14 = vld [vmem:[%s11224_s1 + $0xf48] ss:$16 sps:$4 sm:$0xff]  }
 0x1b0   :  { %5215 = vmatprep.subr.bf16.mxu0 %v7995_v30  ;;  %5748 = vmatprep.subr.bf16.mxu1 %v7998_v31  ;;  %v8086_v30 = vld [vmem:[%s11224_s1 + $0xf64] ss:$16 sps:$4 sm:$0xff]   ;;  %v8089_v31 = vld [vmem:[%s11224_s1 + $0xf6c] ss:$16 sps:$4 sm:$0xff]  }
 0x1b3   :  { %5216 = vmatpush1.bf16.msra.mxu0 %v7993_v25  ;;  %5749 = vmatpush1.bf16.msra.mxu1 %v7996_v32 }
 0x1b4   :  { %5217 = vmatprep.subr.bf16.mxu0 %v8001_v33  ;;  %5750 = vmatprep.subr.bf16.mxu1 %v8004_v26 }
 0x1b7   :  { %5218 = vmatpush1.bf16.msra.mxu0 %v7999_v36  ;;  %5751 = vmatpush1.bf16.msra.mxu1 %v8002_v37 }
 0x1b8   :  { %5219 = vmatprep.subr.bf16.mxu0 %v8007_v21  ;;  %5752 = vmatprep.subr.bf16.mxu1 %v8010_v39 }
 0x1bb   :  { %5220 = vmatpush1.bf16.msra.mxu0 %v8005_v40  ;;  %5753 = vmatpush1.bf16.msra.mxu1 %v8008_v41 }
 0x1bc   :  { %5221 = vmatprep.subr.bf16.mxu0 %v8013_v34  ;;  %5754 = vmatprep.subr.bf16.mxu1 %v8016_v43 }
 0x1bf   :  { %5222 = vmatpush1.bf16.msra.mxu0 %v8011_v44  ;;  %5755 = vmatpush1.bf16.msra.mxu1 %v8014_v45 }
 0x1c0   :  { %5232 = vmatprep.subr.bf16.mxu0 %v8020_v46  ;;  %5765 = vmatprep.subr.bf16.mxu1 %v8023_v35 }
 0x1c2   :  { %5224 = vmatmul.mubr.bf16.vlgmr.msra.gmra.mrb[0].mxu0 %v10043_v48  ;;  %5757 = vmatmul.mubr.bf16.vlgmr.msra.gmra.mrb[0].mxu1 %v10043_v48 }
 0x1c3   :  { %5233 = vmatpush1.bf16.msra.mxu0 %v8018_v50  ;;  %5766 = vmatpush1.bf16.msra.mxu1 %v8021_v51 }
 0x1c4   :  { %5234 = vmatprep.subr.bf16.mxu0 %v8026_v53  ;;  %5767 = vmatprep.subr.bf16.mxu1 %v8029_v38 }
 0x1c5   :  { %5264 = vmatprep.mubr.bf16.mxu0 %v933_v54  ;;  %5797 = vmatprep.mubr.bf16.mxu1 %v933_v54 }
 0x1c7   :  { %5235 = vmatpush1.bf16.msra.mxu0 %v8024_v55  ;;  %5768 = vmatpush1.bf16.msra.mxu1 %v8027_v56 }
 0x1c8   :  { %5236 = vmatprep.subr.bf16.mxu0 %v8032_v47  ;;  %5769 = vmatprep.subr.bf16.mxu1 %v8035_v57 }
 0x1cb   :  { %5237 = vmatpush1.bf16.msra.mxu0 %v8030_v58  ;;  %5770 = vmatpush1.bf16.msra.mxu1 %v8033_v59 }
 0x1cc   :  { %5238 = vmatprep.subr.bf16.mxu0 %v8038_v60  ;;  %5771 = vmatprep.subr.bf16.mxu1 %v8041_v61 }
 0x1cf   :  { %5239 = vmatpush1.bf16.msra.mxu0 %v8036_v62  ;;  %5772 = vmatpush1.bf16.msra.mxu1 %v8039_v63 }
 0x1d0   :  { %5240 = vmatprep.subr.bf16.mxu0 %v8044_v0  ;;  %5773 = vmatprep.subr.bf16.mxu1 %v8047_v1 }
 0x1d3   :  { %5241 = vmatpush1.bf16.msra.mxu0 %v8042_v2  ;;  %5774 = vmatpush1.bf16.msra.mxu1 %v8045_v3 }
 0x1d4   :  { %5242 = vmatprep.subr.bf16.mxu0 %v8050_v4  ;;  %5775 = vmatprep.subr.bf16.mxu1 %v8053_v5 }
 0x1d7   :  { %5243 = vmatpush1.bf16.msra.mxu0 %v8048_v6  ;;  %5776 = vmatpush1.bf16.msra.mxu1 %v8051_v7 }
 0x1d8   :  { %5244 = vmatprep.subr.bf16.mxu0 %v8056_v8  ;;  %5777 = vmatprep.subr.bf16.mxu1 %v8059_v9 }
 0x1db   :  { %5245 = vmatpush1.bf16.msra.mxu0 %v8054_v10  ;;  %5778 = vmatpush1.bf16.msra.mxu1 %v8057_v11 }
 0x1dc   :  { %5246 = vmatprep.subr.bf16.mxu0 %v8062_v12  ;;  %5779 = vmatprep.subr.bf16.mxu1 %v8065_v52 }
 0x1df   :  { %5247 = vmatpush1.bf16.msra.mxu0 %v8060_v15  ;;  %5780 = vmatpush1.bf16.msra.mxu1 %v8063_v16 }
 0x1e0   :  { %5248 = vmatprep.subr.bf16.mxu0 %v8068_v17  ;;  %5781 = vmatprep.subr.bf16.mxu1 %v8071_v18 }
 0x1e3   :  { %5249 = vmatpush1.bf16.msra.mxu0 %v8066_v19  ;;  %5782 = vmatpush1.bf16.msra.mxu1 %v8069_v20 }
 0x1e4   :  { %5250 = vmatprep.subr.bf16.mxu0 %v8074_v22  ;;  %5783 = vmatprep.subr.bf16.mxu1 %v8077_v23 }
 0x1e7   :  { %5251 = vmatpush1.bf16.msra.mxu0 %v8072_v24  ;;  %5784 = vmatpush1.bf16.msra.mxu1 %v8075_v13 }
 0x1e8   :  { %5252 = vmatprep.subr.bf16.mxu0 %v8080_v27  ;;  %5785 = vmatprep.subr.bf16.mxu1 %v8083_v28 }
 0x1e9   :  { %10 = vsyncpa [#allocation3], 0  ;;  %v8084_v25 = vld [vmem:[%s11224_s1 + $0xf60] ss:$16 sps:$4 sm:$0xff]   ;;  %v8087_v32 = vld [vmem:[%s11224_s1 + $0xf68] ss:$16 sps:$4 sm:$0xff]   ;;  %v931_v47 = vcombine.high %v10043_v48, %v10043_v48 }
 0x1ea   :  { %v8092_v33 = vld [vmem:[%s11224_s1 + $0xf84] ss:$16 sps:$4 sm:$0xff]   ;;  %v8095_v26 = vld [vmem:[%s11224_s1 + $0xf8c] ss:$16 sps:$4 sm:$0xff]   ;;  %v8090_v36 = vld [vmem:[%s11224_s1 + $0xf80] ss:$16 sps:$4 sm:$0xff]  }
 0x1eb   :  { %5253 = vmatpush1.bf16.msra.mxu0 %v8078_v29  ;;  %5786 = vmatpush1.bf16.msra.mxu1 %v8081_v14  ;;  %v8093_v37 = vld [vmem:[%s11224_s1 + $0xf88] ss:$16 sps:$4 sm:$0xff]   ;;  %v8098_v21 = vld [vmem:[%s11224_s1 + $0xfa4] ss:$16 sps:$4 sm:$0xff]   ;;  %v8101_v39 = vld [vmem:[%s11224_s1 + $0xfac] ss:$16 sps:$4 sm:$0xff]  }
 0x1ec   :  { %5254 = vmatprep.subr.bf16.mxu0 %v8086_v30  ;;  %5787 = vmatprep.subr.bf16.mxu1 %v8089_v31  ;;  %v8096_v40 = vld [vmem:[%s11224_s1 + $0xfa0] ss:$16 sps:$4 sm:$0xff]   ;;  %v8099_v41 = vld [vmem:[%s11224_s1 + $0xfa8] ss:$16 sps:$4 sm:$0xff]   ;;  %v8104_v34 = vld [vmem:[%s11224_s1 + $0xfc4] ss:$16 sps:$4 sm:$0xff]  }
 0x1ed   :  { %v8107_v43 = vld [vmem:[%s11224_s1 + $0xfcc] ss:$16 sps:$4 sm:$0xff]   ;;  %v10220_v44 = vld [vmem:[%s11223_s0 + $0x10] sm:$0xff]  ;;  %v8105_v46 = vld [vmem:[%s11224_s1 + $0xfc8] ss:$16 sps:$4 sm:$0xff]   ;;  %vm4941_vm0 = vcmask 523264  }
 0x1ee   :  { %v8102_v45 = vld [vmem:[%s11224_s1 + $0xfc0] ss:$16 sps:$4 sm:$0xff]   ;;  %v8110_v35 = vld [vmem:[%s11224_s1 + $0xfe4] ss:$16 sps:$4 sm:$0xff]   ;;  %v8113_v50 = vld [vmem:[%s11224_s1 + $0xfec] ss:$16 sps:$4 sm:$0xff]   ;;  %v10236_v51 = vrot.slane %v10220_v44, %v8749_v49 }
 0x1ef   :  { %5255 = vmatpush1.bf16.msra.mxu0 %v8084_v25  ;;  %5788 = vmatpush1.bf16.msra.mxu1 %v8087_v32  ;;  %v8108_v53 = vld [vmem:[%s11224_s1 + $0xfe0] ss:$16 sps:$4 sm:$0xff]   ;;  %v8111_v38 = vld [vmem:[%s11224_s1 + $0xfe8] ss:$16 sps:$4 sm:$0xff]   ;;  %v8116_v54 = vld [vmem:[%s11224_s1 + $0x1004] ss:$16 sps:$4 sm:$0xff]  }
 0x1f0   :  { %5256 = vmatprep.subr.bf16.mxu0 %v8092_v33  ;;  %5789 = vmatprep.subr.bf16.mxu1 %v8095_v26  ;;  %v8119_v55 = vld [vmem:[%s11224_s1 + $0x100c] ss:$16 sps:$4 sm:$0xff]   ;;  %v949_v56 = vcombine.high %v10236_v51, %v10236_v51  ;;  %v8114_v57 = vld [vmem:[%s11224_s1 + $0x1000] ss:$16 sps:$4 sm:$0xff]   ;;  %v8117_v58 = vld [vmem:[%s11224_s1 + $0x1008] ss:$16 sps:$4 sm:$0xff]  }
 0x1f1   :  { %v8122_v59 = vld [vmem:[%s11224_s1 + $0x1024] ss:$16 sps:$4 sm:$0xff]   ;;  %v8125_v48 = vld [vmem:[%s11224_s1 + $0x102c] ss:$16 sps:$4 sm:$0xff]   ;;  %v8120_v61 = vld [vmem:[%s11224_s1 + $0x1020] ss:$16 sps:$4 sm:$0xff]  }
 0x1f2   :  { %v10267_v60 = vrot.slane %v949_v56, %v8749_v49  ;;  %v8123_v62 = vld [vmem:[%s11224_s1 + $0x1028] ss:$16 sps:$4 sm:$0xff]   ;;  %v8128_v63 = vld [vmem:[%s11224_s1 + $0x1044] ss:$16 sps:$4 sm:$0xff]   ;;  %v8131_v0 = vld [vmem:[%s11224_s1 + $0x104c] ss:$16 sps:$4 sm:$0xff]  }
 0x1f3   :  { %5257 = vmatpush1.bf16.msra.mxu0 %v8090_v36  ;;  %5790 = vmatpush1.bf16.msra.mxu1 %v8093_v37  ;;  %v8126_v1 = vld [vmem:[%s11224_s1 + $0x1040] ss:$16 sps:$4 sm:$0xff]   ;;  %v8129_v2 = vld [vmem:[%s11224_s1 + $0x1048] ss:$16 sps:$4 sm:$0xff]   ;;  %v8134_v3 = vld [vmem:[%s11224_s1 + $0x1064] ss:$16 sps:$4 sm:$0xff]  }
 0x1f4   :  { %5258 = vmatprep.subr.bf16.mxu0 %v8098_v21  ;;  %5791 = vmatprep.subr.bf16.mxu1 %v8101_v39  ;;  %v8137_v4 = vld [vmem:[%s11224_s1 + $0x106c] ss:$16 sps:$4 sm:$0xff]   ;;  %v8132_v5 = vld [vmem:[%s11224_s1 + $0x1060] ss:$16 sps:$4 sm:$0xff]   ;;  %v8135_v6 = vld [vmem:[%s11224_s1 + $0x1068] ss:$16 sps:$4 sm:$0xff]  }
 0x1f5   :  { %v8140_v7 = vld [vmem:[%s11224_s1 + $0x1084] ss:$16 sps:$4 sm:$0xff]   ;;  %v8143_v8 = vld [vmem:[%s11224_s1 + $0x108c] ss:$16 sps:$4 sm:$0xff]   ;;  %v8138_v9 = vld [vmem:[%s11224_s1 + $0x1080] ss:$16 sps:$4 sm:$0xff]  }
 0x1f6   :  { %v8141_v10 = vld [vmem:[%s11224_s1 + $0x1088] ss:$16 sps:$4 sm:$0xff]   ;;  %v8146_v11 = vld [vmem:[%s11224_s1 + $0x10a4] ss:$16 sps:$4 sm:$0xff]   ;;  %v8149_v12 = vld [vmem:[%s11224_s1 + $0x10ac] ss:$16 sps:$4 sm:$0xff]  }
 0x1f7   :  { %5259 = vmatpush1.bf16.msra.mxu0 %v8096_v40  ;;  %5792 = vmatpush1.bf16.msra.mxu1 %v8099_v41  ;;  %v8144_v52 = vld [vmem:[%s11224_s1 + $0x10a0] ss:$16 sps:$4 sm:$0xff]   ;;  %v8147_v15 = vld [vmem:[%s11224_s1 + $0x10a8] ss:$16 sps:$4 sm:$0xff]   ;;  %v8152_v16 = vld [vmem:[%s11224_s1 + $0x10c4] ss:$16 sps:$4 sm:$0xff]  }
 0x1f8   :  { %5260 = vmatprep.subr.bf16.mxu0 %v8104_v34  ;;  %5793 = vmatprep.subr.bf16.mxu1 %v8107_v43  ;;  %v8155_v17 = vld [vmem:[%s11224_s1 + $0x10cc] ss:$16 sps:$4 sm:$0xff]   ;;  %v8150_v18 = vld [vmem:[%s11224_s1 + $0x10c0] ss:$16 sps:$4 sm:$0xff]   ;;  %v8153_v19 = vld [vmem:[%s11224_s1 + $0x10c8] ss:$16 sps:$4 sm:$0xff]  }
 0x1f9   :  { %v8158_v20 = vld [vmem:[%s11224_s1 + $0x10e4] ss:$16 sps:$4 sm:$0xff]   ;;  %v8161_v22 = vld [vmem:[%s11224_s1 + $0x10ec] ss:$16 sps:$4 sm:$0xff]   ;;  %v8156_v23 = vld [vmem:[%s11224_s1 + $0x10e0] ss:$16 sps:$4 sm:$0xff]  }
 0x1fa   :  { %v8159_v24 = vld [vmem:[%s11224_s1 + $0x10e8] ss:$16 sps:$4 sm:$0xff]   ;;  %v8164_v13 = vld [vmem:[%s11224_s1 + $0x1104] ss:$16 sps:$4 sm:$0xff]   ;;  %v8167_v27 = vld [vmem:[%s11224_s1 + $0x110c] ss:$16 sps:$4 sm:$0xff]  }
 0x1fb   :  { %5261 = vmatpush1.bf16.msra.mxu0 %v8102_v45  ;;  %5794 = vmatpush1.bf16.msra.mxu1 %v8105_v46  ;;  %v8162_v28 = vld [vmem:[%s11224_s1 + $0x1100] ss:$16 sps:$4 sm:$0xff]   ;;  %v8165_v29 = vld [vmem:[%s11224_s1 + $0x1108] ss:$16 sps:$4 sm:$0xff]   ;;  %v8170_v14 = vld [vmem:[%s11224_s1 + $0x1124] ss:$16 sps:$4 sm:$0xff]  }
 0x1fc   :  { %5262 = vmatprep.subr.bf16.mxu0 %v8110_v35  ;;  %5795 = vmatprep.subr.bf16.mxu1 %v8113_v50  ;;  %v8173_v30 = vld [vmem:[%s11224_s1 + $0x112c] ss:$16 sps:$4 sm:$0xff]   ;;  %v8168_v31 = vld [vmem:[%s11224_s1 + $0x1120] ss:$16 sps:$4 sm:$0xff]   ;;  %v8171_v25 = vld [vmem:[%s11224_s1 + $0x1128] ss:$16 sps:$4 sm:$0xff]  }
 0x1fd   :  { %v8176_v32 = vld [vmem:[%s11224_s1 + $0x1144] ss:$16 sps:$4 sm:$0xff]   ;;  %v8179_v33 = vld [vmem:[%s11224_s1 + $0x114c] ss:$16 sps:$4 sm:$0xff]   ;;  %v8174_v26 = vld [vmem:[%s11224_s1 + $0x1140] ss:$16 sps:$4 sm:$0xff]  }
 0x1fe   :  { %v8177_v36 = vld [vmem:[%s11224_s1 + $0x1148] ss:$16 sps:$4 sm:$0xff]   ;;  %v8182_v37 = vld [vmem:[%s11224_s1 + $0x1164] ss:$16 sps:$4 sm:$0xff]   ;;  %v8185_v21 = vld [vmem:[%s11224_s1 + $0x116c] ss:$16 sps:$4 sm:$0xff]  }
 0x1ff   :  { %5263 = vmatpush1.bf16.msra.mxu0 %v8108_v53  ;;  %5796 = vmatpush1.bf16.msra.mxu1 %v8111_v38  ;;  %v8180_v39 = vld [vmem:[%s11224_s1 + $0x1160] ss:$16 sps:$4 sm:$0xff]   ;;  %v8183_v40 = vld [vmem:[%s11224_s1 + $0x1168] ss:$16 sps:$4 sm:$0xff]   ;;  %v8188_v41 = vld [vmem:[%s11224_s1 + $0x1184] ss:$16 sps:$4 sm:$0xff]  }
 0x200   :  { %5273 = vmatprep.subr.bf16.mxu0 %v8116_v54  ;;  %5806 = vmatprep.subr.bf16.mxu1 %v8119_v55  ;;  %v8191_v34 = vld [vmem:[%s11224_s1 + $0x118c] ss:$16 sps:$4 sm:$0xff]   ;;  %v8186_v43 = vld [vmem:[%s11224_s1 + $0x1180] ss:$16 sps:$4 sm:$0xff]   ;;  %v8189_v45 = vld [vmem:[%s11224_s1 + $0x1188] ss:$16 sps:$4 sm:$0xff]  }
 0x201   :  { %v8194_v46 = vld [vmem:[%s11224_s1 + $0x11a4] ss:$16 sps:$4 sm:$0xff]   ;;  %v8197_v35 = vld [vmem:[%s11224_s1 + $0x11ac] ss:$16 sps:$4 sm:$0xff]   ;;  %v8192_v50 = vld [vmem:[%s11224_s1 + $0x11a0] ss:$16 sps:$4 sm:$0xff]  }
 0x202   :  { %5265 = vmatmul.mubr.bf16.vlgmr.msra.gmra.mrb[0].mxu0 %v931_v47  ;;  %5798 = vmatmul.mubr.bf16.vlgmr.msra.gmra.mrb[0].mxu1 %v931_v47  ;;  %v8195_v53 = vld [vmem:[%s11224_s1 + $0x11a8] ss:$16 sps:$4 sm:$0xff]   ;;  %v8200_v38 = vld [vmem:[%s11224_s1 + $0x11c4] ss:$16 sps:$4 sm:$0xff]   ;;  %v8203_v54 = vld [vmem:[%s11224_s1 + $0x11cc] ss:$16 sps:$4 sm:$0xff]  }
 0x203   :  { %5274 = vmatpush1.bf16.msra.mxu0 %v8114_v57  ;;  %5807 = vmatpush1.bf16.msra.mxu1 %v8117_v58  ;;  %v8198_v55 = vld [vmem:[%s11224_s1 + $0x11c0] ss:$16 sps:$4 sm:$0xff]   ;;  %v8201_v56 = vld [vmem:[%s11224_s1 + $0x11c8] ss:$16 sps:$4 sm:$0xff]   ;;  %v8206_v47 = vld [vmem:[%s11224_s1 + $0x11e4] ss:$16 sps:$4 sm:$0xff]  }
 0x204   :  { %5275 = vmatprep.subr.bf16.mxu0 %v8122_v59  ;;  %5808 = vmatprep.subr.bf16.mxu1 %v8125_v48  ;;  %v8209_v57 = vld [vmem:[%s11224_s1 + $0x11ec] ss:$16 sps:$4 sm:$0xff]   ;;  %v8204_v58 = vld [vmem:[%s11224_s1 + $0x11e0] ss:$16 sps:$4 sm:$0xff]   ;;  %v8207_v59 = vld [vmem:[%s11224_s1 + $0x11e8] ss:$16 sps:$4 sm:$0xff]  }
 0x205   :  { %5305 = vmatprep.mubr.bf16.mxu0 %v10267_v60  ;;  %5838 = vmatprep.mubr.bf16.mxu1 %v10267_v60  ;;  %v8212_v48 = vld [vmem:[%s11224_s1 + $0x1204] ss:$16 sps:$4 sm:$0xff]   ;;  %s8583_s6 = smov [#allocation2]  }
 0x206   :  { %s6369_s7 = sshll.u32 %s8583_s6, 4  ;;  %s6370_s7 = int_to_ptr.vmem [resolvable:$true] %s6369_s7 }
 0x207   :  { %5276 = vmatpush1.bf16.msra.mxu0 %v8120_v61  ;;  %5809 = vmatpush1.bf16.msra.mxu1 %v8123_v62  ;;  %v8215_v61 = vld [vmem:[%s11224_s1 + $0x120c] ss:$16 sps:$4 sm:$0xff]   ;;  %v10453_v62 = vrot.slane %v10236_v51, %v8749_v49  ;;  %s8557_s8 = scalar_lea.vmem %s6370_s7, 32  ;;  %p8562_p1 = scmp.lt.s32.totalorder %s6370_s7, %s6370_s7 }
 0x208   :  { %5277 = vmatprep.subr.bf16.mxu0 %v8128_v63  ;;  %5810 = vmatprep.subr.bf16.mxu1 %v8131_v0  ;;  %v8210_v63 = vld [vmem:[%s11224_s1 + $0x1200] ss:$16 sps:$4 sm:$0xff]   ;;  %v8213_v0 = vld [vmem:[%s11224_s1 + $0x1208] ss:$16 sps:$4 sm:$0xff]   ;;  %v8221_v51 = vld [vmem:[%s11224_s1 + $0x122c] ss:$16 sps:$4 sm:$0xff]   ;;  %p8558_p0 = scmp.ne.s32.totalorder %s6370_s7, %s8557_s8  ;;  %p8563_p2 = scmp.lt.s32.totalorder %s8557_s8, %s8557_s8 }
 0x20a   :  { %p8564_p3 = por %p8563_p2, %p8562_p1 }
 0x20b   :  { %5278 = vmatpush1.bf16.msra.mxu0 %v8126_v1  ;;  %5811 = vmatpush1.bf16.msra.mxu1 %v8129_v2  ;;  %v8218_v1 = vld [vmem:[%s11224_s1 + $0x1224] ss:$16 sps:$4 sm:$0xff]   ;;  %v981_v2 = vcombine.high %v10267_v60, %v10267_v60 }
 0x20c   :  { %5279 = vmatprep.subr.bf16.mxu0 %v8134_v3  ;;  %5812 = vmatprep.subr.bf16.mxu1 %v8137_v4  ;;  %v8216_v3 = vld [vmem:[%s11224_s1 + $0x1220] ss:$16 sps:$4 sm:$0xff]   ;;  %v8219_v4 = vld [vmem:[%s11224_s1 + $0x1228] ss:$16 sps:$4 sm:$0xff]   ;;  %v8224_v60 = vld [vmem:[%s11224_s1 + $0x1244] ss:$16 sps:$4 sm:$0xff]   ;;  %p8565_p4 = pnand %p8564_p3, %p8558_p0 }
 0x20f   :  { %5280 = vmatpush1.bf16.msra.mxu0 %v8132_v5  ;;  %5813 = vmatpush1.bf16.msra.mxu1 %v8135_v6  ;;  %v8227_v5 = vld [vmem:[%s11224_s1 + $0x124c] ss:$16 sps:$4 sm:$0xff]   ;;  %v8222_v6 = vld [vmem:[%s11224_s1 + $0x1240] ss:$16 sps:$4 sm:$0xff]  }
 0x210   :  { %5281 = vmatprep.subr.bf16.mxu0 %v8140_v7  ;;  %5814 = vmatprep.subr.bf16.mxu1 %v8143_v8  ;;  %v8225_v7 = vld [vmem:[%s11224_s1 + $0x1248] ss:$16 sps:$4 sm:$0xff]   ;;  %v8230_v8 = vld [vmem:[%s11224_s1 + $0x1264] ss:$16 sps:$4 sm:$0xff]  }
 0x213   :  { %5282 = vmatpush1.bf16.msra.mxu0 %v8138_v9  ;;  %5815 = vmatpush1.bf16.msra.mxu1 %v8141_v10  ;;  %v8233_v9 = vld [vmem:[%s11224_s1 + $0x126c] ss:$16 sps:$4 sm:$0xff]   ;;  %v8228_v10 = vld [vmem:[%s11224_s1 + $0x1260] ss:$16 sps:$4 sm:$0xff]  }
 0x214   :  { %5283 = vmatprep.subr.bf16.mxu0 %v8146_v11  ;;  %5816 = vmatprep.subr.bf16.mxu1 %v8149_v12  ;;  %v8231_v11 = vld [vmem:[%s11224_s1 + $0x1268] ss:$16 sps:$4 sm:$0xff]   ;;  %v8236_v12 = vld [vmem:[%s11224_s1 + $0x1284] ss:$16 sps:$4 sm:$0xff]  }
 0x217   :  { %5284 = vmatpush1.bf16.msra.mxu0 %v8144_v52  ;;  %5817 = vmatpush1.bf16.msra.mxu1 %v8147_v15  ;;  %v8239_v52 = vld [vmem:[%s11224_s1 + $0x128c] ss:$16 sps:$4 sm:$0xff]   ;;  %v8234_v15 = vld [vmem:[%s11224_s1 + $0x1280] ss:$16 sps:$4 sm:$0xff]  }
 0x218   :  { %5285 = vmatprep.subr.bf16.mxu0 %v8152_v16  ;;  %5818 = vmatprep.subr.bf16.mxu1 %v8155_v17  ;;  %v8237_v16 = vld [vmem:[%s11224_s1 + $0x1288] ss:$16 sps:$4 sm:$0xff]   ;;  %v8242_v17 = vld [vmem:[%s11224_s1 + $0x12a4] ss:$16 sps:$4 sm:$0xff]  }
 0x21b   :  { %5286 = vmatpush1.bf16.msra.mxu0 %v8150_v18  ;;  %5819 = vmatpush1.bf16.msra.mxu1 %v8153_v19  ;;  %v8245_v18 = vld [vmem:[%s11224_s1 + $0x12ac] ss:$16 sps:$4 sm:$0xff]   ;;  %v8240_v19 = vld [vmem:[%s11224_s1 + $0x12a0] ss:$16 sps:$4 sm:$0xff]  }
 0x21c   :  { %5287 = vmatprep.subr.bf16.mxu0 %v8158_v20  ;;  %5820 = vmatprep.subr.bf16.mxu1 %v8161_v22  ;;  %v8243_v20 = vld [vmem:[%s11224_s1 + $0x12a8] ss:$16 sps:$4 sm:$0xff]   ;;  %v8248_v22 = vld [vmem:[%s11224_s1 + $0x12c4] ss:$16 sps:$4 sm:$0xff]  }
 0x21f   :  { %5288 = vmatpush1.bf16.msra.mxu0 %v8156_v23  ;;  %5821 = vmatpush1.bf16.msra.mxu1 %v8159_v24  ;;  %v8251_v23 = vld [vmem:[%s11224_s1 + $0x12cc] ss:$16 sps:$4 sm:$0xff]   ;;  %v8246_v24 = vld [vmem:[%s11224_s1 + $0x12c0] ss:$16 sps:$4 sm:$0xff]  }
 0x220   :  { %5289 = vmatprep.subr.bf16.mxu0 %v8164_v13  ;;  %5822 = vmatprep.subr.bf16.mxu1 %v8167_v27  ;;  %v8249_v13 = vld [vmem:[%s11224_s1 + $0x12c8] ss:$16 sps:$4 sm:$0xff]   ;;  %v8254_v27 = vld [vmem:[%s11224_s1 + $0x12e4] ss:$16 sps:$4 sm:$0xff]  }
 0x223   :  { %5290 = vmatpush1.bf16.msra.mxu0 %v8162_v28  ;;  %5823 = vmatpush1.bf16.msra.mxu1 %v8165_v29  ;;  %v8257_v28 = vld [vmem:[%s11224_s1 + $0x12ec] ss:$16 sps:$4 sm:$0xff]   ;;  %v8252_v29 = vld [vmem:[%s11224_s1 + $0x12e0] ss:$16 sps:$4 sm:$0xff]  }
 0x224   :  { %5291 = vmatprep.subr.bf16.mxu0 %v8170_v14  ;;  %5824 = vmatprep.subr.bf16.mxu1 %v8173_v30  ;;  %v8255_v14 = vld [vmem:[%s11224_s1 + $0x12e8] ss:$16 sps:$4 sm:$0xff]   ;;  %v8260_v30 = vld [vmem:[%s11224_s1 + $0x1304] ss:$16 sps:$4 sm:$0xff]  }
 0x227   :  { %5292 = vmatpush1.bf16.msra.mxu0 %v8168_v31  ;;  %5825 = vmatpush1.bf16.msra.mxu1 %v8171_v25  ;;  %v8263_v31 = vld [vmem:[%s11224_s1 + $0x130c] ss:$16 sps:$4 sm:$0xff]   ;;  %v8258_v25 = vld [vmem:[%s11224_s1 + $0x1300] ss:$16 sps:$4 sm:$0xff]  }
 0x228   :  { %5293 = vmatprep.subr.bf16.mxu0 %v8176_v32  ;;  %5826 = vmatprep.subr.bf16.mxu1 %v8179_v33  ;;  %v8261_v32 = vld [vmem:[%s11224_s1 + $0x1308] ss:$16 sps:$4 sm:$0xff]   ;;  %v8266_v33 = vld [vmem:[%s11224_s1 + $0x1324] ss:$16 sps:$4 sm:$0xff]  }
 0x22b   :  { %5294 = vmatpush1.bf16.msra.mxu0 %v8174_v26  ;;  %5827 = vmatpush1.bf16.msra.mxu1 %v8177_v36  ;;  %v8269_v26 = vld [vmem:[%s11224_s1 + $0x132c] ss:$16 sps:$4 sm:$0xff]   ;;  %v8264_v36 = vld [vmem:[%s11224_s1 + $0x1320] ss:$16 sps:$4 sm:$0xff]  }
 0x22c   :  { %5295 = vmatprep.subr.bf16.mxu0 %v8182_v37  ;;  %5828 = vmatprep.subr.bf16.mxu1 %v8185_v21  ;;  %v8267_v37 = vld [vmem:[%s11224_s1 + $0x1328] ss:$16 sps:$4 sm:$0xff]   ;;  %v8272_v21 = vld [vmem:[%s11224_s1 + $0x1344] ss:$16 sps:$4 sm:$0xff]  }
 0x22f   :  { %5296 = vmatpush1.bf16.msra.mxu0 %v8180_v39  ;;  %5829 = vmatpush1.bf16.msra.mxu1 %v8183_v40  ;;  %v8275_v39 = vld [vmem:[%s11224_s1 + $0x134c] ss:$16 sps:$4 sm:$0xff]   ;;  %v8270_v40 = vld [vmem:[%s11224_s1 + $0x1340] ss:$16 sps:$4 sm:$0xff]  }
 0x230   :  { %5297 = vmatprep.subr.bf16.mxu0 %v8188_v41  ;;  %5830 = vmatprep.subr.bf16.mxu1 %v8191_v34  ;;  %v8273_v41 = vld [vmem:[%s11224_s1 + $0x1348] ss:$16 sps:$4 sm:$0xff]   ;;  %v8278_v34 = vld [vmem:[%s11224_s1 + $0x1364] ss:$16 sps:$4 sm:$0xff]  }
 0x233   :  { %5298 = vmatpush1.bf16.msra.mxu0 %v8186_v43  ;;  %5831 = vmatpush1.bf16.msra.mxu1 %v8189_v45  ;;  %v8281_v43 = vld [vmem:[%s11224_s1 + $0x136c] ss:$16 sps:$4 sm:$0xff]   ;;  %v8276_v45 = vld [vmem:[%s11224_s1 + $0x1360] ss:$16 sps:$4 sm:$0xff]  }
 0x234   :  { %5299 = vmatprep.subr.bf16.mxu0 %v8194_v46  ;;  %5832 = vmatprep.subr.bf16.mxu1 %v8197_v35  ;;  %v8279_v46 = vld [vmem:[%s11224_s1 + $0x1368] ss:$16 sps:$4 sm:$0xff]   ;;  %v8284_v35 = vld [vmem:[%s11224_s1 + $0x1384] ss:$16 sps:$4 sm:$0xff]  }
 0x237   :  { %5300 = vmatpush1.bf16.msra.mxu0 %v8192_v50  ;;  %5833 = vmatpush1.bf16.msra.mxu1 %v8195_v53  ;;  %v8287_v50 = vld [vmem:[%s11224_s1 + $0x138c] ss:$16 sps:$4 sm:$0xff]   ;;  %v8282_v53 = vld [vmem:[%s11224_s1 + $0x1380] ss:$16 sps:$4 sm:$0xff]  }
 0x238   :  { %5301 = vmatprep.subr.bf16.mxu0 %v8200_v38  ;;  %5834 = vmatprep.subr.bf16.mxu1 %v8203_v54  ;;  %v8285_v38 = vld [vmem:[%s11224_s1 + $0x1388] ss:$16 sps:$4 sm:$0xff]   ;;  %v8290_v54 = vld [vmem:[%s11224_s1 + $0x13a4] ss:$16 sps:$4 sm:$0xff]  }
 0x23b   :  { %5302 = vmatpush1.bf16.msra.mxu0 %v8198_v55  ;;  %5835 = vmatpush1.bf16.msra.mxu1 %v8201_v56  ;;  %v8293_v55 = vld [vmem:[%s11224_s1 + $0x13ac] ss:$16 sps:$4 sm:$0xff]   ;;  %v8288_v56 = vld [vmem:[%s11224_s1 + $0x13a0] ss:$16 sps:$4 sm:$0xff]  }
 0x23c   :  { %5303 = vmatprep.subr.bf16.mxu0 %v8206_v47  ;;  %5836 = vmatprep.subr.bf16.mxu1 %v8209_v57  ;;  %v8291_v47 = vld [vmem:[%s11224_s1 + $0x13a8] ss:$16 sps:$4 sm:$0xff]   ;;  %v8296_v57 = vld [vmem:[%s11224_s1 + $0x13c4] ss:$16 sps:$4 sm:$0xff]  }
 0x23f   :  { %5304 = vmatpush1.bf16.msra.mxu0 %v8204_v58  ;;  %5837 = vmatpush1.bf16.msra.mxu1 %v8207_v59  ;;  %v8299_v58 = vld [vmem:[%s11224_s1 + $0x13cc] ss:$16 sps:$4 sm:$0xff]   ;;  %v934_v59 = vcombine.high %v10220_v44, %v10220_v44 }
 0x240   :  { %5314 = vmatprep.subr.bf16.mxu0 %v8212_v48  ;;  %5847 = vmatprep.subr.bf16.mxu1 %v8215_v61  ;;  %v8294_v48 = vld [vmem:[%s11224_s1 + $0x13c0] ss:$16 sps:$4 sm:$0xff]   ;;  %v8297_v61 = vld [vmem:[%s11224_s1 + $0x13c8] ss:$16 sps:$4 sm:$0xff]   ;;  %v8305_v44 = vld [vmem:[%s11224_s1 + $0x13ec] ss:$16 sps:$4 sm:$0xff]  }
 0x242   :  { %5306 = vmatmul.mubr.bf16.vlgmr.msra.gmra.mrb[0].mxu0 %v10453_v62  ;;  %5839 = vmatmul.mubr.bf16.vlgmr.msra.gmra.mrb[0].mxu1 %v10453_v62 }
 0x243   :  { %5315 = vmatpush1.bf16.msra.mxu0 %v8210_v63  ;;  %5848 = vmatpush1.bf16.msra.mxu1 %v8213_v0  ;;  %v8302_v63 = vld [vmem:[%s11224_s1 + $0x13e4] ss:$16 sps:$4 sm:$0xff]   ;;  %v10642_v0 = vrot.slane %v934_v59, %v8749_v49  ;;  %v8381_v59 = vld [vmem:[%s11224_s1 + $0x1588] ss:$16 sps:$4 sm:$0xff]  }
 0x244   :  { %5316 = vmatprep.subr.bf16.mxu0 %v8218_v1  ;;  %5849 = vmatprep.subr.bf16.mxu1 %v8221_v51  ;;  %v8300_v1 = vld [vmem:[%s11224_s1 + $0x13e0] ss:$16 sps:$4 sm:$0xff]   ;;  %v8303_v51 = vld [vmem:[%s11224_s1 + $0x13e8] ss:$16 sps:$4 sm:$0xff]  }
 0x245   :  { %5346 = vmatprep.mubr.bf16.mxu0 %v981_v2  ;;  %5879 = vmatprep.mubr.bf16.mxu1 %v981_v2  ;;  %v8308_v2 = vld [vmem:[%s11224_s1 + $0x1404] ss:$16 sps:$4 sm:$0xff]  }
 0x247   :  { %5317 = vmatpush1.bf16.msra.mxu0 %v8216_v3  ;;  %5850 = vmatpush1.bf16.msra.mxu1 %v8219_v4  ;;  %v8311_v3 = vld [vmem:[%s11224_s1 + $0x140c] ss:$16 sps:$4 sm:$0xff]   ;;  %v950_v4 = vcombine.high %v10642_v0, %v10642_v0 }
 0x248   :  { %5318 = vmatprep.subr.bf16.mxu0 %v8224_v60  ;;  %5851 = vmatprep.subr.bf16.mxu1 %v8227_v5  ;;  %v979_v60 = vcombine.high %v10453_v62, %v10453_v62  ;;  %v8306_v5 = vld [vmem:[%s11224_s1 + $0x1400] ss:$16 sps:$4 sm:$0xff]   ;;  %v8317_v62 = vld [vmem:[%s11224_s1 + $0x142c] ss:$16 sps:$4 sm:$0xff]  }
 0x24b   :  { %5319 = vmatpush1.bf16.msra.mxu0 %v8222_v6  ;;  %5852 = vmatpush1.bf16.msra.mxu1 %v8225_v7  ;;  %v8309_v6 = vld [vmem:[%s11224_s1 + $0x1408] ss:$16 sps:$4 sm:$0xff]   ;;  %v8314_v7 = vld [vmem:[%s11224_s1 + $0x1424] ss:$16 sps:$4 sm:$0xff]  }
 0x24c   :  { %5320 = vmatprep.subr.bf16.mxu0 %v8230_v8  ;;  %5853 = vmatprep.subr.bf16.mxu1 %v8233_v9  ;;  %v10673_v8 = vrot.slane %v950_v4, %v8749_v49  ;;  %v8312_v9 = vld [vmem:[%s11224_s1 + $0x1420] ss:$16 sps:$4 sm:$0xff]   ;;  %v8398_v4 = vld [vmem:[%s11224_s1 + $0x15e4] ss:$16 sps:$4 sm:$0xff]  }
 0x24f   :  { %5321 = vmatpush1.bf16.msra.mxu0 %v8228_v10  ;;  %5854 = vmatpush1.bf16.msra.mxu1 %v8231_v11  ;;  %v8315_v10 = vld [vmem:[%s11224_s1 + $0x1428] ss:$16 sps:$4 sm:$0xff]   ;;  %v8320_v11 = vld [vmem:[%s11224_s1 + $0x1444] ss:$16 sps:$4 sm:$0xff]  }
 0x250   :  { %5322 = vmatprep.subr.bf16.mxu0 %v8236_v12  ;;  %5855 = vmatprep.subr.bf16.mxu1 %v8239_v52  ;;  %v8323_v12 = vld [vmem:[%s11224_s1 + $0x144c] ss:$16 sps:$4 sm:$0xff]   ;;  %v8318_v52 = vld [vmem:[%s11224_s1 + $0x1440] ss:$16 sps:$4 sm:$0xff]  }
 0x253   :  { %5323 = vmatpush1.bf16.msra.mxu0 %v8234_v15  ;;  %5856 = vmatpush1.bf16.msra.mxu1 %v8237_v16  ;;  %v8321_v15 = vld [vmem:[%s11224_s1 + $0x1448] ss:$16 sps:$4 sm:$0xff]   ;;  %v8326_v16 = vld [vmem:[%s11224_s1 + $0x1464] ss:$16 sps:$4 sm:$0xff]  }
 0x254   :  { %5324 = vmatprep.subr.bf16.mxu0 %v8242_v17  ;;  %5857 = vmatprep.subr.bf16.mxu1 %v8245_v18  ;;  %v8329_v17 = vld [vmem:[%s11224_s1 + $0x146c] ss:$16 sps:$4 sm:$0xff]   ;;  %v8324_v18 = vld [vmem:[%s11224_s1 + $0x1460] ss:$16 sps:$4 sm:$0xff]  }
 0x257   :  { %5325 = vmatpush1.bf16.msra.mxu0 %v8240_v19  ;;  %5858 = vmatpush1.bf16.msra.mxu1 %v8243_v20  ;;  %v8327_v19 = vld [vmem:[%s11224_s1 + $0x1468] ss:$16 sps:$4 sm:$0xff]   ;;  %v8332_v20 = vld [vmem:[%s11224_s1 + $0x1484] ss:$16 sps:$4 sm:$0xff]  }
 0x258   :  { %5326 = vmatprep.subr.bf16.mxu0 %v8248_v22  ;;  %5859 = vmatprep.subr.bf16.mxu1 %v8251_v23  ;;  %v8335_v22 = vld [vmem:[%s11224_s1 + $0x148c] ss:$16 sps:$4 sm:$0xff]   ;;  %v8330_v23 = vld [vmem:[%s11224_s1 + $0x1480] ss:$16 sps:$4 sm:$0xff]  }
 0x25b   :  { %5327 = vmatpush1.bf16.msra.mxu0 %v8246_v24  ;;  %5860 = vmatpush1.bf16.msra.mxu1 %v8249_v13  ;;  %v8333_v24 = vld [vmem:[%s11224_s1 + $0x1488] ss:$16 sps:$4 sm:$0xff]   ;;  %v8338_v13 = vld [vmem:[%s11224_s1 + $0x14a4] ss:$16 sps:$4 sm:$0xff]  }
 0x25c   :  { %5328 = vmatprep.subr.bf16.mxu0 %v8254_v27  ;;  %5861 = vmatprep.subr.bf16.mxu1 %v8257_v28  ;;  %v8341_v27 = vld [vmem:[%s11224_s1 + $0x14ac] ss:$16 sps:$4 sm:$0xff]   ;;  %v8336_v28 = vld [vmem:[%s11224_s1 + $0x14a0] ss:$16 sps:$4 sm:$0xff]  }
 0x25f   :  { %5329 = vmatpush1.bf16.msra.mxu0 %v8252_v29  ;;  %5862 = vmatpush1.bf16.msra.mxu1 %v8255_v14  ;;  %v8339_v29 = vld [vmem:[%s11224_s1 + $0x14a8] ss:$16 sps:$4 sm:$0xff]   ;;  %v8344_v14 = vld [vmem:[%s11224_s1 + $0x14c4] ss:$16 sps:$4 sm:$0xff]  }
 0x260   :  { %5330 = vmatprep.subr.bf16.mxu0 %v8260_v30  ;;  %5863 = vmatprep.subr.bf16.mxu1 %v8263_v31  ;;  %v8347_v30 = vld [vmem:[%s11224_s1 + $0x14cc] ss:$16 sps:$4 sm:$0xff]   ;;  %v8342_v31 = vld [vmem:[%s11224_s1 + $0x14c0] ss:$16 sps:$4 sm:$0xff]  }
 0x263   :  { %5331 = vmatpush1.bf16.msra.mxu0 %v8258_v25  ;;  %5864 = vmatpush1.bf16.msra.mxu1 %v8261_v32  ;;  %v8345_v25 = vld [vmem:[%s11224_s1 + $0x14c8] ss:$16 sps:$4 sm:$0xff]   ;;  %v8350_v32 = vld [vmem:[%s11224_s1 + $0x14e4] ss:$16 sps:$4 sm:$0xff]  }
 0x264   :  { %5332 = vmatprep.subr.bf16.mxu0 %v8266_v33  ;;  %5865 = vmatprep.subr.bf16.mxu1 %v8269_v26  ;;  %v8353_v33 = vld [vmem:[%s11224_s1 + $0x14ec] ss:$16 sps:$4 sm:$0xff]   ;;  %v8348_v26 = vld [vmem:[%s11224_s1 + $0x14e0] ss:$16 sps:$4 sm:$0xff]  }
 0x267   :  { %5333 = vmatpush1.bf16.msra.mxu0 %v8264_v36  ;;  %5866 = vmatpush1.bf16.msra.mxu1 %v8267_v37  ;;  %v8351_v36 = vld [vmem:[%s11224_s1 + $0x14e8] ss:$16 sps:$4 sm:$0xff]   ;;  %v8356_v37 = vld [vmem:[%s11224_s1 + $0x1504] ss:$16 sps:$4 sm:$0xff]  }
 0x268   :  { %5334 = vmatprep.subr.bf16.mxu0 %v8272_v21  ;;  %5867 = vmatprep.subr.bf16.mxu1 %v8275_v39  ;;  %v8359_v21 = vld [vmem:[%s11224_s1 + $0x150c] ss:$16 sps:$4 sm:$0xff]   ;;  %v8354_v39 = vld [vmem:[%s11224_s1 + $0x1500] ss:$16 sps:$4 sm:$0xff]  }
 0x26b   :  { %5335 = vmatpush1.bf16.msra.mxu0 %v8270_v40  ;;  %5868 = vmatpush1.bf16.msra.mxu1 %v8273_v41  ;;  %v8357_v40 = vld [vmem:[%s11224_s1 + $0x1508] ss:$16 sps:$4 sm:$0xff]   ;;  %v8362_v41 = vld [vmem:[%s11224_s1 + $0x1524] ss:$16 sps:$4 sm:$0xff]  }
 0x26c   :  { %5336 = vmatprep.subr.bf16.mxu0 %v8278_v34  ;;  %5869 = vmatprep.subr.bf16.mxu1 %v8281_v43  ;;  %v8365_v34 = vld [vmem:[%s11224_s1 + $0x152c] ss:$16 sps:$4 sm:$0xff]   ;;  %v8360_v43 = vld [vmem:[%s11224_s1 + $0x1520] ss:$16 sps:$4 sm:$0xff]  }
 0x26f   :  { %5337 = vmatpush1.bf16.msra.mxu0 %v8276_v45  ;;  %5870 = vmatpush1.bf16.msra.mxu1 %v8279_v46  ;;  %v8363_v45 = vld [vmem:[%s11224_s1 + $0x1528] ss:$16 sps:$4 sm:$0xff]   ;;  %v8368_v46 = vld [vmem:[%s11224_s1 + $0x1544] ss:$16 sps:$4 sm:$0xff]  }
 0x270   :  { %5338 = vmatprep.subr.bf16.mxu0 %v8284_v35  ;;  %5871 = vmatprep.subr.bf16.mxu1 %v8287_v50  ;;  %v8371_v35 = vld [vmem:[%s11224_s1 + $0x154c] ss:$16 sps:$4 sm:$0xff]   ;;  %v8366_v50 = vld [vmem:[%s11224_s1 + $0x1540] ss:$16 sps:$4 sm:$0xff]  }
 0x273   :  { %5339 = vmatpush1.bf16.msra.mxu0 %v8282_v53  ;;  %5872 = vmatpush1.bf16.msra.mxu1 %v8285_v38  ;;  %v8369_v53 = vld [vmem:[%s11224_s1 + $0x1548] ss:$16 sps:$4 sm:$0xff]   ;;  %v8374_v38 = vld [vmem:[%s11224_s1 + $0x1564] ss:$16 sps:$4 sm:$0xff]  }
 0x274   :  { %5340 = vmatprep.subr.bf16.mxu0 %v8290_v54  ;;  %5873 = vmatprep.subr.bf16.mxu1 %v8293_v55  ;;  %v8377_v54 = vld [vmem:[%s11224_s1 + $0x156c] ss:$16 sps:$4 sm:$0xff]   ;;  %v8372_v55 = vld [vmem:[%s11224_s1 + $0x1560] ss:$16 sps:$4 sm:$0xff]  }
 0x277   :  { %5341 = vmatpush1.bf16.msra.mxu0 %v8288_v56  ;;  %5874 = vmatpush1.bf16.msra.mxu1 %v8291_v47  ;;  %v8375_v56 = vld [vmem:[%s11224_s1 + $0x1568] ss:$16 sps:$4 sm:$0xff]   ;;  %v8380_v47 = vld [vmem:[%s11224_s1 + $0x1584] ss:$16 sps:$4 sm:$0xff]  }
 0x278   :  { %5342 = vmatprep.subr.bf16.mxu0 %v8296_v57  ;;  %5875 = vmatprep.subr.bf16.mxu1 %v8299_v58  ;;  %v8383_v57 = vld [vmem:[%s11224_s1 + $0x158c] ss:$16 sps:$4 sm:$0xff]   ;;  %v8378_v58 = vld [vmem:[%s11224_s1 + $0x1580] ss:$16 sps:$4 sm:$0xff]  }
 0x27b   :  { %5343 = vmatpush1.bf16.msra.mxu0 %v8294_v48  ;;  %5876 = vmatpush1.bf16.msra.mxu1 %v8297_v61  ;;  %v8386_v48 = vld [vmem:[%s11224_s1 + $0x15a4] ss:$16 sps:$4 sm:$0xff]   ;;  %v8389_v61 = vld [vmem:[%s11224_s1 + $0x15ac] ss:$16 sps:$4 sm:$0xff]  }
 0x27c   :  { %5344 = vmatprep.subr.bf16.mxu0 %v8302_v63  ;;  %5877 = vmatprep.subr.bf16.mxu1 %v8305_v44  ;;  %v8384_v63 = vld [vmem:[%s11224_s1 + $0x15a0] ss:$16 sps:$4 sm:$0xff]   ;;  %v8387_v44 = vld [vmem:[%s11224_s1 + $0x15a8] ss:$16 sps:$4 sm:$0xff]  }
 0x27f   :  { %5345 = vmatpush1.bf16.msra.mxu0 %v8300_v1  ;;  %5878 = vmatpush1.bf16.msra.mxu1 %v8303_v51  ;;  %v8392_v1 = vld [vmem:[%s11224_s1 + $0x15c4] ss:$16 sps:$4 sm:$0xff]   ;;  %v8395_v51 = vld [vmem:[%s11224_s1 + $0x15cc] ss:$16 sps:$4 sm:$0xff]  }
 0x280   :  { %5355 = vmatprep.subr.bf16.mxu0 %v8308_v2  ;;  %5888 = vmatprep.subr.bf16.mxu1 %v8311_v3  ;;  %v8390_v2 = vld [vmem:[%s11224_s1 + $0x15c0] ss:$16 sps:$4 sm:$0xff]   ;;  %v8393_v3 = vld [vmem:[%s11224_s1 + $0x15c8] ss:$16 sps:$4 sm:$0xff]  }
 0x282   :  { %5347 = vmatmul.mubr.bf16.vlgmr.msra.gmra.mrb[0].mxu0 %v979_v60  ;;  %5880 = vmatmul.mubr.bf16.vlgmr.msra.gmra.mrb[0].mxu1 %v979_v60  ;;  %v8401_v60 = vld [vmem:[%s11224_s1 + $0x15ec] ss:$16 sps:$4 sm:$0xff]  }
 0x283   :  { %5356 = vmatpush1.bf16.msra.mxu0 %v8306_v5  ;;  %5889 = vmatpush1.bf16.msra.mxu1 %v8309_v6  ;;  %v8396_v5 = vld [vmem:[%s11224_s1 + $0x15e0] ss:$16 sps:$4 sm:$0xff]   ;;  %v8399_v6 = vld [vmem:[%s11224_s1 + $0x15e8] ss:$16 sps:$4 sm:$0xff]  }
 0x284   :  { %5357 = vmatprep.subr.bf16.mxu0 %v8314_v7  ;;  %5890 = vmatprep.subr.bf16.mxu1 %v8317_v62  ;;  %v8405_v7 = vld [vmem:[%s11224_s1 + $0x1604] ss:$16 sps:$4 sm:$0xff]   ;;  %v8408_v62 = vld [vmem:[%s11224_s1 + $0x160c] ss:$16 sps:$4 sm:$0xff]  }
 0x285   :  { %5387 = vmatprep.mubr.bf16.mxu0 %v10673_v8  ;;  %5920 = vmatprep.mubr.bf16.mxu1 %v10673_v8 }
 0x287   :  { %5358 = vmatpush1.bf16.msra.mxu0 %v8312_v9  ;;  %5891 = vmatpush1.bf16.msra.mxu1 %v8315_v10  ;;  %v10859_v9 = vrot.slane %v10642_v0, %v8749_v49  ;;  %v8403_v10 = vld [vmem:[%s11224_s1 + $0x1600] ss:$16 sps:$4 sm:$0xff]   ;;  %v8414_v0 = vld [vmem:[%s11224_s1 + $0x162c] ss:$16 sps:$4 sm:$0xff]  }
 0x288   :  { %5359 = vmatprep.subr.bf16.mxu0 %v8320_v11  ;;  %5892 = vmatprep.subr.bf16.mxu1 %v8323_v12  ;;  %v8406_v11 = vld [vmem:[%s11224_s1 + $0x1608] ss:$16 sps:$4 sm:$0xff]   ;;  %v8411_v12 = vld [vmem:[%s11224_s1 + $0x1624] ss:$16 sps:$4 sm:$0xff]  }
 0x28b   :  { %5360 = vmatpush1.bf16.msra.mxu0 %v8318_v52  ;;  %5893 = vmatpush1.bf16.msra.mxu1 %v8321_v15  ;;  %v982_v52 = vcombine.high %v10673_v8, %v10673_v8  ;;  %v8409_v15 = vld [vmem:[%s11224_s1 + $0x1620] ss:$16 sps:$4 sm:$0xff]   ;;  %v8417_v8 = vld [vmem:[%s11224_s1 + $0x1644] ss:$16 sps:$4 sm:$0xff]  }
 0x28c   :  { %5361 = vmatprep.subr.bf16.mxu0 %v8326_v16  ;;  %5894 = vmatprep.subr.bf16.mxu1 %v8329_v17  ;;  %v8412_v16 = vld [vmem:[%s11224_s1 + $0x1628] ss:$16 sps:$4 sm:$0xff]   ;;  %v8420_v17 = vld [vmem:[%s11224_s1 + $0x164c] ss:$16 sps:$4 sm:$0xff]  }
 0x28f   :  { %5362 = vmatpush1.bf16.msra.mxu0 %v8324_v18  ;;  %5895 = vmatpush1.bf16.msra.mxu1 %v8327_v19  ;;  %v8415_v18 = vld [vmem:[%s11224_s1 + $0x1640] ss:$16 sps:$4 sm:$0xff]   ;;  %v8418_v19 = vld [vmem:[%s11224_s1 + $0x1648] ss:$16 sps:$4 sm:$0xff]  }
 0x290   :  { %5363 = vmatprep.subr.bf16.mxu0 %v8332_v20  ;;  %5896 = vmatprep.subr.bf16.mxu1 %v8335_v22  ;;  %v8423_v20 = vld [vmem:[%s11224_s1 + $0x1664] ss:$16 sps:$4 sm:$0xff]   ;;  %v8426_v22 = vld [vmem:[%s11224_s1 + $0x166c] ss:$16 sps:$4 sm:$0xff]  }
 0x293   :  { %5364 = vmatpush1.bf16.msra.mxu0 %v8330_v23  ;;  %5897 = vmatpush1.bf16.msra.mxu1 %v8333_v24  ;;  %v8421_v23 = vld [vmem:[%s11224_s1 + $0x1660] ss:$16 sps:$4 sm:$0xff]   ;;  %v8424_v24 = vld [vmem:[%s11224_s1 + $0x1668] ss:$16 sps:$4 sm:$0xff]  }
 0x294   :  { %5365 = vmatprep.subr.bf16.mxu0 %v8338_v13  ;;  %5898 = vmatprep.subr.bf16.mxu1 %v8341_v27  ;;  %v8429_v13 = vld [vmem:[%s11224_s1 + $0x1684] ss:$16 sps:$4 sm:$0xff]   ;;  %v8432_v27 = vld [vmem:[%s11224_s1 + $0x168c] ss:$16 sps:$4 sm:$0xff]  }
 0x297   :  { %5366 = vmatpush1.bf16.msra.mxu0 %v8336_v28  ;;  %5899 = vmatpush1.bf16.msra.mxu1 %v8339_v29  ;;  %v8427_v28 = vld [vmem:[%s11224_s1 + $0x1680] ss:$16 sps:$4 sm:$0xff]   ;;  %v8430_v29 = vld [vmem:[%s11224_s1 + $0x1688] ss:$16 sps:$4 sm:$0xff]  }
 0x298   :  { %5367 = vmatprep.subr.bf16.mxu0 %v8344_v14  ;;  %5900 = vmatprep.subr.bf16.mxu1 %v8347_v30  ;;  %v8435_v14 = vld [vmem:[%s11224_s1 + $0x16a4] ss:$16 sps:$4 sm:$0xff]   ;;  %v8438_v30 = vld [vmem:[%s11224_s1 + $0x16ac] ss:$16 sps:$4 sm:$0xff]  }
 0x29b   :  { %5368 = vmatpush1.bf16.msra.mxu0 %v8342_v31  ;;  %5901 = vmatpush1.bf16.msra.mxu1 %v8345_v25  ;;  %v8433_v31 = vld [vmem:[%s11224_s1 + $0x16a0] ss:$16 sps:$4 sm:$0xff]   ;;  %v8436_v25 = vld [vmem:[%s11224_s1 + $0x16a8] ss:$16 sps:$4 sm:$0xff]  }
 0x29c   :  { %5369 = vmatprep.subr.bf16.mxu0 %v8350_v32  ;;  %5902 = vmatprep.subr.bf16.mxu1 %v8353_v33  ;;  %v8441_v32 = vld [vmem:[%s11224_s1 + $0x16c4] ss:$16 sps:$4 sm:$0xff]   ;;  %v8444_v33 = vld [vmem:[%s11224_s1 + $0x16cc] ss:$16 sps:$4 sm:$0xff]  }
 0x29f   :  { %5370 = vmatpush1.bf16.msra.mxu0 %v8348_v26  ;;  %5903 = vmatpush1.bf16.msra.mxu1 %v8351_v36  ;;  %v8439_v26 = vld [vmem:[%s11224_s1 + $0x16c0] ss:$16 sps:$4 sm:$0xff]   ;;  %v8442_v36 = vld [vmem:[%s11224_s1 + $0x16c8] ss:$16 sps:$4 sm:$0xff]  }
 0x2a0   :  { %5371 = vmatprep.subr.bf16.mxu0 %v8356_v37  ;;  %5904 = vmatprep.subr.bf16.mxu1 %v8359_v21  ;;  %v8447_v37 = vld [vmem:[%s11224_s1 + $0x16e4] ss:$16 sps:$4 sm:$0xff]   ;;  %v8450_v21 = vld [vmem:[%s11224_s1 + $0x16ec] ss:$16 sps:$4 sm:$0xff]  }
 0x2a3   :  { %5372 = vmatpush1.bf16.msra.mxu0 %v8354_v39  ;;  %5905 = vmatpush1.bf16.msra.mxu1 %v8357_v40  ;;  %v8445_v39 = vld [vmem:[%s11224_s1 + $0x16e0] ss:$16 sps:$4 sm:$0xff]   ;;  %v8448_v40 = vld [vmem:[%s11224_s1 + $0x16e8] ss:$16 sps:$4 sm:$0xff]  }
 0x2a4   :  { %5373 = vmatprep.subr.bf16.mxu0 %v8362_v41  ;;  %5906 = vmatprep.subr.bf16.mxu1 %v8365_v34  ;;  %v8453_v41 = vld [vmem:[%s11224_s1 + $0x1704] ss:$16 sps:$4 sm:$0xff]   ;;  %v8456_v34 = vld [vmem:[%s11224_s1 + $0x170c] ss:$16 sps:$4 sm:$0xff]  }
 0x2a7   :  { %5374 = vmatpush1.bf16.msra.mxu0 %v8360_v43  ;;  %5907 = vmatpush1.bf16.msra.mxu1 %v8363_v45  ;;  %v8451_v43 = vld [vmem:[%s11224_s1 + $0x1700] ss:$16 sps:$4 sm:$0xff]   ;;  %v8454_v45 = vld [vmem:[%s11224_s1 + $0x1708] ss:$16 sps:$4 sm:$0xff]  }
 0x2a8   :  { %5375 = vmatprep.subr.bf16.mxu0 %v8368_v46  ;;  %5908 = vmatprep.subr.bf16.mxu1 %v8371_v35  ;;  %v8459_v46 = vld [vmem:[%s11224_s1 + $0x1724] ss:$16 sps:$4 sm:$0xff]   ;;  %v8462_v35 = vld [vmem:[%s11224_s1 + $0x172c] ss:$16 sps:$4 sm:$0xff]  }
 0x2ab   :  { %5376 = vmatpush1.bf16.msra.mxu0 %v8366_v50  ;;  %5909 = vmatpush1.bf16.msra.mxu1 %v8369_v53  ;;  %v8457_v50 = vld [vmem:[%s11224_s1 + $0x1720] ss:$16 sps:$4 sm:$0xff]   ;;  %v8460_v53 = vld [vmem:[%s11224_s1 + $0x1728] ss:$16 sps:$4 sm:$0xff]  }
 0x2ac   :  { %5377 = vmatprep.subr.bf16.mxu0 %v8374_v38  ;;  %5910 = vmatprep.subr.bf16.mxu1 %v8377_v54  ;;  %v8465_v38 = vld [vmem:[%s11224_s1 + $0x1744] ss:$16 sps:$4 sm:$0xff]   ;;  %v8468_v54 = vld [vmem:[%s11224_s1 + $0x174c] ss:$16 sps:$4 sm:$0xff]  }
 0x2af   :  { %5378 = vmatpush1.bf16.msra.mxu0 %v8372_v55  ;;  %5911 = vmatpush1.bf16.msra.mxu1 %v8375_v56  ;;  %v8463_v55 = vld [vmem:[%s11224_s1 + $0x1740] ss:$16 sps:$4 sm:$0xff]   ;;  %v8466_v56 = vld [vmem:[%s11224_s1 + $0x1748] ss:$16 sps:$4 sm:$0xff]  }
 0x2b0   :  { %5379 = vmatprep.subr.bf16.mxu0 %v8380_v47  ;;  %5912 = vmatprep.subr.bf16.mxu1 %v8383_v57  ;;  %v8471_v47 = vld [vmem:[%s11224_s1 + $0x1764] ss:$16 sps:$4 sm:$0xff]   ;;  %v8474_v57 = vld [vmem:[%s11224_s1 + $0x176c] ss:$16 sps:$4 sm:$0xff]  }
 0x2b3   :  { %5380 = vmatpush1.bf16.msra.mxu0 %v8378_v58  ;;  %5913 = vmatpush1.bf16.msra.mxu1 %v8381_v59  ;;  %v8469_v58 = vld [vmem:[%s11224_s1 + $0x1760] ss:$16 sps:$4 sm:$0xff]   ;;  %v8472_v59 = vld [vmem:[%s11224_s1 + $0x1768] ss:$16 sps:$4 sm:$0xff]  }
 0x2b4   :  { %5381 = vmatprep.subr.bf16.mxu0 %v8386_v48  ;;  %5914 = vmatprep.subr.bf16.mxu1 %v8389_v61  ;;  %v8477_v48 = vld [vmem:[%s11224_s1 + $0x1784] ss:$16 sps:$4 sm:$0xff]   ;;  %v8480_v61 = vld [vmem:[%s11224_s1 + $0x178c] ss:$16 sps:$4 sm:$0xff]  }
 0x2b7   :  { %5382 = vmatpush1.bf16.msra.mxu0 %v8384_v63  ;;  %5915 = vmatpush1.bf16.msra.mxu1 %v8387_v44  ;;  %v8475_v63 = vld [vmem:[%s11224_s1 + $0x1780] ss:$16 sps:$4 sm:$0xff]   ;;  %v8478_v44 = vld [vmem:[%s11224_s1 + $0x1788] ss:$16 sps:$4 sm:$0xff]  }
 0x2b8   :  { %5383 = vmatprep.subr.bf16.mxu0 %v8392_v1  ;;  %5916 = vmatprep.subr.bf16.mxu1 %v8395_v51  ;;  %v8483_v1 = vld [vmem:[%s11224_s1 + $0x17a4] ss:$16 sps:$4 sm:$0xff]   ;;  %v8486_v51 = vld [vmem:[%s11224_s1 + $0x17ac] ss:$16 sps:$4 sm:$0xff]  }
 0x2bb   :  { %5384 = vmatpush1.bf16.msra.mxu0 %v8390_v2  ;;  %5917 = vmatpush1.bf16.msra.mxu1 %v8393_v3  ;;  %v8481_v2 = vld [vmem:[%s11224_s1 + $0x17a0] ss:$16 sps:$4 sm:$0xff]   ;;  %v8484_v3 = vld [vmem:[%s11224_s1 + $0x17a8] ss:$16 sps:$4 sm:$0xff]  }
 0x2bc   :  { %5385 = vmatprep.subr.bf16.mxu0 %v8398_v4  ;;  %5918 = vmatprep.subr.bf16.mxu1 %v8401_v60  ;;  %v8489_v4 = vld [vmem:[%s11224_s1 + $0x17c4] ss:$16 sps:$4 sm:$0xff]   ;;  %v8492_v60 = vld [vmem:[%s11224_s1 + $0x17cc] ss:$16 sps:$4 sm:$0xff]  }
 0x2bf   :  { %5386 = vmatpush1.bf16.msra.mxu0 %v8396_v5  ;;  %5919 = vmatpush1.bf16.msra.mxu1 %v8399_v6  ;;  %v8487_v5 = vld [vmem:[%s11224_s1 + $0x17c0] ss:$16 sps:$4 sm:$0xff]   ;;  %v8490_v6 = vld [vmem:[%s11224_s1 + $0x17c8] ss:$16 sps:$4 sm:$0xff]  }
 0x2c0   :  { %5396 = vmatprep.subr.bf16.mxu0 %v8405_v7  ;;  %5929 = vmatprep.subr.bf16.mxu1 %v8408_v62  ;;  %v8495_v7 = vld [vmem:[%s11224_s1 + $0x17e4] ss:$16 sps:$4 sm:$0xff]   ;;  %v8498_v62 = vld [vmem:[%s11224_s1 + $0x17ec] ss:$16 sps:$4 sm:$0xff]  }
 0x2c2   :  { %5388 = vmatmul.mubr.bf16.vlgmr.msra.gmra.mrb[0].mxu0 %v10859_v9  ;;  %5921 = vmatmul.mubr.bf16.vlgmr.msra.gmra.mrb[0].mxu1 %v10859_v9 }
 0x2c3   :  { %5397 = vmatpush1.bf16.msra.mxu0 %v8403_v10  ;;  %5930 = vmatpush1.bf16.msra.mxu1 %v8406_v11  ;;  %v8493_v10 = vld [vmem:[%s11224_s1 + $0x17e0] ss:$16 sps:$4 sm:$0xff]   ;;  %v8496_v11 = vld [vmem:[%s11224_s1 + $0x17e8] ss:$16 sps:$4 sm:$0xff]  }
 0x2c4   :  { %5398 = vmatprep.subr.bf16.mxu0 %v8411_v12  ;;  %5931 = vmatprep.subr.bf16.mxu1 %v8414_v0  ;;  %v8501_v12 = vld [vmem:[%s11224_s1 + $0x1804] ss:$16 sps:$4 sm:$0xff]   ;;  %v8504_v0 = vld [vmem:[%s11224_s1 + $0x180c] ss:$16 sps:$4 sm:$0xff]  }
 0x2c5   :  { %5428 = vmatprep.mubr.bf16.mxu0 %v982_v52  ;;  %5961 = vmatprep.mubr.bf16.mxu1 %v982_v52  ;;  %v980_v52 = vcombine.high %v10859_v9, %v10859_v9  ;;  %v8510_v9 = vld [vmem:[%s11224_s1 + $0x182c] ss:$16 sps:$4 sm:$0xff]  }
 0x2c7   :  { %5399 = vmatpush1.bf16.msra.mxu0 %v8409_v15  ;;  %5932 = vmatpush1.bf16.msra.mxu1 %v8412_v16  ;;  %v8499_v15 = vld [vmem:[%s11224_s1 + $0x1800] ss:$16 sps:$4 sm:$0xff]   ;;  %v8502_v16 = vld [vmem:[%s11224_s1 + $0x1808] ss:$16 sps:$4 sm:$0xff]  }
 0x2c8   :  { %5400 = vmatprep.subr.bf16.mxu0 %v8417_v8  ;;  %5933 = vmatprep.subr.bf16.mxu1 %v8420_v17  ;;  %v8507_v8 = vld [vmem:[%s11224_s1 + $0x1824] ss:$16 sps:$4 sm:$0xff]   ;;  %v8505_v17 = vld [vmem:[%s11224_s1 + $0x1820] ss:$16 sps:$4 sm:$0xff]  }
 0x2cb   :  { %5401 = vmatpush1.bf16.msra.mxu0 %v8415_v18  ;;  %5934 = vmatpush1.bf16.msra.mxu1 %v8418_v19  ;;  %v8508_v18 = vld [vmem:[%s11224_s1 + $0x1828] ss:$16 sps:$4 sm:$0xff]   ;;  %v8513_v19 = vld [vmem:[%s11224_s1 + $0x1844] ss:$16 sps:$4 sm:$0xff]  }
 0x2cc   :  { %5402 = vmatprep.subr.bf16.mxu0 %v8423_v20  ;;  %5935 = vmatprep.subr.bf16.mxu1 %v8426_v22  ;;  %v8516_v20 = vld [vmem:[%s11224_s1 + $0x184c] ss:$16 sps:$4 sm:$0xff]   ;;  %v8582_v22 = vmov 0  }
 0x2cf   :  { %5403 = vmatpush1.bf16.msra.mxu0 %v8421_v23  ;;  %5936 = vmatpush1.bf16.msra.mxu1 %v8424_v24  ;;  %v8511_v23 = vld [vmem:[%s11224_s1 + $0x1840] ss:$16 sps:$4 sm:$0xff]   ;;  %v8514_v24 = vld [vmem:[%s11224_s1 + $0x1848] ss:$16 sps:$4 sm:$0xff]  }
 0x2d0   :  { %5404 = vmatprep.subr.bf16.mxu0 %v8429_v13  ;;  %5937 = vmatprep.subr.bf16.mxu1 %v8432_v27  ;;  %v8519_v13 = vld [vmem:[%s11224_s1 + $0x1864] ss:$16 sps:$4 sm:$0xff]   ;;  %v8522_v27 = vld [vmem:[%s11224_s1 + $0x186c] ss:$16 sps:$4 sm:$0xff]  }
 0x2d3   :  { %5405 = vmatpush1.bf16.msra.mxu0 %v8427_v28  ;;  %5938 = vmatpush1.bf16.msra.mxu1 %v8430_v29  ;;  %v8517_v28 = vld [vmem:[%s11224_s1 + $0x1860] ss:$16 sps:$4 sm:$0xff]   ;;  %v8520_v29 = vld [vmem:[%s11224_s1 + $0x1868] ss:$16 sps:$4 sm:$0xff]  }
 0x2d4   :  { %5406 = vmatprep.subr.bf16.mxu0 %v8435_v14  ;;  %5939 = vmatprep.subr.bf16.mxu1 %v8438_v30  ;;  %v6377_v14 = vld.sshfl [vmem:[%s11223_s0 + $0x18] sm:$0x1 pattern:$0x75316420]  ;;  %v8523_v30 = vld [vmem:[%s11226_s3 + $0x40] sm:$0xff]  }
 0x2d7   :  { %5407 = vmatpush1.bf16.msra.mxu0 %v8433_v31  ;;  %5940 = vmatpush1.bf16.msra.mxu1 %v8436_v25  ;;  %v8524_v31 = vld [vmem:[%s11226_s3 + $0xc0] sm:$0xff]   ;;  %v996_v25 = vrot.slane %v6377_v14, %v8749_v49  ;;  %v8528_v49 = vld [vmem:[%s11226_s3 + $0xc8] sm:$0xff]  }
 0x2d8   :  { %5408 = vmatprep.subr.bf16.mxu0 %v8441_v32  ;;  %5941 = vmatprep.subr.bf16.mxu1 %v8444_v33  ;;  %v8525_v32 = vld [vmem:[%s11226_s3] sm:$0xff]  }
 0x2d9   :  { %v8526_v33 = vld [vmem:[%s11226_s3 + $0x80] sm:$0xff]  }
 0x2db   :  { %5409 = vmatpush1.bf16.msra.mxu0 %v8439_v26  ;;  %5942 = vmatpush1.bf16.msra.mxu1 %v8442_v36  ;;  %v8527_v26 = vld [vmem:[%s11226_s3 + $0x48] sm:$0xff]  }
 0x2dc   :  { %5410 = vmatprep.subr.bf16.mxu0 %v8447_v37  ;;  %5943 = vmatprep.subr.bf16.mxu1 %v8450_v21  ;;  %v8529_v36 = vld [vmem:[%s11226_s3 + $0x8] sm:$0xff]   ;;  %v8531_v21 = vld [vmem:[%s11226_s3 + $0x50] sm:$0xff]  }
 0x2dd   :  { %v8530_v37 = vld [vmem:[%s11226_s3 + $0x88] sm:$0xff]  }
 0x2df   :  { %5411 = vmatpush1.bf16.msra.mxu0 %v8445_v39  ;;  %5944 = vmatpush1.bf16.msra.mxu1 %v8448_v40  ;;  %v8532_v39 = vld [vmem:[%s11226_s3 + $0xd0] sm:$0xff]  }
 0x2e0   :  { %5412 = vmatprep.subr.bf16.mxu0 %v8453_v41  ;;  %5945 = vmatprep.subr.bf16.mxu1 %v8456_v34  ;;  %v8533_v40 = vld [vmem:[%s11226_s3 + $0x10] sm:$0xff]   ;;  %v8535_v34 = vld [vmem:[%s11226_s3 + $0x58] sm:$0xff]  }
 0x2e1   :  { %v8534_v41 = vld [vmem:[%s11226_s3 + $0x90] sm:$0xff]  }
 0x2e3   :  { %5413 = vmatpush1.bf16.msra.mxu0 %v8451_v43  ;;  %5946 = vmatpush1.bf16.msra.mxu1 %v8454_v45  ;;  %v8536_v43 = vld [vmem:[%s11226_s3 + $0xd8] sm:$0xff]  }
 0x2e4   :  { %5414 = vmatprep.subr.bf16.mxu0 %v8459_v46  ;;  %5947 = vmatprep.subr.bf16.mxu1 %v8462_v35  ;;  %v8537_v45 = vld [vmem:[%s11226_s3 + $0x18] sm:$0xff]   ;;  %v8539_v35 = vld [vmem:[%s11226_s3 + $0x60] sm:$0xff]  }
 0x2e5   :  { %v8538_v46 = vld [vmem:[%s11226_s3 + $0x98] sm:$0xff]  }
 0x2e7   :  { %5415 = vmatpush1.bf16.msra.mxu0 %v8457_v50  ;;  %5948 = vmatpush1.bf16.msra.mxu1 %v8460_v53  ;;  %v8540_v50 = vld [vmem:[%s11226_s3 + $0xe0] sm:$0xff]  }
 0x2e8   :  { %5416 = vmatprep.subr.bf16.mxu0 %v8465_v38  ;;  %5949 = vmatprep.subr.bf16.mxu1 %v8468_v54  ;;  %v8541_v53 = vld [vmem:[%s11226_s3 + $0x20] sm:$0xff]   ;;  %v8543_v54 = vld [vmem:[%s11226_s3 + $0x68] sm:$0xff]  }
 0x2e9   :  { %v8542_v38 = vld [vmem:[%s11226_s3 + $0xa0] sm:$0xff]  }
 0x2eb   :  { %5417 = vmatpush1.bf16.msra.mxu0 %v8463_v55  ;;  %5950 = vmatpush1.bf16.msra.mxu1 %v8466_v56  ;;  %v8544_v55 = vld [vmem:[%s11226_s3 + $0xe8] sm:$0xff]  }
 0x2ec   :  { %5418 = vmatprep.subr.bf16.mxu0 %v8471_v47  ;;  %5951 = vmatprep.subr.bf16.mxu1 %v8474_v57  ;;  %v8545_v56 = vld [vmem:[%s11226_s3 + $0x28] sm:$0xff]   ;;  %v8547_v57 = vld [vmem:[%s11226_s3 + $0x70] sm:$0xff]  }
 0x2ed   :  { %v8546_v47 = vld [vmem:[%s11226_s3 + $0xa8] sm:$0xff]  }
 0x2ef   :  { %5419 = vmatpush1.bf16.msra.mxu0 %v8469_v58  ;;  %5952 = vmatpush1.bf16.msra.mxu1 %v8472_v59  ;;  %v8548_v58 = vld [vmem:[%s11226_s3 + $0xf0] sm:$0xff]  }
 0x2f0   :  { %5420 = vmatprep.subr.bf16.mxu0 %v8477_v48  ;;  %5953 = vmatprep.subr.bf16.mxu1 %v8480_v61  ;;  %v8549_v59 = vld [vmem:[%s11226_s3 + $0x30] sm:$0xff]   ;;  %v8551_v61 = vld [vmem:[%s11226_s3 + $0x78] sm:$0xff]  }
 0x2f1   :  { %v8550_v48 = vld [vmem:[%s11226_s3 + $0xb0] sm:$0xff]  }
 0x2f3   :  { %5421 = vmatpush1.bf16.msra.mxu0 %v8475_v63  ;;  %5954 = vmatpush1.bf16.msra.mxu1 %v8478_v44  ;;  %v8552_v63 = vld [vmem:[%s11226_s3 + $0xf8] sm:$0xff]  }
 0x2f4   :  { %5422 = vmatprep.subr.bf16.mxu0 %v8483_v1  ;;  %5955 = vmatprep.subr.bf16.mxu1 %v8486_v51  ;;  %v8553_v44 = vld [vmem:[%s11226_s3 + $0x38] sm:$0xff]   ;;  %v814_v51 = vsub.s32 0, %v8731_v42 }
 0x2f5   :  { %v8554_v1 = vld [vmem:[%s11226_s3 + $0xb8] sm:$0xff]  }
 0x2f7   :  { %5423 = vmatpush1.bf16.msra.mxu0 %v8481_v2  ;;  %5956 = vmatpush1.bf16.msra.mxu1 %v8484_v3  ;;  %v822_v2 = vsub.s32 2, %v8731_v42  ;;  %v810_v3 = vld [vmem:[%s11225_s2] sm:$0xf] }
 0x2f8   :  { %5424 = vmatprep.subr.bf16.mxu0 %v8489_v4  ;;  %5957 = vmatprep.subr.bf16.mxu1 %v8492_v60  ;;  %v818_v4 = vsub.s32 1, %v8731_v42  ;;  %v826_v60 = vsub.s32 3, %v8731_v42 }
 0x2fb   :  { %5425 = vmatpush1.bf16.msra.mxu0 %v8487_v5  ;;  %5958 = vmatpush1.bf16.msra.mxu1 %v8490_v6  ;;  %v815_v5 = vrot.slane %v810_v3, %v814_v51  ;;  %v823_v6 = vrot.slane %v810_v3, %v822_v2 }
 0x2fc   :  { %5426 = vmatprep.subr.bf16.mxu0 %v8495_v7  ;;  %5959 = vmatprep.subr.bf16.mxu1 %v8498_v62  ;;  %v819_v7 = vrot.slane %v810_v3, %v818_v4  ;;  %v827_v62 = vrot.slane %v810_v3, %v826_v60 }
 0x2ff   :  { %5427 = vmatpush1.bf16.msra.mxu0 %v8493_v10  ;;  %5960 = vmatpush1.bf16.msra.mxu1 %v8496_v11 }
 0x300   :  { %5437 = vmatprep.subr.bf16.mxu0 %v8501_v12  ;;  %5970 = vmatprep.subr.bf16.mxu1 %v8504_v0 }
 0x302   :  { %5429 = vmatmul.mubr.bf16.vlgmr.msra.gmra.mrb[0].mxu0 %v980_v52  ;;  %5962 = vmatmul.mubr.bf16.vlgmr.msra.gmra.mrb[0].mxu1 %v980_v52 }
 0x303   :  { %5438 = vmatpush1.bf16.msra.mxu0 %v8499_v15  ;;  %5971 = vmatpush1.bf16.msra.mxu1 %v8502_v16 }
 0x304   :  { %5439 = vmatprep.subr.bf16.mxu0 %v8507_v8  ;;  %5972 = vmatprep.subr.bf16.mxu1 %v8510_v9 }
 0x305   :  { %5469 = vmatprep.mubr.bf16.mxu0 %v8582_v22  ;;  %6002 = vmatprep.mubr.bf16.mxu1 %v8582_v22 }
 0x307   :  { %5440 = vmatpush1.bf16.msra.mxu0 %v8505_v17  ;;  %5973 = vmatpush1.bf16.msra.mxu1 %v8508_v18 }
 0x308   :  { %5441 = vmatprep.subr.bf16.mxu0 %v8513_v19  ;;  %5974 = vmatprep.subr.bf16.mxu1 %v8516_v20 }
 0x30b   :  { %5442 = vmatpush1.bf16.msra.mxu0 %v8511_v23  ;;  %5975 = vmatpush1.bf16.msra.mxu1 %v8514_v24 }
 0x30c   :  { %5443 = vmatprep.subr.bf16.mxu0 %v8519_v13  ;;  %5976 = vmatprep.subr.bf16.mxu1 %v8522_v27 }
 0x30f   :  { %5444 = vmatpush1.bf16.msra.mxu0 %v8517_v28  ;;  %5977 = vmatpush1.bf16.msra.mxu1 %v8520_v29 }
 0x310   :  { %7197 = vmatprep.subr.bf16.mxu0 %v8523_v30  ;;  %7219 = vmatprep.subr.bf16.mxu1 %v8524_v31  ;;  %v7164_v30 = vld [vmem:[%s11227_s4] ss:$0 sm:$0xff] }
 0x312   :  { %7162 = vmatmul.mubr.msk.bf16.vlgmr.msra.gmra.mrb[0].mxu0 %vm4941_vm0, %v996_v25  ;;  %7163 = vmatmul.mubr.msk.bf16.vlgmr.msra.gmra.mrb[0].mxu1 %vm4941_vm0, %v996_v25 }
 0x313   :  { %7198 = vmatpush3.bf16.msra.mxu0 %v8525_v32  ;;  %7220 = vmatpush3.bf16.msra.mxu1 %v8526_v33 }
 0x314   :  { %7199 = vmatprep.subr.bf16.mxu0 %v8527_v26  ;;  %7221 = vmatprep.subr.bf16.mxu1 %v8528_v49 }
 0x317   :  { %7200 = vmatpush3.bf16.msra.mxu0 %v8529_v36  ;;  %7222 = vmatpush3.bf16.msra.mxu1 %v8530_v37 }
 0x318   :  { %7201 = vmatprep.subr.bf16.mxu0 %v8531_v21  ;;  %7223 = vmatprep.subr.bf16.mxu1 %v8532_v39 }
 0x31b   :  { %7202 = vmatpush3.bf16.msra.mxu0 %v8533_v40  ;;  %7224 = vmatpush3.bf16.msra.mxu1 %v8534_v41 }
 0x31c   :  { %7203 = vmatprep.subr.bf16.mxu0 %v8535_v34  ;;  %7225 = vmatprep.subr.bf16.mxu1 %v8536_v43 }
 0x31f   :  { %7204 = vmatpush3.bf16.msra.mxu0 %v8537_v45  ;;  %7226 = vmatpush3.bf16.msra.mxu1 %v8538_v46 }
 0x320   :  { %7205 = vmatprep.subr.bf16.mxu0 %v8539_v35  ;;  %7227 = vmatprep.subr.bf16.mxu1 %v8540_v50 }
 0x323   :  { %7206 = vmatpush3.bf16.msra.mxu0 %v8541_v53  ;;  %7228 = vmatpush3.bf16.msra.mxu1 %v8542_v38 }
 0x324   :  { %7207 = vmatprep.subr.bf16.mxu0 %v8543_v54  ;;  %7229 = vmatprep.subr.bf16.mxu1 %v8544_v55 }
 0x327   :  { %7208 = vmatpush3.bf16.msra.mxu0 %v8545_v56  ;;  %7230 = vmatpush3.bf16.msra.mxu1 %v8546_v47 }
 0x328   :  { %7209 = vmatprep.subr.bf16.mxu0 %v8547_v57  ;;  %7231 = vmatprep.subr.bf16.mxu1 %v8548_v58 }
 0x32b   :  { %7210 = vmatpush3.bf16.msra.mxu0 %v8549_v59  ;;  %7232 = vmatpush3.bf16.msra.mxu1 %v8550_v48 }
 0x32c   :  { %7211 = vmatprep.subr.bf16.mxu0 %v8551_v61  ;;  %7233 = vmatprep.subr.bf16.mxu1 %v8552_v63 }
 0x32f   :  { %7212 = vmatpush3.bf16.msra.mxu0 %v8553_v44  ;;  %7234 = vmatpush3.bf16.msra.mxu1 %v8554_v1 }
 0x3e5   :  { %v5471_v10 = vpop.f32.mrb[0].mxu0  ;;  %v6004_v11 = vpop.f32.mrb[0].mxu1 }
 0x3e6   :  { %v7241_v12 = vadd.f32 %v5471_v10, %v815_v5  ;;  %v7243_v0 = vadd.f32 %v6004_v11, %v823_v6  ;;  %v5473_v52 = vpop.f32.mrb[1].mxu0  ;;  %v6006_v15 = vpop.f32.mrb[1].mxu1 }
 0x3e7   :  { %v7242_v16 = vadd.f32 %v5473_v52, %v819_v7  ;;  %v7244_v8 = vadd.f32 %v6006_v15, %v827_v62  ;;  %v5475_v9 = vpop.f32.mrb[2].mxu0  ;;  %v6008_v17 = vpop.f32.mrb[2].mxu1 }
 0x3e8   :  { %v6011_v18 = vmax.f32 %v7241_v12, 0.0  ;;  %v6013_v19 = vmax.f32 %v7243_v0, 0.0  ;;  %v5476_v20 = vpop.f32.mrb[3].mxu0  ;;  %v6009_v22 = vpop.f32.mrb[3].mxu1 }
 0x3e9   :  { %v6012_v23 = vmax.f32 %v7242_v16, 0.0  ;;  %v6014_v42 = vmax.f32 %v7244_v8, 0.0 }
 0x3ea   :  { %v6015_v27 = vpack.c.bf16 %v6011_v18, %v6011_v18  ;;  %v6017_v28 = vpack.c.bf16 %v6013_v19, %v6013_v19 }
 0x3eb   :  { %v6016_v24 = vpack.c.bf16 %v6012_v23, %v6012_v23  ;;  %v6018_v13 = vpack.c.bf16 %v6014_v42, %v6014_v42 }
 0x3ed   :  { %6314 = vmatprep.mubr.bf16.mxu0 %v6016_v24  ;;  %6354 = vmatprep.mubr.bf16.mxu1 %v6018_v13 }
 0x3ee   :  { %6315 = vmatmul.mubr.bf16.vlgmr.msra.gmra.mrb[4].mxu0 %v6015_v27  ;;  %6355 = vmatmul.mubr.bf16.vlgmr.msra.gmra.mrb[4].mxu1 %v6017_v28 }
 0x4c1   :  { %v7213_v29 = vpop.f32.mrb[4].mxu0  ;;  %v7235_v14 = vpop.f32.mrb[4].mxu1 }
 0x4c2   :  { %v7214_v31 = vpop.f32.mrb[5].mxu0  ;;  %v7236_v25 = vpop.f32.mrb[5].mxu1 }
 0x4c3   :  { %v7215_v32 = vadd.f32 %v7214_v31, %v7213_v29  ;;  %v7237_v33 = vadd.f32 %v7236_v25, %v7235_v14  ;;  %v7216_v26 = vpop.f32.mrb[6].mxu0  ;;  %v7238_v49 = vpop.f32.mrb[6].mxu1 }
 0x4c4   :  { %v7217_v36 = vpop.f32.mrb[7].mxu0  ;;  %v7239_v37 = vpop.f32.mrb[7].mxu1 }
 0x4c5   :  { %v6317_v21 = vadd.f32 %v7215_v32, %v7164_v30 }
 0x4c7   :  { %v6357_v39 = vadd.f32 %v7237_v33, %v6317_v21 }
 0x4c9   :  { %6362 = vst [vmem:[#allocation2] sm:$0x3] %v6357_v39 }
 0x4ca   :  { %8568 = shalt.err (!%p8565_p4)
}
 0x4cb   :  { %s8569_s10 = scalar_lea.hbm %s11228_s5, 32 }
 0x4cc   :  { %p8570_p5 = scmp.ne.s32.totalorder %s11228_s5, %s8569_s10  ;;  %p8573_p6 = scmp.lt.u32.totalorder %s8569_s10, %s11228_s5 }
 0x4ce   :  { %p8575_p7 = pnand %p8573_p6, %p8570_p5 }
 0x4d0   :  { %8578 = shalt.err (!%p8575_p7)
}
 0x4d1   :  { %6372 = dma.vmem_to_hbm [thread:$0]  %s6370_s7, 32, %s11228_s5, [#allocation3]  }
 0x4d2   :  { %8579 = dma.done.wait [#allocation3], 32  }
 0x4d3   :  { %8580 = vsyncadd [#allocation3], 4294967264 }
 0x4d4   :  { %6376 = vsyncpa [#allocation3], 1 }

</bundles_post_ra>
